<compile_context>
chip_gen: v5e
topology: v5e:2x2
jax: 0.10.0
libtpu: 0.0.40
codegen_flags: <defaults>
</compile_context>

<pallas_src>
import functools

import numpy as np
import jax
import jax.numpy as jnp
from jax import lax
from jax.experimental import pallas as pl
from jax.experimental.pallas import tpu as pltpu


def _adaptive_bounds(out_size, in_size):
    """Exact PyTorch AdaptiveMaxPool2d window bounds (static)."""
    bounds = []
    for o in range(out_size):
        s = (o * in_size) // out_size
        e = -(-((o + 1) * in_size) // out_size)  # ceil
        bounds.append((s, e))
    return bounds


def _interp_matrix(out_size, in_size):
    """Bilinear (align_corners=True) interpolation matrix M: out = M @ in."""
    M = np.zeros((out_size, in_size), dtype=np.float32)
    for o in range(out_size):
        if out_size == 1:
            src = 0.0
        else:
            src = o * (in_size - 1) / (out_size - 1)
        i0 = min(int(np.floor(src)), in_size - 1)
        i1 = min(i0 + 1, in_size - 1)
        w1 = src - i0
        M[o, i0] += 1.0 - w1
        M[o, i1] += w1
    return M


def _round_up(x, m):
    return -(-x // m) * m


def _gca_kernel(scale, ci_pad, x_ref, wqkv_ref, bqkv_ref, gamma_ref, mt_ref,
                o_ref):
    S = scale
    _, C, H, W = x_ref.shape
    N = S * S
    x = x_ref[0]  # (C, H, W) f32

    # ---- Adaptive max pool -> (C, N) ----
    if H % S == 0 and W % S == 0:
        # Divisible case (exact PyTorch windows): two reshape+max reductions.
        kh, kw = H // S, W // S
        xw = jnp.max(x.reshape(C * H, S, kw), axis=-1)                    # (C*H, S)
        gflat = jnp.max(xw.reshape(C * S, kh, S), axis=1).reshape(C, N)   # (C, N)
    else:
        # General fallback: exact PyTorch adaptive bounds (static windows).
        cols = [jnp.max(x[:, :, s0:e0], axis=-1)
                for (s0, e0) in _adaptive_bounds(S, W)]
        xw = jnp.stack(cols, axis=-1)                                     # (C, H, S)
        rows = [jnp.max(xw[:, s0:e0, :], axis=1)
                for (s0, e0) in _adaptive_bounds(S, H)]
        gflat = jnp.stack(rows, axis=1).reshape(C, N)                     # (C, N)

    # ---- Fused Q/K/V projection: one MXU matmul (bf16 operands, f32 acc) ----
    gb = gflat.astype(jnp.bfloat16)
    qkv = jnp.dot(wqkv_ref[...], gb, preferred_element_type=jnp.float32)  # (R, N)
    qkv = qkv + bqkv_ref[...]
    q = qkv[0:ci_pad]                       # (ci_pad, N), rows >= Ci are exactly 0
    k = qkv[ci_pad:2 * ci_pad]              # (ci_pad, N), rows >= Ci are exactly 0
    v = qkv[2 * ci_pad:2 * ci_pad + C]      # (C, N)

    # energy[n, m] = sum_ci q[ci, n] * k[ci, m]   (zero-padded rows add 0)
    energy = lax.dot_general(q.astype(jnp.bfloat16), k.astype(jnp.bfloat16),
                             (((0,), (0,)), ((), ())),
                             preferred_element_type=jnp.float32)          # (N, N)
    energy = energy - jnp.max(energy, axis=-1, keepdims=True)
    e = jnp.exp(energy)                                                   # f32 EUP
    att = e * pl.reciprocal(jnp.sum(e, axis=-1, keepdims=True), approx=True)

    # out[c, n] = sum_m v[c, m] * att[n, m]       (no explicit transpose)
    out = lax.dot_general(v.astype(jnp.bfloat16), att.astype(jnp.bfloat16),
                          (((1,), (1,)), ((), ())),
                          preferred_element_type=jnp.float32)             # (C, N)
    nl = gamma_ref[0] * out + gflat                                       # (C, N)

    # ---- Bilinear upsample: one matmul vs kron(Lh, Lw)^T -> lane-dense ----
    up = jnp.dot(nl, mt_ref[...], preferred_element_type=jnp.float32)     # (C, HW)

    # ---- Sigmoid, lane-dense store (last dim H*W = multiple of 128) ----
    o_ref[0] = jax.nn.sigmoid(up)


def gca_element(x, wq, bq, wk, bk, wv, bv, gamma, scale):
    """GCA_Element(att_mode='origin') forward. x: (B, C, H, W) float32."""
    B, C, H, W = x.shape
    Ci = wq.shape[0]
    S = scale
    N = S * S
    HW = H * W

    # Upsample operator: up_flat = nl @ Mt, with
    # Mt[i*S + j, h*W + w] = Lh[h, i] * Lw[w, j]  (matches row-major reshapes).
    mt = jnp.asarray(np.kron(_interp_matrix(H, S), _interp_matrix(W, S)).T)  # (N, HW)
    gamma_s = jnp.reshape(gamma, (1,)).astype(jnp.float32)

    # Stack Q/K/V weights & biases; each section padded to an 8-sublane
    # boundary so kernel-side slices stay tile-aligned (padding rows are 0).
    ci_pad = _round_up(Ci, 8)
    R = 2 * ci_pad + C
    w_qkv = jnp.zeros((R, C), jnp.float32)
    w_qkv = (w_qkv.at[0:Ci].set(wq)
                  .at[ci_pad:ci_pad + Ci].set(wk)
                  .at[2 * ci_pad:2 * ci_pad + C].set(wv))
    b_qkv = jnp.zeros((R, 1), jnp.float32)
    b_qkv = (b_qkv.at[0:Ci].set(bq)
                  .at[ci_pad:ci_pad + Ci].set(bk)
                  .at[2 * ci_pad:2 * ci_pad + C].set(bv))
    w_qkv = w_qkv.astype(jnp.bfloat16)   # bf16 MXU operand, cast once in wrapper

    kernel = functools.partial(_gca_kernel, S, ci_pad)
    rep = lambda shape: pl.BlockSpec(shape, lambda b, s=shape: (0,) * len(s))

    out_flat = pl.pallas_call(
        kernel,
        out_shape=jax.ShapeDtypeStruct((B, C, HW), jnp.float32),
        grid=(B,),
        in_specs=[
            pl.BlockSpec((1, C, H, W), lambda b: (b, 0, 0, 0)),   # x (one batch)
            rep((R, C)),                                          # stacked W_qkv (bf16)
            rep((R, 1)),                                          # stacked b_qkv (f32)
            pl.BlockSpec(memory_space=pltpu.MemorySpace.SMEM),    # gamma scalar
            rep((N, HW)),                                         # kron(Lh,Lw)^T
        ],
        out_specs=pl.BlockSpec((1, C, HW), lambda b: (b, 0, 0)),  # lane-dense
        compiler_params=pltpu.CompilerParams(
            dimension_semantics=("parallel",)),
    )(x, w_qkv, b_qkv, gamma_s, mt)
    return out_flat.reshape(B, C, H, W)


def gca_reference(x, wq, bq, wk, bk, wv, bv, gamma, scale):
    """Pure-JAX f32 reference (same math as the PyTorch module)."""
    B, C, H, W = x.shape
    S = scale
    cols = [jnp.max(x[:, :, :, s0:e0], axis=-1)
            for (s0, e0) in _adaptive_bounds(S, W)]
    xw = jnp.stack(cols, axis=-1)
    rows = [jnp.max(xw[:, :, s0:e0, :], axis=2)
            for (s0, e0) in _adaptive_bounds(S, H)]
    g = jnp.stack(rows, axis=2)                         # (B, C, S, S)
    gf = g.reshape(B, C, S * S)
    q = jnp.einsum('oc,bcn->bon', wq, gf) + bq[None]
    k = jnp.einsum('oc,bcn->bon', wk, gf) + bk[None]
    v = jnp.einsum('oc,bcn->bon', wv, gf) + bv[None]
    energy = jnp.einsum('bon,bom->bnm', q, k)
    att = jax.nn.softmax(energy, axis=-1)
    out = jnp.einsum('bcm,bnm->bcn', v, att)
    nl = gamma[0] * out + gf
    nl3 = nl.reshape(B, C, S, S)
    lh = jnp.asarray(_interp_matrix(H, S))
    lw = jnp.asarray(_interp_matrix(W, S))
    up = jnp.einsum('bcij,hi,wj->bchw', nl3, lh, lw)
    return jax.nn.sigmoid(up)


if __name__ == "__main__":
    B, C, H, W = 2, 16, 16, 16
    scale = 8
    reduce_ratio_nl = 8
    Ci = C // reduce_ratio_nl

    key = jax.random.PRNGKey(0)
    ks = jax.random.split(key, 7)
    x = jax.random.normal(ks[0], (B, C, H, W), jnp.float32)

    # Deterministic synthetic parameter init (shapes per module __init__).
    wq = 0.2 * jax.random.normal(ks[1], (Ci, C), jnp.float32)
    bq = 0.1 * jax.random.normal(ks[2], (Ci, 1), jnp.float32)
    wk = 0.2 * jax.random.normal(ks[3], (Ci, C), jnp.float32)
    bk = 0.1 * jax.random.normal(ks[4], (Ci, 1), jnp.float32)
    wv = 0.2 * jax.random.normal(ks[5], (C, C), jnp.float32)
    bv = 0.1 * jax.random.normal(ks[6], (C, 1), jnp.float32)
    # NOTE: PyTorch initializes gamma to 0 (attention branch inert); we use a
    # nonzero deterministic value so the attention path is actually exercised.
    gamma = jnp.full((1,), 0.3, jnp.float32)

    out = gca_element(x, wq, bq, wk, bk, wv, bv, gamma, scale)
    jax.block_until_ready(out)

    ref = gca_reference(x, wq, bq, wk, bk, wv, bv, gamma, scale)
    # Kernel uses bf16 MXU operands in the attention block (f32 accumulation),
    # so compare against the pure-f32 reference with a slightly looser bound.
    np.testing.assert_allclose(np.array(out), np.array(ref), rtol=1e-2, atol=1e-2)
    print("KERNEL_OK")
</pallas_src>

<mosaic_0001>
module attributes {stable_mosaic.version = 11 : i64} {
  func.func @_gca_kernel(%arg0: i32, %arg1: memref<1x16x16x16xf32, #tpu.memory_space<vmem>>, %arg2: memref<32x16xbf16, #tpu.memory_space<vmem>>, %arg3: memref<32x1xf32, #tpu.memory_space<vmem>>, %arg4: memref<1xf32, #tpu.memory_space<smem>>, %arg5: memref<64x256xf32, #tpu.memory_space<vmem>>, %arg6: memref<1x16x256xf32, #tpu.memory_space<vmem>>) attributes {dimension_semantics = [#tpu.dimension_semantics<parallel>], iteration_bounds = array<i64: 2>, scalar_prefetch = 0 : i64, scratch_operands = 0 : i64, tpu.core_type = #tpu.core_type<tc>, window_params = [{transform_indices = @transform_0, window_bounds = array<i64: 1, 16, 16, 16>}, {pipeline_mode = #tpu.pipeline_mode<synchronous>, transform_indices = @transform_1, window_bounds = array<i64: 32, 16>}, {pipeline_mode = #tpu.pipeline_mode<synchronous>, transform_indices = @transform_2, window_bounds = array<i64: 32, 1>}, {transform_indices = @transform_3, window_bounds = array<i64: 1>}, {pipeline_mode = #tpu.pipeline_mode<synchronous>, transform_indices = @transform_4, window_bounds = array<i64: 64, 256>}, {transform_indices = @transform_5, window_bounds = array<i64: 1, 16, 256>}]} {
    %c0 = arith.constant 0 : index
    %c0_0 = arith.constant 0 : index
    %c0_1 = arith.constant 0 : index
    %c0_2 = arith.constant 0 : index
    %0 = vector.load %arg1[%c0, %c0_0, %c0_1, %c0_2] : memref<1x16x16x16xf32, #tpu.memory_space<vmem>>, vector<1x16x16x16xf32>
    %1 = vector.shape_cast %0 : vector<1x16x16x16xf32> to vector<16x16x16xf32>
    %2 = vector.shape_cast %1 : vector<16x16x16xf32> to vector<256x8x2xf32>
    %cst = arith.constant dense<0xFF800000> : vector<256x8xf32>
    %3 = vector.multi_reduction <maximumf>, %2, %cst [2] : vector<256x8x2xf32> to vector<256x8xf32>
    %4 = vector.shape_cast %3 : vector<256x8xf32> to vector<128x2x8xf32>
    %cst_3 = arith.constant dense<0xFF800000> : vector<128x8xf32>
    %5 = vector.multi_reduction <maximumf>, %4, %cst_3 [1] : vector<128x2x8xf32> to vector<128x8xf32>
    %6 = vector.shape_cast %5 : vector<128x8xf32> to vector<16x64xf32>
    %7 = arith.truncf %6 : vector<16x64xf32> to vector<16x64xbf16>
    %c0_4 = arith.constant 0 : index
    %c0_5 = arith.constant 0 : index
    %8 = vector.load %arg2[%c0_4, %c0_5] : memref<32x16xbf16, #tpu.memory_space<vmem>>, vector<32x16xbf16>
    %cst_6 = arith.constant dense<0.000000e+00> : vector<32x64xf32>
    %9 = tpu.matmul %8, %7, %cst_6 {dimension_numbers = #tpu.dot_dimension_numbers<[1], [0], [0], [1], [0, 0, 1, 1], [], []>} : vector<32x16xbf16>, vector<16x64xbf16>, vector<32x64xf32> -> vector<32x64xf32>
    %c0_7 = arith.constant 0 : index
    %c0_8 = arith.constant 0 : index
    %10 = vector.load %arg3[%c0_7, %c0_8] : memref<32x1xf32, #tpu.memory_space<vmem>>, vector<32x1xf32>
    %11 = vector.broadcast %10 : vector<32x1xf32> to vector<32x64xf32>
    %12 = arith.addf %9, %11 : vector<32x64xf32>
    %13 = vector.extract_strided_slice %12 {offsets = [0, 0], sizes = [8, 64], strides = [1, 1]} : vector<32x64xf32> to vector<8x64xf32>
    %14 = vector.extract_strided_slice %12 {offsets = [8, 0], sizes = [8, 64], strides = [1, 1]} : vector<32x64xf32> to vector<8x64xf32>
    %15 = vector.extract_strided_slice %12 {offsets = [16, 0], sizes = [16, 64], strides = [1, 1]} : vector<32x64xf32> to vector<16x64xf32>
    %16 = arith.truncf %13 : vector<8x64xf32> to vector<8x64xbf16>
    %17 = arith.truncf %14 : vector<8x64xf32> to vector<8x64xbf16>
    %cst_9 = arith.constant dense<0.000000e+00> : vector<64x64xf32>
    %18 = tpu.matmul %16, %17, %cst_9 {dimension_numbers = #tpu.dot_dimension_numbers<[0], [0], [1], [1], [0, 1, 1, 1], [], []>} : vector<8x64xbf16>, vector<8x64xbf16>, vector<64x64xf32> -> vector<64x64xf32>
    %cst_10 = arith.constant dense<0xFF800000> : vector<64xf32>
    %19 = vector.multi_reduction <maximumf>, %18, %cst_10 [1] : vector<64x64xf32> to vector<64xf32>
    %20 = vector.shape_cast %19 : vector<64xf32> to vector<64x1xf32>
    %21 = vector.broadcast %20 : vector<64x1xf32> to vector<64x64xf32>
    %22 = arith.subf %18, %21 : vector<64x64xf32>
    %23 = math.exp %22 : vector<64x64xf32>
    %cst_11 = arith.constant dense<0.000000e+00> : vector<64xf32>
    %24 = vector.multi_reduction <add>, %23, %cst_11 [1] : vector<64x64xf32> to vector<64xf32>
    %25 = vector.shape_cast %24 : vector<64xf32> to vector<64x1xf32>
    %26 = tpu.reciprocal %25 {approx = true} : vector<64x1xf32> -> vector<64x1xf32>
    %27 = vector.broadcast %26 : vector<64x1xf32> to vector<64x64xf32>
    %28 = arith.mulf %23, %27 : vector<64x64xf32>
    %29 = arith.truncf %15 : vector<16x64xf32> to vector<16x64xbf16>
    %30 = arith.truncf %28 : vector<64x64xf32> to vector<64x64xbf16>
    %cst_12 = arith.constant dense<0.000000e+00> : vector<16x64xf32>
    %31 = tpu.matmul %29, %30, %cst_12 {dimension_numbers = #tpu.dot_dimension_numbers<[1], [1], [0], [0], [0, 0, 1, 0], [], []>} : vector<16x64xbf16>, vector<64x64xbf16>, vector<16x64xf32> -> vector<16x64xf32>
    %c0_13 = arith.constant 0 : index
    %32 = memref.load %arg4[%c0_13] : memref<1xf32, #tpu.memory_space<smem>>
    %33 = vector.broadcast %32 : f32 to vector<16x64xf32>
    %34 = arith.mulf %33, %31 : vector<16x64xf32>
    %35 = arith.addf %34, %6 : vector<16x64xf32>
    %c0_14 = arith.constant 0 : index
    %c0_15 = arith.constant 0 : index
    %36 = vector.load %arg5[%c0_14, %c0_15] : memref<64x256xf32, #tpu.memory_space<vmem>>, vector<64x256xf32>
    %cst_16 = arith.constant dense<0.000000e+00> : vector<16x256xf32>
    %37 = tpu.matmul %35, %36, %cst_16 {dimension_numbers = #tpu.dot_dimension_numbers<[1], [0], [0], [1], [0, 0, 1, 1], [], []>} : vector<16x64xf32>, vector<64x256xf32>, vector<16x256xf32> -> vector<16x256xf32>
    %38 = arith.negf %37 : vector<16x256xf32>
    %39 = math.exp %38 : vector<16x256xf32>
    %cst_17 = arith.constant 1.000000e+00 : f32
    %40 = vector.broadcast %cst_17 : f32 to vector<16x256xf32>
    %41 = arith.addf %40, %39 : vector<16x256xf32>
    %42 = arith.divf %40, %41 : vector<16x256xf32>
    %c0_18 = arith.constant 0 : index
    %c0_19 = arith.constant 0 : index
    %c0_20 = arith.constant 0 : index
    %43 = vector.load %arg6[%c0_18, %c0_19, %c0_20] : memref<1x16x256xf32, #tpu.memory_space<vmem>>, vector<1x16x256xf32>
    %44 = vector.shape_cast %43 : vector<1x16x256xf32> to vector<16x256xf32>
    %45 = vector.shape_cast %42 : vector<16x256xf32> to vector<1x16x256xf32>
    tpu.vector_store %arg6[%c0_18, %c0_19, %c0_20], %45 {strides = array<i32>} : memref<1x16x256xf32, #tpu.memory_space<vmem>>, vector<1x16x256xf32>,
    return
  }
  func.func @transform_0(%arg0: i32) -> (i32, i32, i32, i32) {
    %c0_i32 = arith.constant 0 : i32
    %c0_i32_0 = arith.constant 0 : i32
    %c0_i32_1 = arith.constant 0 : i32
    %c0_i32_2 = arith.constant 0 : i32
    return %arg0, %c0_i32, %c0_i32_0, %c0_i32_1 : i32, i32, i32, i32
  }
  func.func @transform_1(%arg0: i32) -> (i32, i32) {
    %c0_i32 = arith.constant 0 : i32
    %c0_i32_0 = arith.constant 0 : i32
    %c0_i32_1 = arith.constant 0 : i32
    return %c0_i32, %c0_i32_0 : i32, i32
  }
  func.func @transform_2(%arg0: i32) -> (i32, i32) {
    %c0_i32 = arith.constant 0 : i32
    %c0_i32_0 = arith.constant 0 : i32
    %c0_i32_1 = arith.constant 0 : i32
    return %c0_i32, %c0_i32_0 : i32, i32
  }
  func.func @transform_3(%arg0: i32) -> i32 {
    %c0_i32 = arith.constant 0 : i32
    %c0_i32_0 = arith.constant 0 : i32
    return %c0_i32 : i32
  }
  func.func @transform_4(%arg0: i32) -> (i32, i32) {
    %c0_i32 = arith.constant 0 : i32
    %c0_i32_0 = arith.constant 0 : i32
    %c0_i32_1 = arith.constant 0 : i32
    return %c0_i32, %c0_i32_0 : i32, i32
  }
  func.func @transform_5(%arg0: i32) -> (i32, i32, i32) {
    %c0_i32 = arith.constant 0 : i32
    %c0_i32_0 = arith.constant 0 : i32
    %c0_i32_1 = arith.constant 0 : i32
    return %arg0, %c0_i32, %c0_i32_0 : i32, i32, i32
  }
}

</mosaic_0001>

<bundles_post_ra>
// kernel: tpu_custom_call.1
= control target key start
LH: loop header
LB: loop body
LE: loop exit
PB: predicated region body
PF: predicated region fallthrough
CT: control target
= control target key end

     0   :  { %s13777_s0 = inlined_call_operand.hbm [shape: f32[2,16,16,16], index: 0, kind: input, shape index: {}]   ;;  %s13778_s1 = inlined_call_operand.vmem [shape: bf16[32,16], index: 1, kind: input, shape index: {}]   ;;  %s13779_s2 = inlined_call_operand.vmem [shape: f32[32,1], index: 2, kind: input, shape index: {}]   ;;  %s13780_s3 = inlined_call_operand.<no memory space> [shape: f32[1], index: 3, kind: input, shape index: {}]   ;;  %s13781_s4 = inlined_call_operand.hbm [shape: f32[64,256], index: 4, kind: input, shape index: {}]   ;;  %s13782_s5 = inlined_call_operand.hbm [shape: f32[2,16,256], index: 5, kind: output, shape index: {}]  }
   0x1   :  { %10 = sst [smem:[#allocation2]] %s13780_s3 }
   0x2   :  { %11 = vsyncpa [#allocation4], 0 }
   0x3   :  { %13 = vsyncpa [#allocation4 + $0x1], 0 }
   0x4   :  { %14 = vsyncpa [#allocation7], 0 }
   0x5   :  { %15 = vsyncpa [#allocation5], 0 }
   0x6   :  { %17 = vsyncpa [#allocation5 + $0x1], 0  ;;  %s7296_s20 = smov 0   ;;  %s7298_s21 = smov 0  }
   0x7   :  { %s7300_s22 = smov 0   ;;  %s7302_s23 = smov 0  }
   0x8 LB: > { %s7317_s3 = sadd.s32 4294967295, %s7244_s23   ;;  %s6905_s24 = sadd.s32 4294967294, %s7244_s23   ;;  %s7244_s23 = sphi %s7302_s23, %s15100_s23   ;;  %s7240_s22 = sphi %s7300_s22, %s15099_s22   ;;  %s7236_s21 = sphi %s7298_s21, %s15098_s21   ;;  %s7232_s20 = sphi %s7296_s20, %s15097_s20  }
   0x9   : > { %p43_p0 = scmp.ne.s32.totalorder %s7236_s21, %s7232_s20  ;;  %p44_p1 = scmp.eq.s32.totalorder %s7317_s3, 0 }
   0xa   : > { %p151_p2 = scmp.eq.s32.totalorder %s7317_s3, 1  ;;  %p157_p3 = scmp.eq.s32.totalorder %s6905_s24, 1 }
   0xb   : > { %p7326_p4 = por %p44_p1, %p43_p0  ;;  %p6906_p5 = scmp.ge.s32.totalorder %s7244_s23, 1 }
   0xc   : > { %p7331_p6 = por %p157_p3, %p43_p0  ;;  %p164_p7 = scmp.lt.s32.totalorder %s7244_s23, 3 }
   0xd   : > { %s184_s29 = sshll.u32 %s13781_s4, 4  ;;  %s7246_s6 = smov [#allocation6]   ;;  %s185_s29 = int_to_ptr.hbm [resolvable:$true] %s184_s29 }
   0xe   : > { %p7339_p8 = pnand %p6906_p5, %p164_p7  ;;  %s186_s7 = sshll.u32 %s7246_s6, 4  ;;  %s187_s7 = int_to_ptr.vmem [resolvable:$true] %s186_s7 }
   0xf   : > { %s7349_s8 = sadd.s32 1, %s7244_s23   ;;  %s7247_s9 = smov 256  }
  0x10   : > { %p6957_p9 = pneg %p7339_p8  ;;  %s7248_s10 = smov 16  }
  0x11   : > { %s27_s11 = ssub.s32 %s7244_s23, %s7349_s8  ;;  %s30_s12 = sadd.s32 1, %s7240_s22 }
  0x12   : > { %p6958_p10 = pnand %p6957_p9, %p44_p1  ;;  %p28_p12 = scmp.eq.s32.totalorder %s27_s11, 0 }
  0x13   : > { %p37_p13 = scmp.ne.s32.totalorder %s7240_s22, %s7236_s21  ;;  %p38_p0 = scmp.eq.s32.totalorder %s7244_s23, 0 }
  0x14   : > { %6960 = dma.hbm_to_vmem [thread:$0]  (!%p6958_p10), %s185_s29, 2048, %s187_s7, [#allocation7], %s7247_s9, %s7247_s9, %s7248_s10  }
  0x15   : > { %p6970_p3 = scmp.lt.s32.totalorder %s7244_s23, 2  ;;  %p39_p5 = por %p38_p0, %p37_p13 }
  0x16   : > { %s7359_s13 = scalar_select %p28_p12, %s7240_s22, %s30_s12  }
  0x17   : > { %p7363_p7 = por %p151_p2, %p37_p13  ;;  %s200_s15 = sand.u32 1, %s7240_s22  }
  0x18   : > { %s6944_s16 = sshll.u32 %s7244_s23, 8  ;;  %s6909_s17 = sshll.u32 %s200_s15, 8 }
  0x19   : > { %s209_s24 = scalar_lea.hbm %s13777_s0, %s6944_s16  ;;  %s204_s28 = scalar_lea.vmem [#allocation3], %s6909_s17 }
  0x1a   : > { %s210_s27 = sshll.u32 %s209_s24, 4  ;;  %s212_s29 = sshll.u32 %s204_s28, 4  ;;  %s211_s27 = int_to_ptr.hbm [resolvable:$true] %s210_s27  ;;  %s213_s29 = int_to_ptr.vmem [resolvable:$true] %s212_s29 }
  0x1b   : > { %p7374_p9 = pnand %p6970_p3, %p39_p5  ;;  %s201_s7 = scalar_lea.sflag [#allocation4], %s200_s15 }
  0x1c   : > { %s7144_s9 = sshra.s32 %s211_s27, 4  ;;  %s7151_s16 = scalar_lea.hbm %s13777_s0, 512  ;;  %s7145_s9 = int_to_ptr.hbm [resolvable:$true] %s7144_s9 }
  0x1d   : > { %s7146_s10 = scalar_lea.hbm %s7145_s9, 256  ;;  %p7148_p10 = pneg %p7374_p9 }
  0x1e   : > { %p7147_p2 = scmp.ne.s32.totalorder %s7145_s9, %s7146_s10  ;;  %p7152_p0 = scmp.lt.s32.totalorder %s7145_s9, %s13777_s0 }
  0x1f   : > { %p7153_p3 = scmp.lt.s32.totalorder %s7151_s16, %s7146_s10 }
  0x20   : > { %p7149_p12 = pnand %p7148_p10, %p7147_p2 }
  0x21   : > { %p7154_p5 = por %p7153_p3, %p7152_p0 }
  0x22   : > { %p7150_p13 = pneg %p7149_p12 }
  0x24   : > { %p7155_p11 = pnand %p7154_p5, %p7150_p13 }
  0x26   : > { %7158 = shalt.err (!%p7155_p11)
}
  0x27   : > { %s7249_s15 = smov 128   ;;  %s7250_s19 = smov 8  }
  0x28   : > { %6964 = dma.hbm_to_vmem [thread:$0]  (!%p7374_p9), %s211_s27, 4096, %s213_s29, %s201_s7, %s7249_s15, %s7249_s15, %s7250_s19  }
  0x29   : > { %224 = sbr.rel (%p7339_p8) target bundleno = 2612 (0xa34), region = 40 }
  0x2e   : > { %s7391_s24 = sand.u32 1, %s7236_s21  }
  0x2f   : > { %s6913_s28 = sshll.u32 %s7391_s24, 8  ;;  %s227_s9 = scalar_lea.sflag [#allocation4], %s7391_s24 }
  0x30   : > { %s7395_s10 = scalar_lea.vmem [#allocation3], %s6913_s28 }
  0x31   : > { %7219 = dma.done.wait (%p7326_p4), %s227_s9, 4096  }
  0x32   : > { %7221 = vsyncadd (%p7326_p4), %s227_s9, 4294963200 }
  0x33   : > { %7223 = dma.done.wait (%p44_p1), [#allocation7], 2048  }
  0x34   : > { %7225 = vsyncadd (%p44_p1), [#allocation7], 4294965248  ;;  %v7406_v0 = vld [vmem:[%s7395_s10 + $0x20] sm:$0xff]  ;;  %v7409_v1 = vld [vmem:[%s7395_s10 + $0x10] sm:$0xff]  ;;  %s7251_s25 = smov 126   ;;  %s7252_s30 = smov 124  }
  0x35   : > { %v7412_v2 = vld [vmem:[%s7395_s10] sm:$0xff]  ;;  %336 = vrot.lane.b32.xlu2 %v7406_v0, %s7251_s25  ;;  %332 = vrot.lane.b32.xlu1 %v7409_v1, %s7251_s25  ;;  %v7421_v3 = vld [vmem:[%s7395_s10 + $0x28] sm:$0xff]  ;;  %s7253_s27 = smov 122   ;;  %s7254_s29 = smov 120   ;;  %vm1001_vm0 = vcmask 1047556   ;;  %vm4585_vm1 = vcmask 15360  }
  0x36   : > { %328 = vrot.lane.b32.xlu0 %v7412_v2, %s7251_s25  ;;  %v7424_v4 = vld [vmem:[%s7395_s10 + $0x18] sm:$0xff]  ;;  %v7427_v5 = vld [vmem:[%s7395_s10 + $0x8] sm:$0xff]  ;;  %v7436_v6 = vld [vmem:[%s7395_s10 + $0x40] sm:$0xff]  ;;  %s7255_s6 = smov 118   ;;  %s7256_s7 = smov 116   ;;  %vm5781_vm2 = vcmask 130112  }
  0x37   : > { %v7439_v7 = vld [vmem:[%s7395_s10 + $0x38] sm:$0xff]  ;;  %v7442_v8 = vld [vmem:[%s7395_s10 + $0x30] sm:$0xff]  ;;  %v7457_v11 = vld [vmem:[%s7395_s10 + $0x48] sm:$0xff]  ;;  %s7257_s11 = smov 114   ;;  %vm5785_vm3 = vcmask 195712   ;;  %vm5789_vm4 = vcmask 261312  }
  0x38   : > { %v7451_v9 = vld [vmem:[%s7395_s10 + $0x58] sm:$0xff]  ;;  %v7454_v10 = vld [vmem:[%s7395_s10 + $0x50] sm:$0xff]  ;;  %v7469_v13 = vld [vmem:[%s7395_s10 + $0x68] sm:$0xff]  ;;  %vm5793_vm5 = vcmask 326912   ;;  %vm5797_vm6 = vcmask 392512   ;;  %vm5801_vm7 = vcmask 458112  }
  0x39   : > { %v7466_v12 = vld [vmem:[%s7395_s10 + $0x70] sm:$0xff]  ;;  %v7472_v14 = vld [vmem:[%s7395_s10 + $0x60] sm:$0xff]  ;;  %v7481_v15 = vld [vmem:[%s7395_s10 + $0x88] sm:$0xff]  ;;  %vm5805_vm8 = vcmask 523712   ;;  %vm6032_vm9 = vcmask 1041409   ;;  %vm6034_vm10 = vcmask 1042434  }
  0x3a   : > { %v7484_v16 = vld [vmem:[%s7395_s10 + $0x80] sm:$0xff]  ;;  %v7487_v17 = vld [vmem:[%s7395_s10 + $0x78] sm:$0xff]  ;;  %v7502_v20 = vld [vmem:[%s7395_s10 + $0x90] sm:$0xff]  ;;  %vm6036_vm11 = vcmask 1043459   ;;  %vm6038_vm12 = vcmask 1044484   ;;  %vm6040_vm13 = vcmask 1045509  }
  0x3b   : > { %v7496_v18 = vld [vmem:[%s7395_s10 + $0xa0] sm:$0xff]  ;;  %v7499_v19 = vld [vmem:[%s7395_s10 + $0x98] sm:$0xff]  ;;  %v7514_v22 = vld [vmem:[%s7395_s10 + $0xb0] sm:$0xff]  ;;  %vm6042_vm14 = vcmask 1046534   ;;  %vm6044_vm15 = vcmask 1047559   ;;  %s6807_s15 = scalar_lea.sflag [#allocation5], %s7391_s24 }
  0x3c   : > { %v7511_v21 = vld [vmem:[%s7395_s10 + $0xb8] sm:$0xff]  ;;  %v7517_v23 = vld [vmem:[%s7395_s10 + $0xa8] sm:$0xff]  ;;  %v7526_v24 = vld [vmem:[%s7395_s10 + $0xd0] sm:$0xff] }
  0x3d   : > { %338 = vrot.lane.b32.xlu2 %v7421_v3, %s7251_s25  ;;  %334 = vrot.lane.b32.xlu1 %v7424_v4, %s7251_s25  ;;  %v7529_v25 = vld [vmem:[%s7395_s10 + $0xc8] sm:$0xff]  ;;  %v7532_v26 = vld [vmem:[%s7395_s10 + $0xc0] sm:$0xff] }
  0x3e   : > { %330 = vrot.lane.b32.xlu0 %v7427_v5, %s7251_s25  ;;  %v7541_v27 = vld [vmem:[%s7395_s10 + $0xe8] sm:$0xff]  ;;  %v7544_v28 = vld [vmem:[%s7395_s10 + $0xe0] sm:$0xff]  ;;  %v7547_v29 = vld [vmem:[%s7395_s10 + $0xd8] sm:$0xff] }
  0x3f   : > { %v7556_v30 = vld [vmem:[%s7395_s10 + $0xf8] sm:$0xff]  ;;  %v7559_v31 = vld [vmem:[%s7395_s10 + $0xf0] sm:$0xff] }
  0x45   : > { %344 = vrot.lane.b32.xlu2 %v7436_v6, %s7251_s25  ;;  %342 = vrot.lane.b32.xlu1 %v7439_v7, %s7251_s25 }
  0x46   : > { %340 = vrot.lane.b32.xlu0 %v7442_v8, %s7251_s25 }
  0x4d   : > { %350 = vrot.lane.b32.xlu2 %v7451_v9, %s7251_s25  ;;  %348 = vrot.lane.b32.xlu1 %v7454_v10, %s7251_s25 }
  0x4e   : > { %346 = vrot.lane.b32.xlu0 %v7457_v11, %s7251_s25 }
  0x55   : > { %356 = vrot.lane.b32.xlu2 %v7466_v12, %s7251_s25  ;;  %354 = vrot.lane.b32.xlu1 %v7469_v13, %s7251_s25 }
  0x56   : > { %352 = vrot.lane.b32.xlu0 %v7472_v14, %s7251_s25 }
  0x5d   : > { %362 = vrot.lane.b32.xlu2 %v7481_v15, %s7251_s25  ;;  %360 = vrot.lane.b32.xlu1 %v7484_v16, %s7251_s25 }
  0x5e   : > { %358 = vrot.lane.b32.xlu0 %v7487_v17, %s7251_s25 }
  0x65   : > { %368 = vrot.lane.b32.xlu2 %v7496_v18, %s7251_s25  ;;  %366 = vrot.lane.b32.xlu1 %v7499_v19, %s7251_s25 }
  0x66   : > { %364 = vrot.lane.b32.xlu0 %v7502_v20, %s7251_s25 }
  0x6d   : > { %374 = vrot.lane.b32.xlu2 %v7511_v21, %s7251_s25  ;;  %372 = vrot.lane.b32.xlu1 %v7514_v22, %s7251_s25 }
  0x6e   : > { %370 = vrot.lane.b32.xlu0 %v7517_v23, %s7251_s25 }
  0x75   : > { %380 = vrot.lane.b32.xlu2 %v7526_v24, %s7251_s25  ;;  %378 = vrot.lane.b32.xlu1 %v7529_v25, %s7251_s25 }
  0x76   : > { %376 = vrot.lane.b32.xlu0 %v7532_v26, %s7251_s25 }
  0x7d   : > { %386 = vrot.lane.b32.xlu2 %v7541_v27, %s7251_s25  ;;  %384 = vrot.lane.b32.xlu1 %v7544_v28, %s7251_s25 }
  0x7e   : > { %382 = vrot.lane.b32.xlu0 %v7547_v29, %s7251_s25 }
  0x85   : > { %390 = vrot.lane.b32.xlu1 %v7556_v30, %s7251_s25  ;;  %424 = vrot.lane.b32.xlu2 %v7412_v2, %s7252_s30 }
  0x86   : > { %388 = vrot.lane.b32.xlu0 %v7559_v31, %s7251_s25  ;;  %s7194_s25 = scalar_lea.hbm %s13782_s5, 64 }
  0x8d   : > { %428 = vrot.lane.b32.xlu1 %v7409_v1, %s7252_s30  ;;  %430 = vrot.lane.b32.xlu2 %v7424_v4, %s7252_s30 }
  0x8e   : > { %426 = vrot.lane.b32.xlu0 %v7427_v5, %s7252_s30 }
  0x8f   : > { %v7573_v32 = vpop.permute.xlu2 %336 }
  0x95   : > { %434 = vrot.lane.b32.xlu1 %v7421_v3, %s7252_s30  ;;  %436 = vrot.lane.b32.xlu2 %v7442_v8, %s7252_s30 }
  0x96   : > { %432 = vrot.lane.b32.xlu0 %v7406_v0, %s7252_s30 }
  0x97   : > { %v7581_v33 = vpop.permute.xlu2 %338 }
  0x98   : > { %14160 = vst [vmem:[#allocation12_spill] sm:$0xff] %v7581_v33 }
  0x9d   : > { %440 = vrot.lane.b32.xlu1 %v7436_v6, %s7252_s30  ;;  %442 = vrot.lane.b32.xlu2 %v7457_v11, %s7252_s30 }
  0x9e   : > { %438 = vrot.lane.b32.xlu0 %v7439_v7, %s7252_s30 }
  0x9f   : > { %v7589_v34 = vpop.permute.xlu2 %344 }
  0xa0   : > { %14161 = vst [vmem:[#allocation13_spill] sm:$0xff] %v7589_v34 }
  0xa5   : > { %446 = vrot.lane.b32.xlu1 %v7451_v9, %s7252_s30  ;;  %448 = vrot.lane.b32.xlu2 %v7472_v14, %s7252_s30 }
  0xa6   : > { %444 = vrot.lane.b32.xlu0 %v7454_v10, %s7252_s30 }
  0xa7   : > { %v7597_v35 = vpop.permute.xlu2 %350  ;;  %v7599_v36 = vpop.permute.xlu1 %332 }
  0xa8   : > { %14162 = vst [vmem:[#allocation14_spill] sm:$0xff] %v7597_v35  ;;  %v7601_v37 = vpop.permute.xlu0 %328 }
  0xad   : > { %452 = vrot.lane.b32.xlu1 %v7466_v12, %s7252_s30  ;;  %454 = vrot.lane.b32.xlu2 %v7487_v17, %s7252_s30 }
  0xae   : > { %450 = vrot.lane.b32.xlu0 %v7469_v13, %s7252_s30 }
  0xaf   : > { %v7609_v38 = vpop.permute.xlu2 %356  ;;  %v7611_v39 = vpop.permute.xlu1 %334 }
  0xb0   : > { %14163 = vst [vmem:[#allocation15_spill] sm:$0xff] %v7609_v38  ;;  %v7613_v40 = vpop.permute.xlu0 %330 }
  0xb1   : > { %14164 = vst [vmem:[#allocation16_spill] sm:$0xff] %v7611_v39 }
  0xb5   : > { %458 = vrot.lane.b32.xlu1 %v7481_v15, %s7252_s30  ;;  %460 = vrot.lane.b32.xlu2 %v7502_v20, %s7252_s30 }
  0xb6   : > { %456 = vrot.lane.b32.xlu0 %v7484_v16, %s7252_s30 }
  0xb7   : > { %v7621_v41 = vpop.permute.xlu2 %362  ;;  %v7623_v42 = vpop.permute.xlu1 %342 }
  0xb8   : > { %14165 = vst [vmem:[#allocation17_spill] sm:$0xff] %v7621_v41  ;;  %v7625_v43 = vpop.permute.xlu0 %340  ;;  %v8657_v41 = vld [vmem:[%s7395_s10 + $0x60] sm:$0xff] }
  0xb9   : > { %14166 = vst [vmem:[#allocation18_spill] sm:$0xff] %v7623_v42 }
  0xba   : > { %14167 = vst [vmem:[#allocation19_spill] sm:$0xff] %v7625_v43 }
  0xbd   : > { %464 = vrot.lane.b32.xlu1 %v7496_v18, %s7252_s30  ;;  %466 = vrot.lane.b32.xlu2 %v7517_v23, %s7252_s30 }
  0xbe   : > { %462 = vrot.lane.b32.xlu0 %v7499_v19, %s7252_s30 }
  0xbf   : > { %v7633_v44 = vpop.permute.xlu2 %368  ;;  %v7635_v45 = vpop.permute.xlu1 %348 }
  0xc0   : > { %14168 = vst [vmem:[#allocation20_spill] sm:$0xff] %v7635_v45  ;;  %v7637_v46 = vpop.permute.xlu0 %346 }
  0xc1   : > { %14169 = vst [vmem:[#allocation21_spill] sm:$0xff] %v7637_v46 }
  0xc5   : > { %470 = vrot.lane.b32.xlu1 %v7511_v21, %s7252_s30  ;;  %472 = vrot.lane.b32.xlu2 %v7532_v26, %s7252_s30 }
  0xc6   : > { %468 = vrot.lane.b32.xlu0 %v7514_v22, %s7252_s30 }
  0xc7   : > { %v7645_v47 = vpop.permute.xlu2 %374  ;;  %v7647_v48 = vpop.permute.xlu1 %354 }
  0xc8   : > { %14170 = vst [vmem:[#allocation22_spill] sm:$0xff] %v7645_v47  ;;  %v7649_v49 = vpop.permute.xlu0 %352 }
  0xc9   : > { %14171 = vst [vmem:[#allocation23_spill] sm:$0xff] %v7647_v48 }
  0xca   : > { %14172 = vst [vmem:[#allocation24_spill] sm:$0xff] %v7649_v49 }
  0xcd   : > { %476 = vrot.lane.b32.xlu1 %v7526_v24, %s7252_s30  ;;  %478 = vrot.lane.b32.xlu2 %v7547_v29, %s7252_s30 }
  0xce   : > { %474 = vrot.lane.b32.xlu0 %v7529_v25, %s7252_s30 }
  0xcf   : > { %v7657_v50 = vpop.permute.xlu2 %380  ;;  %v7659_v51 = vpop.permute.xlu1 %360 }
  0xd0   : > { %14173 = vst [vmem:[#allocation25_spill] sm:$0xff] %v7657_v50  ;;  %v7661_v52 = vpop.permute.xlu0 %358 }
  0xd1   : > { %14174 = vst [vmem:[#allocation26_spill] sm:$0xff] %v7659_v51 }
  0xd2   : > { %14175 = vst [vmem:[#allocation27_spill] sm:$0xff] %v7661_v52 }
  0xd5   : > { %482 = vrot.lane.b32.xlu1 %v7541_v27, %s7252_s30  ;;  %484 = vrot.lane.b32.xlu2 %v7559_v31, %s7252_s30 }
  0xd6   : > { %480 = vrot.lane.b32.xlu0 %v7544_v28, %s7252_s30 }
  0xd7   : > { %v7669_v53 = vpop.permute.xlu2 %386  ;;  %v7671_v54 = vpop.permute.xlu1 %366 }
  0xd8   : > { %14176 = vst [vmem:[#allocation28_spill] sm:$0xff] %v7669_v53  ;;  %v7673_v55 = vpop.permute.xlu0 %364 }
  0xd9   : > { %14177 = vst [vmem:[#allocation29_spill] sm:$0xff] %v7671_v54 }
  0xda   : > { %14178 = vst [vmem:[#allocation30_spill] sm:$0xff] %v7673_v55 }
  0xdd   : > { %520 = vrot.lane.b32.xlu1 %v7412_v2, %s7253_s27  ;;  %522 = vrot.lane.b32.xlu2 %v7427_v5, %s7253_s27 }
  0xde   : > { %486 = vrot.lane.b32.xlu0 %v7556_v30, %s7252_s30 }
  0xdf   : > { %v7681_v56 = vpop.permute.xlu1 %372  ;;  %v7683_v57 = vpop.permute.xlu2 %424 }
  0xe0   : > { %14179 = vst [vmem:[#allocation31_spill] sm:$0xff] %v7681_v56  ;;  %v7685_v58 = vpop.permute.xlu0 %370 }
  0xe1   : > { %14180 = vst [vmem:[#allocation32_spill] sm:$0xff] %v7685_v58 }
  0xe5   : > { %526 = vrot.lane.b32.xlu1 %v7424_v4, %s7253_s27  ;;  %528 = vrot.lane.b32.xlu2 %v7406_v0, %s7253_s27 }
  0xe6   : > { %524 = vrot.lane.b32.xlu0 %v7409_v1, %s7253_s27 }
  0xe7   : > { %v7693_v59 = vpop.permute.xlu1 %378  ;;  %v7695_v60 = vpop.permute.xlu2 %430 }
  0xe8   : > { %14181 = vst [vmem:[#allocation33_spill] sm:$0xff] %v7693_v59  ;;  %v7697_v61 = vpop.permute.xlu0 %376 }
  0xe9   : > { %14182 = vst [vmem:[#allocation34_spill] sm:$0xff] %v7695_v60 }
  0xea   : > { %14183 = vst [vmem:[#allocation35_spill] sm:$0xff] %v7697_v61 }
  0xed   : > { %532 = vrot.lane.b32.xlu1 %v7442_v8, %s7253_s27  ;;  %534 = vrot.lane.b32.xlu2 %v7439_v7, %s7253_s27 }
  0xee   : > { %530 = vrot.lane.b32.xlu0 %v7421_v3, %s7253_s27 }
  0xef   : > { %v7705_v62 = vpop.permute.xlu1 %384  ;;  %v7707_v63 = vpop.permute.xlu2 %436 }
  0xf0   : > { %14184 = vst [vmem:[#allocation36_spill] sm:$0xff] %v7705_v62  ;;  %v7709_v58 = vpop.permute.xlu0 %382 }
  0xf1   : > { %14185 = vst [vmem:[#allocation37_spill] sm:$0xff] %v7707_v63 }
  0xf2   : > { %14186 = vst [vmem:[#allocation38_spill] sm:$0xff] %v7709_v58 }
  0xf5   : > { %538 = vrot.lane.b32.xlu1 %v7457_v11, %s7253_s27  ;;  %540 = vrot.lane.b32.xlu2 %v7454_v10, %s7253_s27 }
  0xf6   : > { %536 = vrot.lane.b32.xlu0 %v7436_v6, %s7253_s27 }
  0xf7   : > { %v7717_v61 = vpop.permute.xlu1 %390  ;;  %v7719_v59 = vpop.permute.xlu2 %442 }
  0xf8   : > { %14187 = vst [vmem:[#allocation39_spill] sm:$0xff] %v7717_v61  ;;  %v7721_v60 = vpop.permute.xlu0 %388 }
  0xf9   : > { %14188 = vst [vmem:[#allocation40_spill] sm:$0xff] %v7719_v59 }
  0xfa   : > { %14189 = vst [vmem:[#allocation41_spill] sm:$0xff] %v7721_v60 }
  0xfd   : > { %544 = vrot.lane.b32.xlu1 %v7472_v14, %s7253_s27  ;;  %546 = vrot.lane.b32.xlu2 %v7469_v13, %s7253_s27 }
  0xfe   : > { %542 = vrot.lane.b32.xlu0 %v7451_v9, %s7253_s27 }
  0xff   : > { %v7729_v58 = vpop.permute.xlu1 %428  ;;  %v7731_v62 = vpop.permute.xlu2 %448 }
 0x100   : > { %14190 = vst [vmem:[#allocation42_spill] sm:$0xff] %v7729_v58  ;;  %v7733_v63 = vpop.permute.xlu0 %426 }
 0x101   : > { %14191 = vst [vmem:[#allocation43_spill] sm:$0xff] %v7731_v62 }
 0x105   : > { %550 = vrot.lane.b32.xlu1 %v7487_v17, %s7253_s27  ;;  %552 = vrot.lane.b32.xlu2 %v7484_v16, %s7253_s27 }
 0x106   : > { %548 = vrot.lane.b32.xlu0 %v7466_v12, %s7253_s27 }
 0x107   : > { %v7741_v60 = vpop.permute.xlu1 %434  ;;  %v7743_v61 = vpop.permute.xlu2 %454 }
 0x108   : > { %14192 = vst [vmem:[#allocation44_spill] sm:$0xff] %v7741_v60  ;;  %v7745_v59 = vpop.permute.xlu0 %432 }
 0x109   : > { %14193 = vst [vmem:[#allocation45_spill] sm:$0xff] %v7743_v61 }
 0x10a   : > { %14194 = vst [vmem:[#allocation46_spill] sm:$0xff] %v7745_v59 }
 0x10d   : > { %556 = vrot.lane.b32.xlu1 %v7502_v20, %s7253_s27  ;;  %558 = vrot.lane.b32.xlu2 %v7499_v19, %s7253_s27 }
 0x10e   : > { %554 = vrot.lane.b32.xlu0 %v7481_v15, %s7253_s27 }
 0x10f   : > { %v7753_v62 = vpop.permute.xlu1 %440  ;;  %v7755_v56 = vpop.permute.xlu2 %460 }
 0x110   : > { %14195 = vst [vmem:[#allocation47_spill] sm:$0xff] %v7753_v62  ;;  %v7757_v55 = vpop.permute.xlu0 %438 }
 0x111   : > { %14196 = vst [vmem:[#allocation48_spill] sm:$0xff] %v7755_v56  ;;  %v14375_v43 = vld [vmem:[#allocation46_spill] sm:$0xff] }
 0x112   : > { %14197 = vst [vmem:[#allocation49_spill] sm:$0xff] %v7757_v55 }
 0x115   : > { %562 = vrot.lane.b32.xlu1 %v7517_v23, %s7253_s27  ;;  %564 = vrot.lane.b32.xlu2 %v7514_v22, %s7253_s27 }
 0x116   : > { %560 = vrot.lane.b32.xlu0 %v7496_v18, %s7253_s27 }
 0x117   : > { %v7765_v61 = vpop.permute.xlu1 %446  ;;  %v7767_v60 = vpop.permute.xlu2 %466 }
 0x118   : > { %14198 = vst [vmem:[#allocation50_spill] sm:$0xff] %v7765_v61  ;;  %v7769_v59 = vpop.permute.xlu0 %444 }
 0x119   : > { %14199 = vst [vmem:[#allocation51_spill] sm:$0xff] %v7767_v60 }
 0x11a   : > { %14200 = vst [vmem:[#allocation52_spill] sm:$0xff] %v7769_v59 }
 0x11d   : > { %568 = vrot.lane.b32.xlu1 %v7532_v26, %s7253_s27  ;;  %570 = vrot.lane.b32.xlu2 %v7529_v25, %s7253_s27 }
 0x11e   : > { %566 = vrot.lane.b32.xlu0 %v7511_v21, %s7253_s27 }
 0x11f   : > { %v7777_v55 = vpop.permute.xlu1 %452  ;;  %v7779_v62 = vpop.permute.xlu2 %472 }
 0x120   : > { %14201 = vst [vmem:[#allocation53_spill] sm:$0xff] %v7777_v55  ;;  %v7781_v56 = vpop.permute.xlu0 %450 }
 0x121   : > { %14202 = vst [vmem:[#allocation54_spill] sm:$0xff] %v7779_v62 }
 0x122   : > { %14203 = vst [vmem:[#allocation55_spill] sm:$0xff] %v7781_v56 }
 0x125   : > { %574 = vrot.lane.b32.xlu1 %v7547_v29, %s7253_s27  ;;  %576 = vrot.lane.b32.xlu2 %v7544_v28, %s7253_s27 }
 0x126   : > { %572 = vrot.lane.b32.xlu0 %v7526_v24, %s7253_s27 }
 0x127   : > { %v7789_v59 = vpop.permute.xlu1 %458  ;;  %v7791_v60 = vpop.permute.xlu2 %478 }
 0x128   : > { %14204 = vst [vmem:[#allocation56_spill] sm:$0xff] %v7789_v59  ;;  %v7793_v61 = vpop.permute.xlu0 %456 }
 0x129   : > { %14205 = vst [vmem:[#allocation57_spill] sm:$0xff] %v7791_v60 }
 0x12a   : > { %14206 = vst [vmem:[#allocation58_spill] sm:$0xff] %v7793_v61 }
 0x12d   : > { %580 = vrot.lane.b32.xlu1 %v7559_v31, %s7253_s27  ;;  %582 = vrot.lane.b32.xlu2 %v7556_v30, %s7253_s27 }
 0x12e   : > { %578 = vrot.lane.b32.xlu0 %v7541_v27, %s7253_s27 }
 0x12f   : > { %v7801_v56 = vpop.permute.xlu1 %464  ;;  %v7803_v55 = vpop.permute.xlu2 %484 }
 0x130   : > { %14207 = vst [vmem:[#allocation59_spill] sm:$0xff] %v7801_v56  ;;  %v7805_v62 = vpop.permute.xlu0 %462 }
 0x131   : > { %14208 = vst [vmem:[#allocation60_spill] sm:$0xff] %v7803_v55 }
 0x132   : > { %14209 = vst [vmem:[#allocation61_spill] sm:$0xff] %v7805_v62 }
 0x135   : > { %618 = vrot.lane.b32.xlu1 %v7427_v5, %s7254_s29  ;;  %620 = vrot.lane.b32.xlu2 %v7409_v1, %s7254_s29 }
 0x136   : > { %616 = vrot.lane.b32.xlu0 %v7412_v2, %s7254_s29 }
 0x137   : > { %v7813_v60 = vpop.permute.xlu1 %470  ;;  %v7815_v59 = vpop.permute.xlu2 %522 }
 0x138   : > { %14210 = vst [vmem:[#allocation62_spill] sm:$0xff] %v7813_v60  ;;  %v7817_v61 = vpop.permute.xlu0 %468 }
 0x139   : > { %14211 = vst [vmem:[#allocation63_spill] sm:$0xff] %v7817_v61 }
 0x13d   : > { %624 = vrot.lane.b32.xlu1 %v7406_v0, %s7254_s29  ;;  %626 = vrot.lane.b32.xlu2 %v7421_v3, %s7254_s29 }
 0x13e   : > { %622 = vrot.lane.b32.xlu0 %v7424_v4, %s7254_s29 }
 0x13f   : > { %v7825_v55 = vpop.permute.xlu1 %476  ;;  %v7827_v62 = vpop.permute.xlu2 %528 }
 0x140   : > { %14212 = vst [vmem:[#allocation64_spill] sm:$0xff] %v7825_v55  ;;  %v7829_v56 = vpop.permute.xlu0 %474 }
 0x141   : > { %14213 = vst [vmem:[#allocation65_spill] sm:$0xff] %v7827_v62 }
 0x142   : > { %14214 = vst [vmem:[#allocation66_spill] sm:$0xff] %v7829_v56 }
 0x145   : > { %630 = vrot.lane.b32.xlu1 %v7439_v7, %s7254_s29  ;;  %632 = vrot.lane.b32.xlu2 %v7436_v6, %s7254_s29 }
 0x146   : > { %628 = vrot.lane.b32.xlu0 %v7442_v8, %s7254_s29 }
 0x147   : > { %v7837_v60 = vpop.permute.xlu1 %482  ;;  %v7839_v61 = vpop.permute.xlu2 %534 }
 0x148   : > { %14215 = vst [vmem:[#allocation67_spill] sm:$0xff] %v7837_v60  ;;  %v7841_v58 = vpop.permute.xlu0 %480 }
 0x149   : > { %14216 = vst [vmem:[#allocation68_spill] sm:$0xff] %v7839_v61 }
 0x14a   : > { %14217 = vst [vmem:[#allocation69_spill] sm:$0xff] %v7841_v58 }
 0x14d   : > { %636 = vrot.lane.b32.xlu1 %v7454_v10, %s7254_s29  ;;  %638 = vrot.lane.b32.xlu2 %v7451_v9, %s7254_s29 }
 0x14e   : > { %634 = vrot.lane.b32.xlu0 %v7457_v11, %s7254_s29 }
 0x14f   : > { %v7849_v56 = vpop.permute.xlu1 %520  ;;  %v7851_v55 = vpop.permute.xlu2 %540 }
 0x150   : > { %14218 = vst [vmem:[#allocation70_spill] sm:$0xff] %v7851_v55  ;;  %v7853_v62 = vpop.permute.xlu0 %486 }
 0x151   : > { %14219 = vst [vmem:[#allocation71_spill] sm:$0xff] %v7853_v62 }
 0x155   : > { %642 = vrot.lane.b32.xlu1 %v7469_v13, %s7254_s29  ;;  %644 = vrot.lane.b32.xlu2 %v7466_v12, %s7254_s29 }
 0x156   : > { %640 = vrot.lane.b32.xlu0 %v7472_v14, %s7254_s29 }
 0x157   : > { %v7861_v60 = vpop.permute.xlu1 %526  ;;  %v7863_v58 = vpop.permute.xlu2 %546 }
 0x158   : > { %14220 = vst [vmem:[#allocation72_spill] sm:$0xff] %v7861_v60  ;;  %v7865_v61 = vpop.permute.xlu0 %524 }
 0x159   : > { %14221 = vst [vmem:[#allocation73_spill] sm:$0xff] %v7863_v58 }
 0x15a   : > { %14222 = vst [vmem:[#allocation74_spill] sm:$0xff] %v7865_v61 }
 0x15d   : > { %648 = vrot.lane.b32.xlu1 %v7484_v16, %s7254_s29  ;;  %650 = vrot.lane.b32.xlu2 %v7481_v15, %s7254_s29 }
 0x15e   : > { %646 = vrot.lane.b32.xlu0 %v7487_v17, %s7254_s29 }
 0x15f   : > { %v7873_v62 = vpop.permute.xlu1 %532  ;;  %v7875_v55 = vpop.permute.xlu2 %552 }
 0x160   : > { %14223 = vst [vmem:[#allocation75_spill] sm:$0xff] %v7873_v62  ;;  %v7877_v54 = vpop.permute.xlu0 %530 }
 0x161   : > { %14224 = vst [vmem:[#allocation76_spill] sm:$0xff] %v7875_v55  ;;  %v14341_v48 = vld [vmem:[#allocation74_spill] sm:$0xff] }
 0x162   : > { %14225 = vst [vmem:[#allocation77_spill] sm:$0xff] %v7877_v54 }
 0x165   : > { %654 = vrot.lane.b32.xlu1 %v7499_v19, %s7254_s29  ;;  %656 = vrot.lane.b32.xlu2 %v7496_v18, %s7254_s29 }
 0x166   : > { %652 = vrot.lane.b32.xlu0 %v7502_v20, %s7254_s29 }
 0x167   : > { %v7885_v58 = vpop.permute.xlu1 %538  ;;  %v7887_v60 = vpop.permute.xlu2 %558 }
 0x168   : > { %14226 = vst [vmem:[#allocation78_spill] sm:$0xff] %v7885_v58  ;;  %v7889_v61 = vpop.permute.xlu0 %536 }
 0x169   : > { %14227 = vst [vmem:[#allocation79_spill] sm:$0xff] %v7887_v60 }
 0x16a   : > { %14228 = vst [vmem:[#allocation80_spill] sm:$0xff] %v7889_v61 }
 0x16d   : > { %660 = vrot.lane.b32.xlu1 %v7514_v22, %s7254_s29  ;;  %662 = vrot.lane.b32.xlu2 %v7511_v21, %s7254_s29 }
 0x16e   : > { %658 = vrot.lane.b32.xlu0 %v7517_v23, %s7254_s29 }
 0x16f   : > { %v7897_v54 = vpop.permute.xlu1 %544  ;;  %v7899_v62 = vpop.permute.xlu2 %564 }
 0x170   : > { %14229 = vst [vmem:[#allocation81_spill] sm:$0xff] %v7897_v54  ;;  %v7901_v55 = vpop.permute.xlu0 %542 }
 0x171   : > { %14230 = vst [vmem:[#allocation82_spill] sm:$0xff] %v7899_v62 }
 0x172   : > { %14231 = vst [vmem:[#allocation83_spill] sm:$0xff] %v7901_v55 }
 0x175   : > { %666 = vrot.lane.b32.xlu1 %v7529_v25, %s7254_s29  ;;  %668 = vrot.lane.b32.xlu2 %v7526_v24, %s7254_s29 }
 0x176   : > { %664 = vrot.lane.b32.xlu0 %v7532_v26, %s7254_s29 }
 0x177   : > { %v7909_v58 = vpop.permute.xlu1 %550  ;;  %v7911_v60 = vpop.permute.xlu2 %570 }
 0x178   : > { %14232 = vst [vmem:[#allocation84_spill] sm:$0xff] %v7909_v58  ;;  %v7913_v61 = vpop.permute.xlu0 %548 }
 0x179   : > { %14233 = vst [vmem:[#allocation85_spill] sm:$0xff] %v7911_v60 }
 0x17a   : > { %14234 = vst [vmem:[#allocation86_spill] sm:$0xff] %v7913_v61 }
 0x17d   : > { %672 = vrot.lane.b32.xlu1 %v7544_v28, %s7254_s29  ;;  %674 = vrot.lane.b32.xlu2 %v7541_v27, %s7254_s29 }
 0x17e   : > { %670 = vrot.lane.b32.xlu0 %v7547_v29, %s7254_s29 }
 0x17f   : > { %v7921_v55 = vpop.permute.xlu1 %556  ;;  %v7923_v54 = vpop.permute.xlu2 %576 }
 0x180   : > { %14235 = vst [vmem:[#allocation87_spill] sm:$0xff] %v7921_v55  ;;  %v7925_v62 = vpop.permute.xlu0 %554 }
 0x181   : > { %14236 = vst [vmem:[#allocation88_spill] sm:$0xff] %v7923_v54 }
 0x182   : > { %14237 = vst [vmem:[#allocation89_spill] sm:$0xff] %v7925_v62 }
 0x185   : > { %678 = vrot.lane.b32.xlu1 %v7556_v30, %s7254_s29  ;;  %712 = vrot.lane.b32.xlu2 %v7412_v2, %s7255_s6 }
 0x186   : > { %676 = vrot.lane.b32.xlu0 %v7559_v31, %s7254_s29  ;;  %s6268_s29 = sld [smem:[#allocation2]] }
 0x187   : > { %v7933_v58 = vpop.permute.xlu1 %562  ;;  %v7935_v60 = vpop.permute.xlu2 %582 }
 0x188   : > { %14238 = vst [vmem:[#allocation90_spill] sm:$0xff] %v7933_v58  ;;  %v7937_v61 = vpop.permute.xlu0 %560 }
 0x189   : > { %14239 = vst [vmem:[#allocation91_spill] sm:$0xff] %v7935_v60 }
 0x18a   : > { %14240 = vst [vmem:[#allocation92_spill] sm:$0xff] %v7937_v61 }
 0x18d   : > { %716 = vrot.lane.b32.xlu1 %v7409_v1, %s7255_s6  ;;  %718 = vrot.lane.b32.xlu2 %v7424_v4, %s7255_s6 }
 0x18e   : > { %714 = vrot.lane.b32.xlu0 %v7427_v5, %s7255_s6 }
 0x18f   : > { %v7945_v54 = vpop.permute.xlu1 %568  ;;  %v7947_v62 = vpop.permute.xlu2 %620 }
 0x190   : > { %14241 = vst [vmem:[#allocation93_spill] sm:$0xff] %v7945_v54  ;;  %v7949_v55 = vpop.permute.xlu0 %566 }
 0x191   : > { %14242 = vst [vmem:[#allocation94_spill] sm:$0xff] %v7947_v62 }
 0x192   : > { %14243 = vst [vmem:[#allocation95_spill] sm:$0xff] %v7949_v55 }
 0x195   : > { %722 = vrot.lane.b32.xlu1 %v7421_v3, %s7255_s6  ;;  %724 = vrot.lane.b32.xlu2 %v7442_v8, %s7255_s6 }
 0x196   : > { %720 = vrot.lane.b32.xlu0 %v7406_v0, %s7255_s6 }
 0x197   : > { %v7957_v60 = vpop.permute.xlu1 %574  ;;  %v7959_v58 = vpop.permute.xlu2 %626 }
 0x198   : > { %14244 = vst [vmem:[#allocation96_spill] sm:$0xff] %v7957_v60  ;;  %v7961_v61 = vpop.permute.xlu0 %572 }
 0x199   : > { %14245 = vst [vmem:[#allocation97_spill] sm:$0xff] %v7959_v58 }
 0x19a   : > { %14246 = vst [vmem:[#allocation98_spill] sm:$0xff] %v7961_v61 }
 0x19d   : > { %728 = vrot.lane.b32.xlu1 %v7436_v6, %s7255_s6  ;;  %730 = vrot.lane.b32.xlu2 %v7457_v11, %s7255_s6 }
 0x19e   : > { %726 = vrot.lane.b32.xlu0 %v7439_v7, %s7255_s6 }
 0x19f   : > { %v7969_v55 = vpop.permute.xlu1 %580  ;;  %v7971_v54 = vpop.permute.xlu2 %632 }
 0x1a0   : > { %14247 = vst [vmem:[#allocation99_spill] sm:$0xff] %v7969_v55  ;;  %v7973_v62 = vpop.permute.xlu0 %578 }
 0x1a1   : > { %14248 = vst [vmem:[#allocation100_spill] sm:$0xff] %v7971_v54 }
 0x1a2   : > { %14249 = vst [vmem:[#allocation101_spill] sm:$0xff] %v7973_v62 }
 0x1a5   : > { %734 = vrot.lane.b32.xlu1 %v7451_v9, %s7255_s6  ;;  %736 = vrot.lane.b32.xlu2 %v7472_v14, %s7255_s6 }
 0x1a6   : > { %732 = vrot.lane.b32.xlu0 %v7454_v10, %s7255_s6 }
 0x1a7   : > { %v7981_v60 = vpop.permute.xlu1 %618  ;;  %v7983_v61 = vpop.permute.xlu2 %638 }
 0x1a8   : > { %14250 = vst [vmem:[#allocation102_spill] sm:$0xff] %v7983_v61  ;;  %v7985_v58 = vpop.permute.xlu0 %616 }
 0x1ad   : > { %740 = vrot.lane.b32.xlu1 %v7466_v12, %s7255_s6  ;;  %742 = vrot.lane.b32.xlu2 %v7487_v17, %s7255_s6 }
 0x1ae   : > { %738 = vrot.lane.b32.xlu0 %v7469_v13, %s7255_s6 }
 0x1af   : > { %v7993_v62 = vpop.permute.xlu1 %624  ;;  %v7995_v55 = vpop.permute.xlu2 %644 }
 0x1b0   : > { %14251 = vst [vmem:[#allocation103_spill] sm:$0xff] %v7993_v62  ;;  %v7997_v54 = vpop.permute.xlu0 %622 }
 0x1b1   : > { %14252 = vst [vmem:[#allocation104_spill] sm:$0xff] %v7995_v55 }
 0x1b2   : > { %14253 = vst [vmem:[#allocation105_spill] sm:$0xff] %v7997_v54 }
 0x1b5   : > { %746 = vrot.lane.b32.xlu1 %v7481_v15, %s7255_s6  ;;  %748 = vrot.lane.b32.xlu2 %v7502_v20, %s7255_s6 }
 0x1b6   : > { %744 = vrot.lane.b32.xlu0 %v7484_v16, %s7255_s6 }
 0x1b7   : > { %v8005_v61 = vpop.permute.xlu1 %630  ;;  %v8007_v53 = vpop.permute.xlu2 %650 }
 0x1b8   : > { %14254 = vst [vmem:[#allocation106_spill] sm:$0xff] %v8005_v61  ;;  %v8009_v52 = vpop.permute.xlu0 %628 }
 0x1b9   : > { %14255 = vst [vmem:[#allocation107_spill] sm:$0xff] %v8007_v53 }
 0x1ba   : > { %14256 = vst [vmem:[#allocation108_spill] sm:$0xff] %v8009_v52 }
 0x1bd   : > { %752 = vrot.lane.b32.xlu1 %v7496_v18, %s7255_s6  ;;  %754 = vrot.lane.b32.xlu2 %v7517_v23, %s7255_s6 }
 0x1be   : > { %750 = vrot.lane.b32.xlu0 %v7499_v19, %s7255_s6 }
 0x1bf   : > { %v8017_v55 = vpop.permute.xlu1 %636  ;;  %v8019_v54 = vpop.permute.xlu2 %656 }
 0x1c0   : > { %14257 = vst [vmem:[#allocation109_spill] sm:$0xff] %v8017_v55  ;;  %v8021_v62 = vpop.permute.xlu0 %634 }
 0x1c1   : > { %14258 = vst [vmem:[#allocation110_spill] sm:$0xff] %v8019_v54 }
 0x1c2   : > { %14259 = vst [vmem:[#allocation111_spill] sm:$0xff] %v8021_v62 }
 0x1c5   : > { %758 = vrot.lane.b32.xlu1 %v7511_v21, %s7255_s6  ;;  %760 = vrot.lane.b32.xlu2 %v7532_v26, %s7255_s6 }
 0x1c6   : > { %756 = vrot.lane.b32.xlu0 %v7514_v22, %s7255_s6 }
 0x1c7   : > { %v8029_v61 = vpop.permute.xlu1 %642  ;;  %v8033_v52 = vpop.permute.xlu2 %662 }
 0x1c8   : > { %14260 = vst [vmem:[#allocation112_spill] sm:$0xff] %v8029_v61  ;;  %v8031_v53 = vpop.permute.xlu0 %640 }
 0x1c9   : > { %14261 = vst [vmem:[#allocation113_spill] sm:$0xff] %v8031_v53 }
 0x1ca   : > { %14262 = vst [vmem:[#allocation114_spill] sm:$0xff] %v8033_v52 }
 0x1cd   : > { %764 = vrot.lane.b32.xlu1 %v7526_v24, %s7255_s6  ;;  %766 = vrot.lane.b32.xlu2 %v7547_v29, %s7255_s6 }
 0x1ce   : > { %762 = vrot.lane.b32.xlu0 %v7529_v25, %s7255_s6 }
 0x1cf   : > { %v8041_v62 = vpop.permute.xlu1 %648  ;;  %v8045_v54 = vpop.permute.xlu2 %668 }
 0x1d0   : > { %14263 = vst [vmem:[#allocation115_spill] sm:$0xff] %v8041_v62  ;;  %v8043_v55 = vpop.permute.xlu0 %646 }
 0x1d1   : > { %14264 = vst [vmem:[#allocation116_spill] sm:$0xff] %v8043_v55 }
 0x1d2   : > { %14265 = vst [vmem:[#allocation117_spill] sm:$0xff] %v8045_v54 }
 0x1d5   : > { %770 = vrot.lane.b32.xlu1 %v7541_v27, %s7255_s6  ;;  %772 = vrot.lane.b32.xlu2 %v7559_v31, %s7255_s6 }
 0x1d6   : > { %768 = vrot.lane.b32.xlu0 %v7544_v28, %s7255_s6 }
 0x1d7   : > { %v8053_v61 = vpop.permute.xlu1 %654  ;;  %v8057_v53 = vpop.permute.xlu2 %674 }
 0x1d8   : > { %14266 = vst [vmem:[#allocation118_spill] sm:$0xff] %v8053_v61  ;;  %v8055_v52 = vpop.permute.xlu0 %652 }
 0x1d9   : > { %14267 = vst [vmem:[#allocation119_spill] sm:$0xff] %v8055_v52 }
 0x1da   : > { %14268 = vst [vmem:[#allocation120_spill] sm:$0xff] %v8057_v53 }
 0x1dd   : > { %808 = vrot.lane.b32.xlu1 %v7412_v2, %s7256_s7  ;;  %810 = vrot.lane.b32.xlu2 %v7427_v5, %s7256_s7 }
 0x1de   : > { %774 = vrot.lane.b32.xlu0 %v7556_v30, %s7255_s6  ;;  %s6915_s6 = sshll.u32 %s7391_s24, 5 }
 0x1df   : > { %v8065_v55 = vpop.permute.xlu1 %660  ;;  %v8075_v53 = vpop.permute.xlu2 %712 }
 0x1e0   : > { %14269 = vst [vmem:[#allocation121_spill] sm:$0xff] %v8065_v55  ;;  %v8067_v54 = vpop.permute.xlu0 %658 }
 0x1e1   : > { %14270 = vst [vmem:[#allocation122_spill] sm:$0xff] %v8067_v54 }
 0x1e5   : > { %814 = vrot.lane.b32.xlu1 %v7424_v4, %s7256_s7  ;;  %816 = vrot.lane.b32.xlu2 %v7406_v0, %s7256_s7 }
 0x1e6   : > { %812 = vrot.lane.b32.xlu0 %v7409_v1, %s7256_s7 }
 0x1e7   : > { %v8077_v61 = vpop.permute.xlu1 %666  ;;  %v8091_v62 = vpop.permute.xlu2 %718 }
 0x1e8   : > { %14271 = vst [vmem:[#allocation123_spill] sm:$0xff] %v8077_v61  ;;  %v8079_v52 = vpop.permute.xlu0 %664 }
 0x1e9   : > { %14272 = vst [vmem:[#allocation124_spill] sm:$0xff] %v8079_v52 }
 0x1ea   : > { %14275 = vst [vmem:[#allocation127_spill] sm:$0xff] %v8091_v62 }
 0x1ed   : > { %820 = vrot.lane.b32.xlu1 %v7442_v8, %s7256_s7  ;;  %822 = vrot.lane.b32.xlu2 %v7439_v7, %s7256_s7 }
 0x1ee   : > { %818 = vrot.lane.b32.xlu0 %v7421_v3, %s7256_s7 }
 0x1ef   : > { %v8087_v54 = vpop.permute.xlu1 %672  ;;  %v8103_v51 = vpop.permute.xlu2 %724 }
 0x1f0   : > { %14273 = vst [vmem:[#allocation125_spill] sm:$0xff] %v8087_v54  ;;  %v8089_v55 = vpop.permute.xlu0 %670 }
 0x1f1   : > { %14274 = vst [vmem:[#allocation126_spill] sm:$0xff] %v8089_v55 }
 0x1f2   : > { %14278 = vst [vmem:[#allocation130_spill] sm:$0xff] %v8103_v51 }
 0x1f5   : > { %826 = vrot.lane.b32.xlu1 %v7457_v11, %s7256_s7  ;;  %828 = vrot.lane.b32.xlu2 %v7454_v10, %s7256_s7 }
 0x1f6   : > { %824 = vrot.lane.b32.xlu0 %v7436_v6, %s7256_s7 }
 0x1f7   : > { %v8099_v61 = vpop.permute.xlu1 %678  ;;  %v8115_v62 = vpop.permute.xlu2 %730 }
 0x1f8   : > { %14276 = vst [vmem:[#allocation128_spill] sm:$0xff] %v8099_v61  ;;  %v8101_v52 = vpop.permute.xlu0 %676 }
 0x1f9   : > { %14277 = vst [vmem:[#allocation129_spill] sm:$0xff] %v8101_v52 }
 0x1fa   : > { %14280 = vst [vmem:[#allocation132_spill] sm:$0xff] %v8115_v62 }
 0x1fd   : > { %832 = vrot.lane.b32.xlu1 %v7472_v14, %s7256_s7  ;;  %834 = vrot.lane.b32.xlu2 %v7469_v13, %s7256_s7 }
 0x1fe   : > { %830 = vrot.lane.b32.xlu0 %v7451_v9, %s7256_s7 }
 0x1ff   : > { %v8111_v55 = vpop.permute.xlu1 %716  ;;  %v8133_v62 = vpop.permute.xlu2 %736 }
 0x200   : > { %14279 = vst [vmem:[#allocation131_spill] sm:$0xff] %v8111_v55  ;;  %v8113_v54 = vpop.permute.xlu0 %714 }
 0x201   : > { %14283 = vst [vmem:[#allocation135_spill] sm:$0xff] %v8133_v62 }
 0x205   : > { %838 = vrot.lane.b32.xlu1 %v7487_v17, %s7256_s7  ;;  %840 = vrot.lane.b32.xlu2 %v7484_v16, %s7256_s7 }
 0x206   : > { %836 = vrot.lane.b32.xlu0 %v7466_v12, %s7256_s7 }
 0x207   : > { %v8123_v61 = vpop.permute.xlu1 %722  ;;  %v8149_v50 = vpop.permute.xlu2 %742 }
 0x208   : > { %14281 = vst [vmem:[#allocation133_spill] sm:$0xff] %v8123_v61  ;;  %v8125_v52 = vpop.permute.xlu0 %720 }
 0x209   : > { %14282 = vst [vmem:[#allocation134_spill] sm:$0xff] %v8125_v52 }
 0x20a   : > { %14288 = vst [vmem:[#allocation140_spill] sm:$0xff] %v8149_v50 }
 0x20d   : > { %844 = vrot.lane.b32.xlu1 %v7502_v20, %s7256_s7  ;;  %846 = vrot.lane.b32.xlu2 %v7499_v19, %s7256_s7 }
 0x20e   : > { %842 = vrot.lane.b32.xlu0 %v7481_v15, %s7256_s7 }
 0x20f   : > { %v8135_v51 = vpop.permute.xlu1 %728 }
 0x210   : > { %14284 = vst [vmem:[#allocation136_spill] sm:$0xff] %v8135_v51  ;;  %v8137_v55 = vpop.permute.xlu0 %726  ;;  %v8161_v51 = vpop.permute.xlu2 %748 }
 0x211   : > { %14285 = vst [vmem:[#allocation137_spill] sm:$0xff] %v8137_v55 }
 0x212   : > { %14291 = vst [vmem:[#allocation143_spill] sm:$0xff] %v8161_v51 }
 0x215   : > { %850 = vrot.lane.b32.xlu1 %v7517_v23, %s7256_s7  ;;  %852 = vrot.lane.b32.xlu2 %v7514_v22, %s7256_s7 }
 0x216   : > { %848 = vrot.lane.b32.xlu0 %v7496_v18, %s7256_s7 }
 0x217   : > { %v8145_v61 = vpop.permute.xlu1 %734 }
 0x218   : > { %14286 = vst [vmem:[#allocation138_spill] sm:$0xff] %v8145_v61  ;;  %v8147_v52 = vpop.permute.xlu0 %732 }
 0x219   : > { %14287 = vst [vmem:[#allocation139_spill] sm:$0xff] %v8147_v52  ;;  %v8173_v52 = vpop.permute.xlu2 %754 }
 0x21a   : > { %14293 = vst [vmem:[#allocation145_spill] sm:$0xff] %v8173_v52 }
 0x21d   : > { %856 = vrot.lane.b32.xlu1 %v7532_v26, %s7256_s7  ;;  %858 = vrot.lane.b32.xlu2 %v7529_v25, %s7256_s7 }
 0x21e   : > { %854 = vrot.lane.b32.xlu0 %v7511_v21, %s7256_s7 }
 0x21f   : > { %v8157_v62 = vpop.permute.xlu1 %740 }
 0x220   : > { %14289 = vst [vmem:[#allocation141_spill] sm:$0xff] %v8157_v62  ;;  %v8159_v55 = vpop.permute.xlu0 %738 }
 0x221   : > { %14290 = vst [vmem:[#allocation142_spill] sm:$0xff] %v8159_v55  ;;  %v8191_v52 = vpop.permute.xlu2 %760 }
 0x222   : > { %14296 = vst [vmem:[#allocation148_spill] sm:$0xff] %v8191_v52 }
 0x225   : > { %862 = vrot.lane.b32.xlu1 %v7547_v29, %s7256_s7  ;;  %864 = vrot.lane.b32.xlu2 %v7544_v28, %s7256_s7 }
 0x226   : > { %860 = vrot.lane.b32.xlu0 %v7526_v24, %s7256_s7 }
 0x227   : > { %v8169_v50 = vpop.permute.xlu1 %746 }
 0x228   : > { %14292 = vst [vmem:[#allocation144_spill] sm:$0xff] %v8169_v50  ;;  %v8171_v61 = vpop.permute.xlu0 %744 }
 0x22d   : > { %868 = vrot.lane.b32.xlu1 %v7559_v31, %s7256_s7  ;;  %870 = vrot.lane.b32.xlu2 %v7556_v30, %s7256_s7 }
 0x22e   : > { %866 = vrot.lane.b32.xlu0 %v7541_v27, %s7256_s7  ;;  %s13737_s7 = scalar_lea.vmem [#allocation8], %s6915_s6 }
 0x22f   : > { %v8181_v55 = vpop.permute.xlu1 %752 }
 0x230   : > { %14294 = vst [vmem:[#allocation146_spill] sm:$0xff] %v8181_v55  ;;  %v8183_v62 = vpop.permute.xlu0 %750  ;;  %v8207_v55 = vpop.permute.xlu2 %766 }
 0x231   : > { %14295 = vst [vmem:[#allocation147_spill] sm:$0xff] %v8183_v62 }
 0x232   : > { %14301 = vst [vmem:[#allocation153_spill] sm:$0xff] %v8207_v55  ;;  %v7258_v55 = vmov 1983009808  }
 0x235   : > { %906 = vrot.lane.b32.xlu1 %v7427_v5, %s7257_s11  ;;  %908 = vrot.lane.b32.xlu2 %v7409_v1, %s7257_s11 }
 0x236   : > { %904 = vrot.lane.b32.xlu0 %v7412_v2, %s7257_s11 }
 0x237   : > { %v8193_v50 = vpop.permute.xlu1 %758 }
 0x238   : > { %14297 = vst [vmem:[#allocation149_spill] sm:$0xff] %v8193_v50  ;;  %v8195_v51 = vpop.permute.xlu0 %756 }
 0x239   : > { %14298 = vst [vmem:[#allocation150_spill] sm:$0xff] %v8195_v51 }
 0x23d   : > { %912 = vrot.lane.b32.xlu1 %v7406_v0, %s7257_s11  ;;  %914 = vrot.lane.b32.xlu2 %v7421_v3, %s7257_s11 }
 0x23e   : > { %910 = vrot.lane.b32.xlu0 %v7424_v4, %s7257_s11  ;;  %v8219_v4 = vpop.permute.xlu2 %772 }
 0x23f   : > { %v8203_v62 = vpop.permute.xlu1 %764  ;;  %14304 = vst [vmem:[#allocation156_spill] sm:$0xff] %v8219_v4 }
 0x240   : > { %14299 = vst [vmem:[#allocation151_spill] sm:$0xff] %v8203_v62  ;;  %v8205_v1 = vpop.permute.xlu0 %762 }
 0x241   : > { %14300 = vst [vmem:[#allocation152_spill] sm:$0xff] %v8205_v1 }
 0x245   : > { %918 = vrot.lane.b32.xlu1 %v7439_v7, %s7257_s11  ;;  %920 = vrot.lane.b32.xlu2 %v7436_v6, %s7257_s11 }
 0x246   : > { %916 = vrot.lane.b32.xlu0 %v7442_v8, %s7257_s11  ;;  %v8231_v8 = vpop.permute.xlu2 %810 }
 0x247   : > { %v8215_v0 = vpop.permute.xlu1 %770 }
 0x248   : > { %14302 = vst [vmem:[#allocation154_spill] sm:$0xff] %v8215_v0  ;;  %v8217_v3 = vpop.permute.xlu0 %768 }
 0x249   : > { %14303 = vst [vmem:[#allocation155_spill] sm:$0xff] %v8217_v3 }
 0x24d   : > { %924 = vrot.lane.b32.xlu1 %v7454_v10, %s7257_s11  ;;  %926 = vrot.lane.b32.xlu2 %v7451_v9, %s7257_s11 }
 0x24e   : > { %922 = vrot.lane.b32.xlu0 %v7457_v11, %s7257_s11  ;;  %v8249_v11 = vpop.permute.xlu2 %816 }
 0x24f   : > { %v8227_v7 = vpop.permute.xlu1 %808 }
 0x250   : > { %v8229_v6 = vpop.permute.xlu0 %774  ;;  %v1025_v1 = vrot.slane %v8227_v7, 4 }
 0x251   : > { %14305 = vst [vmem:[#allocation157_spill] sm:$0xff] %v8229_v6 }
 0x255   : > { %930 = vrot.lane.b32.xlu1 %v7469_v13, %s7257_s11  ;;  %932 = vrot.lane.b32.xlu2 %v7466_v12, %s7257_s11 }
 0x256   : > { %928 = vrot.lane.b32.xlu0 %v7472_v14, %s7257_s11 }
 0x257   : > { %v8239_v10 = vpop.permute.xlu1 %814 }
 0x258   : > { %14306 = vst [vmem:[#allocation158_spill] sm:$0xff] %v8239_v10  ;;  %v8241_v9 = vpop.permute.xlu0 %812 }
 0x25d   : > { %936 = vrot.lane.b32.xlu1 %v7484_v16, %s7257_s11  ;;  %938 = vrot.lane.b32.xlu2 %v7481_v15, %s7257_s11  ;;  %v8265_v16 = vpop.permute.xlu2 %822 }
 0x25e   : > { %934 = vrot.lane.b32.xlu0 %v7487_v17, %s7257_s11  ;;  %14310 = vst [vmem:[#allocation162_spill] sm:$0xff] %v8265_v16 }
 0x25f   : > { %v8251_v13 = vpop.permute.xlu1 %820 }
 0x260   : > { %v8253_v12 = vpop.permute.xlu0 %818 }
 0x261   : > { %14307 = vst [vmem:[#allocation159_spill] sm:$0xff] %v8253_v12 }
 0x265   : > { %942 = vrot.lane.b32.xlu1 %v7499_v19, %s7257_s11  ;;  %944 = vrot.lane.b32.xlu2 %v7496_v18, %s7257_s11  ;;  %v8277_v19 = vpop.permute.xlu2 %828 }
 0x266   : > { %940 = vrot.lane.b32.xlu0 %v7502_v20, %s7257_s11  ;;  %14313 = vst [vmem:[#allocation165_spill] sm:$0xff] %v8277_v19 }
 0x267   : > { %v8261_v14 = vpop.permute.xlu1 %826 }
 0x268   : > { %14308 = vst [vmem:[#allocation160_spill] sm:$0xff] %v8261_v14  ;;  %v8263_v15 = vpop.permute.xlu0 %824  ;;  %v1015_v14 = vrot.slane %v7601_v37, 4 }
 0x269   : > { %14309 = vst [vmem:[#allocation161_spill] sm:$0xff] %v8263_v15 }
 0x26d   : > { %948 = vrot.lane.b32.xlu1 %v7514_v22, %s7257_s11  ;;  %950 = vrot.lane.b32.xlu2 %v7511_v21, %s7257_s11  ;;  %v8289_v22 = vpop.permute.xlu2 %834 }
 0x26e   : > { %946 = vrot.lane.b32.xlu0 %v7517_v23, %s7257_s11  ;;  %14316 = vst [vmem:[#allocation168_spill] sm:$0xff] %v8289_v22 }
 0x26f   : > { %v8273_v17 = vpop.permute.xlu1 %832 }
 0x270   : > { %14311 = vst [vmem:[#allocation163_spill] sm:$0xff] %v8273_v17  ;;  %v8275_v18 = vpop.permute.xlu0 %830  ;;  %v1026_v17 = vsel %vm1001_vm0, %v1025_v1, %v7985_v58 }
 0x271   : > { %14312 = vst [vmem:[#allocation164_spill] sm:$0xff] %v8275_v18  ;;  %v1006_v18 = vunpack.c.l.s4 %v7258_v55  ;;  %v1016_v55 = vsel %vm1001_vm0, %v7849_v56, %v1015_v14 }
 0x273   : > { %v8333_v3 = vunpack.c.0.s8 %v1006_v18 }
 0x275   : > { %954 = vrot.lane.b32.xlu1 %v7529_v25, %s7257_s11  ;;  %956 = vrot.lane.b32.xlu2 %v7526_v24, %s7257_s11  ;;  %v8305_v25 = vpop.permute.xlu2 %840  ;;  %v1024_v1 = vperm.slane %v1016_v55, %v8333_v3 }
 0x276   : > { %952 = vrot.lane.b32.xlu0 %v7532_v26, %s7257_s11 }
 0x277   : > { %v8285_v20 = vpop.permute.xlu1 %838 }
 0x278   : > { %14314 = vst [vmem:[#allocation166_spill] sm:$0xff] %v8285_v20  ;;  %v8287_v21 = vpop.permute.xlu0 %836 }
 0x279   : > { %14315 = vst [vmem:[#allocation167_spill] sm:$0xff] %v8287_v21  ;;  %v1000_v21 = vrot.slane %v7683_v57, 4 }
 0x27b   : > { %v1002_v18 = vsel %vm1001_vm0, %v1000_v21, %v7412_v2 }
 0x27c   : > { %v1008_v21 = vperm.slane %v1002_v18, %v8333_v3  ;;  %v1061_v18 = vrot.slane %v1024_v1, 4 }
 0x27d   : > { %960 = vrot.lane.b32.xlu1 %v7544_v28, %s7257_s11  ;;  %962 = vrot.lane.b32.xlu2 %v7541_v27, %s7257_s11 }
 0x27e   : > { %958 = vrot.lane.b32.xlu0 %v7547_v29, %s7257_s11  ;;  %v8315_v29 = vpop.permute.xlu2 %846 }
 0x27f   : > { %v8297_v23 = vpop.permute.xlu1 %844  ;;  %14321 = vst [vmem:[#allocation173_spill] sm:$0xff] %v8315_v29 }
 0x280   : > { %v8299_v24 = vpop.permute.xlu0 %842 }
 0x281   : > { %14317 = vst [vmem:[#allocation169_spill] sm:$0xff] %v8299_v24 }
 0x285   : > { %966 = vrot.lane.b32.xlu1 %v7556_v30, %s7257_s11 }
 0x286   : > { %964 = vrot.lane.b32.xlu0 %v7559_v31, %s7257_s11  ;;  %v8321_v30 = vpop.permute.xlu2 %852  ;;  %v1013_v31 = vrot.slane %v7849_v56, 4  ;;  %v1125_v56 = vrot.slane %v7815_v59, 4  ;;  %s6947_s11 = sshll.u32 %s7317_s3, 5  ;;  %s6819_s3 = sshll.u32 %s13737_s7, 4  ;;  %s6820_s3 = int_to_ptr.vmem [resolvable:$true] %s6819_s3 }
 0x287   : > { %v8307_v26 = vpop.permute.xlu1 %850  ;;  %14324 = vst [vmem:[#allocation176_spill] sm:$0xff] %v8321_v30  ;;  %s6818_s17 = scalar_lea.hbm %s13782_s5, %s6947_s11 }
 0x288   : > { %14318 = vst [vmem:[#allocation170_spill] sm:$0xff] %v8307_v26  ;;  %v8309_v28 = vpop.permute.xlu0 %848  ;;  %v1126_v55 = vsel %vm1001_vm0, %v1125_v56, %v7613_v40  ;;  %s6821_s18 = sshll.u32 %s6818_s17, 4  ;;  %s6822_s18 = int_to_ptr.hbm [resolvable:$true] %s6821_s18 }
 0x289   : > { %s7188_s19 = sshra.s32 %s6822_s18, 4  ;;  %s7189_s19 = int_to_ptr.hbm [resolvable:$true] %s7188_s19 }
 0x28a   : > { %s7190_s28 = scalar_lea.hbm %s7189_s19, 32  ;;  %p7195_p11 = scmp.lt.s32.totalorder %s7189_s19, %s13782_s5 }
 0x28b   : > { %p7191_p1 = scmp.ne.s32.totalorder %s7189_s19, %s7190_s28  ;;  %p7196_p9 = scmp.lt.s32.totalorder %s7194_s25, %s7190_s28 }
 0x28d   : > { %p7192_p4 = pnand %p7191_p1, %p7363_p7  ;;  %p7197_p2 = por %p7196_p9, %p7195_p11 }
 0x28e   : > { %v8336_v50 = vpop.permute.xlu2 %858 }
 0x28f   : > { %v8311_v27 = vpop.permute.xlu1 %856  ;;  %14327 = vst [vmem:[#allocation179_spill] sm:$0xff] %v8336_v50  ;;  %p7193_p8 = pneg %p7192_p4 }
 0x290   : > { %14319 = vst [vmem:[#allocation171_spill] sm:$0xff] %v8311_v27  ;;  %v8313_v20 = vpop.permute.xlu0 %854 }
 0x291   : > { %14320 = vst [vmem:[#allocation172_spill] sm:$0xff] %v8313_v20  ;;  %v1003_v20 = vrot.slane %v7412_v2, 4  ;;  %p7198_p10 = pnand %p7197_p2, %p7193_p8 }
 0x296   : > { %v8380_v35 = vpop.permute.xlu2 %864 }
 0x297   : > { %v8317_v6 = vpop.permute.xlu1 %862  ;;  %14328 = vst [vmem:[#allocation180_spill] sm:$0xff] %v8380_v35 }
 0x298   : > { %14322 = vst [vmem:[#allocation174_spill] sm:$0xff] %v8317_v6  ;;  %v8319_v0 = vpop.permute.xlu0 %860  ;;  %v1014_v6 = vsel %vm1001_vm0, %v1013_v31, %v7601_v37  ;;  %v1032_v37 = vperm.slane %v1026_v17, %v8333_v3 }
 0x299   : > { %14323 = vst [vmem:[#allocation175_spill] sm:$0xff] %v8319_v0  ;;  %v7259_v0 = vmov 1934713408  }
 0x29a   : > { %v1054_v26 = vunpack.c.l.s4 %v7259_v0  ;;  %v1075_v0 = vrot.slane %v1032_v37, 4 }
 0x29f   : > { %v8324_v22 = vpop.permute.xlu1 %868 }
 0x2a0   : > { %14325 = vst [vmem:[#allocation177_spill] sm:$0xff] %v8324_v22  ;;  %v8326_v4 = vpop.permute.xlu0 %866  ;;  %v1027_v22 = vrot.slane %v7985_v58, 4  ;;  %v1004_v58 = vsel %vm1001_vm0, %v7683_v57, %v1003_v20 }
 0x2a1   : > { %14326 = vst [vmem:[#allocation178_spill] sm:$0xff] %v8326_v4  ;;  %v1020_v4 = vperm.slane %v1014_v6, %v8333_v3  ;;  %v1039_v6 = vrot.slane %v8075_v53, 4  ;;  %v1012_v17 = vperm.slane %v1004_v58, %v8333_v3  ;;  %v8378_v58 = vperm.slane %v1126_v55, %v8333_v3 }
 0x2a2   : > { %v1028_v14 = vsel %vm1001_vm0, %v8227_v7, %v1027_v22  ;;  %v1051_v7 = vrot.slane %v1008_v21, 4  ;;  %v1113_v22 = vrot.slane %v7733_v63, 4 }
 0x2a3   : > { %v1049_v31 = vrot.slane %v1020_v4, 4  ;;  %v1036_v57 = vperm.slane %v1028_v14, %v8333_v3  ;;  %v8374_v14 = vunpack.c.0.s8 %v1054_v26  ;;  %v1062_v33 = vsel %vm1001_vm0, %v1061_v18, %v1012_v17 }
 0x2a5   : > { %v1050_v20 = vsel %vm1001_vm0, %v1049_v31, %v1008_v21  ;;  %v1087_v56 = vrot.slane %v1036_v57, 4  ;;  %v1052_v31 = vsel %vm1001_vm0, %v1020_v4, %v1051_v7  ;;  %v1063_v21 = vrot.slane %v1012_v17, 4 }
 0x2a6   : > { %v1056_v35 = vperm.slane %v1050_v20, %v8374_v14  ;;  %v1060_v7 = vperm.slane %v1052_v31, %v8374_v14 }
 0x2a7   : > { %v8348_v16 = vpop.permute.xlu1 %906 }
 0x2a8   : > { %v905_v62 = vpop.permute.xlu0 %904 }
 0x2a9   : > { %v1037_v2 = vrot.slane %v905_v62, 4  ;;  %v1040_v50 = vsel %vm1001_vm0, %v905_v62, %v1039_v6 }
 0x2aa   : > { %v1048_v19 = vperm.slane %v1040_v50, %v8333_v3  ;;  %v1127_v50 = vrot.slane %v7613_v40, 4 }
 0x2ab   : > { %v1038_v62 = vsel %vm1001_vm0, %v1037_v2, %v8075_v53  ;;  %v1149_v53 = vrot.slane %v8348_v16, 4 }
 0x2ac   : > { %v1044_v6 = vperm.slane %v1038_v62, %v8333_v3  ;;  %v1088_v55 = vsel %vm1001_vm0, %v1048_v19, %v1087_v56  ;;  %v1085_v40 = vrot.slane %v1048_v19, 4  ;;  %v1064_v56 = vsel %vm1001_vm0, %v1024_v1, %v1063_v21 }
 0x2ad   : > { %v1150_v4 = vsel %vm1001_vm0, %v1149_v53, %v8113_v54  ;;  %v8405_v18 = vperm.slane %v1088_v55, %v8374_v14  ;;  %v1151_v19 = vrot.slane %v8113_v54, 4  ;;  %v1099_v53 = vrot.slane %v1056_v35, 4 }
 0x2ae   : > { %v1076_v62 = vsel %vm1001_vm0, %v1044_v6, %v1075_v0  ;;  %v1073_v26 = vrot.slane %v1044_v6, 4  ;;  %v1114_v0 = vsel %vm1001_vm0, %v1113_v22, %v7427_v5  ;;  %v1161_v6 = vrot.slane %v8378_v58, 4 }
 0x2af   : > { %v8383_v2 = vpop.permute.xlu1 %912  ;;  %v1084_v38 = vperm.slane %v1076_v62, %v8374_v14  ;;  %v8408_v5 = vperm.slane %v1062_v33, %v8374_v14  ;;  %v1137_v22 = vrot.slane %v8231_v8, 4  ;;  %v8414_v31 = vperm.slane %v1150_v4, %v8333_v3 }
 0x2b0   : > { %v8388_v12 = vpop.permute.xlu0 %910  ;;  %v1074_v17 = vsel %vm1001_vm0, %v1073_v26, %v1032_v37  ;;  %v1086_v37 = vsel %vm1001_vm0, %v1085_v40, %v1036_v57  ;;  %v1152_v26 = vsel %vm1001_vm0, %v8348_v16, %v1151_v19  ;;  %v1109_v57 = vrot.slane %v8405_v18, 4  ;;  %v8435_v19 = vpop.permute.xlu2 %870 }
 0x2b1   : > { %14329 = vst [vmem:[#allocation181_spill] sm:$0xff] %v8388_v12  ;;  %v1101_v20 = vrot.slane %v1084_v38, 4  ;;  %v1080_v62 = vperm.slane %v1074_v17, %v8374_v14  ;;  %v8431_v16 = vperm.slane %v1114_v0, %v8333_v3  ;;  %v1138_v40 = vsel %vm1001_vm0, %v1137_v22, %v7981_v60  ;;  %v7072_v17 = vld [vmem:[%s7395_s10 + $0x8] sm:$0xff] }
 0x2b2   : > { %14332 = vst [vmem:[#allocation184_spill] sm:$0xff] %v8435_v19  ;;  %v8447_v0 = vperm.slane %v1064_v56, %v8374_v14  ;;  %v1115_v22 = vrot.slane %v7072_v17, 4  ;;  %v1139_v4 = vrot.slane %v7981_v60, 4  ;;  %v1128_v17 = vsel %vm1001_vm0, %v7815_v59, %v1127_v50 }
 0x2b3   : > { %v1102_v1 = vsel %vm1001_vm0, %v1101_v20, %v1060_v7  ;;  %v1100_v54 = vsel %vm1001_vm0, %v1080_v62, %v1099_v53  ;;  %v1097_v21 = vrot.slane %v1080_v62, 4  ;;  %v8439_v53 = vperm.slane %v1086_v37, %v8374_v14 }
 0x2b4   : > { %v4592_v33 = vsel %vm4585_vm1, %v1102_v1, -inf  ;;  %v4589_v20 = vsel %vm4585_vm1, %v1100_v54, -inf  ;;  %v8442_v1 = vperm.slane %v1152_v26, %v8333_v3  ;;  %v1162_v37 = vsel %vm1001_vm0, %v1161_v6, %v8431_v16 }
 0x2b5   : > { %4593 = vmax.xlane.f32.xlu1 %v4592_v33  ;;  %4590 = vmax.xlane.f32.xlu0 %v4589_v20  ;;  %v1098_v62 = vsel %vm1001_vm0, %v1097_v21, %v1056_v35  ;;  %v1185_v33 = vrot.slane %v8414_v31, 4  ;;  %v1107_v35 = vrot.slane %v8408_v5, 4  ;;  %v1144_v20 = vperm.slane %v1138_v40, %v8333_v3 }
 0x2b6   : > { %v4586_v54 = vsel %vm4585_vm1, %v1098_v62, -inf  ;;  %v1110_v56 = vsel %vm1001_vm0, %v1109_v57, %v8447_v0  ;;  %v1140_v60 = vsel %vm1001_vm0, %v8231_v8, %v1139_v4  ;;  %v1197_v26 = vrot.slane %v8442_v1, 4 }
 0x2b7   : > { %v8422_v55 = vpop.permute.xlu1 %918  ;;  %4587 = vmax.xlane.f32.xlu2 %v4586_v54  ;;  %v1108_v62 = vsel %vm1001_vm0, %v8439_v53, %v1107_v35  ;;  %v1103_v54 = vrot.slane %v1060_v7, 4  ;;  %v1168_v21 = vperm.slane %v1162_v37, %v8374_v14  ;;  %v1186_v40 = vsel %vm1001_vm0, %v1185_v33, %v1144_v20 }
 0x2b8   : > { %14330 = vst [vmem:[#allocation182_spill] sm:$0xff] %v8422_v55  ;;  %v8427_v52 = vpop.permute.xlu0 %916  ;;  %v1116_v59 = vsel %vm1001_vm0, %v7733_v63, %v1115_v22  ;;  %v4604_v8 = vsel %vm4585_vm1, %v1110_v56, -inf  ;;  %v1136_v4 = vperm.slane %v1128_v17, %v8333_v3  ;;  %v1148_v35 = vperm.slane %v1140_v60, %v8333_v3  ;;  %v14336_v56 = vld [vmem:[#allocation26_spill] sm:$0xff]  ;;  %v909_v46 = vpop.permute.xlu2 %908 }
 0x2b9   : > { %14331 = vst [vmem:[#allocation183_spill] sm:$0xff] %v8427_v52  ;;  %v1104_v50 = vsel %vm1001_vm0, %v1084_v38, %v1103_v54  ;;  %v4601_v37 = vsel %vm4585_vm1, %v1108_v62, -inf  ;;  %v1192_v6 = vperm.slane %v1186_v40, %v8374_v14  ;;  %v8486_v38 = vld [vmem:[%s7395_s10 + $0x18] sm:$0xff]  ;;  %v8490_v17 = vld [vmem:[%s7395_s10 + $0x30] sm:$0xff]  ;;  %v1124_v57 = vperm.slane %v1116_v59, %v8333_v3 }
 0x2ba   : > { %v4595_v62 = vsel %vm4585_vm1, %v1104_v50, -inf  ;;  %v1198_v40 = vsel %vm1001_vm0, %v1197_v26, %v1148_v35  ;;  %v1163_v19 = vrot.slane %v8431_v16, 4  ;;  %v1105_v54 = vrot.slane %v8439_v53, 4  ;;  %v14340_v59 = vld [vmem:[#allocation42_spill] sm:$0xff] }
 0x2bb   : > { %v1173_v47 = vrot.slane %v1136_v4, 4  ;;  %v1249_v60 = vrot.slane %v8241_v9, 4  ;;  %v1187_v26 = vrot.slane %v1144_v20, 4  ;;  %v8504_v63 = vperm.slane %v1198_v40, %v8374_v14  ;;  %v14342_v40 = vld [vmem:[#allocation94_spill] sm:$0xff] }
 0x2bc   : > { %v1164_v16 = vsel %vm1001_vm0, %v8378_v58, %v1163_v19  ;;  %v1237_v53 = vrot.slane %v14341_v48, 4  ;;  %v1261_v55 = vrot.slane %v909_v46, 4  ;;  %v14357_v49 = vrot.slane %v8486_v38, 4 }
 0x2bd   : > { %4605 = vmax.xlane.f32.xlu1 %v4604_v8  ;;  %4602 = vmax.xlane.f32.xlu0 %v4601_v37  ;;  %v1211_v8 = vrot.slane %v1168_v21, 4  ;;  %v1175_v37 = vrot.slane %v1124_v57, 4  ;;  %v1188_v20 = vsel %vm1001_vm0, %v8414_v31, %v1187_v26  ;;  %v1250_v42 = vsel %vm1001_vm0, %v1249_v60, %v14342_v40 }
 0x2be   : > { %v1217_v60 = vrot.slane %v8504_v63, 4 }
 0x2bf   : > { %v8474_v7 = vpop.permute.xlu1 %924  ;;  %4596 = vmax.xlane.f32.xlu2 %v4595_v62  ;;  %v1212_v50 = vsel %vm1001_vm0, %v1192_v6, %v1211_v8  ;;  %v1225_v62 = vrot.slane %v14340_v59, 4  ;;  %v1106_v8 = vsel %vm1001_vm0, %v1105_v54, %v8408_v5  ;;  %v1199_v5 = vrot.slane %v1148_v35, 4 }
 0x2c0   : > { %14333 = vst [vmem:[#allocation185_spill] sm:$0xff] %v8474_v7  ;;  %v8479_v33 = vpop.permute.xlu0 %922  ;;  %v4613_v22 = vsel %vm4585_vm1, %v1212_v50, -inf  ;;  %v8522_v7 = vperm.slane %v1164_v16, %v8374_v14  ;;  %v1176_v50 = vsel %vm1001_vm0, %v1136_v4, %v1175_v37  ;;  %v8536_v4 = vld [vmem:[%s7395_s10 + $0x48] sm:$0xff]  ;;  %v1256_v37 = vperm.slane %v1250_v42, %v8333_v3 }
 0x2c1   : > { %14334 = vst [vmem:[#allocation186_spill] sm:$0xff] %v8479_v33  ;;  %v1209_v33 = vrot.slane %v1192_v6, 4  ;;  %v1174_v6 = vsel %vm1001_vm0, %v1173_v47, %v1124_v57  ;;  %v4598_v47 = vsel %vm4585_vm1, %v1106_v8, -inf  ;;  %v1196_v57 = vperm.slane %v1188_v20, %v8374_v14 }
 0x2c2   : > { %v8541_v26 = vperm.slane %v1174_v6, %v8374_v14  ;;  %v1200_v16 = vsel %vm1001_vm0, %v8442_v1, %v1199_v5  ;;  %v1215_v8 = vrot.slane %v8522_v7, 4  ;;  %v1184_v20 = vperm.slane %v1176_v50, %v8374_v14 }
 0x2c3   : > { %v1210_v58 = vsel %vm1001_vm0, %v1209_v33, %v1168_v21  ;;  %v1238_v21 = vsel %vm1001_vm0, %v1237_v53, %v7599_v36  ;;  %v14345_v33 = vld [vmem:[#allocation131_spill] sm:$0xff]  ;;  %v7076_v53 = vld [vmem:[%s7395_s10 + $0x10] sm:$0xff]  ;;  %v1111_v6 = vrot.slane %v8447_v0, 4  ;;  %v1208_v50 = vperm.slane %v1200_v16, %v8374_v14 }
 0x2c4   : > { %v4610_v31 = vsel %vm4585_vm1, %v1210_v58, -inf  ;;  %v1227_v58 = vrot.slane %v7076_v53, 4  ;;  %v1218_v42 = vsel %vm1001_vm0, %v1217_v60, %v8541_v26  ;;  %v1216_v5 = vsel %vm1001_vm0, %v1196_v57, %v1215_v8  ;;  %v14347_v0 = vld [vmem:[#allocation30_spill] sm:$0xff] }
 0x2c5   : > { %4614 = vmax.xlane.f32.xlu1 %v4613_v22  ;;  %v1262_v22 = vsel %vm1001_vm0, %v1261_v55, %v14345_v33  ;;  %4611 = vmax.xlane.f32.xlu0 %v4610_v31  ;;  %v1226_v55 = vsel %vm1001_vm0, %v1225_v62, %v7076_v53  ;;  %v1244_v31 = vperm.slane %v1238_v21, %v8333_v3  ;;  %v1263_v62 = vrot.slane %v14345_v33, 4 }
 0x2c6   : > { %v1268_v35 = vperm.slane %v1262_v22, %v8333_v3  ;;  %v1232_v21 = vperm.slane %v1226_v55, %v8333_v3  ;;  %v1299_v53 = vrot.slane %v1256_v37, 4  ;;  %v4622_v22 = vsel %vm4585_vm1, %v1218_v42, -inf }
 0x2c7   : > { %v8526_v54 = vpop.permute.xlu1 %930  ;;  %4599 = vmax.xlane.f32.xlu2 %v4598_v47  ;;  %v14346_v47 = vrot.slane %v7599_v36, 4  ;;  %v1112_v60 = vsel %vm1001_vm0, %v8405_v18, %v1111_v6  ;;  %v1264_v33 = vsel %vm1001_vm0, %v909_v46, %v1263_v62  ;;  %v1273_v55 = vrot.slane %v1244_v31, 4 }
 0x2c8   : > { %v8518_v19 = vpop.permute.xlu0 %928  ;;  %14344 = vst [vmem:[#allocation42_spill] sm:$0xff] %v8526_v54  ;;  %v4619_v42 = vsel %vm4585_vm1, %v1216_v5, -inf  ;;  %v1228_v18 = vsel %vm1001_vm0, %v14340_v59, %v1227_v58  ;;  %v4607_v6 = vsel %vm4585_vm1, %v1112_v60, -inf  ;;  %v1275_v46 = vrot.slane %v1232_v21, 4 }
 0x2c9   : > { %14343 = vst [vmem:[#allocation26_spill] sm:$0xff] %v8518_v19  ;;  %v1240_v1 = vsel %vm1001_vm0, %v14341_v48, %v14346_v47  ;;  %v1300_v47 = vsel %vm1001_vm0, %v1268_v35, %v1299_v53  ;;  %v1223_v48 = vrot.slane %v1184_v20, 4  ;;  %v1221_v19 = vrot.slane %v1208_v50, 4 }
 0x2ca   : > { %v8572_v16 = vperm.slane %v1240_v1, %v8333_v3  ;;  %v1251_v62 = vrot.slane %v14342_v40, 4  ;;  %v1297_v1 = vrot.slane %v1268_v35, 4  ;;  %v2817_v5 = vrot.slane %v8305_v25, 4 }
 0x2cb   : > { %v1224_v53 = vsel %vm1001_vm0, %v1208_v50, %v1223_v48  ;;  %v1213_v59 = vrot.slane %v1196_v57, 4  ;;  %v8588_v58 = vperm.slane %v1300_v47, %v8374_v14  ;;  %v8591_v60 = vperm.slane %v1228_v18, %v8333_v3 }
 0x2cc   : > { %v1285_v40 = vrot.slane %v8572_v16, 4  ;;  %v1274_v35 = vsel %vm1001_vm0, %v1273_v55, %v1232_v21  ;;  %v1222_v57 = vsel %vm1001_vm0, %v1221_v19, %v1184_v20  ;;  %v1276_v48 = vsel %vm1001_vm0, %v1244_v31, %v1275_v46  ;;  %v14353_v55 = vld [vmem:[#allocation58_spill] sm:$0xff] }
 0x2cd   : > { %4623 = vmax.xlane.f32.xlu1 %v4622_v22  ;;  %4620 = vmax.xlane.f32.xlu0 %v4619_v42  ;;  %v8581_v22 = vperm.slane %v1264_v33, %v8333_v3  ;;  %v14351_v42 = vld [vmem:[#allocation76_spill] sm:$0xff]  ;;  %v4631_v18 = vsel %vm4585_vm1, %v1224_v53, -inf  ;;  %v1214_v45 = vsel %vm1001_vm0, %v1213_v59, %v8522_v7  ;;  %v1298_v21 = vsel %vm1001_vm0, %v1297_v1, %v1256_v37 }
 0x2ce   : > { %v2805_v33 = vrot.slane %v14351_v42, 4  ;;  %v2793_v27 = vrot.slane %v14353_v55, 4  ;;  %v8613_v19 = vperm.slane %v1274_v35, %v8374_v14  ;;  %v4628_v7 = vsel %vm4585_vm1, %v1222_v57, -inf }
 0x2cf   : > { %4608 = vmax.xlane.f32.xlu2 %v4607_v6  ;;  %v8583_v54 = vpop.permute.xlu1 %936  ;;  %v1252_v6 = vsel %vm1001_vm0, %v8241_v9, %v1251_v62  ;;  %v1309_v47 = vrot.slane %v8581_v22, 4  ;;  %v14354_v9 = vld [vmem:[#allocation115_spill] sm:$0xff]  ;;  %v8624_v46 = vperm.slane %v1276_v48, %v8374_v14  ;;  %v8630_v53 = vperm.slane %v1298_v21, %v8374_v14 }
 0x2d0   : > { %v8569_v8 = vpop.permute.xlu0 %934  ;;  %v2829_v50 = vrot.slane %v8583_v54, 4  ;;  %v2818_v62 = vsel %vm1001_vm0, %v2817_v5, %v14354_v9  ;;  %v2806_v20 = vsel %vm1001_vm0, %v2805_v33, %v14336_v56  ;;  %v8618_v31 = vperm.slane %v1252_v6, %v8333_v3  ;;  %v14355_v33 = vld [vmem:[#allocation34_spill] sm:$0xff]  ;;  %v14356_v6 = vld [vmem:[#allocation87_spill] sm:$0xff] }
 0x2d1   : > { %14350 = vst [vmem:[#allocation74_spill] sm:$0xff] %v8569_v8  ;;  %v8598_v8 = vpop.permute.xlu2 %914  ;;  %v4616_v5 = vsel %vm4585_vm1, %v1214_v45, -inf  ;;  %v1286_v59 = vsel %vm1001_vm0, %v1285_v40, %v8591_v60  ;;  %v1337_v35 = vrot.slane %v14355_v33, 4  ;;  %v3029_v57 = vrot.slane %v14356_v6, 4 }
 0x2d2   : > { %14352 = vst [vmem:[#allocation94_spill] sm:$0xff] %v8598_v8  ;;  %v1325_v8 = vrot.slane %v8588_v58, 4  ;;  %v2830_v1 = vsel %vm1001_vm0, %v2829_v50, %v8171_v61  ;;  %v2824_v48 = vperm.slane %v2818_v62, %v8333_v3  ;;  %v1310_v50 = vsel %vm1001_vm0, %v1309_v47, %v8618_v31 }
 0x2d3   : > { %v2812_v29 = vperm.slane %v2806_v20, %v8333_v3  ;;  %v2836_v62 = vperm.slane %v2830_v1, %v8333_v3  ;;  %v1292_v47 = vperm.slane %v1286_v59, %v8374_v14  ;;  %v1316_v20 = vperm.slane %v1310_v50, %v8374_v14  ;;  %v14360_v50 = vld [vmem:[#allocation143_spill] sm:$0xff] }
 0x2d4   : > { %v1326_v40 = vsel %vm1001_vm0, %v1325_v8, %v8624_v46  ;;  %v3030_v1 = vsel %vm1001_vm0, %v3029_v57, %v14347_v0  ;;  %v1327_v36 = vrot.slane %v8624_v46, 4 }
 0x2d5   : > { %4632 = vmax.xlane.f32.xlu1 %v4631_v18  ;;  %4629 = vmax.xlane.f32.xlu0 %v4628_v7  ;;  %v8640_v18 = vld [vmem:[%s7395_s10 + $0x80] sm:$0xff]  ;;  %v1323_v7 = vrot.slane %v8613_v19, 4  ;;  %v4640_v59 = vsel %vm4585_vm1, %v1326_v40, -inf  ;;  %v2841_v57 = vrot.slane %v2812_v29, 4  ;;  %v1331_v10 = vrot.slane %v1292_v47, 4 }
 0x2d6   : > { %v2794_v45 = vsel %vm1001_vm0, %v2793_v27, %v8640_v18  ;;  %v1340_v27 = vsel %vm1001_vm0, %v14355_v33, %v14357_v49  ;;  %v1338_v49 = vsel %vm1001_vm0, %v1337_v35, %v8486_v38  ;;  %v14358_v33 = vld [vmem:[#allocation48_spill] sm:$0xff]  ;;  %v3041_v38 = vrot.slane %v8297_v23, 4 }
 0x2d7   : > { %4617 = vmax.xlane.f32.xlu2 %v4616_v5  ;;  %v1219_v5 = vrot.slane %v8541_v26, 4  ;;  %v1324_v8 = vsel %vm1001_vm0, %v8630_v53, %v1323_v7  ;;  %v2867_v26 = vrot.slane %v2824_v48, 4  ;;  %v3017_v24 = vrot.slane %v14358_v33, 4 }
 0x2d8   : > { %v8621_v37 = vpop.permute.xlu0 %940  ;;  %v2800_v34 = vperm.slane %v2794_v45, %v8333_v3  ;;  %v4637_v40 = vsel %vm4585_vm1, %v1324_v8, -inf  ;;  %v1329_v45 = vrot.slane %v1316_v20, 4  ;;  %v1332_v51 = vsel %vm1001_vm0, %v1316_v20, %v1331_v10  ;;  %v14364_v10 = vld [vmem:[#allocation119_spill] sm:$0xff] }
 0x2d9   : > { %v3053_v21 = vrot.slane %v8621_v37, 4  ;;  %v1220_v15 = vsel %vm1001_vm0, %v8504_v63, %v1219_v5  ;;  %v8672_v7 = vpop.permute.xlu2 %920  ;;  %v2868_v63 = vsel %vm1001_vm0, %v2836_v62, %v2867_v26  ;;  %v8679_v5 = vperm.slane %v3030_v1, %v8333_v3 }
 0x2da   : > { %14359 = vst [vmem:[#allocation131_spill] sm:$0xff] %v8672_v7  ;;  %v4625_v35 = vsel %vm4585_vm1, %v1220_v15, -inf  ;;  %v8684_v7 = vld [vmem:[%s7395_s10 + $0x28] sm:$0xff]  ;;  %v1321_v26 = vrot.slane %v8630_v53, 4  ;;  %v2843_v30 = vrot.slane %v2800_v34, 4  ;;  %v8694_v15 = vperm.slane %v2868_v63, %v8374_v14 }
 0x2db   : > { %v3054_v12 = vsel %vm1001_vm0, %v3053_v21, %v14360_v50  ;;  %v3065_v39 = vrot.slane %v8679_v5, 4  ;;  %v3042_v20 = vsel %vm1001_vm0, %v3041_v38, %v14364_v10  ;;  %v1330_v63 = vsel %vm1001_vm0, %v1329_v45, %v1292_v47  ;;  %v14366_v45 = vld [vmem:[#allocation65_spill] sm:$0xff] }
 0x2dc   : > { %v8688_v8 = vperm.slane %v3054_v12, %v8333_v3  ;;  %v8703_v12 = vld [vmem:[%s7395_s10 + $0x90] sm:$0xff]  ;;  %v1322_v1 = vsel %vm1001_vm0, %v1321_v26, %v8613_v19  ;;  %v2893_v47 = vrot.slane %v8694_v15, 4  ;;  %v8730_v19 = vperm.slane %v3042_v20, %v8333_v3  ;;  %v14368_v38 = vld [vmem:[#allocation37_spill] sm:$0xff] }
 0x2dd   : > { %4641 = vmax.xlane.f32.xlu1 %v4640_v59  ;;  %4638 = vmax.xlane.f32.xlu0 %v4637_v40  ;;  %v2865_v59 = vrot.slane %v2836_v62, 4  ;;  %v8697_v40 = vperm.slane %v1338_v49, %v8333_v3  ;;  %v8700_v62 = vperm.slane %v1340_v27, %v8333_v3  ;;  %v3018_v53 = vsel %vm1001_vm0, %v3017_v24, %v8703_v12 }
 0x2de   : > { %v2844_v49 = vsel %vm1001_vm0, %v2812_v29, %v2843_v30  ;;  %v3089_v21 = vrot.slane %v8688_v8, 4  ;;  %v4649_v27 = vsel %vm4585_vm1, %v1332_v51, -inf  ;;  %v3024_v30 = vperm.slane %v3018_v53, %v8333_v3 }
 0x2df   : > { %4626 = vmax.xlane.f32.xlu2 %v4625_v35  ;;  %14362 = vst [vmem:[#allocation30_spill] sm:$0xff] %v8697_v40  ;;  %v2842_v35 = vsel %vm1001_vm0, %v2841_v57, %v2800_v34  ;;  %v2866_v24 = vsel %vm1001_vm0, %v2865_v59, %v2824_v48  ;;  %v8720_v57 = vld [vmem:[%s7395_s10 + $0x20] sm:$0xff]  ;;  %v4646_v48 = vsel %vm4585_vm1, %v1330_v63, -inf  ;;  %v1461_v59 = vrot.slane %v14366_v45, 4  ;;  %v8743_v34 = vld [vmem:[%s7395_s10 + $0x78] sm:$0xff] }
 0x2e0   : > { %14363 = vst [vmem:[#allocation76_spill] sm:$0xff] %v8700_v62  ;;  %v8725_v29 = vperm.slane %v2842_v35, %v8374_v14  ;;  %v8738_v35 = vperm.slane %v2844_v49, %v8374_v14  ;;  %v2872_v51 = vperm.slane %v2866_v24, %v8374_v14  ;;  %v3066_v63 = vsel %vm1001_vm0, %v3065_v39, %v3024_v30  ;;  %v8760_v39 = vld [vmem:[%s7395_s10 + $0x40] sm:$0xff] }
 0x2e1   : > { %v8734_v26 = vpop.permute.xlu2 %926  ;;  %v1485_v49 = vrot.slane %v8383_v2, 4  ;;  %v14370_v20 = vrot.slane %v8490_v17, 4  ;;  %14371 = vst [vmem:[#allocation115_spill] sm:$0xff] %v8760_v39  ;;  %v1462_v40 = vsel %vm1001_vm0, %v1461_v59, %v7573_v32  ;;  %v3072_v52 = vperm.slane %v3066_v63, %v8374_v14 }
 0x2e2   : > { %14367 = vst [vmem:[#allocation58_spill] sm:$0xff] %v8734_v26  ;;  %v2894_v24 = vsel %vm1001_vm0, %v2893_v47, %v8738_v35  ;;  %v2891_v53 = vrot.slane %v8725_v29, 4  ;;  %v8770_v26 = vld [vmem:[%s7395_s10 + $0x38] sm:$0xff]  ;;  %v1328_v46 = vsel %vm1001_vm0, %v8588_v58, %v1327_v36  ;;  %v2795_v63 = vrot.slane %v8640_v18, 4 }
 0x2e3   : > { %14372 = vst [vmem:[#allocation34_spill] sm:$0xff] %v8770_v26  ;;  %v1449_v26 = vrot.slane %v14375_v43, 4 }
 0x2e4   : > { %v2892_v47 = vsel %vm1001_vm0, %v2872_v51, %v2891_v53 }
 0x2e5   : > { %4650 = vmax.xlane.f32.xlu1 %v4649_v27  ;;  %4647 = vmax.xlane.f32.xlu0 %v4646_v48  ;;  %v4634_v27 = vsel %vm4585_vm1, %v1322_v1, -inf  ;;  %v3090_v48 = vsel %vm1001_vm0, %v3089_v21, %v8730_v19  ;;  %v1673_v1 = vrot.slane %v14368_v38, 4  ;;  %v4973_v58 = vsel %vm4585_vm1, %v2892_v47, -inf }
 0x2e6   : > { %v3096_v62 = vperm.slane %v3090_v48, %v8374_v14  ;;  %v14374_v48 = vld [vmem:[#allocation134_spill] sm:$0xff]  ;;  %v2831_v47 = vrot.slane %v8171_v61, 4 }
 0x2e7   : > { %4635 = vmax.xlane.f32.xlu2 %v4634_v27  ;;  %v1676_v27 = vsel %vm1001_vm0, %v14368_v38, %v14370_v20  ;;  %v1311_v38 = vrot.slane %v8618_v31, 4  ;;  %v4976_v20 = vsel %vm4585_vm1, %v2894_v24, -inf  ;;  %v1674_v59 = vsel %vm1001_vm0, %v1673_v1, %v8490_v17 }
 0x2e8   : > { %v8780_v53 = vperm.slane %v1676_v27, %v8333_v3  ;;  %v1486_v39 = vsel %vm1001_vm0, %v1485_v49, %v14374_v48  ;;  %v8787_v31 = vperm.slane %v1462_v40, %v8333_v3  ;;  %v1473_v17 = vrot.slane %v8249_v11, 4 }
 0x2e9   : > { %v1312_v36 = vsel %vm1001_vm0, %v8581_v22, %v1311_v38  ;;  %v4643_v1 = vsel %vm4585_vm1, %v1328_v46, -inf  ;;  %v3115_v24 = vrot.slane %v3072_v52, 4  ;;  %v3113_v27 = vrot.slane %v3096_v62, 4  ;;  %v8802_v38 = vpop.permute.xlu2 %932 }
 0x2ea   : > { %v8795_v49 = vperm.slane %v1674_v59, %v8333_v3  ;;  %v8798_v21 = vperm.slane %v1486_v39, %v8333_v3  ;;  %v2889_v40 = vrot.slane %v2872_v51, 4  ;;  %v1287_v22 = vrot.slane %v8591_v60, 4  ;;  %14376 = vst [vmem:[#allocation87_spill] sm:$0xff] %v8802_v38  ;;  %v14377_v60 = vld [vmem:[#allocation103_spill] sm:$0xff]  ;;  %v9034_v38 = vld [vmem:[%s7395_s10 + $0xa0] sm:$0xff] }
 0x2eb   : > { %v8806_v46 = vperm.slane %v1312_v36, %v8374_v14  ;;  %v1450_v59 = vsel %vm1001_vm0, %v1449_v26, %v8720_v57  ;;  %v3091_v39 = vrot.slane %v8730_v19, 4  ;;  %v1474_v61 = vsel %vm1001_vm0, %v1473_v17, %v14377_v60 }
 0x2ec   : > { %v1288_v36 = vsel %vm1001_vm0, %v8572_v16, %v1287_v22  ;;  %v1521_v26 = vrot.slane %v8798_v21, 4  ;;  %v2890_v19 = vsel %vm1001_vm0, %v2889_v40, %v8725_v29  ;;  %v8834_v16 = vperm.slane %v1450_v59, %v8333_v3 }
 0x2ed   : > { %4977 = vmax.xlane.f32.xlu1 %v4976_v20  ;;  %4974 = vmax.xlane.f32.xlu0 %v4973_v58  ;;  %v3067_v20 = vrot.slane %v3024_v30, 4  ;;  %v3116_v58 = vsel %vm1001_vm0, %v3096_v62, %v3115_v24  ;;  %v1497_v30 = vrot.slane %v8787_v31, 4  ;;  %v3114_v62 = vsel %vm1001_vm0, %v3113_v27, %v3072_v52 }
 0x2ee   : > { %v5021_v24 = vsel %vm4585_vm1, %v3116_v58, -inf  ;;  %v1333_v52 = vrot.slane %v8806_v46, 4  ;;  %v8837_v27 = vperm.slane %v1474_v61, %v8333_v3  ;;  %v2819_v40 = vrot.slane %v14354_v9, 4  ;;  %v8939_v58 = vpop.permute.xlu0 %946 }
 0x2ef   : > { %4644 = vmax.xlane.f32.xlu2 %v4643_v1  ;;  %v3068_v51 = vsel %vm1001_vm0, %v8679_v5, %v3067_v20  ;;  %v2832_v1 = vsel %vm1001_vm0, %v8583_v54, %v2831_v47  ;;  %v3092_v5 = vsel %vm1001_vm0, %v8688_v8, %v3091_v39  ;;  %v14378_v20 = vld [vmem:[#allocation40_spill] sm:$0xff]  ;;  %v5018_v8 = vsel %vm4585_vm1, %v3114_v62, -inf  ;;  %v8853_v39 = vpop.permute.xlu1 %942  ;;  %14392 = vst [vmem:[#allocation103_spill] sm:$0xff] %v8939_v58 }
 0x2f0   : > { %v2009_v17 = vrot.slane %v14378_v20, 4  ;;  %v8831_v54 = vperm.slane %v3068_v51, %v8374_v14  ;;  %v8840_v29 = vperm.slane %v2832_v1, %v8333_v3  ;;  %v4970_v18 = vsel %vm4585_vm1, %v2890_v19, -inf  ;;  %14379 = vst [vmem:[#allocation48_spill] sm:$0xff] %v8853_v39 }
 0x2f1   : > { %v8846_v22 = vperm.slane %v1288_v36, %v8374_v14  ;;  %v8849_v47 = vperm.slane %v3092_v5, %v8374_v14  ;;  %v1498_v51 = vsel %vm1001_vm0, %v1497_v30, %v8834_v16  ;;  %v1522_v9 = vsel %vm1001_vm0, %v1521_v26, %v8837_v27  ;;  %v8878_v5 = vpop.permute.xlu2 %938 }
 0x2f2   : > { %v14380_v61 = vrot.slane %v14336_v56, 4  ;;  %v2820_v62 = vsel %vm1001_vm0, %v8305_v25, %v2819_v40  ;;  %v2010_v19 = vsel %vm1001_vm0, %v2009_v17, %v8536_v4  ;;  %v14381_v30 = vrot.slane %v8536_v4, 4  ;;  %14382 = vst [vmem:[#allocation143_spill] sm:$0xff] %v8878_v5 }
 0x2f3   : > { %v1334_v36 = vsel %vm1001_vm0, %v1333_v52, %v8846_v22  ;;  %v2877_v26 = vrot.slane %v8840_v29, 4  ;;  %v2796_v25 = vsel %vm1001_vm0, %v14353_v55, %v2795_v63  ;;  %v1504_v17 = vperm.slane %v1498_v51, %v8374_v14  ;;  %v8899_v51 = vld [vmem:[%s7395_s10 + $0x58] sm:$0xff] }
 0x2f4   : > { %v2808_v1 = vsel %vm1001_vm0, %v14351_v42, %v14380_v61  ;;  %v2012_v56 = vsel %vm1001_vm0, %v14378_v20, %v14381_v30  ;;  %v2895_v42 = vrot.slane %v8738_v35, 4  ;;  %v1528_v4 = vperm.slane %v1522_v9, %v8374_v14 }
 0x2f5   : > { %5022 = vmax.xlane.f32.xlu1 %v5021_v24  ;;  %5019 = vmax.xlane.f32.xlu0 %v5018_v8  ;;  %v3119_v24 = vrot.slane %v8831_v54, 4  ;;  %v2816_v8 = vperm.slane %v2808_v1, %v8333_v3  ;;  %v8886_v20 = vperm.slane %v2820_v62, %v8333_v3  ;;  %v4652_v35 = vsel %vm4585_vm1, %v1334_v36, -inf  ;;  %v8904_v62 = vld [vmem:[%s7395_s10 + $0x50] sm:$0xff] }
 0x2f6   : > { %v2896_v55 = vsel %vm1001_vm0, %v8694_v15, %v2895_v42  ;;  %v8892_v63 = vperm.slane %v2010_v19, %v8333_v3  ;;  %v8895_v40 = vperm.slane %v2012_v56, %v8333_v3  ;;  %14386 = vst [vmem:[#allocation37_spill] sm:$0xff] %v8904_v62  ;;  %v2804_v19 = vperm.slane %v2796_v25, %v8333_v3  ;;  %v8926_v1 = vld [vmem:[%s7395_s10 + $0x70] sm:$0xff]  ;;  %v14440_v62 = vld [vmem:[#allocation115_spill] sm:$0xff] }
 0x2f7   : > { %4971 = vmax.xlane.f32.xlu2 %v4970_v18  ;;  %v3120_v52 = vsel %vm1001_vm0, %v8849_v47, %v3119_v24  ;;  %v2878_v24 = vsel %vm1001_vm0, %v2877_v26, %v8886_v20  ;;  %v4979_v30 = vsel %vm4585_vm1, %v2896_v55, -inf  ;;  %v1547_v56 = vrot.slane %v1504_v17, 4  ;;  %v8922_v55 = vld [vmem:[%s7395_s10 + $0xa8] sm:$0xff]  ;;  %14389 = vst [vmem:[#allocation46_spill] sm:$0xff] %v8926_v1 }
 0x2f8   : > { %14383 = vst [vmem:[#allocation119_spill] sm:$0xff] %v8892_v63  ;;  %v5027_v15 = vsel %vm4585_vm1, %v3120_v52, -inf  ;;  %v1545_v42 = vrot.slane %v1528_v4, 4  ;;  %v1499_v9 = vrot.slane %v8834_v16, 4  ;;  %v2853_v59 = vrot.slane %v2816_v8, 4 }
 0x2f9   : > { %14384 = vst [vmem:[#allocation65_spill] sm:$0xff] %v8895_v40  ;;  %v3117_v52 = vrot.slane %v8849_v47, 4  ;;  %v1548_v25 = vsel %vm1001_vm0, %v1528_v4, %v1547_v56  ;;  %v8930_v47 = vpop.permute.xlu1 %948  ;;  %v14390_v4 = vrot.slane %v8657_v41, 4  ;;  %v14391_v56 = vld [vmem:[#allocation43_spill] sm:$0xff]  ;;  %v2855_v36 = vrot.slane %v2804_v19, 4 }
 0x2fa   : > { %14388 = vst [vmem:[#allocation134_spill] sm:$0xff] %v8922_v55  ;;  %v1500_v26 = vsel %vm1001_vm0, %v8787_v31, %v1499_v9  ;;  %v3043_v18 = vrot.slane %v14364_v10, 4  ;;  %v1546_v40 = vsel %vm1001_vm0, %v1545_v42, %v1504_v17  ;;  %v4685_v16 = vsel %vm4585_vm1, %v1548_v25, -inf  ;;  %v8951_v10 = vpop.permute.xlu2 %944 }
 0x2fb   : > { %v2854_v61 = vsel %vm1001_vm0, %v2853_v59, %v2804_v19  ;;  %v3055_v9 = vrot.slane %v14360_v50, 4  ;;  %v8955_v42 = vperm.slane %v1500_v26, %v8374_v14  ;;  %v14394_v19 = vld [vmem:[#allocation92_spill] sm:$0xff]  ;;  %v2879_v50 = vrot.slane %v8886_v20, 4 }
 0x2fc   : > { %v8968_v26 = vperm.slane %v2854_v61, %v8374_v14  ;;  %v2345_v25 = vrot.slane %v14391_v56, 4 }
 0x2fd   : > { %4653 = vmax.xlane.f32.xlu1 %v4652_v35  ;;  %5028 = vmax.xlane.f32.xlu0 %v5027_v15  ;;  %v8919_v15 = vperm.slane %v2878_v24, %v8374_v14  ;;  %v2348_v24 = vsel %vm1001_vm0, %v14391_v56, %v14390_v4  ;;  %v3044_v4 = vsel %vm1001_vm0, %v8297_v23, %v3043_v18  ;;  %v14396_v56 = vrot.slane %v8703_v12, 4 }
 0x2fe   : > { %v3056_v23 = vsel %vm1001_vm0, %v8621_v37, %v3055_v9  ;;  %v2880_v20 = vsel %vm1001_vm0, %v8840_v29, %v2879_v50  ;;  %v8977_v37 = vperm.slane %v2348_v24, %v8333_v3  ;;  %v1335_v24 = vrot.slane %v8846_v22, 4 }
 0x2ff   : > { %4980 = vmax.xlane.f32.xlu2 %v4979_v30  ;;  %v1523_v30 = vrot.slane %v8837_v27, 4  ;;  %v3118_v27 = vsel %vm1001_vm0, %v3117_v52, %v8831_v54  ;;  %v2897_v17 = vrot.slane %v8919_v15, 4  ;;  %v14393_v54 = vrot.slane %v14347_v0, 4 }
 0x300   : > { %v4682_v52 = vsel %vm4585_vm1, %v1546_v40, -inf  ;;  %v5024_v18 = vsel %vm4585_vm1, %v3118_v27, -inf  ;;  %14395 = vst [vmem:[#allocation40_spill] sm:$0xff] %v8977_v37  ;;  %v3277_v40 = vrot.slane %v8951_v10, 4  ;;  %v3064_v29 = vperm.slane %v3056_v23, %v8333_v3 }
 0x301   : > { %v1524_v31 = vsel %vm1001_vm0, %v8798_v21, %v1523_v30  ;;  %v3032_v59 = vsel %vm1001_vm0, %v14356_v6, %v14393_v54  ;;  %v3253_v21 = vrot.slane %v14394_v19, 4  ;;  %v2856_v6 = vsel %vm1001_vm0, %v2816_v8, %v2855_v36 }
 0x302   : > { %v1532_v0 = vperm.slane %v1524_v31, %v8374_v14  ;;  %v2898_v61 = vsel %vm1001_vm0, %v2897_v17, %v8968_v26  ;;  %v1551_v30 = vrot.slane %v8955_v42, 4  ;;  %v3020_v8 = vsel %vm1001_vm0, %v14358_v33, %v14396_v56  ;;  %v8997_v33 = vpop.permute.xlu1 %954  ;;  %v9018_v56 = vpop.permute.xlu2 %950 }
 0x303   : > { %v3040_v36 = vperm.slane %v3032_v59, %v8333_v3  ;;  %v3254_v27 = vsel %vm1001_vm0, %v3253_v21, %v7633_v44  ;;  %v2864_v9 = vperm.slane %v2856_v6, %v8374_v14  ;;  %v2346_v12 = vsel %vm1001_vm0, %v2345_v25, %v8657_v41  ;;  %14397 = vst [vmem:[#allocation43_spill] sm:$0xff] %v8997_v33  ;;  %v9004_v21 = vld [vmem:[%s7395_s10 + $0x68] sm:$0xff]  ;;  %v9010_v41 = vpop.permute.xlu0 %952 }
 0x304   : > { %v1552_v31 = vsel %vm1001_vm0, %v1532_v0, %v1551_v30  ;;  %v4982_v54 = vsel %vm4585_vm1, %v2898_v61, -inf  ;;  %v1336_v22 = vsel %vm1001_vm0, %v8806_v46, %v1335_v24  ;;  %v3028_v59 = vperm.slane %v3020_v8, %v8333_v3  ;;  %14398 = vst [vmem:[#allocation92_spill] sm:$0xff] %v9004_v21  ;;  %v14433_v21 = vld [vmem:[#allocation150_spill] sm:$0xff] }
 0x305   : > { %4686 = vmax.xlane.f32.xlu1 %v4685_v16  ;;  %4683 = vmax.xlane.f32.xlu0 %v4682_v52  ;;  %v3052_v16 = vperm.slane %v3044_v4, %v8333_v3  ;;  %v2888_v4 = vperm.slane %v2880_v20, %v8374_v14  ;;  %v14399_v52 = vld [vmem:[#allocation59_spill] sm:$0xff]  ;;  %v3077_v25 = vrot.slane %v3040_v36, 4  ;;  %v9013_v20 = vperm.slane %v3254_v27, %v8333_v3 }
 0x306   : > { %v3241_v23 = vrot.slane %v14399_v52, 4  ;;  %v4691_v61 = vsel %vm4585_vm1, %v1552_v31, -inf  ;;  %v3265_v30 = vrot.slane %v8309_v28, 4  ;;  %14401 = vst [vmem:[#allocation59_spill] sm:$0xff] %v9018_v56  ;;  %v4655_v8 = vsel %vm4585_vm1, %v1336_v22, -inf }
 0x307   : > { %5025 = vmax.xlane.f32.xlu2 %v5024_v18  ;;  %v3103_v17 = vrot.slane %v3052_v16, 4  ;;  %v14400_v18 = vld [vmem:[#allocation146_spill] sm:$0xff]  ;;  %v2901_v24 = vrot.slane %v2888_v4, 4  ;;  %v3101_v50 = vrot.slane %v3064_v29, 4  ;;  %v3079_v31 = vrot.slane %v3028_v59, 4 }
 0x308   : > { %v3278_v6 = vsel %vm1001_vm0, %v3277_v40, %v14400_v18  ;;  %v2903_v40 = vrot.slane %v2864_v9, 4  ;;  %v1487_v35 = vrot.slane %v14374_v48, 4 }
 0x309   : > { %v3104_v46 = vsel %vm1001_vm0, %v3064_v29, %v3103_v17  ;;  %v9025_v27 = vperm.slane %v3278_v6, %v8333_v3  ;;  %v1549_v17 = vrot.slane %v1532_v0, 4  ;;  %v3289_v29 = vrot.slane %v9013_v20, 4  ;;  %v14403_v6 = vld [vmem:[#allocation110_spill] sm:$0xff] }
 0x30a   : > { %v2904_v33 = vsel %vm1001_vm0, %v2888_v4, %v2903_v40  ;;  %v3078_v0 = vsel %vm1001_vm0, %v3077_v25, %v3028_v59  ;;  %v3266_v48 = vsel %vm1001_vm0, %v3265_v30, %v14403_v6  ;;  %v1488_v4 = vsel %vm1001_vm0, %v8383_v2, %v1487_v35  ;;  %v9053_v25 = vld [vmem:[%s7395_s10 + $0xc0] sm:$0xff] }
 0x30b   : > { %v3313_v40 = vrot.slane %v9025_v27, 4  ;;  %v4991_v22 = vsel %vm4585_vm1, %v2904_v33, -inf  ;;  %v3102_v37 = vsel %vm1001_vm0, %v3101_v50, %v3052_v16  ;;  %14404 = vst [vmem:[#allocation110_spill] sm:$0xff] %v9053_v25  ;;  %v9058_v35 = vperm.slane %v3078_v0, %v8374_v14  ;;  %v9069_v16 = vpop.permute.xlu1 %960 }
 0x30c   : > { %14405 = vst [vmem:[#allocation187_spill] sm:$0xff] %v9069_v16  ;;  %v1475_v50 = vrot.slane %v14377_v60, 4 }
 0x30d   : > { %4983 = vmax.xlane.f32.xlu1 %v4982_v54  ;;  %4692 = vmax.xlane.f32.xlu0 %v4691_v61  ;;  %v9022_v54 = vperm.slane %v2346_v12, %v8333_v3  ;;  %v9030_v61 = vperm.slane %v3104_v46, %v8374_v14  ;;  %v3242_v12 = vsel %vm1001_vm0, %v3241_v23, %v9034_v38 }
 0x30e   : > { %v2902_v46 = vsel %vm1001_vm0, %v2901_v24, %v2864_v9  ;;  %v1550_v23 = vsel %vm1001_vm0, %v1549_v17, %v8955_v42  ;;  %v9064_v9 = vperm.slane %v3266_v48, %v8333_v3  ;;  %v9067_v42 = vperm.slane %v1488_v4, %v8333_v3  ;;  %v9073_v24 = vpop.permute.xlu0 %958 }
 0x30f   : > { %14402 = vst [vmem:[#allocation146_spill] sm:$0xff] %v9022_v54  ;;  %4656 = vmax.xlane.f32.xlu2 %v4655_v8  ;;  %v3080_v8 = vsel %vm1001_vm0, %v3040_v36, %v3079_v31  ;;  %v3125_v2 = vrot.slane %v9030_v61, 4  ;;  %v9061_v36 = vperm.slane %v3242_v12, %v8333_v3  ;;  %v4988_v33 = vsel %vm4585_vm1, %v2902_v46, -inf  ;;  %v14407_v12 = vld [vmem:[#allocation44_spill] sm:$0xff] }
 0x310   : > { %14406 = vst [vmem:[#allocation188_spill] sm:$0xff] %v9073_v24  ;;  %v4688_v17 = vsel %vm4585_vm1, %v1550_v23, -inf  ;;  %v9077_v31 = vperm.slane %v3080_v8, %v8374_v14  ;;  %v1561_v0 = vrot.slane %v14407_v12, 4  ;;  %v14408_v48 = vrot.slane %v7573_v32, 4 }
 0x311   : > { %v3290_v60 = vsel %vm1001_vm0, %v3289_v29, %v9061_v36  ;;  %v3314_v46 = vsel %vm1001_vm0, %v3313_v40, %v9064_v9  ;;  %v14409_v23 = vrot.slane %v8684_v7, 4  ;;  %v14411_v29 = vrot.slane %v8743_v34, 4 }
 0x312   : > { %v1464_v4 = vsel %vm1001_vm0, %v14366_v45, %v14408_v48  ;;  %v3126_v32 = vsel %vm1001_vm0, %v3125_v2, %v9077_v31  ;;  %v3123_v45 = vrot.slane %v9058_v35, 4  ;;  %v14413_v48 = vrot.slane %v8720_v57, 4 }
 0x313   : > { %v1564_v8 = vsel %vm1001_vm0, %v14407_v12, %v14409_v23  ;;  %v1472_v23 = vperm.slane %v1464_v4, %v8333_v3  ;;  %v3296_v59 = vperm.slane %v3290_v60, %v8374_v14  ;;  %v3320_v30 = vperm.slane %v3314_v46, %v8374_v14  ;;  %v9130_v46 = vld [vmem:[%s7395_s10 + $0x88] sm:$0xff] }
 0x314   : > { %v1452_v12 = vsel %vm1001_vm0, %v14375_v43, %v14413_v48  ;;  %v5036_v57 = vsel %vm4585_vm1, %v3126_v32, -inf  ;;  %v9124_v4 = vperm.slane %v1564_v8, %v8333_v3  ;;  %14416 = vst [vmem:[#allocation190_spill] sm:$0xff] %v9130_v46  ;;  %v14417_v32 = vld [vmem:[#allocation75_spill] sm:$0xff] }
 0x315   : > { %4992 = vmax.xlane.f32.xlu1 %v4991_v22  ;;  %4989 = vmax.xlane.f32.xlu0 %v4988_v33  ;;  %v3108_v22 = vperm.slane %v3102_v37, %v8374_v14  ;;  %v1476_v37 = vsel %vm1001_vm0, %v8249_v11, %v1475_v50  ;;  %v9095_v33 = vpop.permute.xlu2 %956  ;;  %v1533_v11 = vrot.slane %v9067_v42, 4  ;;  %v2899_v50 = vrot.slane %v8968_v26, 4 }
 0x316   : > { %14410 = vst [vmem:[#allocation44_spill] sm:$0xff] %v9095_v33  ;;  %v1562_v26 = vsel %vm1001_vm0, %v1561_v0, %v8684_v7  ;;  %v1509_v0 = vrot.slane %v1472_v23, 4  ;;  %v3337_v48 = vrot.slane %v3320_v30, 4 }
 0x317   : > { %4689 = vmax.xlane.f32.xlu2 %v4688_v17  ;;  %v14412_v17 = vld [vmem:[#allocation45_spill] sm:$0xff]  ;;  %v3124_v2 = vsel %vm1001_vm0, %v3108_v22, %v3123_v45  ;;  %v2900_v43 = vsel %vm1001_vm0, %v8919_v15, %v2899_v50  ;;  %v9143_v45 = vpop.permute.xlu1 %966  ;;  %v9146_v63 = vperm.slane %v1562_v26, %v8333_v3  ;;  %v3243_v26 = vrot.slane %v9034_v38, 4 }
 0x318   : > { %v2684_v40 = vsel %vm1001_vm0, %v14412_v17, %v14411_v29  ;;  %v2681_v24 = vrot.slane %v14412_v17, 4  ;;  %v9116_v29 = vperm.slane %v1476_v37, %v8333_v3  ;;  %14414 = vst [vmem:[#allocation45_spill] sm:$0xff] %v9124_v4  ;;  %v1460_v37 = vperm.slane %v1452_v12, %v8333_v3 }
 0x319   : > { %v9127_v60 = vperm.slane %v2684_v40, %v8333_v3  ;;  %v1685_v17 = vrot.slane %v14417_v32, 4  ;;  %v5033_v15 = vsel %vm4585_vm1, %v3124_v2, -inf  ;;  %v4985_v8 = vsel %vm4585_vm1, %v2900_v43, -inf  ;;  %14418 = vst [vmem:[#allocation75_spill] sm:$0xff] %v9143_v45 }
 0x31a   : > { %v1534_v7 = vsel %vm1001_vm0, %v1533_v11, %v9116_v29  ;;  %v3339_v40 = vrot.slane %v3296_v59, 4  ;;  %v2682_v50 = vsel %vm1001_vm0, %v2681_v24, %v8743_v34  ;;  %v1697_v12 = vrot.slane %v8251_v13, 4  ;;  %14419 = vst [vmem:[#allocation191_spill] sm:$0xff] %v9146_v63 }
 0x31b   : > { %14415 = vst [vmem:[#allocation189_spill] sm:$0xff] %v9127_v60  ;;  %v3121_v2 = vrot.slane %v3108_v22, 4  ;;  %v9153_v16 = vperm.slane %v1534_v7, %v8374_v14  ;;  %v1511_v34 = vrot.slane %v1460_v37, 4  ;;  %v3315_v45 = vrot.slane %v9064_v9, 4 }
 0x31c   : > { %v3340_v43 = vsel %vm1001_vm0, %v3320_v30, %v3339_v40  ;;  %v3338_v30 = vsel %vm1001_vm0, %v3337_v48, %v3296_v59  ;;  %v1510_v7 = vsel %vm1001_vm0, %v1509_v0, %v1460_v37  ;;  %v14424_v40 = vld [vmem:[#allocation108_spill] sm:$0xff]  ;;  %v9174_v38 = vperm.slane %v2682_v50, %v8333_v3  ;;  %v14426_v50 = vld [vmem:[#allocation130_spill] sm:$0xff] }
 0x31d   : > { %5037 = vmax.xlane.f32.xlu1 %v5036_v57  ;;  %5034 = vmax.xlane.f32.xlu0 %v5033_v15  ;;  %v3291_v57 = vrot.slane %v9061_v36, 4  ;;  %v9149_v15 = vpop.permute.xlu0 %964  ;;  %v14421_v36 = vld [vmem:[#allocation19_spill] sm:$0xff]  ;;  %v9162_v4 = vpop.permute.xlu2 %962  ;;  %v3122_v9 = vsel %vm1001_vm0, %v3121_v2, %v9058_v35  ;;  %v1553_v59 = vrot.slane %v9153_v16, 4  ;;  %v1512_v0 = vsel %vm1001_vm0, %v1472_v23, %v1511_v34 }
 0x31e   : > { %14420 = vst [vmem:[#allocation192_spill] sm:$0xff] %v9149_v15  ;;  %v1686_v24 = vsel %vm1001_vm0, %v1685_v17, %v14421_v36  ;;  %v1698_v15 = vsel %vm1001_vm0, %v1697_v12, %v14424_v40  ;;  %v5069_v17 = vsel %vm4585_vm1, %v3340_v43, -inf  ;;  %v1535_v48 = vrot.slane %v9116_v29, 4  ;;  %v14427_v34 = vld [vmem:[#allocation63_spill] sm:$0xff] }
 0x31f   : > { %4986 = vmax.xlane.f32.xlu2 %v4985_v8  ;;  %v3292_v22 = vsel %vm1001_vm0, %v9013_v20, %v3291_v57  ;;  %v14422_v8 = vld [vmem:[#allocation183_spill] sm:$0xff]  ;;  %14423 = vst [vmem:[#allocation19_spill] sm:$0xff] %v9162_v4  ;;  %v3316_v20 = vsel %vm1001_vm0, %v9025_v27, %v3315_v45  ;;  %v9177_v57 = vperm.slane %v1686_v24, %v8333_v3  ;;  %v5066_v35 = vsel %vm4585_vm1, %v3338_v30, -inf }
 0x320   : > { %v1709_v11 = vrot.slane %v14422_v8, 4  ;;  %14425 = vst [vmem:[#allocation183_spill] sm:$0xff] %v9174_v38  ;;  %v9181_v37 = vperm.slane %v3292_v22, %v8374_v14  ;;  %v9187_v27 = vperm.slane %v1510_v7, %v8374_v14  ;;  %v9190_v45 = vperm.slane %v1698_v15, %v8333_v3 }
 0x321   : > { %v5030_v2 = vsel %vm4585_vm1, %v3122_v9, -inf  ;;  %v9196_v43 = vperm.slane %v3316_v20, %v8374_v14  ;;  %v3244_v29 = vsel %vm1001_vm0, %v14399_v52, %v3243_v26  ;;  %v3465_v24 = vrot.slane %v14427_v34, 4 }
 0x322   : > { %v1710_v12 = vsel %vm1001_vm0, %v1709_v11, %v14426_v50  ;;  %v1536_v15 = vsel %vm1001_vm0, %v9067_v42, %v1535_v48  ;;  %v1721_v11 = vrot.slane %v9177_v57, 4  ;;  %v1554_v7 = vsel %vm1001_vm0, %v1553_v59, %v9187_v27 }
 0x323   : > { %v1520_v9 = vperm.slane %v1512_v0, %v8374_v14  ;;  %v14428_v52 = vrot.slane %v7633_v44, 4  ;;  %v3279_v20 = vrot.slane %v14400_v18, 4  ;;  %v1716_v42 = vperm.slane %v1710_v12, %v8333_v3 }
 0x324   : > { %v3127_v48 = vrot.slane %v9077_v31, 4  ;;  %v1747_v59 = vrot.slane %v9190_v45, 4  ;;  %v1544_v0 = vperm.slane %v1536_v15, %v8374_v14  ;;  %v4694_v18 = vsel %vm4585_vm1, %v1554_v7, -inf }
 0x325   : > { %5070 = vmax.xlane.f32.xlu1 %v5069_v17  ;;  %5067 = vmax.xlane.f32.xlu0 %v5066_v35  ;;  %v3343_v17 = vrot.slane %v9181_v37, 4  ;;  %v3256_v26 = vsel %vm1001_vm0, %v14394_v19, %v14428_v52  ;;  %v3280_v44 = vsel %vm1001_vm0, %v8951_v10, %v3279_v20  ;;  %v5776_v19 = vlaneseq  ;;  %v9230_v52 = vld [vmem:[%s7395_s10 + $0xb0] sm:$0xff] }
 0x326   : > { %v3128_v12 = vsel %vm1001_vm0, %v9030_v61, %v3127_v48  ;;  %v9227_v31 = vperm.slane %v3244_v29, %v8333_v3  ;;  %v3466_v35 = vsel %vm1001_vm0, %v3465_v24, %v9230_v52  ;;  %v9236_v15 = vperm.slane %v3256_v26, %v8333_v3 }
 0x327   : > { %5031 = vmax.xlane.f32.xlu2 %v5030_v2  ;;  %v3344_v23 = vsel %vm1001_vm0, %v9196_v43, %v3343_v17  ;;  %v14429_v17 = vld [vmem:[#allocation82_spill] sm:$0xff]  ;;  %v1559_v7 = vrot.slane %v1520_v9, 4  ;;  %v1748_v20 = vsel %vm1001_vm0, %v1716_v42, %v1747_v59  ;;  %v1722_v61 = vsel %vm1001_vm0, %v1721_v11, %v8795_v49  ;;  %v14430_v11 = vld [vmem:[#allocation31_spill] sm:$0xff] }
 0x328   : > { %v4594_v22 = vpop.xlane.xlu1 %4593  ;;  %v4591_v30 = vpop.xlane.xlu0 %4590  ;;  %v3477_v60 = vrot.slane %v14429_v17, 4  ;;  %v5075_v10 = vsel %vm4585_vm1, %v3344_v23, -inf  ;;  %v9243_v29 = vperm.slane %v3280_v44, %v8333_v3  ;;  %v3501_v48 = vrot.slane %v8930_v47, 4 }
 0x329   : > { %v5039_v24 = vsel %vm4585_vm1, %v3128_v12, -inf  ;;  %v1557_v4 = vrot.slane %v1544_v0, 4  ;;  %v3267_v26 = vrot.slane %v14403_v6, 4  ;;  %v9248_v56 = vand.u32 127, %v5776_v19 }
 0x32a   : > { %v4588_v2 = vpop.xlane.xlu2 %4587  ;;  %v3341_v59 = vrot.slane %v9196_v43, 4  ;;  %v3478_v44 = vsel %vm1001_vm0, %v3477_v60, %v14430_v11  ;;  %v3301_v54 = vrot.slane %v9236_v15, 4  ;;  %v9258_v12 = vperm.slane %v1748_v20, %v8374_v14 }
 0x32b   : > { %v3268_v6 = vsel %vm1001_vm0, %v8309_v28, %v3267_v26  ;;  %v9265_v19 = vadd.s32 4294967288, %v9248_v56  ;;  %v14432_v43 = vrot.slane %v8795_v49, 4  ;;  %v1558_v20 = vsel %vm1001_vm0, %v1557_v4, %v1520_v9  ;;  %v14435_v26 = vld [vmem:[#allocation176_spill] sm:$0xff] }
 0x32c   : > { %v9276_v28 = vperm.slane %v1722_v61, %v8374_v14  ;;  %v3342_v49 = vsel %vm1001_vm0, %v3341_v59, %v9181_v37  ;;  %v1773_v4 = vrot.slane %v9258_v12, 4  ;;  %v9299_v61 = vperm.slane %v3478_v44, %v8333_v3 }
 0x32d   : > { %4695 = vmax.xlane.f32.xlu1 %v4694_v18  ;;  %5076 = vmax.xlane.f32.xlu0 %v5075_v10  ;;  %v1745_v18 = vrot.slane %v1716_v42, 4  ;;  %v1560_v10 = vsel %vm1001_vm0, %v1544_v0, %v1559_v7  ;;  %v9262_v42 = vmax.f32 %v4588_v2, %v4591_v30  ;;  %v1724_v60 = vsel %vm1001_vm0, %v9177_v57, %v14432_v43 }
 0x32e   : > { %v3502_v0 = vsel %vm1001_vm0, %v3501_v48, %v14433_v21  ;;  %v4703_v2 = vsel %vm4585_vm1, %v1560_v10, -inf  ;;  %v3489_v43 = vrot.slane %v14435_v26, 4  ;;  %v9287_v48 = vperm.slane %v3268_v6, %v8333_v3  ;;  %v14436_v6 = vld [vmem:[#allocation47_spill] sm:$0xff] }
 0x32f   : > { %5040 = vmax.xlane.f32.xlu2 %v5039_v24  ;;  %14431 = vst [vmem:[#allocation108_spill] sm:$0xff] %v9262_v42  ;;  %v3325_v24 = vrot.slane %v9243_v29, 4  ;;  %v1746_v57 = vsel %vm1001_vm0, %v1745_v18, %v9190_v45  ;;  %v6400_v9 = vperm.slane %v9262_v42, %v9248_v56  ;;  %v4700_v45 = vsel %vm4585_vm1, %v1558_v20, -inf }
 0x330   : > { %v9250_v23 = vpop.xlane.xlu1 %4605  ;;  %v4603_v33 = vpop.xlane.xlu0 %4602  ;;  %v5072_v18 = vsel %vm4585_vm1, %v3342_v49, -inf  ;;  %v9303_v59 = vperm.slane %v1724_v60, %v8374_v14  ;;  %v9306_v10 = vperm.slane %v1746_v57, %v8374_v14  ;;  %v3302_v20 = vsel %vm1001_vm0, %v3301_v54, %v9227_v31 }
 0x331   : > { %v3326_v44 = vsel %vm1001_vm0, %v3325_v24, %v9287_v48  ;;  %v9325_v54 = vadd.s32 4294967280, %v9248_v56  ;;  %v1555_v24 = vrot.slane %v9187_v27, 4  ;;  %v3513_v42 = vrot.slane %v9299_v61, 4 }
 0x332   : > { %v4597_v7 = vpop.xlane.xlu2 %4596  ;;  %v1774_v57 = vsel %vm1001_vm0, %v1773_v4, %v9303_v59  ;;  %v3308_v4 = vperm.slane %v3302_v20, %v8374_v14  ;;  %v3332_v25 = vperm.slane %v3326_v44, %v8374_v14  ;;  %v14441_v63 = vrot.slane %v14440_v62, 4  ;;  %v14442_v20 = vld [vmem:[#allocation16_spill] sm:$0xff] }
 0x333   : > { %v9278_v30 = vmax.f32 %v4594_v22, %v4597_v7  ;;  %v9291_v22 = vperm.slane %v3502_v0, %v8333_v3  ;;  %v1771_v0 = vrot.slane %v9276_v28, 4  ;;  %v4736_v58 = vsel %vm4585_vm1, %v1774_v57, -inf }
 0x334   : > { %v1556_v27 = vsel %vm1001_vm0, %v9153_v16, %v1555_v24  ;;  %v9345_v55 = vsel %vm1001_vm0, %v14436_v6, %v14441_v63  ;;  %v3347_v57 = vrot.slane %v3308_v4, 4 }
 0x335   : > { %14434 = vst [vmem:[#allocation130_spill] sm:$0xff] %v9278_v30  ;;  %4704 = vmax.xlane.f32.xlu1 %v4703_v2  ;;  %v6401_v37 = vperm.slane %v9278_v30, %v9265_v19  ;;  %4701 = vmax.xlane.f32.xlu0 %v4700_v45  ;;  %v14437_v45 = vld [vmem:[#allocation72_spill] sm:$0xff]  ;;  %v14438_v30 = vld [vmem:[#allocation121_spill] sm:$0xff]  ;;  %v4697_v63 = vsel %vm4585_vm1, %v1556_v27, -inf }
 0x336   : > { %v1349_v49 = vrot.slane %v14437_v45, 4  ;;  %v3490_v60 = vsel %vm1001_vm0, %v3489_v43, %v14438_v30  ;;  %v1772_v43 = vsel %vm1001_vm0, %v9306_v10, %v1771_v0  ;;  %v3303_v0 = vrot.slane %v9227_v31, 4 }
 0x337   : > { %v6402_v7 = vsel %vm5781_vm2, %v6401_v37, %v6400_v9  ;;  %5073 = vmax.xlane.f32.xlu2 %v5072_v18  ;;  %v9321_v9 = vperm.slane %v3466_v35, %v8333_v3  ;;  %v3537_v37 = vrot.slane %v9291_v22, 4  ;;  %v9334_v35 = vperm.slane %v3490_v60, %v8333_v3 }
 0x338   : > { %v4615_v2 = vpop.xlane.xlu1 %4614  ;;  %v4612_v18 = vpop.xlane.xlu0 %4611  ;;  %v1350_v44 = vsel %vm1001_vm0, %v1349_v49, %v14442_v20  ;;  %v4733_v16 = vsel %vm4585_vm1, %v1772_v43, -inf  ;;  %v3345_v31 = vrot.slane %v3332_v25, 4 }
 0x339   : > { %v3538_v62 = vsel %vm1001_vm0, %v3537_v37, %v9334_v35  ;;  %v3514_v49 = vsel %vm1001_vm0, %v3513_v42, %v9321_v9  ;;  %v9361_v24 = vperm.slane %v1350_v44, %v8333_v3  ;;  %v1769_v37 = vrot.slane %v9306_v10, 4 }
 0x33a   : > { %v4600_v45 = vpop.xlane.xlu2 %4599  ;;  %v3304_v42 = vsel %vm1001_vm0, %v9236_v15, %v3303_v0  ;;  %v9375_v44 = vperm.slane %v3538_v62, %v8374_v14  ;;  %v9381_v10 = vadd.s32 4294967272, %v9248_v56  ;;  %v9388_v15 = vadd.s32 4294967264, %v9248_v56 }
 0x33b   : > { %v9336_v1 = vmax.f32 %v4600_v45, %v4603_v33  ;;  %v14443_v33 = vld [vmem:[#allocation158_spill] sm:$0xff]  ;;  %v3346_v62 = vsel %vm1001_vm0, %v3345_v31, %v3308_v4  ;;  %v14451_v31 = vld [vmem:[#allocation127_spill] sm:$0xff] }
 0x33c   : > { %v1361_v45 = vrot.slane %v14443_v33, 4  ;;  %v14445_v33 = vld [vmem:[#allocation105_spill] sm:$0xff]  ;;  %14446 = vst [vmem:[#allocation82_spill] sm:$0xff] %v9381_v10 }
 0x33d   : > { %14439 = vst [vmem:[#allocation63_spill] sm:$0xff] %v9336_v1  ;;  %4737 = vmax.xlane.f32.xlu1 %v4736_v58  ;;  %v6403_v60 = vperm.slane %v9336_v1, %v9325_v54  ;;  %4734 = vmax.xlane.f32.xlu0 %v4733_v16  ;;  %v3515_v58 = vrot.slane %v9321_v9, 4  ;;  %v14444_v16 = vrot.slane %v14421_v36, 4  ;;  %v3348_v9 = vsel %vm1001_vm0, %v3332_v25, %v3347_v57 }
 0x33e   : > { %v9384_v36 = vperm.slane %v3514_v49, %v8374_v14  ;;  %14448 = vst [vmem:[#allocation31_spill] sm:$0xff] %v9388_v15  ;;  %v9390_v25 = vmax.f32 %v4612_v18, %v4615_v2  ;;  %v1770_v57 = vsel %vm1001_vm0, %v1769_v37, %v9276_v28  ;;  %v3561_v2 = vrot.slane %v9375_v44, 4 }
 0x33f   : > { %v6404_v1 = vsel %vm5785_vm3, %v6403_v60, %v6402_v7  ;;  %4698 = vmax.xlane.f32.xlu2 %v4697_v63  ;;  %v1688_v27 = vsel %vm1001_vm0, %v14417_v32, %v14444_v16  ;;  %v1362_v7 = vsel %vm1001_vm0, %v1361_v45, %v14445_v33  ;;  %v3327_v60 = vrot.slane %v9287_v48, 4  ;;  %v14447_v32 = vld [vmem:[#allocation181_spill] sm:$0xff] }
 0x340   : > { %v9364_v43 = vpop.xlane.xlu1 %4623  ;;  %v4621_v63 = vpop.xlane.xlu0 %4620  ;;  %v1373_v16 = vrot.slane %v14447_v32, 4  ;;  %14449 = vst [vmem:[#allocation150_spill] sm:$0xff] %v9390_v25  ;;  %v5081_v48 = vsel %vm4585_vm1, %v3348_v9, -inf  ;;  %v9402_v33 = vperm.slane %v1362_v7, %v8333_v3  ;;  %v9406_v18 = vperm.slane %v3304_v42, %v8374_v14 }
 0x341   : > { %v3328_v49 = vsel %vm1001_vm0, %v9243_v29, %v3327_v60  ;;  %v5078_v28 = vsel %vm4585_vm1, %v3346_v62, -inf  ;;  %v6407_v37 = vperm.slane %v9390_v25, %v9388_v15  ;;  %v4730_v9 = vsel %vm4585_vm1, %v1770_v57, -inf  ;;  %v14454_v25 = vld [vmem:[#allocation80_spill] sm:$0xff] }
 0x342   : > { %v4609_v0 = vpop.xlane.xlu2 %4608  ;;  %v1374_v29 = vsel %vm1001_vm0, %v1373_v16, %v14451_v31  ;;  %v9418_v42 = vperm.slane %v3328_v49, %v8374_v14  ;;  %v9427_v62 = vperm.slane %v1688_v27, %v8333_v3  ;;  %v3562_v57 = vsel %vm1001_vm0, %v3561_v2, %v9384_v36 }
 0x343   : > { %v9394_v45 = vmax.f32 %v9250_v23, %v4609_v0  ;;  %v3539_v23 = vrot.slane %v9334_v35, 4  ;;  %v1385_v35 = vrot.slane %v9361_v24, 4  ;;  %v3516_v0 = vsel %vm1001_vm0, %v9299_v61, %v3515_v58 }
 0x344   : > { %v3351_v49 = vrot.slane %v9406_v18, 4  ;;  %v9436_v61 = vadd.s32 4294967256, %v9248_v56  ;;  %v1411_v58 = vrot.slane %v9402_v33, 4  ;;  %v3524_v2 = vperm.slane %v3516_v0, %v8374_v14 }
 0x345   : > { %14450 = vst [vmem:[#allocation176_spill] sm:$0xff] %v9394_v45  ;;  %5082 = vmax.xlane.f32.xlu1 %v5081_v48  ;;  %v6405_v4 = vperm.slane %v9394_v45, %v9381_v10  ;;  %5079 = vmax.xlane.f32.xlu0 %v5078_v28  ;;  %v3540_v16 = vsel %vm1001_vm0, %v9291_v22, %v3539_v23  ;;  %v1775_v22 = vrot.slane %v9303_v59, 4  ;;  %v1909_v45 = vrot.slane %v14454_v25, 4 }
 0x346   : > { %14452 = vst [vmem:[#allocation47_spill] sm:$0xff] %v9436_v61  ;;  %v3352_v23 = vsel %vm1001_vm0, %v9418_v42, %v3351_v49  ;;  %v14455_v49 = vld [vmem:[#allocation30_spill] sm:$0xff] }
 0x347   : > { %v6406_v7 = vsel %vm5789_vm4, %v6405_v4, %v6404_v1  ;;  %4731 = vmax.xlane.f32.xlu2 %v4730_v9  ;;  %v1711_v1 = vrot.slane %v14426_v50, 4  ;;  %v1380_v4 = vperm.slane %v1374_v29, %v8333_v3  ;;  %v5114_v9 = vsel %vm4585_vm1, %v3562_v57, -inf }
 0x348   : > { %v4633_v60 = vpop.xlane.xlu1 %4632  ;;  %v6408_v48 = vsel %vm5793_vm5, %v6407_v37, %v6406_v7  ;;  %v4630_v28 = vpop.xlane.xlu0 %4629  ;;  %v3548_v37 = vperm.slane %v3540_v16, %v8374_v14  ;;  %v1776_v59 = vsel %vm1001_vm0, %v9258_v12, %v1775_v22  ;;  %v1733_v7 = vrot.slane %v9427_v62, 4  ;;  %v14456_v16 = vld [vmem:[#allocation131_spill] sm:$0xff] }
 0x349   : > { %v1712_v50 = vsel %vm1001_vm0, %v14422_v8, %v1711_v1  ;;  %v1386_v0 = vsel %vm1001_vm0, %v1385_v35, %v14455_v49  ;;  %v1933_v15 = vrot.slane %v14456_v16, 4  ;;  %v1412_v57 = vsel %vm1001_vm0, %v1380_v4, %v1411_v58 }
 0x34a   : > { %v4618_v27 = vpop.xlane.xlu2 %4617  ;;  %v9461_v12 = vperm.slane %v1712_v50, %v8333_v3  ;;  %v4739_v1 = vsel %vm4585_vm1, %v1776_v59, -inf  ;;  %v3567_v22 = vrot.slane %v3524_v2, 4  ;;  %v1409_v35 = vrot.slane %v1380_v4, 4  ;;  %v14459_v4 = vld [vmem:[#allocation136_spill] sm:$0xff] }
 0x34b   : > { %v9446_v29 = vmax.f32 %v4618_v27, %v4621_v63  ;;  %v5087_v63 = vsel %vm4585_vm1, %v3352_v23, -inf  ;;  %v3565_v27 = vrot.slane %v3548_v37, 4  ;;  %v3349_v23 = vrot.slane %v9418_v42, 4 }
 0x34c   : > { %v3568_v50 = vsel %vm1001_vm0, %v3548_v37, %v3567_v22  ;;  %v9489_v37 = vperm.slane %v1386_v0, %v8374_v14  ;;  %v1410_v0 = vsel %vm1001_vm0, %v1409_v35, %v9402_v33 }
 0x34d   : > { %14453 = vst [vmem:[#allocation121_spill] sm:$0xff] %v9446_v29  ;;  %5115 = vmax.xlane.f32.xlu1 %v5114_v9  ;;  %v6409_v8 = vperm.slane %v9446_v29, %v9436_v61  ;;  %5088 = vmax.xlane.f32.xlu0 %v5087_v63  ;;  %v1699_v9 = vrot.slane %v14424_v40, 4  ;;  %v14457_v29 = vld [vmem:[#allocation13_spill] sm:$0xff]  ;;  %v14458_v63 = vrot.slane %v14455_v49, 4  ;;  %v9477_v40 = vperm.slane %v1412_v57, %v8374_v14 }
 0x34e   : > { %v1910_v58 = vsel %vm1001_vm0, %v1909_v45, %v14457_v29  ;;  %v9486_v45 = vadd.s32 4294967248, %v9248_v56  ;;  %v1757_v49 = vrot.slane %v9461_v12, 4  ;;  %v9495_v57 = vmax.f32 %v4630_v28, %v4633_v60  ;;  %v14464_v60 = vld [vmem:[#allocation161_spill] sm:$0xff] }
 0x34f   : > { %v6410_v32 = vsel %vm5797_vm6, %v6409_v8, %v6408_v48  ;;  %4740 = vmax.xlane.f32.xlu2 %v4739_v1  ;;  %v1388_v59 = vsel %vm1001_vm0, %v9361_v24, %v14458_v63  ;;  %v1700_v48 = vsel %vm1001_vm0, %v8251_v13, %v1699_v9  ;;  %v1934_v8 = vsel %vm1001_vm0, %v1933_v15, %v14459_v4 }
 0x350   : > { %v9466_v31 = vpop.xlane.xlu1 %4641  ;;  %v9483_v42 = vpop.xlane.xlu0 %4638  ;;  %14460 = vst [vmem:[#allocation115_spill] sm:$0xff] %v9486_v45  ;;  %v9493_v24 = vadd.s32 4294967240, %v9248_v56  ;;  %v3566_v13 = vsel %vm1001_vm0, %v3565_v27, %v3524_v2  ;;  %v5123_v22 = vsel %vm4585_vm1, %v3568_v50, -inf  ;;  %v3350_v9 = vsel %vm1001_vm0, %v3349_v23, %v9406_v18 }
 0x351   : > { %14462 = vst [vmem:[#allocation30_spill] sm:$0xff] %v9495_v57  ;;  %v9507_v63 = vperm.slane %v1700_v48, %v8333_v3  ;;  %v1921_v28 = vrot.slane %v14464_v60, 4  ;;  %v1437_v2 = vrot.slane %v9477_v40, 4  ;;  %v5120_v27 = vsel %vm4585_vm1, %v3566_v13, -inf  ;;  %v7094_v48 = vld [vmem:[%s7395_s10 + $0x40] sm:$0xff] }
 0x352   : > { %14461 = vst [vmem:[#allocation80_spill] sm:$0xff] %v9493_v24  ;;  %v4627_v1 = vpop.xlane.xlu2 %4626  ;;  %v6413_v33 = vperm.slane %v9495_v57, %v9493_v24  ;;  %v5084_v35 = vsel %vm4585_vm1, %v3350_v9, -inf  ;;  %v9521_v23 = vperm.slane %v1388_v59, %v8374_v14  ;;  %v9524_v50 = vperm.slane %v1410_v0, %v8374_v14  ;;  %v14466_v59 = vld [vmem:[#allocation100_spill] sm:$0xff] }
 0x353   : > { %v9499_v15 = vmax.f32 %v9364_v43, %v4627_v1  ;;  %v9512_v43 = vperm.slane %v1934_v8, %v8333_v3  ;;  %v14465_v8 = vrot.slane %v14436_v6, 4  ;;  %v1758_v9 = vsel %vm1001_vm0, %v1757_v49, %v9507_v63  ;;  %v14471_v24 = vld [vmem:[#allocation56_spill] sm:$0xff] }
 0x354   : > { %v1922_v57 = vsel %vm1001_vm0, %v1921_v28, %v14466_v59  ;;  %v1438_v6 = vsel %vm1001_vm0, %v1437_v2, %v9521_v23  ;;  %v3563_v28 = vrot.slane %v9384_v36, 4  ;;  %v9565_v61 = vperm.slane %v9345_v55, %v8333_v3 }
 0x355   : > { %14463 = vst [vmem:[#allocation131_spill] sm:$0xff] %v9499_v15  ;;  %5124 = vmax.xlane.f32.xlu1 %v5123_v22  ;;  %v6411_v18 = vperm.slane %v9499_v15, %v9486_v45  ;;  %5121 = vmax.xlane.f32.xlu0 %v5120_v27  ;;  %v1898_v1 = vsel %vm1001_vm0, %v14465_v8, %v7094_v48  ;;  %v1435_v48 = vrot.slane %v9489_v37, 4  ;;  %v1969_v49 = vrot.slane %v9512_v43, 4 }
 0x356   : > { %v1734_v27 = vsel %vm1001_vm0, %v1733_v7, %v8780_v53  ;;  %v1916_v7 = vperm.slane %v1910_v58, %v8333_v3  ;;  %v9557_v58 = vperm.slane %v1922_v57, %v8333_v3  ;;  %v4664_v45 = vsel %vm4585_vm1, %v1438_v6, -inf }
 0x357   : > { %v6412_v22 = vsel %vm5801_vm7, %v6411_v18, %v6410_v32  ;;  %5085 = vmax.xlane.f32.xlu2 %v5084_v35  ;;  %v14468_v32 = vld [vmem:[#allocation34_spill] sm:$0xff]  ;;  %v14470_v35 = vld [vmem:[#allocation49_spill] sm:$0xff]  ;;  %v1436_v2 = vsel %vm1001_vm0, %v9524_v50, %v1435_v48  ;;  %v3564_v36 = vsel %vm1001_vm0, %v9375_v44, %v3563_v28  ;;  %v9569_v48 = vld [vmem:[%s7395_s10 + $0xd8] sm:$0xff] }
 0x358   : > { %v4651_v13 = vpop.xlane.xlu1 %4650  ;;  %v9538_v0 = vsel %vm5805_vm8, %v6413_v33, %v6412_v22  ;;  %v14469_v18 = vrot.slane %v14468_v32, 4  ;;  %v4648_v15 = vpop.xlane.xlu0 %4647  ;;  %v1904_v33 = vperm.slane %v1898_v1, %v8333_v3  ;;  %v1764_v32 = vperm.slane %v1758_v9, %v8374_v14  ;;  %14472 = vst [vmem:[#allocation136_spill] sm:$0xff] %v9569_v48  ;;  %v14477_v48 = vld [vmem:[#allocation169_spill] sm:$0xff] }
 0x359   : > { %14467 = vst [vmem:[#allocation13_spill] sm:$0xff] %v9538_v0  ;;  %v1740_v0 = vperm.slane %v1734_v27, %v8374_v14  ;;  %v1945_v57 = vrot.slane %v1916_v7, 4  ;;  %v4661_v6 = vsel %vm4585_vm1, %v1436_v2, -inf  ;;  %v1970_v44 = vsel %vm1001_vm0, %v1969_v49, %v9557_v58  ;;  %v14476_v49 = vld [vmem:[#allocation79_spill] sm:$0xff] }
 0x35a   : > { %v1788_v8 = vsel %vm1001_vm0, %v14470_v35, %v14469_v18  ;;  %v4636_v22 = vpop.xlane.xlu2 %4635  ;;  %v2905_v18 = vrot.slane %v14471_v24, 4  ;;  %v14473_v24 = vld [vmem:[#allocation89_spill] sm:$0xff]  ;;  %v5117_v55 = vsel %vm4585_vm1, %v3564_v36, -inf  ;;  %v1777_v27 = vrot.slane %v1764_v32, 4 }
 0x35b   : > { %v2917_v20 = vrot.slane %v14473_v24, 4  ;;  %v9577_v28 = vperm.slane %v1788_v8, %v8333_v3  ;;  %v1779_v1 = vrot.slane %v1740_v0, 4  ;;  %v1947_v38 = vrot.slane %v1904_v33, 4 }
 0x35c   : > { %v14475_v9 = vrot.slane %v8780_v53, 4  ;;  %v1433_v8 = vrot.slane %v9524_v50, 4  ;;  %v2929_v36 = vrot.slane %v14477_v48, 4  ;;  %v9593_v59 = vperm.slane %v1970_v44, %v8374_v14 }
 0x35d   : > { %4665 = vmax.xlane.f32.xlu1 %v4664_v45  ;;  %14474 = vst [vmem:[#allocation34_spill] sm:$0xff] %v9577_v28  ;;  %4662 = vmax.xlane.f32.xlu0 %v4661_v6  ;;  %v2906_v45 = vsel %vm1001_vm0, %v2905_v18, %v9130_v46  ;;  %v3141_v6 = vrot.slane %v14476_v49, 4  ;;  %v1780_v60 = vsel %vm1001_vm0, %v1764_v32, %v1779_v1  ;;  %v14478_v18 = vld [vmem:[#allocation17_spill] sm:$0xff]  ;;  %v1759_v46 = vrot.slane %v9507_v63, 4 }
 0x35e   : > { %v1736_v2 = vsel %vm1001_vm0, %v9427_v62, %v14475_v9  ;;  %v2918_v53 = vsel %vm1001_vm0, %v2917_v20, %v14478_v18  ;;  %v9599_v62 = vmax.f32 %v4636_v22, %v9483_v42  ;;  %v1946_v50 = vsel %vm1001_vm0, %v1945_v57, %v1904_v33  ;;  %v14482_v22 = vld [vmem:[#allocation107_spill] sm:$0xff] }
 0x35f   : > { %5118 = vmax.xlane.f32.xlu2 %v5117_v55  ;;  %v2941_v55 = vrot.slane %v8878_v5, 4  ;;  %v9605_v49 = vmax.f32 %v4648_v15, %v4651_v13  ;;  %v1778_v1 = vsel %vm1001_vm0, %v1777_v27, %v1740_v0  ;;  %v9609_v44 = vperm.slane %v1736_v2, %v8374_v14 }
 0x360   : > { %v9586_v24 = vpop.xlane.xlu1 %4977  ;;  %14479 = vst [vmem:[#allocation49_spill] sm:$0xff] %v9599_v62  ;;  %v9601_v9 = vpop.xlane.xlu0 %4974  ;;  %v4745_v42 = vsel %vm4585_vm1, %v1780_v60, -inf  ;;  %v1434_v63 = vsel %vm1001_vm0, %v1433_v8, %v9489_v37  ;;  %v1760_v33 = vsel %vm1001_vm0, %v9461_v12, %v1759_v46  ;;  %v2930_v15 = vsel %vm1001_vm0, %v2929_v36, %v14482_v22  ;;  %v14483_v12 = vld [vmem:[#allocation144_spill] sm:$0xff] }
 0x361   : > { %14480 = vst [vmem:[#allocation17_spill] sm:$0xff] %v9605_v49  ;;  %v9622_v13 = vperm.slane %v1946_v50, %v8374_v14  ;;  %v1993_v0 = vrot.slane %v9593_v59, 4  ;;  %v1971_v27 = vrot.slane %v9557_v58, 4  ;;  %v6415_v60 = vperm.slane %v9599_v62, %v9248_v56  ;;  %v9676_v62 = vld [vmem:[%s7395_s10 + $0x98] sm:$0xff]  ;;  %v14532_v22 = vld [vmem:[#allocation20_spill] sm:$0xff] }
 0x362   : > { %v4645_v32 = vpop.xlane.xlu2 %4644  ;;  %v4742_v46 = vsel %vm4585_vm1, %v1778_v1, -inf  ;;  %v2942_v57 = vsel %vm1001_vm0, %v2941_v55, %v14483_v12  ;;  %v6418_v2 = vperm.slane %v9605_v49, %v9325_v54  ;;  %v4658_v8 = vsel %vm4585_vm1, %v1434_v63, -inf  ;;  %14487 = vst [vmem:[#allocation194_spill] sm:$0xff] %v9676_v62 }
 0x363   : > { %v9612_v20 = vmax.f32 %v9466_v31, %v4645_v32  ;;  %v1948_v31 = vsel %vm1001_vm0, %v1916_v7, %v1947_v38  ;;  %v9638_v38 = vperm.slane %v1760_v33, %v8374_v14  ;;  %v9641_v7 = vperm.slane %v2930_v15, %v8333_v3  ;;  %v14484_v32 = vld [vmem:[#allocation61_spill] sm:$0xff] }
 0x364   : > { %v3165_v58 = vrot.slane %v8853_v39, 4  ;;  %v1972_v55 = vsel %vm1001_vm0, %v9512_v43, %v1971_v27  ;;  %v3129_v1 = vrot.slane %v14484_v32, 4  ;;  %v1783_v63 = vrot.slane %v9609_v44, 4  ;;  %v14485_v15 = vld [vmem:[#allocation29_spill] sm:$0xff] }
 0x365   : > { %14481 = vst [vmem:[#allocation193_spill] sm:$0xff] %v9612_v20  ;;  %4746 = vmax.xlane.f32.xlu1 %v4745_v42  ;;  %v6416_v37 = vperm.slane %v9612_v20, %v9265_v19  ;;  %4743 = vmax.xlane.f32.xlu0 %v4742_v46  ;;  %v1994_v42 = vsel %vm1001_vm0, %v1993_v0, %v9622_v13  ;;  %v1439_v43 = vrot.slane %v9521_v23, 4  ;;  %v14486_v20 = vld [vmem:[#allocation147_spill] sm:$0xff] }
 0x366   : > { %v2948_v46 = vperm.slane %v2942_v57, %v8333_v3  ;;  %v2912_v27 = vperm.slane %v2906_v45, %v8333_v3  ;;  %v1784_v49 = vsel %vm1001_vm0, %v9638_v38, %v1783_v63  ;;  %v4778_v57 = vsel %vm4585_vm1, %v1994_v42, -inf }
 0x367   : > { %v6417_v36 = vsel %vm5781_vm2, %v6416_v37, %v6415_v60  ;;  %4659 = vmax.xlane.f32.xlu2 %v4658_v8  ;;  %v3142_v60 = vsel %vm1001_vm0, %v3141_v6, %v14485_v15  ;;  %v2924_v37 = vperm.slane %v2918_v53, %v8333_v3  ;;  %v2979_v6 = vrot.slane %v9641_v7, 4 }
 0x368   : > { %v9645_v50 = vpop.xlane.xlu1 %5022  ;;  %v9654_v33 = vsel %vm5785_vm3, %v6418_v2, %v6417_v36  ;;  %v9660_v8 = vpop.xlane.xlu0 %5019  ;;  %v1956_v2 = vperm.slane %v1948_v31, %v8374_v14  ;;  %v1980_v36 = vperm.slane %v1972_v55, %v8374_v14  ;;  %v3166_v53 = vsel %vm1001_vm0, %v3165_v58, %v14486_v20  ;;  %v14488_v58 = vld [vmem:[#allocation173_spill] sm:$0xff] }
 0x369   : > { %v1440_v23 = vsel %vm1001_vm0, %v9477_v40, %v1439_v43  ;;  %v3130_v31 = vsel %vm1001_vm0, %v3129_v1, %v9676_v62  ;;  %v9682_v55 = vperm.slane %v3142_v60, %v8333_v3  ;;  %v2953_v39 = vrot.slane %v2924_v37, 4  ;;  %v14489_v62 = vld [vmem:[#allocation118_spill] sm:$0xff] }
 0x36a   : > { %v4972_v0 = vpop.xlane.xlu2 %4971  ;;  %v3153_v20 = vrot.slane %v14488_v58, 4  ;;  %v4751_v42 = vsel %vm4585_vm1, %v1784_v49, -inf  ;;  %v2980_v40 = vsel %vm1001_vm0, %v2948_v46, %v2979_v6  ;;  %v9688_v43 = vperm.slane %v3166_v53, %v8333_v3 }
 0x36b   : > { %v4667_v63 = vsel %vm4585_vm1, %v1440_v23, -inf  ;;  %v1999_v45 = vrot.slane %v1956_v2, 4  ;;  %v1997_v15 = vrot.slane %v1980_v36, 4  ;;  %v2955_v1 = vrot.slane %v2912_v27, 4 }
 0x36c   : > { %v3467_v60 = vrot.slane %v9230_v52, 4  ;;  %v2977_v32 = vrot.slane %v2948_v46, 4  ;;  %v1781_v58 = vrot.slane %v9638_v38, 4  ;;  %v9696_v49 = vperm.slane %v3130_v31, %v8333_v3 }
 0x36d   : > { %4779 = vmax.xlane.f32.xlu1 %v4778_v57  ;;  %4752 = vmax.xlane.f32.xlu0 %v4751_v42  ;;  %v3503_v6 = vrot.slane %v14433_v21, 4  ;;  %v2000_v53 = vsel %vm1001_vm0, %v1980_v36, %v1999_v45  ;;  %v9701_v23 = vperm.slane %v2980_v40, %v8374_v14  ;;  %v3177_v42 = vrot.slane %v9682_v55, 4 }
 0x36e   : > { %v3154_v52 = vsel %vm1001_vm0, %v3153_v20, %v14489_v62  ;;  %v9707_v46 = vmax.f32 %v4972_v0, %v9601_v9  ;;  %v2954_v38 = vsel %vm1001_vm0, %v2953_v39, %v2912_v27  ;;  %v3201_v31 = vrot.slane %v9688_v43, 4  ;;  %v7102_v62 = vld [vmem:[%s7395_s10 + $0xa8] sm:$0xff] }
 0x36f   : > { %4668 = vmax.xlane.f32.xlu2 %v4667_v63  ;;  %v3504_v21 = vsel %vm1001_vm0, %v8930_v47, %v3503_v6  ;;  %v1998_v45 = vsel %vm1001_vm0, %v1997_v15, %v1956_v2  ;;  %v2956_v40 = vsel %vm1001_vm0, %v2924_v37, %v2955_v1  ;;  %v4787_v20 = vsel %vm4585_vm1, %v2000_v53, -inf  ;;  %v7097_v1 = vld [vmem:[%s7395_s10 + $0x38] sm:$0xff] }
 0x370   : > { %v9692_v57 = vpop.xlane.xlu1 %4653  ;;  %14490 = vst [vmem:[#allocation195_spill] sm:$0xff] %v9707_v46  ;;  %v5029_v63 = vpop.xlane.xlu0 %5028  ;;  %v1782_v9 = vsel %vm1001_vm0, %v1781_v58, %v9609_v44  ;;  %v2978_v39 = vsel %vm1001_vm0, %v2977_v32, %v9641_v7  ;;  %v14492_v27 = vrot.slane %v14430_v11, 4  ;;  %v9728_v15 = vperm.slane %v3154_v52, %v8333_v3 }
 0x371   : > { %v9732_v37 = vperm.slane %v2954_v38, %v8374_v14  ;;  %v9735_v44 = vperm.slane %v3504_v21, %v8333_v3  ;;  %v6520_v7 = vperm.slane %v9707_v46, %v9248_v56  ;;  %v3491_v32 = vrot.slane %v14438_v30, 4 }
 0x372   : > { %v4981_v36 = vpop.xlane.xlu2 %4980  ;;  %v3480_v47 = vsel %vm1001_vm0, %v14429_v17, %v14492_v27  ;;  %v4784_v17 = vsel %vm4585_vm1, %v1998_v45, -inf  ;;  %v4748_v0 = vsel %vm4585_vm1, %v1782_v9, -inf  ;;  %v9745_v2 = vperm.slane %v2956_v40, %v8374_v14 }
 0x373   : > { %v9716_v48 = vmax.f32 %v9586_v24, %v4981_v36  ;;  %v3005_v24 = vrot.slane %v9701_v23, 4  ;;  %v9748_v58 = vperm.slane %v2978_v39, %v8374_v14  ;;  %v14493_v6 = vrot.slane %v14470_v35, 4 }
 0x374   : > { %v3178_v30 = vsel %vm1001_vm0, %v3177_v42, %v9696_v49  ;;  %v3202_v21 = vsel %vm1001_vm0, %v3201_v31, %v9728_v15  ;;  %v3488_v36 = vperm.slane %v3480_v47, %v8333_v3  ;;  %v3492_v45 = vsel %vm1001_vm0, %v14435_v26, %v3491_v32 }
 0x375   : > { %14491 = vst [vmem:[#allocation196_spill] sm:$0xff] %v9716_v48  ;;  %4788 = vmax.xlane.f32.xlu1 %v4787_v20  ;;  %v6521_v11 = vperm.slane %v9716_v48, %v9265_v19  ;;  %4785 = vmax.xlane.f32.xlu0 %v4784_v17  ;;  %v1786_v53 = vsel %vm1001_vm0, %v14493_v6, %v7097_v1  ;;  %v3003_v40 = vrot.slane %v9732_v37, 4  ;;  %v3549_v9 = vrot.slane %v9735_v44, 4 }
 0x376   : > { %v3006_v35 = vsel %vm1001_vm0, %v3005_v24, %v9745_v2  ;;  %v3468_v20 = vsel %vm1001_vm0, %v14427_v34, %v3467_v60  ;;  %v9774_v42 = vmax.f32 %v9660_v8, %v9645_v50  ;;  %v1995_v39 = vrot.slane %v9622_v13, 4 }
 0x377   : > { %v9755_v52 = vsel %vm5781_vm2, %v6521_v11, %v6520_v7  ;;  %4749 = vmax.xlane.f32.xlu2 %v4748_v0  ;;  %v9780_v26 = vperm.slane %v1786_v53, %v8333_v3  ;;  %v3004_v47 = vsel %vm1001_vm0, %v9748_v58, %v3003_v40  ;;  %v3184_v24 = vperm.slane %v3178_v30, %v8374_v14  ;;  %v9796_v11 = vld [vmem:[%s7395_s10 + $0xf0] sm:$0xff]  ;;  %v14497_v53 = vld [vmem:[#allocation171_spill] sm:$0xff]  ;;  %v14499_v7 = vld [vmem:[#allocation93_spill] sm:$0xff] }
 0x378   : > { %v9757_v38 = vpop.xlane.xlu1 %4686  ;;  %14494 = vst [vmem:[#allocation197_spill] sm:$0xff] %v9774_v42  ;;  %v9776_v31 = vpop.xlane.xlu0 %4683  ;;  %v3208_v34 = vperm.slane %v3202_v21, %v8374_v14  ;;  %v9787_v60 = vperm.slane %v3492_v45, %v8333_v3  ;;  %v5000_v8 = vsel %vm4585_vm1, %v3006_v35, -inf  ;;  %v1996_v13 = vsel %vm1001_vm0, %v9593_v59, %v1995_v39 }
 0x379   : > { %14496 = vst [vmem:[#allocation199_spill] sm:$0xff] %v9796_v11  ;;  %v3476_v32 = vperm.slane %v3468_v20, %v8333_v3  ;;  %v3525_v0 = vrot.slane %v3488_v36, 4  ;;  %v6535_v1 = vperm.slane %v9774_v42, %v9248_v56  ;;  %v4997_v6 = vsel %vm4585_vm1, %v3004_v47, -inf  ;;  %v14501_v42 = vld [vmem:[#allocation124_spill] sm:$0xff]  ;;  %v14527_v11 = vld [vmem:[#allocation37_spill] sm:$0xff] }
 0x37a   : > { %v5026_v27 = vpop.xlane.xlu2 %5025  ;;  %v3550_v59 = vsel %vm1001_vm0, %v3549_v9, %v9787_v60  ;;  %v3713_v30 = vrot.slane %v14497_v53, 4  ;;  %v4781_v21 = vsel %vm4585_vm1, %v1996_v13, -inf  ;;  %v3227_v45 = vrot.slane %v3184_v24, 4  ;;  %v14498_v9 = vld [vmem:[#allocation54_spill] sm:$0xff] }
 0x37b   : > { %v9789_v50 = vmax.f32 %v5026_v27, %v5029_v63  ;;  %v3225_v35 = vrot.slane %v3208_v34, 4  ;;  %v3179_v20 = vrot.slane %v9696_v49, 4  ;;  %v3001_v47 = vrot.slane %v9748_v58, 4 }
 0x37c   : > { %v3228_v13 = vsel %vm1001_vm0, %v3208_v34, %v3227_v45  ;;  %v9821_v17 = vperm.slane %v3550_v59, %v8374_v14  ;;  %v3527_v40 = vrot.slane %v3476_v32, 4  ;;  %v3714_v58 = vsel %vm1001_vm0, %v3713_v30, %v14501_v42 }
 0x37d   : > { %14495 = vst [vmem:[#allocation198_spill] sm:$0xff] %v9789_v50  ;;  %5001 = vmax.xlane.f32.xlu1 %v5000_v8  ;;  %v6536_v63 = vperm.slane %v9789_v50, %v9265_v19  ;;  %4998 = vmax.xlane.f32.xlu0 %v4997_v6  ;;  %v3689_v8 = vrot.slane %v14498_v9, 4  ;;  %v3701_v6 = vrot.slane %v14499_v7, 4  ;;  %v14500_v50 = vld [vmem:[#allocation77_spill] sm:$0xff]  ;;  %v3725_v48 = vrot.slane %v9010_v41, 4 }
 0x37e   : > { %v1573_v49 = vrot.slane %v14500_v50, 4  ;;  %v3226_v34 = vsel %vm1001_vm0, %v3225_v35, %v3184_v24  ;;  %v3526_v59 = vsel %vm1001_vm0, %v3525_v0, %v3476_v32  ;;  %v5045_v28 = vsel %vm4585_vm1, %v3228_v13, -inf  ;;  %v14504_v0 = vld [vmem:[#allocation148_spill] sm:$0xff] }
 0x37f   : > { %v9812_v39 = vsel %vm5781_vm2, %v6536_v63, %v6535_v1  ;;  %4782 = vmax.xlane.f32.xlu2 %v4781_v21  ;;  %v3203_v1 = vrot.slane %v9728_v15, 4  ;;  %v3180_v21 = vsel %vm1001_vm0, %v9682_v55, %v3179_v20  ;;  %v3002_v15 = vsel %vm1001_vm0, %v3001_v47, %v9732_v37  ;;  %v14503_v20 = vld [vmem:[#allocation35_spill] sm:$0xff] }
 0x380   : > { %v9814_v27 = vpop.xlane.xlu1 %4983  ;;  %v4693_v63 = vpop.xlane.xlu0 %4692  ;;  %v3528_v30 = vsel %vm1001_vm0, %v3488_v36, %v3527_v40  ;;  %v3702_v50 = vsel %vm1001_vm0, %v3701_v6, %v14503_v20  ;;  %v3569_v24 = vrot.slane %v9821_v17, 4  ;;  %v5042_v32 = vsel %vm4585_vm1, %v3226_v34, -inf  ;;  %v14505_v6 = vld [vmem:[#allocation94_spill] sm:$0xff] }
 0x381   : > { %v3204_v55 = vsel %vm1001_vm0, %v9688_v43, %v3203_v1  ;;  %v9852_v43 = vperm.slane %v3526_v59, %v8374_v14  ;;  %v9855_v36 = vperm.slane %v3714_v58, %v8333_v3  ;;  %v4994_v35 = vsel %vm4585_vm1, %v3002_v15, -inf  ;;  %v14506_v15 = vld [vmem:[#allocation12_spill] sm:$0xff] }
 0x382   : > { %v4657_v46 = vpop.xlane.xlu2 %4656  ;;  %v9861_v40 = vperm.slane %v3204_v55, %v8374_v14  ;;  %v1597_v13 = vrot.slane %v14505_v6, 4  ;;  %v3708_v58 = vperm.slane %v3702_v50, %v8333_v3  ;;  %v3007_v50 = vrot.slane %v9745_v2, 4 }
 0x383   : > { %v9833_v45 = vmax.f32 %v9692_v57, %v4657_v46  ;;  %v9845_v57 = vperm.slane %v3180_v21, %v8374_v14  ;;  %v3551_v46 = vrot.slane %v9787_v60, 4  ;;  %v7099_v60 = vld [vmem:[%s7395_s10 + $0xc0] sm:$0xff]  ;;  %v3570_v34 = vsel %vm1001_vm0, %v3569_v24, %v9852_v43 }
 0x384   : > { %v3690_v47 = vsel %vm1001_vm0, %v3689_v8, %v7099_v60  ;;  %v3536_v8 = vperm.slane %v3528_v30, %v8374_v14  ;;  %v3008_v2 = vsel %vm1001_vm0, %v9701_v23, %v3007_v50  ;;  %v14511_v50 = vld [vmem:[#allocation159_spill] sm:$0xff] }
 0x385   : > { %14502 = vst [vmem:[#allocation171_spill] sm:$0xff] %v9833_v45  ;;  %5046 = vmax.xlane.f32.xlu1 %v5045_v28  ;;  %v6420_v37 = vperm.slane %v9833_v45, %v9381_v10  ;;  %v3726_v28 = vsel %vm1001_vm0, %v3725_v48, %v14504_v0  ;;  %5043 = vmax.xlane.f32.xlu0 %v5042_v32  ;;  %v3231_v59 = vrot.slane %v9845_v57, 4 }
 0x386   : > { %v3552_v48 = vsel %vm1001_vm0, %v9735_v44, %v3551_v46  ;;  %v3732_v55 = vperm.slane %v3726_v28, %v8333_v3  ;;  %v3696_v24 = vperm.slane %v3690_v47, %v8333_v3  ;;  %v3763_v46 = vrot.slane %v9855_v36, 4 }
 0x387   : > { %v9868_v1 = vsel %vm5789_vm4, %v6420_v37, %v9654_v33  ;;  %4995 = vmax.xlane.f32.xlu2 %v4994_v35  ;;  %v1574_v33 = vsel %vm1001_vm0, %v1573_v49, %v14506_v15  ;;  %v9884_v37 = vmax.f32 %v9776_v31, %v9757_v38  ;;  %v3232_v30 = vsel %vm1001_vm0, %v9861_v40, %v3231_v59  ;;  %v14508_v35 = vld [vmem:[#allocation133_spill] sm:$0xff]  ;;  %v9902_v31 = vld [vmem:[%s7395_s10 + $0xb8] sm:$0xff] }
 0x388   : > { %v9870_v21 = vpop.xlane.xlu1 %4992  ;;  %v9886_v44 = vpop.xlane.xlu0 %4989  ;;  %v3560_v49 = vperm.slane %v3552_v48, %v8374_v14  ;;  %v1598_v28 = vsel %vm1001_vm0, %v1597_v13, %v14508_v35  ;;  %v5126_v38 = vsel %vm4585_vm1, %v3570_v34, -inf  ;;  %14510 = vst [vmem:[#allocation124_spill] sm:$0xff] %v9902_v31  ;;  %v9906_v45 = vperm.slane %v1574_v33, %v8333_v3  ;;  %v14514_v31 = vld [vmem:[#allocation97_spill] sm:$0xff] }
 0x389   : > { %14507 = vst [vmem:[#allocation54_spill] sm:$0xff] %v9884_v37  ;;  %v3737_v59 = vrot.slane %v3708_v58, 4  ;;  %v3575_v48 = vrot.slane %v3536_v8, 4  ;;  %v6430_v13 = vperm.slane %v9884_v37, %v9248_v56  ;;  %v5051_v34 = vsel %vm4585_vm1, %v3232_v30, -inf }
 0x38a   : > { %v4690_v32 = vpop.xlane.xlu2 %4689  ;;  %v3764_v23 = vsel %vm1001_vm0, %v3732_v55, %v3763_v46  ;;  %v9916_v47 = vperm.slane %v1598_v28, %v8333_v3  ;;  %v5003_v33 = vsel %vm4585_vm1, %v3008_v2, -inf  ;;  %v3739_v6 = vrot.slane %v3696_v24, 4  ;;  %v14512_v46 = vld [vmem:[#allocation50_spill] sm:$0xff] }
 0x38b   : > { %v9896_v60 = vmax.f32 %v4690_v32, %v4693_v63  ;;  %v1585_v32 = vrot.slane %v14511_v50, 4  ;;  %v3761_v35 = vrot.slane %v3732_v55, 4  ;;  %v3229_v30 = vrot.slane %v9861_v40, 4 }
 0x38c   : > { %v2233_v15 = vrot.slane %v14512_v46, 4  ;;  %v1935_v50 = vrot.slane %v14459_v4, 4  ;;  %v3576_v28 = vsel %vm1001_vm0, %v3560_v49, %v3575_v48  ;;  %v14513_v2 = vrot.slane %v8899_v51, 4 }
 0x38d   : > { %14509 = vst [vmem:[#allocation93_spill] sm:$0xff] %v9896_v60  ;;  %5127 = vmax.xlane.f32.xlu1 %v5126_v38  ;;  %v6431_v63 = vperm.slane %v9896_v60, %v9265_v19  ;;  %5052 = vmax.xlane.f32.xlu0 %v5051_v34  ;;  %v3573_v38 = vrot.slane %v3560_v49, 4  ;;  %v9929_v34 = vperm.slane %v3764_v23, %v8374_v14  ;;  %v1633_v49 = vrot.slane %v9916_v47, 4 }
 0x38e   : > { %v2236_v55 = vsel %vm1001_vm0, %v14512_v46, %v14513_v2  ;;  %v3738_v40 = vsel %vm1001_vm0, %v3737_v59, %v3696_v24  ;;  %v1586_v4 = vsel %vm1001_vm0, %v1585_v32, %v14514_v31  ;;  %v1936_v48 = vsel %vm1001_vm0, %v14456_v16, %v1935_v50  ;;  %v14516_v24 = vld [vmem:[#allocation134_spill] sm:$0xff]  ;;  %v14518_v32 = vld [vmem:[#allocation51_spill] sm:$0xff] }
 0x38f   : > { %v9920_v37 = vsel %vm5781_vm2, %v6431_v63, %v6430_v13  ;;  %5004 = vmax.xlane.f32.xlu2 %v5003_v33  ;;  %v1609_v13 = vrot.slane %v9906_v45, 4  ;;  %v3740_v33 = vsel %vm1001_vm0, %v3708_v58, %v3739_v6  ;;  %v3574_v51 = vsel %vm1001_vm0, %v3573_v38, %v3536_v8  ;;  %v14520_v38 = vld [vmem:[#allocation100_spill] sm:$0xff] }
 0x390   : > { %v9922_v60 = vpop.xlane.xlu1 %5037  ;;  %v5035_v63 = vpop.xlane.xlu0 %5034  ;;  %v5135_v2 = vsel %vm4585_vm1, %v3576_v28, -inf  ;;  %v3230_v6 = vsel %vm1001_vm0, %v3229_v30, %v9845_v57  ;;  %v3762_v58 = vsel %vm1001_vm0, %v3761_v35, %v9855_v36  ;;  %v14517_v59 = vrot.slane %v14516_v24, 4 }
 0x391   : > { %v14519_v16 = vrot.slane %v14457_v29, 4  ;;  %v9962_v50 = vperm.slane %v3738_v40, %v8374_v14  ;;  %v9965_v57 = vperm.slane %v1586_v4, %v8333_v3  ;;  %v9968_v36 = vperm.slane %v1936_v48, %v8333_v3 }
 0x392   : > { %v4987_v23 = vpop.xlane.xlu2 %4986  ;;  %v3356_v31 = vsel %vm1001_vm0, %v14518_v32, %v14517_v59  ;;  %v5132_v29 = vsel %vm4585_vm1, %v3574_v51, -inf  ;;  %v1923_v30 = vrot.slane %v14520_v38, 4  ;;  %v9976_v28 = vperm.slane %v3740_v33, %v8374_v14  ;;  %v14521_v51 = vld [vmem:[#allocation191_spill] sm:$0xff] }
 0x393   : > { %v9945_v46 = vmax.f32 %v9814_v27, %v4987_v23  ;;  %v1912_v8 = vsel %vm1001_vm0, %v14454_v25, %v14519_v16  ;;  %v3789_v27 = vrot.slane %v9929_v34, 4  ;;  %v5048_v25 = vsel %vm4585_vm1, %v3230_v6, -inf }
 0x394   : > { %v9979_v40 = vperm.slane %v3762_v58, %v8374_v14  ;;  %v3353_v4 = vrot.slane %v14518_v32, 4  ;;  %v1634_v6 = vsel %vm1001_vm0, %v1633_v49, %v9965_v57  ;;  %v9993_v33 = vperm.slane %v2236_v55, %v8333_v3  ;;  %v14523_v58 = vld [vmem:[#allocation161_spill] sm:$0xff] }
 0x395   : > { %14515 = vst [vmem:[#allocation35_spill] sm:$0xff] %v9945_v46  ;;  %5136 = vmax.xlane.f32.xlu1 %v5135_v2  ;;  %v6523_v35 = vperm.slane %v9945_v46, %v9325_v54  ;;  %5133 = vmax.xlane.f32.xlu0 %v5132_v29  ;;  %v1610_v2 = vsel %vm1001_vm0, %v1609_v13, %v14521_v51  ;;  %v1981_v49 = vrot.slane %v9968_v36, 4  ;;  %v3571_v55 = vrot.slane %v9852_v43, 4  ;;  %v7101_v46 = vld [vmem:[%s7395_s10 + $0x58] sm:$0xff] }
 0x396   : > { %14522 = vst [vmem:[#allocation148_spill] sm:$0xff] %v9993_v33  ;;  %v1924_v24 = vsel %vm1001_vm0, %v14523_v58, %v1923_v30  ;;  %v3790_v59 = vsel %vm1001_vm0, %v3789_v27, %v9976_v28  ;;  %v10001_v32 = vperm.slane %v3356_v31, %v8333_v3  ;;  %v1920_v13 = vperm.slane %v1912_v8, %v8333_v3 }
 0x397   : > { %v9984_v48 = vsel %vm5785_vm3, %v6523_v35, %v9755_v52  ;;  %5049 = vmax.xlane.f32.xlu2 %v5048_v25  ;;  %v3787_v52 = vrot.slane %v9962_v50, 4  ;;  %v14525_v35 = vld [vmem:[#allocation52_spill] sm:$0xff]  ;;  %v1616_v30 = vperm.slane %v1610_v2, %v8374_v14  ;;  %v1640_v31 = vperm.slane %v1634_v6, %v8374_v14 }
 0x398   : > { %v9986_v23 = vpop.xlane.xlu1 %5070  ;;  %14524 = vst [vmem:[#allocation50_spill] sm:$0xff] %v10001_v32  ;;  %v10005_v16 = vpop.xlane.xlu0 %5067  ;;  %v10014_v25 = vperm.slane %v1924_v24, %v8333_v3  ;;  %v5168_v58 = vsel %vm4585_vm1, %v3790_v59, -inf  ;;  %v3572_v43 = vsel %vm1001_vm0, %v9821_v17, %v3571_v55  ;;  %v2234_v29 = vsel %vm1001_vm0, %v2233_v15, %v7101_v46  ;;  %v14529_v24 = vld [vmem:[#allocation70_spill] sm:$0xff]  ;;  %v14530_v46 = vld [vmem:[#allocation165_spill] sm:$0xff] }
 0x399   : > { %v3788_v27 = vsel %vm1001_vm0, %v9979_v40, %v3787_v52  ;;  %v3354_v52 = vsel %vm1001_vm0, %v3353_v4, %v7102_v62  ;;  %v14528_v2 = vrot.slane %v14527_v11, 4  ;;  %v2133_v5 = vrot.slane %v14529_v24, 4  ;;  %v14545_v32 = vld [vmem:[#allocation145_spill] sm:$0xff] }
 0x39a   : > { %v5032_v38 = vpop.xlane.xlu2 %5031  ;;  %v5165_v17 = vsel %vm4585_vm1, %v3788_v27, -inf  ;;  %v1982_v15 = vsel %vm1001_vm0, %v1981_v49, %v10014_v25  ;;  %v2145_v55 = vrot.slane %v14530_v46, 4  ;;  %v5129_v62 = vsel %vm4585_vm1, %v3572_v43, -inf }
 0x39b   : > { %v10016_v8 = vmax.f32 %v5032_v38, %v5035_v63  ;;  %v2124_v6 = vsel %vm1001_vm0, %v14525_v35, %v14528_v2  ;;  %v1957_v63 = vrot.slane %v1920_v13, 4  ;;  %v1659_v11 = vrot.slane %v1616_v30, 4 }
 0x39c   : > { %v1657_v4 = vrot.slane %v1640_v31, 4  ;;  %v10038_v38 = vperm.slane %v2234_v29, %v8333_v3  ;;  %v3785_v49 = vrot.slane %v9979_v40, 4  ;;  %v10050_v43 = vperm.slane %v3354_v52, %v8333_v3  ;;  %v14534_v52 = vld [vmem:[#allocation109_spill] sm:$0xff] }
 0x39d   : > { %14526 = vst [vmem:[#allocation134_spill] sm:$0xff] %v10016_v8  ;;  %5169 = vmax.xlane.f32.xlu1 %v5168_v58  ;;  %v6538_v59 = vperm.slane %v10016_v8, %v9325_v54  ;;  %5166 = vmax.xlane.f32.xlu0 %v5165_v17  ;;  %v10041_v58 = vperm.slane %v2124_v6, %v8333_v3  ;;  %v14533_v40 = vrot.slane %v14521_v51, 4 }
 0x39e   : > { %14531 = vst [vmem:[#allocation51_spill] sm:$0xff] %v10038_v38  ;;  %v1660_v8 = vsel %vm1001_vm0, %v1640_v31, %v1659_v11  ;;  %v10054_v29 = vperm.slane %v1982_v15, %v8374_v14  ;;  %v2146_v33 = vsel %vm1001_vm0, %v2145_v55, %v14534_v52  ;;  %v14535_v31 = vld [vmem:[#allocation185_spill] sm:$0xff]  ;;  %v1658_v12 = vsel %vm1001_vm0, %v1657_v4, %v1616_v30  ;;  %v14538_v30 = vld [vmem:[#allocation90_spill] sm:$0xff] }
 0x39f   : > { %v6539_v2 = vsel %vm5785_vm3, %v6538_v59, %v9812_v39  ;;  %5130 = vmax.xlane.f32.xlu2 %v5129_v62  ;;  %v2134_v39 = vsel %vm1001_vm0, %v2133_v5, %v14532_v22  ;;  %v1635_v59 = vrot.slane %v9965_v57, 4  ;;  %v1612_v17 = vsel %vm1001_vm0, %v9906_v45, %v14533_v40 }
 0x3a0   : > { %v10045_v27 = vpop.xlane.xlu1 %4695  ;;  %v5077_v62 = vpop.xlane.xlu0 %5076  ;;  %v2157_v11 = vrot.slane %v14535_v31, 4  ;;  %v1958_v6 = vsel %vm1001_vm0, %v1957_v63, %v9565_v61  ;;  %v4709_v57 = vsel %vm4585_vm1, %v1660_v8, -inf  ;;  %v3786_v51 = vsel %vm1001_vm0, %v3785_v49, %v9962_v50 }
 0x3a1   : > { %v1636_v45 = vsel %vm1001_vm0, %v9916_v47, %v1635_v59  ;;  %v14537_v55 = vrot.slane %v9565_v61, 4  ;;  %v3365_v4 = vrot.slane %v14538_v30, 4  ;;  %v2001_v63 = vrot.slane %v10054_v29, 4 }
 0x3a2   : > { %v5041_v15 = vpop.xlane.xlu2 %5040  ;;  %v1983_v8 = vrot.slane %v10014_v25, 4  ;;  %v4706_v49 = vsel %vm4585_vm1, %v1658_v12, -inf  ;;  %v10091_v47 = vperm.slane %v1958_v6, %v8374_v14  ;;  %v10094_v61 = vperm.slane %v2146_v33, %v8333_v3  ;;  %v7103_v25 = vld [vmem:[%s7395_s10 + $0x50] sm:$0xff] }
 0x3a3   : > { %v10071_v5 = vmax.f32 %v9922_v60, %v5041_v15  ;;  %v1960_v40 = vsel %vm1001_vm0, %v1920_v13, %v14537_v55  ;;  %v10084_v60 = vperm.slane %v1612_v17, %v8374_v14  ;;  %v14539_v13 = vld [vmem:[#allocation139_spill] sm:$0xff]  ;;  %v5162_v17 = vsel %vm4585_vm1, %v3786_v51, -inf }
 0x3a4   : > { %v2158_v59 = vsel %vm1001_vm0, %v2157_v11, %v14539_v13  ;;  %v10100_v15 = vperm.slane %v1636_v45, %v8374_v14  ;;  %v14541_v55 = vld [vmem:[#allocation103_spill] sm:$0xff]  ;;  %v1984_v11 = vsel %vm1001_vm0, %v9968_v36, %v1983_v8  ;;  %v2140_v51 = vperm.slane %v2134_v39, %v8333_v3 }
 0x3a5   : > { %14536 = vst [vmem:[#allocation100_spill] sm:$0xff] %v10071_v5  ;;  %4710 = vmax.xlane.f32.xlu1 %v4709_v57  ;;  %v6540_v50 = vperm.slane %v10071_v5, %v9381_v10  ;;  %4707 = vmax.xlane.f32.xlu0 %v4706_v49  ;;  %v14540_v57 = vrot.slane %v14525_v35, 4  ;;  %v3389_v6 = vrot.slane %v14541_v55, 4  ;;  %v2002_v45 = vsel %vm1001_vm0, %v2001_v63, %v10091_v47 }
 0x3a6   : > { %v1663_v35 = vrot.slane %v10084_v60, 4  ;;  %v1968_v49 = vperm.slane %v1960_v40, %v8374_v14  ;;  %v3791_v36 = vrot.slane %v9976_v28, 4  ;;  %v2195_v63 = vrot.slane %v10094_v61, 4 }
 0x3a7   : > { %v2122_v12 = vsel %vm1001_vm0, %v14540_v57, %v7103_v25  ;;  %v10108_v5 = vsel %vm5789_vm4, %v6540_v50, %v6539_v2  ;;  %5163 = vmax.xlane.f32.xlu2 %v5162_v17  ;;  %v14543_v25 = vld [vmem:[#allocation32_spill] sm:$0xff]  ;;  %v2164_v2 = vperm.slane %v2158_v59, %v8333_v3  ;;  %v10124_v50 = vmax.f32 %v10005_v16, %v9986_v23 }
 0x3a8   : > { %14542 = vst [vmem:[#allocation191_spill] sm:$0xff] %v10108_v5  ;;  %v10110_v33 = vpop.xlane.xlu1 %4704  ;;  %v3366_v57 = vsel %vm1001_vm0, %v3365_v4, %v14543_v25  ;;  %v10126_v17 = vpop.xlane.xlu0 %4701  ;;  %v2128_v39 = vperm.slane %v2122_v12, %v8333_v3  ;;  %v1664_v40 = vsel %vm1001_vm0, %v10100_v15, %v1663_v35  ;;  %v1992_v4 = vperm.slane %v1984_v11, %v8374_v14 }
 0x3a9   : > { %14544 = vst [vmem:[#allocation161_spill] sm:$0xff] %v10124_v50  ;;  %v3390_v59 = vsel %vm1001_vm0, %v3389_v6, %v14545_v32  ;;  %v4790_v23 = vsel %vm4585_vm1, %v2002_v45, -inf  ;;  %v3792_v28 = vsel %vm1001_vm0, %v9929_v34, %v3791_v36  ;;  %v2169_v12 = vrot.slane %v2140_v51, 4  ;;  %v14565_v32 = vld [vmem:[#allocation64_spill] sm:$0xff] }
 0x3aa   : > { %v5074_v8 = vpop.xlane.xlu2 %5073  ;;  %v10143_v25 = vperm.slane %v3366_v57, %v8333_v3  ;;  %v2007_v35 = vrot.slane %v1968_v49, 4  ;;  %v6550_v11 = vperm.slane %v10124_v50, %v9248_v56  ;;  %v4715_v6 = vsel %vm4585_vm1, %v1664_v40, -inf }
 0x3ab   : > { %v10136_v30 = vmax.f32 %v5074_v8, %v5077_v62  ;;  %v2196_v45 = vsel %vm1001_vm0, %v2164_v2, %v2195_v63  ;;  %v14547_v8 = vld [vmem:[#allocation170_spill] sm:$0xff]  ;;  %v10153_v36 = vperm.slane %v3390_v59, %v8333_v3  ;;  %v5171_v57 = vsel %vm4585_vm1, %v3792_v28, -inf }
 0x3ac   : > { %v3377_v34 = vrot.slane %v14547_v8, 4  ;;  %v2171_v16 = vrot.slane %v2128_v39, 4  ;;  %v2193_v55 = vrot.slane %v2164_v2, 4  ;;  %v1661_v40 = vrot.slane %v10100_v15, 4  ;;  %v14548_v15 = vld [vmem:[#allocation122_spill] sm:$0xff] }
 0x3ad   : > { %14546 = vst [vmem:[#allocation52_spill] sm:$0xff] %v10136_v30  ;;  %4791 = vmax.xlane.f32.xlu1 %v4790_v23  ;;  %v6551_v62 = vperm.slane %v10136_v30, %v9265_v19  ;;  %4716 = vmax.xlane.f32.xlu0 %v4715_v6  ;;  %v2005_v23 = vrot.slane %v1992_v4, 4  ;;  %v3727_v8 = vrot.slane %v14504_v0, 4  ;;  %v2008_v59 = vsel %vm1001_vm0, %v1992_v4, %v2007_v35 }
 0x3ae   : > { %v10166_v6 = vperm.slane %v2196_v45, %v8374_v14  ;;  %v3401_v2 = vrot.slane %v10143_v25, 4  ;;  %v3378_v63 = vsel %vm1001_vm0, %v3377_v34, %v14548_v15  ;;  %v3425_v0 = vrot.slane %v10153_v36, 4 }
 0x3af   : > { %v10157_v50 = vsel %vm5781_vm2, %v6551_v62, %v6550_v11  ;;  %5172 = vmax.xlane.f32.xlu2 %v5171_v57  ;;  %v2172_v62 = vsel %vm1001_vm0, %v2140_v51, %v2171_v16  ;;  %v2170_v57 = vsel %vm1001_vm0, %v2169_v12, %v2128_v39  ;;  %v3728_v4 = vsel %vm1001_vm0, %v9010_v41, %v3727_v8 }
 0x3b0   : > { %v10159_v30 = vpop.xlane.xlu1 %4737  ;;  %v10170_v11 = vpop.xlane.xlu0 %4734  ;;  %v2006_v45 = vsel %vm1001_vm0, %v2005_v23, %v1968_v49  ;;  %v4799_v38 = vsel %vm4585_vm1, %v2008_v59, -inf  ;;  %v1662_v51 = vsel %vm1001_vm0, %v1661_v40, %v10084_v60  ;;  %v2194_v39 = vsel %vm1001_vm0, %v2193_v55, %v10094_v61  ;;  %v14551_v23 = vld [vmem:[#allocation46_spill] sm:$0xff] }
 0x3b1   : > { %v14550_v16 = vrot.slane %v14503_v20, 4  ;;  %v10193_v49 = vperm.slane %v2172_v62, %v8374_v14  ;;  %v10197_v12 = vperm.slane %v2170_v57, %v8374_v14  ;;  %v10200_v60 = vperm.slane %v3378_v63, %v8333_v3  ;;  %v14553_v63 = vld [vmem:[#allocation53_spill] sm:$0xff]  ;;  %v10220_v62 = vld [vmem:[%s7395_s10 + $0xd0] sm:$0xff] }
 0x3b2   : > { %v4699_v35 = vpop.xlane.xlu2 %4698  ;;  %v10203_v61 = vperm.slane %v3728_v4, %v8333_v3  ;;  %v4712_v55 = vsel %vm4585_vm1, %v1662_v51, -inf  ;;  %v10211_v8 = vperm.slane %v2194_v39, %v8374_v14  ;;  %v3402_v34 = vsel %vm1001_vm0, %v3401_v2, %v10050_v43  ;;  %14554 = vst [vmem:[#allocation70_spill] sm:$0xff] %v10220_v62 }
 0x3b3   : > { %v10181_v28 = vmax.f32 %v10045_v27, %v4699_v35  ;;  %v3704_v41 = vsel %vm1001_vm0, %v14499_v7, %v14550_v16  ;;  %v2221_v27 = vrot.slane %v10166_v6, 4  ;;  %v4796_v7 = vsel %vm4585_vm1, %v2006_v45, -inf  ;;  %v14556_v45 = vld [vmem:[#allocation110_spill] sm:$0xff] }
 0x3b4   : > { %v14552_v40 = vrot.slane %v14551_v23, 4  ;;  %v3426_v35 = vsel %vm1001_vm0, %v3425_v0, %v10200_v60  ;;  %v14557_v2 = vrot.slane %v14556_v45, 4  ;;  %v2003_v0 = vrot.slane %v10091_v47, 4 }
 0x3b5   : > { %14549 = vst [vmem:[#allocation37_spill] sm:$0xff] %v10181_v28  ;;  %4800 = vmax.xlane.f32.xlu1 %v4799_v38  ;;  %v6433_v20 = vperm.slane %v10181_v28, %v9325_v54  ;;  %v3715_v38 = vrot.slane %v14501_v42, 4  ;;  %4797 = vmax.xlane.f32.xlu0 %v4796_v7  ;;  %v2222_v16 = vsel %vm1001_vm0, %v2221_v27, %v10193_v49  ;;  %v2219_v7 = vrot.slane %v10197_v12, 4  ;;  %v7105_v28 = vld [vmem:[%s7395_s10 + $0x70] sm:$0xff] }
 0x3b6   : > { %v2572_v59 = vsel %vm1001_vm0, %v14553_v63, %v14552_v40  ;;  %v3692_v51 = vsel %vm1001_vm0, %v14498_v9, %v14557_v2  ;;  %v3408_v23 = vperm.slane %v3402_v34, %v8374_v14  ;;  %v2569_v40 = vrot.slane %v14553_v63, 4  ;;  %v14560_v63 = vld [vmem:[#allocation55_spill] sm:$0xff] }
 0x3b7   : > { %v10225_v42 = vsel %vm5785_vm3, %v6433_v20, %v9920_v37  ;;  %4713 = vmax.xlane.f32.xlu2 %v4712_v55  ;;  %v3716_v39 = vsel %vm1001_vm0, %v14497_v53, %v3715_v38  ;;  %v3712_v37 = vperm.slane %v3704_v41, %v8333_v3  ;;  %v3773_v20 = vrot.slane %v10203_v61, 4 }
 0x3b8   : > { %14555 = vst [vmem:[#allocation165_spill] sm:$0xff] %v10225_v42  ;;  %v5083_v4 = vpop.xlane.xlu1 %5082  ;;  %v5080_v55 = vpop.xlane.xlu0 %5079  ;;  %v2220_v53 = vsel %vm1001_vm0, %v10211_v8, %v2219_v7  ;;  %v3432_v27 = vperm.slane %v3426_v35, %v8374_v14  ;;  %v3700_v38 = vperm.slane %v3692_v51, %v8333_v3  ;;  %v10250_v41 = vperm.slane %v3716_v39, %v8333_v3 }
 0x3b9   : > { %v10243_v9 = vmax.f32 %v5080_v55, %v5083_v4  ;;  %v4832_v2 = vsel %vm4585_vm1, %v2222_v16, -inf  ;;  %v2004_v47 = vsel %vm1001_vm0, %v10054_v29, %v2003_v0  ;;  %v10256_v34 = vperm.slane %v2572_v59, %v8333_v3  ;;  %v14561_v55 = vld [vmem:[#allocation92_spill] sm:$0xff]  ;;  %v14563_v59 = vld [vmem:[#allocation175_spill] sm:$0xff] }
 0x3ba   : > { %v4732_v45 = vpop.xlane.xlu2 %4731  ;;  %v14562_v7 = vrot.slane %v14561_v55, 4  ;;  %v3749_v39 = vrot.slane %v3712_v37, 4  ;;  %v4829_v16 = vsel %vm4585_vm1, %v2220_v53, -inf  ;;  %v3451_v57 = vrot.slane %v3408_v23, 4 }
 0x3bb   : > { %14558 = vst [vmem:[#allocation20_spill] sm:$0xff] %v10243_v9  ;;  %v6553_v51 = vperm.slane %v10243_v9, %v9325_v54  ;;  %v3774_v29 = vsel %vm1001_vm0, %v3773_v20, %v10250_v41  ;;  %v3937_v0 = vrot.slane %v14563_v59, 4  ;;  %v4793_v55 = vsel %vm4585_vm1, %v2004_v47, -inf }
 0x3bc   : > { %14559 = vst [vmem:[#allocation109_spill] sm:$0xff] %v10256_v34  ;;  %v2460_v35 = vsel %vm1001_vm0, %v14560_v63, %v14562_v7  ;;  %v3449_v7 = vrot.slane %v3432_v27, 4  ;;  %v3751_v9 = vrot.slane %v3700_v38, 4  ;;  %v2217_v20 = vrot.slane %v10211_v8, 4 }
 0x3bd   : > { %4833 = vmax.xlane.f32.xlu1 %v4832_v2  ;;  %v10271_v4 = vsel %vm5785_vm3, %v6553_v51, %v10157_v50  ;;  %4830 = vmax.xlane.f32.xlu0 %v4829_v16  ;;  %v2570_v2 = vsel %vm1001_vm0, %v2569_v40, %v7105_v28  ;;  %v10277_v53 = vperm.slane %v2460_v35, %v8333_v3  ;;  %v3913_v59 = vrot.slane %v14565_v32, 4  ;;  %v14566_v50 = vld [vmem:[#allocation98_spill] sm:$0xff] }
 0x3be   : > { %v3925_v51 = vrot.slane %v14566_v50, 4  ;;  %v3452_v16 = vsel %vm1001_vm0, %v3432_v27, %v3451_v57  ;;  %v10286_v47 = vperm.slane %v3774_v29, %v8374_v14  ;;  %v3427_v28 = vrot.slane %v10200_v60, 4  ;;  %v14569_v50 = vld [vmem:[#allocation117_spill] sm:$0xff]  ;;  %v14570_v27 = vld [vmem:[#allocation44_spill] sm:$0xff] }
 0x3bf   : > { %14564 = vst [vmem:[#allocation185_spill] sm:$0xff] %v10277_v53  ;;  %4794 = vmax.xlane.f32.xlu2 %v4793_v55  ;;  %v10290_v40 = vmax.f32 %v4732_v45, %v10170_v11  ;;  %v3750_v55 = vsel %vm1001_vm0, %v3749_v39, %v3700_v38  ;;  %v14568_v5 = vrot.slane %v10050_v43, 4  ;;  %v3752_v32 = vsel %vm1001_vm0, %v3712_v37, %v3751_v9 }
 0x3c0   : > { %v10279_v15 = vpop.xlane.xlu1 %5115  ;;  %v5089_v35 = vpop.xlane.xlu0 %5088  ;;  %v3938_v57 = vsel %vm1001_vm0, %v3937_v0, %v14569_v50  ;;  %v3949_v29 = vrot.slane %v14570_v27, 4  ;;  %v3450_v60 = vsel %vm1001_vm0, %v3449_v7, %v3408_v23  ;;  %v5093_v45 = vsel %vm4585_vm1, %v3452_v16, -inf  ;;  %v14573_v0 = vld [vmem:[#allocation151_spill] sm:$0xff]  ;;  %v10337_v16 = vld [vmem:[%s7395_s10 + $0xc8] sm:$0xff]  ;;  %v14585_v50 = vld [vmem:[#allocation18_spill] sm:$0xff] }
 0x3c1   : > { %14567 = vst [vmem:[#allocation139_spill] sm:$0xff] %v10290_v40  ;;  %v3404_v8 = vsel %vm1001_vm0, %v10143_v25, %v14568_v5  ;;  %v2218_v43 = vsel %vm1001_vm0, %v2217_v20, %v10197_v12  ;;  %v3428_v5 = vsel %vm1001_vm0, %v10153_v36, %v3427_v28  ;;  %v14572_v25 = vld [vmem:[#allocation25_spill] sm:$0xff]  ;;  %v10313_v9 = vperm.slane %v3750_v55, %v8374_v14  ;;  %v14578_v28 = vld [vmem:[#allocation127_spill] sm:$0xff] }
 0x3c2   : > { %v4741_v42 = vpop.xlane.xlu2 %4740  ;;  %v3926_v37 = vsel %vm1001_vm0, %v3925_v51, %v14572_v25  ;;  %v3793_v23 = vrot.slane %v10286_v47, 4  ;;  %v6445_v12 = vperm.slane %v10290_v40, %v9248_v56  ;;  %v5090_v38 = vsel %vm4585_vm1, %v3450_v60, -inf  ;;  %14574 = vst [vmem:[#allocation53_spill] sm:$0xff] %v10337_v16  ;;  %v14581_v40 = vld [vmem:[#allocation68_spill] sm:$0xff]  ;;  %v14588_v25 = vld [vmem:[#allocation137_spill] sm:$0xff] }
 0x3c3   : > { %v10303_v11 = vmax.f32 %v10159_v30, %v4741_v42  ;;  %v10317_v30 = vperm.slane %v3404_v8, %v8374_v14  ;;  %v3775_v42 = vrot.slane %v10250_v41, 4  ;;  %v10326_v39 = vperm.slane %v3938_v57, %v8333_v3 }
 0x3c4   : > { %v3950_v7 = vsel %vm1001_vm0, %v3949_v29, %v14573_v0  ;;  %v4826_v20 = vsel %vm4585_vm1, %v2218_v43, -inf  ;;  %v10332_v51 = vperm.slane %v3428_v5, %v8374_v14  ;;  %v3914_v41 = vsel %vm1001_vm0, %v3913_v59, %v10220_v62  ;;  %v14575_v29 = vld [vmem:[#allocation16_spill] sm:$0xff] }
 0x3c5   : > { %14571 = vst [vmem:[#allocation46_spill] sm:$0xff] %v10303_v11  ;;  %5094 = vmax.xlane.f32.xlu1 %v5093_v45  ;;  %v6446_v36 = vperm.slane %v10303_v11, %v9265_v19  ;;  %5091 = vmax.xlane.f32.xlu0 %v5090_v38  ;;  %v3776_v57 = vsel %vm1001_vm0, %v10203_v61, %v3775_v42  ;;  %v14576_v60 = vrot.slane %v14575_v29, 4  ;;  %v14577_v45 = vld [vmem:[#allocation72_spill] sm:$0xff]  ;;  %v3455_v38 = vrot.slane %v10317_v30, 4 }
 0x3c6   : > { %v3932_v5 = vperm.slane %v3926_v37, %v8333_v3  ;;  %v3794_v59 = vsel %vm1001_vm0, %v3793_v23, %v10313_v9  ;;  %v2223_v11 = vrot.slane %v10193_v49, 4  ;;  %v3760_v61 = vperm.slane %v3752_v32, %v8374_v14 }
 0x3c7   : > { %v10341_v55 = vsel %vm5781_vm2, %v6446_v36, %v6445_v12  ;;  %4827 = vmax.xlane.f32.xlu2 %v4826_v20  ;;  %v1352_v43 = vsel %vm1001_vm0, %v14577_v45, %v14576_v60  ;;  %v1375_v12 = vrot.slane %v14578_v28, 4  ;;  %v3956_v36 = vperm.slane %v3950_v7, %v8333_v3  ;;  %v14579_v45 = vld [vmem:[#allocation181_spill] sm:$0xff] }
 0x3c8   : > { %v5125_v8 = vpop.xlane.xlu1 %5124  ;;  %v5122_v20 = vpop.xlane.xlu0 %5121  ;;  %v10358_v42 = vperm.slane %v2570_v2, %v8333_v3  ;;  %v3987_v29 = vrot.slane %v10326_v39, 4  ;;  %v3456_v23 = vsel %vm1001_vm0, %v10332_v51, %v3455_v38  ;;  %v3784_v60 = vperm.slane %v3776_v57, %v8374_v14 }
 0x3c9   : > { %v1376_v28 = vsel %vm1001_vm0, %v14579_v45, %v1375_v12  ;;  %v5174_v49 = vsel %vm4585_vm1, %v3794_v59, -inf  ;;  %v2224_v32 = vsel %vm1001_vm0, %v10166_v6, %v2223_v11  ;;  %v3920_v2 = vperm.slane %v3914_v41, %v8333_v3  ;;  %v14582_v6 = vld [vmem:[#allocation182_spill] sm:$0xff]  ;;  %v14583_v45 = vld [vmem:[#allocation105_spill] sm:$0xff] }
 0x3ca   : > { %v5086_v37 = vpop.xlane.xlu2 %5085  ;;  %v1797_v16 = vrot.slane %v14581_v40, 4  ;;  %v10374_v62 = vperm.slane %v1352_v43, %v8333_v3  ;;  %v3961_v38 = vrot.slane %v3932_v5, 4  ;;  %v3799_v12 = vrot.slane %v3760_v61, 4 }
 0x3cb   : > { %v10366_v7 = vmax.f32 %v5086_v37, %v5089_v35  ;;  %v5099_v35 = vsel %vm4585_vm1, %v3456_v23, -inf  ;;  %v3988_v59 = vsel %vm1001_vm0, %v3956_v36, %v3987_v29  ;;  %v10381_v37 = vperm.slane %v1376_v28, %v8333_v3 }
 0x3cc   : > { %v1821_v11 = vrot.slane %v14582_v6, 4  ;;  %v4835_v41 = vsel %vm4585_vm1, %v2224_v32, -inf  ;;  %v3797_v43 = vrot.slane %v3784_v60, 4  ;;  %v1363_v40 = vrot.slane %v14583_v45, 4  ;;  %v14586_v45 = vld [vmem:[#allocation158_spill] sm:$0xff] }
 0x3cd   : > { %14580 = vst [vmem:[#allocation110_spill] sm:$0xff] %v10366_v7  ;;  %5175 = vmax.xlane.f32.xlu1 %v5174_v49  ;;  %v6555_v57 = vperm.slane %v10366_v7, %v9381_v10  ;;  %5100 = vmax.xlane.f32.xlu0 %v5099_v35  ;;  %v3985_v49 = vrot.slane %v3956_v36, 4  ;;  %v3453_v29 = vrot.slane %v10332_v51, 4  ;;  %v3963_v28 = vrot.slane %v3920_v2, 4 }
 0x3ce   : > { %v1798_v6 = vsel %vm1001_vm0, %v1797_v16, %v14585_v50  ;;  %v3800_v35 = vsel %vm1001_vm0, %v3784_v60, %v3799_v12  ;;  %v10397_v32 = vperm.slane %v3988_v59, %v8374_v14  ;;  %v1397_v36 = vrot.slane %v10374_v62, 4 }
 0x3cf   : > { %v10388_v7 = vsel %vm5789_vm4, %v6555_v57, %v10271_v4  ;;  %4836 = vmax.xlane.f32.xlu2 %v4835_v41  ;;  %v1364_v4 = vsel %vm1001_vm0, %v14586_v45, %v1363_v40  ;;  %v10402_v57 = vmax.f32 %v5122_v20, %v5125_v8  ;;  %v1421_v51 = vrot.slane %v10381_v37, 4 }
 0x3d0   : > { %14584 = vst [vmem:[#allocation55_spill] sm:$0xff] %v10388_v7  ;;  %v10390_v23 = vpop.xlane.xlu1 %4665  ;;  %v4663_v41 = vpop.xlane.xlu0 %4662  ;;  %v3962_v7 = vsel %vm1001_vm0, %v3961_v38, %v3920_v2  ;;  %v1822_v16 = vsel %vm1001_vm0, %v1821_v11, %v14588_v25  ;;  %v3798_v60 = vsel %vm1001_vm0, %v3797_v43, %v3760_v61  ;;  %v3964_v12 = vsel %vm1001_vm0, %v3932_v5, %v3963_v28  ;;  %v14590_v2 = vld [vmem:[#allocation162_spill] sm:$0xff]  ;;  %v14621_v25 = vld [vmem:[#allocation113_spill] sm:$0xff] }
 0x3d1   : > { %14587 = vst [vmem:[#allocation92_spill] sm:$0xff] %v10402_v57  ;;  %v5183_v40 = vsel %vm4585_vm1, %v3800_v35, -inf  ;;  %v3454_v8 = vsel %vm1001_vm0, %v3453_v29, %v10317_v30  ;;  %v3986_v20 = vsel %vm1001_vm0, %v3985_v49, %v10326_v39  ;;  %v1809_v38 = vrot.slane %v14590_v2, 4  ;;  %v14591_v29 = vld [vmem:[#allocation76_spill] sm:$0xff]  ;;  %v7107_v35 = vld [vmem:[%s7395_s10 + $0x68] sm:$0xff]  ;;  %v14625_v2 = vld [vmem:[#allocation143_spill] sm:$0xff] }
 0x3d2   : > { %v5119_v50 = vpop.xlane.xlu2 %5118  ;;  %v10420_v11 = vperm.slane %v1364_v4, %v8333_v3  ;;  %v4013_v5 = vrot.slane %v10397_v32, 4  ;;  %v6566_v30 = vperm.slane %v10402_v57, %v9265_v19  ;;  %v5180_v61 = vsel %vm4585_vm1, %v3798_v60, -inf }
 0x3d3   : > { %v10411_v59 = vmax.f32 %v10279_v15, %v5119_v50  ;;  %v10424_v15 = vperm.slane %v3962_v7, %v8374_v14  ;;  %v10427_v50 = vperm.slane %v1822_v16, %v8333_v3  ;;  %v5096_v43 = vsel %vm4585_vm1, %v3454_v8, -inf  ;;  %v14593_v8 = vld [vmem:[#allocation106_spill] sm:$0xff] }
 0x3d4   : > { %v10436_v49 = vperm.slane %v3964_v12, %v8374_v14  ;;  %v10439_v7 = vperm.slane %v3986_v20, %v8374_v14  ;;  %v1398_v28 = vsel %vm1001_vm0, %v1397_v36, %v14591_v29  ;;  %v14592_v45 = vrot.slane %v14560_v63, 4 }
 0x3d5   : > { %14589 = vst [vmem:[#allocation44_spill] sm:$0xff] %v10411_v59  ;;  %5184 = vmax.xlane.f32.xlu1 %v5183_v40  ;;  %v6565_v39 = vperm.slane %v10411_v59, %v9248_v56  ;;  %5181 = vmax.xlane.f32.xlu0 %v5180_v61  ;;  %v10448_v16 = vperm.slane %v1798_v6, %v8333_v3  ;;  %v4011_v6 = vrot.slane %v10424_v15, 4  ;;  %v14616_v59 = vld [vmem:[#allocation163_spill] sm:$0xff] }
 0x3d6   : > { %v2458_v4 = vsel %vm1001_vm0, %v14592_v45, %v7107_v35  ;;  %v1422_v40 = vsel %vm1001_vm0, %v1421_v51, %v10420_v11  ;;  %v1810_v20 = vsel %vm1001_vm0, %v1809_v38, %v14593_v8  ;;  %v10459_v36 = vmax.f32 %v9886_v44, %v9870_v21 }
 0x3d7   : > { %v10451_v60 = vsel %vm5781_vm2, %v6566_v30, %v6565_v39  ;;  %5097 = vmax.xlane.f32.xlu2 %v5096_v43  ;;  %v4014_v63 = vsel %vm1001_vm0, %v4013_v5, %v10436_v49  ;;  %v1857_v39 = vrot.slane %v10427_v50, 4  ;;  %v3795_v43 = vrot.slane %v10313_v9, 4 }
 0x3d8   : > { %v4747_v12 = vpop.xlane.xlu1 %4746  ;;  %14594 = vst [vmem:[#allocation151_spill] sm:$0xff] %v10459_v36  ;;  %v4744_v61 = vpop.xlane.xlu0 %4743  ;;  %v1404_v51 = vperm.slane %v1398_v28, %v8374_v14  ;;  %v10469_v38 = vperm.slane %v2458_v4, %v8333_v3  ;;  %v4012_v44 = vsel %vm1001_vm0, %v10439_v7, %v4011_v6  ;;  %v1428_v5 = vperm.slane %v1422_v40, %v8374_v14 }
 0x3d9   : > { %v10471_v35 = vmax.f32 %v4744_v61, %v4747_v12  ;;  %v10477_v45 = vperm.slane %v1810_v20, %v8333_v3  ;;  %v5216_v9 = vsel %vm4585_vm1, %v4014_v63, -inf  ;;  %v3796_v28 = vsel %vm1001_vm0, %v10286_v47, %v3795_v43  ;;  %v14598_v20 = vld [vmem:[#allocation31_spill] sm:$0xff] }
 0x3da   : > { %14595 = vst [vmem:[#allocation16_spill] sm:$0xff] %v10469_v38  ;;  %v4660_v21 = vpop.xlane.xlu2 %4659  ;;  %v1833_v12 = vrot.slane %v10448_v16, 4  ;;  %v6525_v61 = vperm.slane %v10459_v36, %v9381_v10  ;;  %v5213_v6 = vsel %vm4585_vm1, %v4012_v44, -inf  ;;  %v1443_v63 = vrot.slane %v1404_v51, 4  ;;  %v14602_v44 = vld [vmem:[#allocation56_spill] sm:$0xff] }
 0x3db   : > { %14596 = vst [vmem:[#allocation72_spill] sm:$0xff] %v10471_v35  ;;  %v10479_v30 = vmax.f32 %v4660_v21, %v4663_v41  ;;  %v6448_v40 = vperm.slane %v10471_v35, %v9325_v54  ;;  %v1858_v47 = vsel %vm1001_vm0, %v1857_v39, %v10477_v45  ;;  %v5177_v21 = vsel %vm4585_vm1, %v3796_v28, -inf }
 0x3dc   : > { %v1441_v4 = vrot.slane %v1428_v5, 4  ;;  %v2147_v28 = vrot.slane %v14534_v52, 4  ;;  %v1444_v36 = vsel %vm1001_vm0, %v1428_v5, %v1443_v63  ;;  %v1423_v52 = vrot.slane %v10420_v11, 4  ;;  %v14606_v11 = vld [vmem:[#allocation24_spill] sm:$0xff] }
 0x3dd   : > { %14597 = vst [vmem:[#allocation127_spill] sm:$0xff] %v10479_v30  ;;  %5217 = vmax.xlane.f32.xlu1 %v5216_v9  ;;  %v6422_v41 = vperm.slane %v10479_v30, %v14598_v20  ;;  %v10497_v43 = vsel %vm5785_vm3, %v6448_v40, %v10341_v55  ;;  %5214 = vmax.xlane.f32.xlu0 %v5213_v6  ;;  %v4009_v55 = vrot.slane %v10439_v7, 4  ;;  %v14599_v40 = vld [vmem:[#allocation81_spill] sm:$0xff]  ;;  %v14603_v7 = vrot.slane %v14591_v29, 4 }
 0x3de   : > { %v10502_v9 = vsel %vm5789_vm4, %v6525_v61, %v9984_v48  ;;  %v2357_v6 = vrot.slane %v14599_v40, 4  ;;  %v10515_v48 = vperm.slane %v1858_v47, %v8374_v14  ;;  %v14600_v61 = vld [vmem:[#allocation190_spill] sm:$0xff]  ;;  %v14604_v63 = vrot.slane %v14532_v22, 4 }
 0x3df   : > { %v6423_v39 = vsel %vm5793_vm5, %v6422_v41, %v9868_v1  ;;  %5178 = vmax.xlane.f32.xlu2 %v5177_v21  ;;  %v14601_v35 = vrot.slane %v14600_v61, 4  ;;  %v10522_v1 = vld [vmem:[%s7395_s10 + $0xe8] sm:$0xff]  ;;  %v1400_v21 = vsel %vm1001_vm0, %v10374_v62, %v14603_v7  ;;  %v1442_v61 = vsel %vm1001_vm0, %v1441_v4, %v1404_v51 }
 0x3e0   : > { %v10508_v30 = vpop.xlane.xlu1 %4779  ;;  %v4753_v5 = vpop.xlane.xlu0 %4752  ;;  %v2136_v47 = vsel %vm1001_vm0, %v14529_v24, %v14604_v63  ;;  %v1834_v29 = vsel %vm1001_vm0, %v1833_v12, %v9780_v26  ;;  %v4673_v62 = vsel %vm4585_vm1, %v1444_v36, -inf  ;;  %v4010_v22 = vsel %vm1001_vm0, %v4009_v55, %v10424_v15  ;;  %v14607_v36 = vld [vmem:[#allocation47_spill] sm:$0xff] }
 0x3e1   : > { %v2908_v57 = vsel %vm1001_vm0, %v14602_v44, %v14601_v35  ;;  %v2148_v35 = vsel %vm1001_vm0, %v14530_v46, %v2147_v28  ;;  %v1424_v24 = vsel %vm1001_vm0, %v10381_v37, %v1423_v52  ;;  %v2358_v46 = vsel %vm1001_vm0, %v2357_v6, %v14606_v11 }
 0x3e2   : > { %v4669_v44 = vpop.xlane.xlu2 %4668  ;;  %v2159_v28 = vrot.slane %v14539_v13, 4  ;;  %v1881_v51 = vrot.slane %v10515_v48, 4  ;;  %v10552_v4 = vperm.slane %v1400_v21, %v8374_v14  ;;  %v4670_v15 = vsel %vm4585_vm1, %v1442_v61, -inf  ;;  %v14610_v61 = vld [vmem:[#allocation57_spill] sm:$0xff] }
 0x3e3   : > { %v10540_v41 = vmax.f32 %v10390_v23, %v4669_v44  ;;  %v1859_v23 = vrot.slane %v10477_v45, 4  ;;  %v10559_v37 = vperm.slane %v1834_v29, %v8374_v14  ;;  %v10562_v55 = vperm.slane %v2148_v35, %v8333_v3  ;;  %v14608_v45 = vld [vmem:[#allocation26_spill] sm:$0xff] }
 0x3e4   : > { %v2160_v13 = vsel %vm1001_vm0, %v14535_v31, %v2159_v28  ;;  %v5210_v6 = vsel %vm4585_vm1, %v4010_v22, -inf  ;;  %v10568_v7 = vperm.slane %v1424_v24, %v8374_v14  ;;  %v2381_v21 = vrot.slane %v14608_v45, 4  ;;  %v14611_v24 = vld [vmem:[#allocation136_spill] sm:$0xff] }
 0x3e5   : > { %14605 = vst [vmem:[#allocation181_spill] sm:$0xff] %v10540_v41  ;;  %4674 = vmax.xlane.f32.xlu1 %v4673_v62  ;;  %v6424_v12 = vperm.slane %v10540_v41, %v14607_v36  ;;  %4671 = vmax.xlane.f32.xlu0 %v4670_v15  ;;  %v14609_v44 = vrot.slane %v9780_v26, 4  ;;  %v1860_v31 = vsel %vm1001_vm0, %v10427_v50, %v1859_v23  ;;  %v4025_v29 = vrot.slane %v14610_v61, 4  ;;  %v7109_v41 = vld [vmem:[%s7395_s10 + $0xd8] sm:$0xff] }
 0x3e6   : > { %v2144_v62 = vperm.slane %v2136_v47, %v8333_v3  ;;  %v1882_v22 = vsel %vm1001_vm0, %v1881_v51, %v10559_v37  ;;  %v14612_v28 = vrot.slane %v14611_v24, 4  ;;  %v2168_v50 = vperm.slane %v2160_v13, %v8333_v3  ;;  %v14613_v24 = vld [vmem:[#allocation135_spill] sm:$0xff] }
 0x3e7   : > { %v10572_v52 = vsel %vm5797_vm6, %v6424_v12, %v6423_v39  ;;  %5211 = vmax.xlane.f32.xlu2 %v5210_v6  ;;  %v1836_v35 = vsel %vm1001_vm0, %v10448_v16, %v14609_v44  ;;  %v1447_v39 = vrot.slane %v10552_v4, 4  ;;  %v10590_v16 = vperm.slane %v2358_v46, %v8333_v3 }
 0x3e8   : > { %v4789_v63 = vpop.xlane.xlu1 %4788  ;;  %v4028_v26 = vsel %vm1001_vm0, %v14610_v61, %v14612_v28  ;;  %v4786_v23 = vpop.xlane.xlu0 %4785  ;;  %v4015_v12 = vrot.slane %v10436_v49, 4  ;;  %v2207_v47 = vrot.slane %v10562_v55, 4  ;;  %v1844_v6 = vperm.slane %v1836_v35, %v8374_v14 }
 0x3e9   : > { %v1448_v51 = vsel %vm1001_vm0, %v10568_v7, %v1447_v39  ;;  %v1868_v44 = vperm.slane %v1860_v31, %v8374_v14  ;;  %v2382_v61 = vsel %vm1001_vm0, %v2381_v21, %v14613_v24  ;;  %v4754_v13 = vsel %vm4585_vm1, %v1882_v22, -inf }
 0x3ea   : > { %v4750_v15 = vpop.xlane.xlu2 %4749  ;;  %v4016_v49 = vsel %vm1001_vm0, %v10397_v32, %v4015_v12  ;;  %v10607_v28 = vperm.slane %v2908_v57, %v8333_v3  ;;  %v4026_v39 = vsel %vm1001_vm0, %v4025_v29, %v7109_v41  ;;  %v10612_v35 = vperm.slane %v4028_v26, %v8333_v3 }
 0x3eb   : > { %v10601_v46 = vmax.f32 %v4750_v15, %v4753_v5  ;;  %v2181_v31 = vrot.slane %v2144_v62, 4  ;;  %v2369_v21 = vrot.slane %v14616_v59, 4  ;;  %v2208_v5 = vsel %vm1001_vm0, %v2168_v50, %v2207_v47 }
 0x3ec   : > { %14615 = vst [vmem:[#allocation158_spill] sm:$0xff] %v10612_v35  ;;  %v4679_v32 = vsel %vm4585_vm1, %v1448_v51, -inf  ;;  %v10620_v57 = vperm.slane %v2382_v61, %v8333_v3  ;;  %v5219_v41 = vsel %vm4585_vm1, %v4016_v49, -inf  ;;  %v1887_v29 = vrot.slane %v1844_v6, 4  ;;  %v14620_v49 = vld [vmem:[#allocation144_spill] sm:$0xff]  ;;  %v14642_v35 = vld [vmem:[#allocation61_spill] sm:$0xff] }
 0x3ed   : > { %14614 = vst [vmem:[#allocation105_spill] sm:$0xff] %v10601_v46  ;;  %4755 = vmax.xlane.f32.xlu1 %v4754_v13  ;;  %v6450_v22 = vperm.slane %v10601_v46, %v9381_v10  ;;  %4680 = vmax.xlane.f32.xlu0 %v4679_v32  ;;  %v1885_v26 = vrot.slane %v1868_v44, 4  ;;  %v2393_v12 = vrot.slane %v10590_v16, 4  ;;  %v2205_v15 = vrot.slane %v2168_v50, 4  ;;  %v14619_v46 = vld [vmem:[#allocation89_spill] sm:$0xff] }
 0x3ee   : > { %v1445_v51 = vrot.slane %v10568_v7, 4  ;;  %v14618_v61 = vrot.slane %v14478_v18, 4  ;;  %v2943_v38 = vrot.slane %v14620_v49, 4  ;;  %v1888_v34 = vsel %vm1001_vm0, %v1868_v44, %v1887_v29 }
 0x3ef   : > { %v10626_v13 = vsel %vm5789_vm4, %v6450_v22, %v10497_v43  ;;  %5220 = vmax.xlane.f32.xlu2 %v5219_v41  ;;  %v10638_v50 = vperm.slane %v2208_v5, %v8374_v14  ;;  %v2370_v43 = vsel %vm1001_vm0, %v2369_v21, %v14621_v25  ;;  %v10642_v22 = vmax.f32 %v4786_v23, %v4789_v63 }
 0x3f0   : > { %14617 = vst [vmem:[#allocation76_spill] sm:$0xff] %v10626_v13  ;;  %v10628_v47 = vpop.xlane.xlu1 %5001  ;;  %v2920_v32 = vsel %vm1001_vm0, %v14619_v46, %v14618_v61  ;;  %v4999_v41 = vpop.xlane.xlu0 %4998  ;;  %v14623_v7 = vrot.slane %v10041_v58, 4  ;;  %v2182_v46 = vsel %vm1001_vm0, %v2181_v31, %v10041_v58  ;;  %v14624_v61 = vld [vmem:[#allocation107_spill] sm:$0xff]  ;;  %v2944_v44 = vsel %vm1001_vm0, %v14625_v2, %v2943_v38 }
 0x3f1   : > { %14622 = vst [vmem:[#allocation31_spill] sm:$0xff] %v10642_v22  ;;  %v2931_v49 = vrot.slane %v14624_v61, 4  ;;  %v2417_v5 = vrot.slane %v10620_v57, 4  ;;  %v1886_v21 = vsel %vm1001_vm0, %v1885_v26, %v1844_v6  ;;  %v4763_v23 = vsel %vm4585_vm1, %v1888_v34, -inf }
 0x3f2   : > { %v2184_v18 = vsel %vm1001_vm0, %v2144_v62, %v14623_v7  ;;  %v4783_v29 = vpop.xlane.xlu2 %4782  ;;  %v1446_v62 = vsel %vm1001_vm0, %v1445_v51, %v10552_v4  ;;  %v2206_v58 = vsel %vm1001_vm0, %v2205_v15, %v10562_v55  ;;  %v10663_v31 = vperm.slane %v2370_v43, %v8333_v3  ;;  %v14628_v43 = vld [vmem:[#allocation146_spill] sm:$0xff] }
 0x3f3   : > { %v10655_v63 = vmax.f32 %v10508_v30, %v4783_v29  ;;  %v10666_v2 = vperm.slane %v2184_v18, %v8374_v14  ;;  %v2229_v38 = vrot.slane %v10638_v50, 4  ;;  %v10670_v30 = vperm.slane %v2182_v46, %v8374_v14  ;;  %v10692_v46 = vld [vmem:[%s7395_s10 + $0xe0] sm:$0xff] }
 0x3f4   : > { %v10673_v34 = vperm.slane %v2944_v44, %v8333_v3  ;;  %v6461_v4 = vperm.slane %v10642_v22, %v9265_v19  ;;  %v4760_v6 = vsel %vm4585_vm1, %v1886_v21, -inf  ;;  %v10682_v26 = vmax.f32 %v10126_v17, %v10110_v33  ;;  %v14630_v21 = vld [vmem:[#allocation169_spill] sm:$0xff]  ;;  %v14635_v22 = vld [vmem:[#allocation60_spill] sm:$0xff] }
 0x3f5   : > { %14626 = vst [vmem:[#allocation81_spill] sm:$0xff] %v10655_v63  ;;  %4764 = vmax.xlane.f32.xlu1 %v4763_v23  ;;  %v6460_v55 = vperm.slane %v10655_v63, %v9248_v56  ;;  %4761 = vmax.xlane.f32.xlu0 %v4760_v6  ;;  %v4676_v15 = vsel %vm4585_vm1, %v1446_v62, -inf  ;;  %v10686_v51 = vperm.slane %v2206_v58, %v8374_v14  ;;  %v2967_v18 = vrot.slane %v10607_v28, 4 }
 0x3f6   : > { %14627 = vst [vmem:[#allocation190_spill] sm:$0xff] %v10682_v26  ;;  %v2394_v7 = vsel %vm1001_vm0, %v2393_v12, %v14628_v43  ;;  %v2418_v17 = vsel %vm1001_vm0, %v2417_v5, %v10663_v31  ;;  %v10701_v29 = vperm.slane %v4026_v39, %v8333_v3  ;;  %v2932_v12 = vsel %vm1001_vm0, %v14630_v21, %v2931_v49 }
 0x3f7   : > { %v10696_v44 = vsel %vm5781_vm2, %v6461_v4, %v6460_v55  ;;  %4677 = vmax.xlane.f32.xlu2 %v4676_v15  ;;  %v2230_v23 = vsel %vm1001_vm0, %v2229_v38, %v10666_v2  ;;  %v2227_v62 = vrot.slane %v10670_v30, 4  ;;  %v2928_v58 = vperm.slane %v2920_v32, %v8333_v3 }
 0x3f8   : > { %v5047_v33 = vpop.xlane.xlu1 %5046  ;;  %14629 = vst [vmem:[#allocation56_spill] sm:$0xff] %v10701_v29  ;;  %v2989_v4 = vrot.slane %v10673_v34, 4  ;;  %v5044_v55 = vpop.xlane.xlu0 %5043  ;;  %v1883_v6 = vrot.slane %v10559_v37, 4  ;;  %v2400_v5 = vperm.slane %v2394_v7, %v8374_v14  ;;  %v6435_v39 = vperm.slane %v10682_v26, %v9381_v10  ;;  %v14645_v29 = vld [vmem:[#allocation79_spill] sm:$0xff] }
 0x3f9   : > { %v10714_v15 = vmax.f32 %v5044_v55, %v5047_v33  ;;  %v2228_v38 = vsel %vm1001_vm0, %v10686_v51, %v2227_v62  ;;  %v2424_v21 = vperm.slane %v2418_v17, %v8374_v14  ;;  %v10720_v32 = vperm.slane %v2932_v12, %v8333_v3  ;;  %v14633_v33 = vld [vmem:[#allocation199_spill] sm:$0xff]  ;;  %v14636_v12 = vld [vmem:[#allocation165_spill] sm:$0xff] }
 0x3fa   : > { %v4996_v49 = vpop.xlane.xlu2 %4995  ;;  %v4844_v37 = vsel %vm4585_vm1, %v2230_v23, -inf  ;;  %v1884_v7 = vsel %vm1001_vm0, %v10515_v48, %v1883_v6  ;;  %v14634_v55 = vrot.slane %v14633_v33, 4  ;;  %v2965_v62 = vrot.slane %v2928_v58, 4 }
 0x3fb   : > { %14631 = vst [vmem:[#allocation24_spill] sm:$0xff] %v10714_v15  ;;  %v10722_v61 = vmax.f32 %v4996_v49, %v4999_v41  ;;  %v6542_v17 = vperm.slane %v10714_v15, %v14598_v20  ;;  %v10736_v41 = vsel %vm5789_vm4, %v6435_v39, %v14636_v12  ;;  %v4841_v48 = vsel %vm4585_vm1, %v2228_v38, -inf  ;;  %v14637_v49 = vld [vmem:[#allocation191_spill] sm:$0xff]  ;;  %v14640_v39 = vld [vmem:[#allocation194_spill] sm:$0xff] }
 0x3fc   : > { %v4364_v63 = vsel %vm1001_vm0, %v14635_v22, %v14634_v55  ;;  %v2990_v6 = vsel %vm1001_vm0, %v2989_v4, %v10720_v32  ;;  %v2443_v55 = vrot.slane %v2400_v5, 4  ;;  %v2441_v26 = vrot.slane %v2424_v21, 4 }
 0x3fd   : > { %14632 = vst [vmem:[#allocation47_spill] sm:$0xff] %v10722_v61  ;;  %4845 = vmax.xlane.f32.xlu1 %v4844_v37  ;;  %v6527_v23 = vperm.slane %v10722_v61, %v14598_v20  ;;  %v10745_v33 = vsel %vm5793_vm5, %v6542_v17, %v14637_v49  ;;  %4842 = vmax.xlane.f32.xlu0 %v4841_v48  ;;  %v4757_v37 = vsel %vm4585_vm1, %v1884_v7, -inf  ;;  %v4361_v12 = vrot.slane %v14635_v22, 4  ;;  %v14639_v48 = vld [vmem:[#allocation118_spill] sm:$0xff] }
 0x3fe   : > { %v2225_v4 = vrot.slane %v10686_v51, 4  ;;  %v10756_v17 = vperm.slane %v4364_v63, %v8333_v3  ;;  %v3155_v49 = vrot.slane %v14639_v48, 4  ;;  %v2444_v7 = vsel %vm1001_vm0, %v2424_v21, %v2443_v55  ;;  %v14647_v55 = vld [vmem:[#allocation173_spill] sm:$0xff] }
 0x3ff   : > { %v6528_v15 = vsel %vm5793_vm5, %v6527_v23, %v10502_v9  ;;  %4758 = vmax.xlane.f32.xlu2 %v4757_v37  ;;  %v10761_v61 = vperm.slane %v2990_v6, %v8374_v14  ;;  %v14641_v22 = vrot.slane %v14640_v39, 4  ;;  %v14643_v23 = vld [vmem:[#allocation29_spill] sm:$0xff]  ;;  %v2419_v63 = vrot.slane %v10663_v31, 4 }
 0x400   : > { %v10752_v38 = vpop.xlane.xlu1 %5127  ;;  %14638 = vst [vmem:[#allocation26_spill] sm:$0xff] %v10756_v17  ;;  %v14644_v37 = vrot.slane %v14643_v23, 4  ;;  %v5053_v8 = vpop.xlane.xlu0 %5052  ;;  %v14646_v48 = vrot.slane %v14628_v43, 4  ;;  %v2968_v6 = vsel %vm1001_vm0, %v2928_v58, %v2967_v18  ;;  %v3156_v39 = vsel %vm1001_vm0, %v14647_v55, %v3155_v49  ;;  %v14649_v18 = vld [vmem:[#allocation95_spill] sm:$0xff] }
 0x401   : > { %v3132_v9 = vsel %vm1001_vm0, %v14642_v35, %v14641_v22  ;;  %v2442_v35 = vsel %vm1001_vm0, %v2441_v26, %v2400_v5  ;;  %v2966_v22 = vsel %vm1001_vm0, %v2965_v62, %v10607_v28  ;;  %v4877_v31 = vsel %vm4585_vm1, %v2444_v7, -inf  ;;  %v14650_v49 = vld [vmem:[#allocation147_spill] sm:$0xff]  ;;  %v14651_v62 = vld [vmem:[#allocation48_spill] sm:$0xff] }
 0x402   : > { %v3144_v51 = vsel %vm1001_vm0, %v14645_v29, %v14644_v37  ;;  %v2396_v21 = vsel %vm1001_vm0, %v10590_v16, %v14646_v48  ;;  %v5005_v10 = vpop.xlane.xlu2 %5004  ;;  %v2226_v43 = vsel %vm1001_vm0, %v2225_v4, %v10670_v30  ;;  %v2420_v16 = vsel %vm1001_vm0, %v10620_v57, %v2419_v63  ;;  %v14652_v48 = vld [vmem:[#allocation59_spill] sm:$0xff] }
 0x403   : > { %v10783_v29 = vmax.f32 %v10628_v47, %v5005_v10  ;;  %v3589_v58 = vrot.slane %v14649_v18, 4  ;;  %v3167_v23 = vrot.slane %v14650_v49, 4  ;;  %v3009_v26 = vrot.slane %v10761_v61, 4  ;;  %v14656_v49 = vld [vmem:[#allocation22_spill] sm:$0xff] }
 0x404   : > { %v10794_v28 = vperm.slane %v2396_v21, %v8374_v14  ;;  %v2991_v10 = vrot.slane %v10720_v32, 4  ;;  %v4874_v30 = vsel %vm4585_vm1, %v2442_v35, -inf  ;;  %v10801_v5 = vperm.slane %v2966_v22, %v8374_v14  ;;  %v7111_v32 = vld [vmem:[%s7395_s10 + $0xf0] sm:$0xff] }
 0x405   : > { %14648 = vst [vmem:[#allocation57_spill] sm:$0xff] %v10783_v29  ;;  %4878 = vmax.xlane.f32.xlu1 %v4877_v31  ;;  %v6529_v47 = vperm.slane %v10783_v29, %v14607_v36  ;;  %v10804_v57 = vperm.slane %v3156_v39, %v8333_v3  ;;  %v3168_v4 = vsel %vm1001_vm0, %v14651_v62, %v3167_v23  ;;  %v4838_v7 = vsel %vm4585_vm1, %v2226_v43, -inf  ;;  %v14655_v22 = vld [vmem:[#allocation62_spill] sm:$0xff] }
 0x406   : > { %4875 = vmax.xlane.f32.xlu0 %v4874_v30  ;;  %v10810_v37 = vperm.slane %v2420_v16, %v8374_v14  ;;  %v10814_v63 = vsel %vm1001_vm0, %v4361_v12, %v7111_v32  ;;  %v3613_v21 = vrot.slane %v14652_v48, 4  ;;  %v2992_v35 = vsel %vm1001_vm0, %v10673_v34, %v2991_v10  ;;  %v10851_v48 = vld [vmem:[%s7395_s10 + $0xf8] sm:$0xff] }
 0x407   : > { %v10818_v55 = vsel %vm5797_vm6, %v6529_v47, %v6528_v15  ;;  %4839 = vmax.xlane.f32.xlu2 %v4838_v7  ;;  %v3577_v31 = vrot.slane %v14655_v22, 4  ;;  %v3152_v43 = vperm.slane %v3144_v51, %v8333_v3  ;;  %v3010_v16 = vsel %vm1001_vm0, %v3009_v26, %v10801_v5 }
 0x408   : > { %14653 = vst [vmem:[#allocation136_spill] sm:$0xff] %v10818_v55  ;;  %v10820_v39 = vpop.xlane.xlu1 %5136  ;;  %v2447_v12 = vrot.slane %v10794_v28, 4  ;;  %v3590_v15 = vsel %vm1001_vm0, %v3589_v58, %v14656_v49  ;;  %v3176_v23 = vperm.slane %v3168_v4, %v8333_v3  ;;  %v10832_v47 = vpop.xlane.xlu0 %5133  ;;  %v2231_v34 = vrot.slane %v10666_v2, 4  ;;  %v14658_v58 = vld [vmem:[#allocation149_spill] sm:$0xff] }
 0x409   : > { %14654 = vst [vmem:[#allocation135_spill] sm:$0xff] %v10820_v39  ;;  %v2976_v10 = vperm.slane %v2968_v6, %v8374_v14  ;;  %v3140_v51 = vperm.slane %v3132_v9, %v8333_v3  ;;  %v3215_v30 = vrot.slane %v10804_v57, 4  ;;  %v3000_v7 = vperm.slane %v2992_v35, %v8374_v14  ;;  %v7112_v6 = vld [vmem:[%s7395_s10 + $0xb8] sm:$0xff] }
 0x40a   : > { %14657 = vst [vmem:[#allocation163_spill] sm:$0xff] %v10832_v47  ;;  %v5050_v26 = vpop.xlane.xlu2 %5049  ;;  %v2448_v62 = vsel %vm1001_vm0, %v10810_v37, %v2447_v12  ;;  %v3614_v32 = vsel %vm1001_vm0, %v3613_v21, %v14658_v58  ;;  %v5006_v29 = vsel %vm4585_vm1, %v3010_v16, -inf  ;;  %v2232_v2 = vsel %vm1001_vm0, %v10638_v50, %v2231_v34  ;;  %v14660_v34 = vld [vmem:[#allocation172_spill] sm:$0xff]  ;;  %v14686_v47 = vld [vmem:[#allocation125_spill] sm:$0xff] }
 0x40b   : > { %v10843_v4 = vmax.f32 %v5050_v26, %v5053_v8  ;;  %v3578_v9 = vsel %vm1001_vm0, %v3577_v31, %v7112_v6  ;;  %v3189_v12 = vrot.slane %v3152_v43, 4  ;;  %v10855_v35 = vperm.slane %v3590_v15, %v8333_v3 }
 0x40c   : > { %v3216_v8 = vsel %vm1001_vm0, %v3176_v23, %v3215_v30  ;;  %v4883_v16 = vsel %vm4585_vm1, %v2448_v62, -inf  ;;  %v3015_v50 = vrot.slane %v2976_v10, 4  ;;  %v3601_v26 = vrot.slane %v14660_v34, 4 }
 0x40d   : > { %14659 = vst [vmem:[#allocation89_spill] sm:$0xff] %v10843_v4  ;;  %5007 = vmax.xlane.f32.xlu1 %v5006_v29  ;;  %v6544_v21 = vperm.slane %v10843_v4, %v14607_v36  ;;  %v10863_v31 = vperm.slane %v3614_v32, %v8333_v3  ;;  %v4847_v6 = vsel %vm4585_vm1, %v2232_v2, -inf  ;;  %v3013_v55 = vrot.slane %v3000_v7, 4  ;;  %v14662_v4 = vld [vmem:[#allocation124_spill] sm:$0xff] }
 0x40e   : > { %4884 = vmax.xlane.f32.xlu0 %v4883_v16  ;;  %v3191_v15 = vrot.slane %v3140_v51, 4  ;;  %v3213_v58 = vrot.slane %v3176_v23, 4  ;;  %v2445_v62 = vrot.slane %v10810_v37, 4  ;;  %v14663_v34 = vrot.slane %v14662_v4, 4 }
 0x40f   : > { %v10868_v29 = vsel %vm5797_vm6, %v6544_v21, %v10745_v33  ;;  %4848 = vmax.xlane.f32.xlu2 %v4847_v6  ;;  %v3951_v16 = vrot.slane %v14573_v0, 4  ;;  %v3016_v2 = vsel %vm1001_vm0, %v3000_v7, %v3015_v50  ;;  %v10880_v23 = vperm.slane %v3216_v8, %v8374_v14 }
 0x410   : > { %14661 = vst [vmem:[#allocation144_spill] sm:$0xff] %v10868_v29  ;;  %v10870_v30 = vpop.xlane.xlu1 %5169  ;;  %v3580_v32 = vsel %vm1001_vm0, %v14655_v22, %v14663_v34  ;;  %v10883_v33 = vperm.slane %v3578_v9, %v8333_v3  ;;  %v3625_v21 = vrot.slane %v10855_v35, 4  ;;  %v10886_v6 = vpop.xlane.xlu0 %5166  ;;  %v3192_v37 = vsel %vm1001_vm0, %v3152_v43, %v3191_v15  ;;  %v14664_v29 = vld [vmem:[#allocation114_spill] sm:$0xff] }
 0x411   : > { %v3190_v4 = vsel %vm1001_vm0, %v3189_v12, %v3140_v51  ;;  %v3602_v22 = vsel %vm1001_vm0, %v3601_v26, %v14664_v29  ;;  %v3649_v0 = vrot.slane %v10863_v31, 4  ;;  %v3952_v7 = vsel %vm1001_vm0, %v14570_v27, %v3951_v16  ;;  %v14666_v12 = vld [vmem:[#allocation25_spill] sm:$0xff]  ;;  %v14668_v15 = vld [vmem:[#allocation98_spill] sm:$0xff] }
 0x412   : > { %v5131_v8 = vpop.xlane.xlu2 %5130  ;;  %v3014_v9 = vsel %vm1001_vm0, %v3013_v55, %v2976_v10  ;;  %v5015_v34 = vsel %vm4585_vm1, %v3016_v2, -inf  ;;  %v2446_v43 = vsel %vm1001_vm0, %v2445_v62, %v10794_v28  ;;  %v3214_v51 = vsel %vm1001_vm0, %v3213_v58, %v10804_v57  ;;  %v14669_v27 = vld [vmem:[#allocation117_spill] sm:$0xff] }
 0x413   : > { %v10897_v50 = vmax.f32 %v10752_v38, %v5131_v8  ;;  %v14667_v26 = vrot.slane %v14666_v12, 4  ;;  %v3939_v16 = vrot.slane %v14669_v27, 4  ;;  %v3237_v55 = vrot.slane %v10880_v23, 4  ;;  %v14675_v12 = vld [vmem:[#allocation64_spill] sm:$0xff] }
 0x414   : > { %v10911_v38 = vperm.slane %v3190_v4, %v8374_v14  ;;  %v10914_v10 = vperm.slane %v3602_v22, %v8333_v3  ;;  %v10917_v28 = vperm.slane %v3952_v7, %v8333_v3  ;;  %v5012_v58 = vsel %vm4585_vm1, %v3014_v9, -inf }
 0x415   : > { %14665 = vst [vmem:[#allocation113_spill] sm:$0xff] %v10897_v50  ;;  %v3928_v29 = vsel %vm1001_vm0, %v14668_v15, %v14667_v26  ;;  %5016 = vmax.xlane.f32.xlu1 %v5015_v34  ;;  %v6568_v57 = vperm.slane %v10897_v50, %v9325_v54  ;;  %v4880_v62 = vsel %vm4585_vm1, %v2446_v43, -inf  ;;  %v10924_v2 = vperm.slane %v3192_v37, %v8374_v14  ;;  %v14673_v43 = vld [vmem:[#allocation70_spill] sm:$0xff]  ;;  %v14676_v26 = vld [vmem:[#allocation175_spill] sm:$0xff] }
 0x416   : > { %5013 = vmax.xlane.f32.xlu0 %v5012_v58  ;;  %v10927_v4 = vperm.slane %v3214_v51, %v8374_v14  ;;  %v3626_v22 = vsel %vm1001_vm0, %v3625_v21, %v10883_v33  ;;  %v10933_v7 = vperm.slane %v10814_v63, %v8333_v3  ;;  %v10936_v8 = vperm.slane %v3580_v32, %v8333_v3 }
 0x417   : > { %v10940_v9 = vsel %vm5785_vm3, %v6568_v57, %v10451_v60  ;;  %4881 = vmax.xlane.f32.xlu2 %v4880_v62  ;;  %v3650_v34 = vsel %vm1001_vm0, %v3649_v0, %v10914_v10  ;;  %v14674_v51 = vrot.slane %v14673_v43, 4  ;;  %v3940_v63 = vsel %vm1001_vm0, %v14676_v26, %v3939_v16 }
 0x418   : > { %14670 = vst [vmem:[#allocation107_spill] sm:$0xff] %v10933_v7  ;;  %v4711_v37 = vpop.xlane.xlu1 %4710  ;;  %v3238_v32 = vsel %vm1001_vm0, %v3237_v55, %v10924_v2  ;;  %v3235_v15 = vrot.slane %v10911_v38, 4  ;;  %v3936_v60 = vperm.slane %v3928_v29, %v8333_v3  ;;  %v3997_v27 = vrot.slane %v10917_v28, 4  ;;  %v4708_v57 = vpop.xlane.xlu0 %4707 }
 0x419   : > { %14671 = vst [vmem:[#allocation143_spill] sm:$0xff] %v10936_v8  ;;  %v3916_v21 = vsel %vm1001_vm0, %v14675_v12, %v14674_v51  ;;  %v3011_v0 = vrot.slane %v10801_v5, 4  ;;  %v3632_v58 = vperm.slane %v3626_v22, %v8374_v14  ;;  %v10958_v43 = vmax.f32 %v4708_v57, %v4711_v37  ;;  %v14678_v57 = vld [vmem:[#allocation88_spill] sm:$0xff]  ;;  %v14681_v8 = vld [vmem:[#allocation53_spill] sm:$0xff] }
 0x41a   : > { %14672 = vst [vmem:[#allocation146_spill] sm:$0xff] %v10940_v9  ;;  %v5164_v51 = vpop.xlane.xlu2 %5163  ;;  %v3236_v16 = vsel %vm1001_vm0, %v10927_v4, %v3235_v15  ;;  %v3656_v55 = vperm.slane %v3650_v34, %v8374_v14  ;;  %v3948_v29 = vperm.slane %v3940_v63, %v8333_v3  ;;  %v5060_v26 = vsel %vm4585_vm1, %v3238_v32, -inf  ;;  %v14679_v32 = vld [vmem:[#allocation180_spill] sm:$0xff] }
 0x41b   : > { %14677 = vst [vmem:[#allocation169_spill] sm:$0xff] %v10958_v43  ;;  %v3012_v5 = vsel %vm1001_vm0, %v10761_v61, %v3011_v0  ;;  %v3924_v37 = vperm.slane %v3916_v21, %v8333_v3  ;;  %v4149_v62 = vrot.slane %v14678_v57, 4  ;;  %v6437_v15 = vperm.slane %v10958_v43, %v14598_v20  ;;  %v14680_v43 = vld [vmem:[#allocation66_spill] sm:$0xff] }
 0x41c   : > { %v3973_v34 = vrot.slane %v3936_v60, 4  ;;  %v5057_v12 = vsel %vm4585_vm1, %v3236_v16, -inf  ;;  %v3675_v50 = vrot.slane %v3632_v58, 4  ;;  %v3998_v63 = vsel %vm1001_vm0, %v3997_v27, %v3948_v29 }
 0x41d   : > { %5061 = vmax.xlane.f32.xlu1 %v5060_v26  ;;  %v4161_v17 = vrot.slane %v14679_v32, 4  ;;  %v10978_v61 = vsel %vm5793_vm5, %v6437_v15, %v10736_v41  ;;  %v5009_v21 = vsel %vm4585_vm1, %v3012_v5, -inf  ;;  %v3673_v0 = vrot.slane %v3656_v55, 4  ;;  %v14683_v15 = vld [vmem:[#allocation69_spill] sm:$0xff]  ;;  %v14704_v32 = vld [vmem:[#allocation132_spill] sm:$0xff] }
 0x41e   : > { %5058 = vmax.xlane.f32.xlu0 %v5057_v12  ;;  %v3627_v22 = vrot.slane %v10883_v33, 4  ;;  %v3801_v26 = vrot.slane %v14680_v43, 4  ;;  %v14682_v18 = vrot.slane %v14681_v8, 4  ;;  %v3233_v49 = vrot.slane %v10927_v4, 4  ;;  %v14685_v4 = vld [vmem:[#allocation36_spill] sm:$0xff] }
 0x41f   : > { %5010 = vmax.xlane.f32.xlu2 %v5009_v21  ;;  %v3975_v41 = vrot.slane %v3924_v37, 4  ;;  %v4137_v12 = vrot.slane %v14683_v15, 4  ;;  %v3676_v5 = vsel %vm1001_vm0, %v3656_v55, %v3675_v50  ;;  %v10993_v7 = vperm.slane %v3998_v63, %v8374_v14  ;;  %v14687_v55 = vld [vmem:[#allocation187_spill] sm:$0xff] }
 0x420   : > { %v3804_v16 = vsel %vm1001_vm0, %v14680_v43, %v14682_v18  ;;  %v10987_v27 = vpop.xlane.xlu1 %4791  ;;  %v3651_v33 = vrot.slane %v10914_v10, 4  ;;  %v10997_v9 = vmax.f32 %v5164_v51, %v10886_v6  ;;  %v4717_v13 = vpop.xlane.xlu0 %4716  ;;  %v3974_v18 = vsel %vm1001_vm0, %v3973_v34, %v3924_v37 }
 0x421   : > { %v3628_v43 = vsel %vm1001_vm0, %v10855_v35, %v3627_v22  ;;  %v4150_v21 = vsel %vm1001_vm0, %v4149_v62, %v14685_v4  ;;  %v4162_v50 = vsel %vm1001_vm0, %v4161_v17, %v14686_v47  ;;  %v4173_v63 = vrot.slane %v14687_v55, 4 }
 0x422   : > { %14684 = vst [vmem:[#allocation199_spill] sm:$0xff] %v10997_v9  ;;  %v5173_v39 = vpop.xlane.xlu2 %5172  ;;  %v3674_v10 = vsel %vm1001_vm0, %v3673_v0, %v3632_v58  ;;  %v5141_v51 = vsel %vm4585_vm1, %v3676_v5, -inf  ;;  %v3234_v37 = vsel %vm1001_vm0, %v3233_v49, %v10911_v38  ;;  %v3652_v35 = vsel %vm1001_vm0, %v10863_v31, %v3651_v33 }
 0x423   : > { %v11009_v6 = vmax.f32 %v10870_v30, %v5173_v39  ;;  %v3976_v62 = vsel %vm1001_vm0, %v3936_v60, %v3975_v41  ;;  %v11018_v17 = vperm.slane %v3974_v18, %v8374_v14  ;;  %v4017_v22 = vrot.slane %v10993_v7, 4  ;;  %v14689_v60 = vld [vmem:[#allocation155_spill] sm:$0xff] }
 0x424   : > { %v11022_v58 = vperm.slane %v3628_v43, %v8374_v14  ;;  %v3999_v39 = vrot.slane %v3948_v29, 4  ;;  %v6580_v30 = vperm.slane %v10997_v9, %v9248_v56  ;;  %v5138_v31 = vsel %vm4585_vm1, %v3674_v10, -inf  ;;  %v14693_v10 = vld [vmem:[#allocation77_spill] sm:$0xff] }
 0x425   : > { %14688 = vst [vmem:[#allocation60_spill] sm:$0xff] %v11009_v6  ;;  %5142 = vmax.xlane.f32.xlu1 %v5141_v51  ;;  %v6581_v49 = vperm.slane %v11009_v6, %v9265_v19  ;;  %v11030_v38 = vperm.slane %v4162_v50, %v8333_v3  ;;  %v4174_v34 = vsel %vm1001_vm0, %v4173_v63, %v14689_v60  ;;  %v5054_v0 = vsel %vm4585_vm1, %v3234_v37, -inf  ;;  %v14691_v50 = vld [vmem:[#allocation12_spill] sm:$0xff]  ;;  %v14701_v9 = vld [vmem:[#allocation97_spill] sm:$0xff] }
 0x426   : > { %5139 = vmax.xlane.f32.xlu0 %v5138_v31  ;;  %v11036_v41 = vperm.slane %v3652_v35, %v8374_v14  ;;  %v3802_v29 = vsel %vm1001_vm0, %v3801_v26, %v14681_v8  ;;  %v4138_v5 = vsel %vm1001_vm0, %v4137_v12, %v10692_v46  ;;  %v4000_v43 = vsel %vm1001_vm0, %v10917_v28, %v3999_v39  ;;  %v14694_v12 = vld [vmem:[#allocation133_spill] sm:$0xff] }
 0x427   : > { %v11043_v33 = vsel %vm5781_vm2, %v6581_v49, %v6580_v30  ;;  %5055 = vmax.xlane.f32.xlu2 %v5054_v0  ;;  %v14692_v63 = vrot.slane %v14691_v50, 4  ;;  %v4156_v37 = vperm.slane %v4150_v21, %v8333_v3  ;;  %v4018_v8 = vsel %vm1001_vm0, %v4017_v22, %v11018_v17 }
 0x428   : > { %v11045_v18 = vpop.xlane.xlu1 %4800  ;;  %v3679_v26 = vrot.slane %v11022_v58, 4  ;;  %v1599_v35 = vrot.slane %v14694_v12, 4  ;;  %v4180_v30 = vperm.slane %v4174_v34, %v8333_v3  ;;  %v11059_v49 = vpop.xlane.xlu0 %4797  ;;  %v3239_v28 = vrot.slane %v10924_v2, 4 }
 0x429   : > { %14690 = vst [vmem:[#allocation165_spill] sm:$0xff] %v11045_v18  ;;  %v1576_v51 = vsel %vm1001_vm0, %v14693_v10, %v14692_v63  ;;  %v3984_v39 = vperm.slane %v3976_v62, %v8374_v14  ;;  %v4144_v31 = vperm.slane %v4138_v5, %v8333_v3  ;;  %v4211_v0 = vrot.slane %v11030_v38, 4  ;;  %v14696_v63 = vld [vmem:[#allocation94_spill] sm:$0xff] }
 0x42a   : > { %14695 = vst [vmem:[#allocation191_spill] sm:$0xff] %v11059_v49  ;;  %v4714_v21 = vpop.xlane.xlu2 %4713  ;;  %v3680_v22 = vsel %vm1001_vm0, %v11036_v41, %v3679_v26  ;;  %v4008_v50 = vperm.slane %v4000_v43, %v8374_v14  ;;  %v1600_v10 = vsel %vm1001_vm0, %v14696_v63, %v1599_v35  ;;  %v5222_v12 = vsel %vm4585_vm1, %v4018_v8, -inf }
 0x42b   : > { %v11070_v34 = vmax.f32 %v4714_v21, %v4717_v13  ;;  %v3240_v2 = vsel %vm1001_vm0, %v10880_v23, %v3239_v28  ;;  %v11076_v62 = vperm.slane %v3802_v29, %v8333_v3  ;;  %v11079_v5 = vperm.slane %v3804_v16, %v8333_v3  ;;  %v14698_v29 = vld [vmem:[#allocation186_spill] sm:$0xff] }
 0x42c   : > { %v11082_v26 = vperm.slane %v1576_v51, %v8333_v3  ;;  %v4185_v43 = vrot.slane %v4156_v37, 4  ;;  %v5147_v35 = vsel %vm4585_vm1, %v3680_v22, -inf  ;;  %v4023_v8 = vrot.slane %v3984_v39, 4 }
 0x42d   : > { %14697 = vst [vmem:[#allocation118_spill] sm:$0xff] %v11070_v34  ;;  %5223 = vmax.xlane.f32.xlu1 %v5222_v12  ;;  %v6439_v13 = vperm.slane %v11070_v34, %v14607_v36  ;;  %v4212_v21 = vsel %vm1001_vm0, %v4180_v30, %v4211_v0  ;;  %v11089_v23 = vperm.slane %v1600_v10, %v8333_v3  ;;  %v2045_v28 = vrot.slane %v14698_v29, 4  ;;  %v14700_v34 = vld [vmem:[#allocation67_spill] sm:$0xff]  ;;  %v14702_v29 = vld [vmem:[#allocation78_spill] sm:$0xff] }
 0x42e   : > { %5148 = vmax.xlane.f32.xlu0 %v5147_v35  ;;  %v5063_v16 = vsel %vm4585_vm1, %v3240_v2, -inf  ;;  %v4021_v51 = vrot.slane %v4008_v50, 4  ;;  %v4187_v63 = vrot.slane %v4144_v31, 4  ;;  %v4209_v6 = vrot.slane %v4180_v30, 4 }
 0x42f   : > { %v11095_v12 = vsel %vm5797_vm6, %v6439_v13, %v10978_v61  ;;  %5064 = vmax.xlane.f32.xlu2 %v5063_v16  ;;  %v3677_v0 = vrot.slane %v11036_v41, 4  ;;  %v4249_v10 = vrot.slane %v14700_v34, 4  ;;  %v1587_v49 = vrot.slane %v14701_v9, 4  ;;  %v14703_v41 = vld [vmem:[#allocation159_spill] sm:$0xff] }
 0x430   : > { %14699 = vst [vmem:[#allocation194_spill] sm:$0xff] %v11095_v12  ;;  %v11097_v22 = vpop.xlane.xlu1 %4833  ;;  %v4024_v35 = vsel %vm1001_vm0, %v4008_v50, %v4023_v8  ;;  %v11104_v2 = vperm.slane %v4212_v21, %v8374_v14  ;;  %v1621_v30 = vrot.slane %v11082_v26, 4  ;;  %v2021_v18 = vrot.slane %v14702_v29, 4  ;;  %v11108_v61 = vpop.xlane.xlu0 %4830 }
 0x431   : > { %v4188_v13 = vsel %vm1001_vm0, %v4156_v37, %v4187_v63  ;;  %v4186_v16 = vsel %vm1001_vm0, %v4185_v43, %v4144_v31  ;;  %v1588_v12 = vsel %vm1001_vm0, %v14703_v41, %v1587_v49  ;;  %v1645_v9 = vrot.slane %v11089_v23, 4 }
 0x432   : > { %v2046_v50 = vsel %vm1001_vm0, %v2045_v28, %v14704_v32  ;;  %v4795_v8 = vpop.xlane.xlu2 %4794  ;;  %v4022_v21 = vsel %vm1001_vm0, %v4021_v51, %v3984_v39  ;;  %v5231_v55 = vsel %vm4585_vm1, %v4024_v35, -inf  ;;  %v3678_v37 = vsel %vm1001_vm0, %v3677_v0, %v11022_v58  ;;  %v14707_v28 = vld [vmem:[#allocation160_spill] sm:$0xff] }
 0x433   : > { %v11119_v47 = vmax.f32 %v10987_v27, %v4795_v8  ;;  %v4210_v31 = vsel %vm1001_vm0, %v4209_v6, %v11030_v38  ;;  %v14706_v49 = vrot.slane %v10522_v1, 4  ;;  %v2033_v63 = vrot.slane %v14707_v28, 4 }
 0x434   : > { %v4237_v39 = vrot.slane %v11104_v2, 4  ;;  %v11133_v27 = vperm.slane %v4186_v16, %v8374_v14  ;;  %v11136_v51 = vperm.slane %v1588_v12, %v8333_v3  ;;  %v11139_v58 = vperm.slane %v2046_v50, %v8333_v3  ;;  %v14709_v16 = vld [vmem:[#allocation18_spill] sm:$0xff]  ;;  %v14711_v50 = vld [vmem:[#allocation68_spill] sm:$0xff] }
 0x435   : > { %14705 = vst [vmem:[#allocation61_spill] sm:$0xff] %v11119_v47  ;;  %v4252_v43 = vsel %vm1001_vm0, %v14700_v34, %v14706_v49  ;;  %5232 = vmax.xlane.f32.xlu1 %v5231_v55  ;;  %v6463_v6 = vperm.slane %v11119_v47, %v9325_v54  ;;  %v5228_v38 = vsel %vm4585_vm1, %v4022_v21, -inf  ;;  %v14708_v34 = vld [vmem:[#allocation21_spill] sm:$0xff]  ;;  %v5144_v55 = vsel %vm4585_vm1, %v3678_v37, -inf }
 0x436   : > { %v2022_v0 = vsel %vm1001_vm0, %v2021_v18, %v14708_v34  ;;  %5229 = vmax.xlane.f32.xlu0 %v5228_v38  ;;  %v11148_v35 = vperm.slane %v4188_v13, %v8374_v14  ;;  %v11151_v12 = vperm.slane %v4210_v31, %v8374_v14  ;;  %v14710_v41 = vrot.slane %v14709_v16, 4  ;;  %v14713_v49 = vld [vmem:[#allocation45_spill] sm:$0xff]  ;;  %v14715_v38 = vld [vmem:[#allocation111_spill] sm:$0xff] }
 0x437   : > { %v11159_v21 = vsel %vm5785_vm3, %v6463_v6, %v10696_v44  ;;  %5145 = vmax.xlane.f32.xlu2 %v5144_v55  ;;  %v1622_v37 = vsel %vm1001_vm0, %v1621_v30, %v14713_v49  ;;  %v1646_v13 = vsel %vm1001_vm0, %v1645_v9, %v11136_v51  ;;  %v11166_v31 = vperm.slane %v4252_v43, %v8333_v3 }
 0x438   : > { %v1800_v8 = vsel %vm1001_vm0, %v14711_v50, %v14710_v41  ;;  %14712 = vst [vmem:[#allocation29_spill] sm:$0xff] %v11159_v21  ;;  %v5095_v18 = vpop.xlane.xlu1 %5094  ;;  %v2034_v16 = vsel %vm1001_vm0, %v2033_v63, %v14715_v38  ;;  %v4238_v41 = vsel %vm1001_vm0, %v4237_v39, %v11148_v35  ;;  %v4235_v44 = vrot.slane %v11133_v27, 4  ;;  %v5092_v50 = vpop.xlane.xlu0 %5091 }
 0x439   : > { %14714 = vst [vmem:[#allocation79_spill] sm:$0xff] %v11166_v31  ;;  %v14716_v6 = vrot.slane %v10692_v46, 4  ;;  %v2028_v30 = vperm.slane %v2022_v0, %v8333_v3  ;;  %v2081_v9 = vrot.slane %v11139_v58, 4  ;;  %v4019_v43 = vrot.slane %v11018_v17, 4 }
 0x43a   : > { %v11180_v47 = vmax.f32 %v5092_v50, %v5095_v18  ;;  %v4828_v63 = vpop.xlane.xlu2 %4827  ;;  %v4236_v39 = vsel %vm1001_vm0, %v11151_v12, %v4235_v44  ;;  %v1628_v28 = vperm.slane %v1622_v37, %v8374_v14  ;;  %v1652_v46 = vperm.slane %v1646_v13, %v8374_v14  ;;  %v14723_v18 = vld [vmem:[#allocation119_spill] sm:$0xff] }
 0x43b   : > { %v4140_v55 = vsel %vm1001_vm0, %v14683_v15, %v14716_v6  ;;  %v11187_v32 = vperm.slane %v1800_v8, %v8333_v3  ;;  %v2040_v15 = vperm.slane %v2034_v16, %v8333_v3  ;;  %v5264_v0 = vsel %vm4585_vm1, %v4238_v41, -inf }
 0x43c   : > { %14717 = vst [vmem:[#allocation173_spill] sm:$0xff] %v11180_v47  ;;  %v4020_v17 = vsel %vm1001_vm0, %v10993_v7, %v4019_v43  ;;  %v4250_v44 = vsel %vm1001_vm0, %v4249_v10, %v10522_v1  ;;  %v6557_v37 = vperm.slane %v11180_v47, %v14598_v20  ;;  %v11200_v8 = vperm.slane %v4140_v55, %v8333_v3  ;;  %v14718_v7 = vld [vmem:[#allocation55_spill] sm:$0xff] }
 0x43d   : > { %5265 = vmax.xlane.f32.xlu1 %v5264_v0  ;;  %v2057_v13 = vrot.slane %v2028_v30, 4  ;;  %v5261_v16 = vsel %vm4585_vm1, %v4236_v39, -inf  ;;  %v2082_v41 = vsel %vm1001_vm0, %v2081_v9, %v2040_v15  ;;  %v5225_v43 = vsel %vm4585_vm1, %v4020_v17, -inf }
 0x43e   : > { %v11206_v50 = vsel %vm5793_vm5, %v6557_v37, %v14718_v7  ;;  %5262 = vmax.xlane.f32.xlu0 %v5261_v16  ;;  %v1667_v1 = vrot.slane %v1628_v28, 4  ;;  %v1665_v10 = vrot.slane %v1652_v46, 4  ;;  %v11210_v6 = vperm.slane %v4250_v44, %v8333_v3 }
 0x43f   : > { %5226 = vmax.xlane.f32.xlu2 %v5225_v43  ;;  %v4233_v9 = vrot.slane %v11151_v12, 4  ;;  %v14720_v37 = vrot.slane %v14713_v49, 4  ;;  %v2371_v17 = vrot.slane %v14621_v25, 4  ;;  %v11224_v44 = vperm.slane %v2082_v41, %v8374_v14  ;;  %v14724_v25 = vld [vmem:[#allocation86_spill] sm:$0xff] }
 0x440   : > { %14719 = vst [vmem:[#allocation147_spill] sm:$0xff] %v11210_v6  ;;  %v11214_v39 = vpop.xlane.xlu1 %5175  ;;  %v1668_v7 = vsel %vm1001_vm0, %v1652_v46, %v1667_v1  ;;  %v14721_v55 = vrot.slane %v14606_v11, 4  ;;  %v1647_v0 = vrot.slane %v11136_v51, 4  ;;  %v11232_v12 = vmax.f32 %v4828_v63, %v11108_v61  ;;  %v5101_v49 = vpop.xlane.xlu0 %5100 }
 0x441   : > { %v1624_v16 = vsel %vm1001_vm0, %v11082_v26, %v14720_v37  ;;  %v2058_v26 = vsel %vm1001_vm0, %v2057_v13, %v14723_v18  ;;  %v2581_v37 = vrot.slane %v14724_v25, 4  ;;  %v2383_v46 = vrot.slane %v14613_v24, 4 }
 0x442   : > { %v2360_v43 = vsel %vm1001_vm0, %v14599_v40, %v14721_v55  ;;  %14722 = vst [vmem:[#allocation48_spill] sm:$0xff] %v11232_v12  ;;  %v2372_v41 = vsel %vm1001_vm0, %v14616_v59, %v2371_v17  ;;  %v4837_v11 = vpop.xlane.xlu2 %4836  ;;  %v1666_v1 = vsel %vm1001_vm0, %v1665_v10, %v1628_v28  ;;  %v4721_v61 = vsel %vm4585_vm1, %v1668_v7, -inf }
 0x443   : > { %v11242_v40 = vmax.f32 %v11097_v22, %v4837_v11  ;;  %v4234_v51 = vsel %vm1001_vm0, %v4233_v9, %v11133_v27  ;;  %v1648_v63 = vsel %vm1001_vm0, %v11089_v23, %v1647_v0  ;;  %v11250_v24 = vperm.slane %v2058_v26, %v8374_v14 }
 0x444   : > { %v2105_v59 = vrot.slane %v11224_v44, 4  ;;  %v11254_v13 = vperm.slane %v1624_v16, %v8374_v14  ;;  %v14726_v22 = vrot.slane %v14723_v18, 4  ;;  %v2083_v10 = vrot.slane %v2040_v15, 4  ;;  %v14727_v16 = vld [vmem:[#allocation87_spill] sm:$0xff]  ;;  %v14733_v15 = vld [vmem:[#allocation141_spill] sm:$0xff] }
 0x445   : > { %14725 = vst [vmem:[#allocation62_spill] sm:$0xff] %v11242_v40  ;;  %4722 = vmax.xlane.f32.xlu1 %v4721_v61  ;;  %v6475_v27 = vperm.slane %v11232_v12, %v9248_v56  ;;  %v6476_v23 = vperm.slane %v11242_v40, %v9265_v19  ;;  %v4718_v55 = vsel %vm4585_vm1, %v1666_v1, -inf  ;;  %v11265_v0 = vperm.slane %v2372_v41, %v8333_v3  ;;  %v14738_v40 = vld [vmem:[#allocation145_spill] sm:$0xff] }
 0x446   : > { %v2060_v28 = vsel %vm1001_vm0, %v2028_v30, %v14726_v22  ;;  %v2384_v9 = vsel %vm1001_vm0, %v14608_v45, %v2383_v46  ;;  %4719 = vmax.xlane.f32.xlu0 %v4718_v55  ;;  %v5258_v18 = vsel %vm4585_vm1, %v4234_v51, -inf  ;;  %v11271_v30 = vperm.slane %v1648_v63, %v8374_v14  ;;  %v14730_v46 = vld [vmem:[#allocation71_spill] sm:$0xff] }
 0x447   : > { %v2605_v17 = vrot.slane %v14727_v16, 4  ;;  %v11276_v7 = vsel %vm5781_vm2, %v6476_v23, %v6475_v27  ;;  %5259 = vmax.xlane.f32.xlu2 %v5258_v18  ;;  %v2084_v41 = vsel %vm1001_vm0, %v11139_v58, %v2083_v10  ;;  %v14729_v45 = vrot.slane %v10851_v48, 4  ;;  %v14731_v63 = vld [vmem:[#allocation15_spill] sm:$0xff] }
 0x448   : > { %v11278_v26 = vpop.xlane.xlu1 %5184  ;;  %v2368_v1 = vperm.slane %v2360_v43, %v8333_v3  ;;  %v2106_v61 = vsel %vm1001_vm0, %v2105_v59, %v11250_v24  ;;  %v1671_v51 = vrot.slane %v11254_v13, 4  ;;  %v2582_v22 = vsel %vm1001_vm0, %v2581_v37, %v14731_v63  ;;  %v11293_v23 = vpop.xlane.xlu0 %5181 }
 0x449   : > { %14728 = vst [vmem:[#allocation124_spill] sm:$0xff] %v11278_v26  ;;  %v4476_v11 = vsel %vm1001_vm0, %v14730_v46, %v14729_v45  ;;  %v2392_v27 = vperm.slane %v2384_v9, %v8333_v3  ;;  %v4239_v58 = vrot.slane %v11148_v35, 4  ;;  %v2068_v10 = vperm.slane %v2060_v28, %v8374_v14 }
 0x44a   : > { %14732 = vst [vmem:[#allocation25_spill] sm:$0xff] %v11293_v23  ;;  %v4473_v55 = vrot.slane %v14730_v46, 4  ;;  %v2431_v43 = vrot.slane %v11265_v0, 4  ;;  %v5098_v18 = vpop.xlane.xlu2 %5097  ;;  %v1672_v59 = vsel %vm1001_vm0, %v11271_v30, %v1671_v51  ;;  %v2092_v45 = vperm.slane %v2084_v41, %v8374_v14 }
 0x44b   : > { %v2606_v37 = vsel %vm1001_vm0, %v2605_v17, %v14733_v15  ;;  %v11304_v9 = vmax.f32 %v5098_v18, %v5101_v49  ;;  %v4802_v47 = vsel %vm4585_vm1, %v2106_v61, -inf  ;;  %v4240_v35 = vsel %vm1001_vm0, %v11104_v2, %v4239_v58  ;;  %v14736_v18 = vld [vmem:[#allocation167_spill] sm:$0xff] }
 0x44c   : > { %v11311_v46 = vperm.slane %v4476_v11, %v8333_v3  ;;  %v2405_v31 = vrot.slane %v2368_v1, 4  ;;  %v11314_v51 = vperm.slane %v2582_v22, %v8333_v3  ;;  %v2432_v41 = vsel %vm1001_vm0, %v2392_v27, %v2431_v43 }
 0x44d   : > { %14734 = vst [vmem:[#allocation98_spill] sm:$0xff] %v11304_v9  ;;  %4803 = vmax.xlane.f32.xlu1 %v4802_v47  ;;  %v6559_v49 = vperm.slane %v11304_v9, %v14607_v36  ;;  %v4727_v17 = vsel %vm4585_vm1, %v1672_v59, -inf  ;;  %v2111_v61 = vrot.slane %v2068_v10, 4  ;;  %v2593_v2 = vrot.slane %v14736_v18, 4 }
 0x44e   : > { %14735 = vst [vmem:[#allocation117_spill] sm:$0xff] %v11311_v46  ;;  %v11322_v58 = vperm.slane %v2606_v37, %v8333_v3  ;;  %4728 = vmax.xlane.f32.xlu0 %v4727_v17  ;;  %v5267_v11 = vsel %vm4585_vm1, %v4240_v35, -inf  ;;  %v2109_v28 = vrot.slane %v2092_v45, 4  ;;  %v4474_v47 = vsel %vm1001_vm0, %v4473_v55, %v10851_v48  ;;  %v14739_v48 = vld [vmem:[#allocation73_spill] sm:$0xff]  ;;  %v14742_v37 = vld [vmem:[#allocation104_spill] sm:$0xff] }
 0x44f   : > { %v2429_v22 = vrot.slane %v2392_v27, 4  ;;  %v11329_v43 = vsel %vm5797_vm6, %v6559_v49, %v11206_v50  ;;  %5268 = vmax.xlane.f32.xlu2 %v5267_v11  ;;  %v1669_v9 = vrot.slane %v11271_v30, 4  ;;  %v3391_v17 = vrot.slane %v14738_v40, 4  ;;  %v14740_v49 = vld [vmem:[#allocation40_spill] sm:$0xff] }
 0x450   : > { %14737 = vst [vmem:[#allocation70_spill] sm:$0xff] %v11329_v43  ;;  %v11331_v59 = vpop.xlane.xlu1 %5217  ;;  %v2112_v35 = vsel %vm1001_vm0, %v2092_v45, %v2111_v61  ;;  %v11338_v12 = vperm.slane %v2432_v41, %v8374_v14  ;;  %v2469_v27 = vrot.slane %v14739_v48, 4  ;;  %v2617_v55 = vrot.slane %v11314_v51, 4  ;;  %v11342_v50 = vpop.xlane.xlu0 %5214  ;;  %v14743_v41 = vld [vmem:[#allocation103_spill] sm:$0xff] }
 0x451   : > { %v14741_v11 = vrot.slane %v14740_v49, 4  ;;  %v2406_v30 = vsel %vm1001_vm0, %v2405_v31, %v14740_v49  ;;  %v2594_v40 = vsel %vm1001_vm0, %v2593_v2, %v14742_v37  ;;  %v2641_v45 = vrot.slane %v11322_v58, 4  ;;  %v14745_v2 = vld [vmem:[#allocation32_spill] sm:$0xff] }
 0x452   : > { %v3392_v61 = vsel %vm1001_vm0, %v14743_v41, %v3391_v17  ;;  %v5179_v46 = vpop.xlane.xlu2 %5178  ;;  %v2110_v6 = vsel %vm1001_vm0, %v2109_v28, %v2068_v10  ;;  %v4811_v26 = vsel %vm4585_vm1, %v2112_v35, -inf  ;;  %v2430_v31 = vsel %vm1001_vm0, %v2429_v22, %v11265_v0  ;;  %v14748_v17 = vld [vmem:[#allocation122_spill] sm:$0xff] }
 0x453   : > { %v2408_v43 = vsel %vm1001_vm0, %v2368_v1, %v14741_v11  ;;  %v11356_v23 = vmax.f32 %v11214_v39, %v5179_v46  ;;  %v1670_v1 = vsel %vm1001_vm0, %v1669_v9, %v11254_v13  ;;  %v14746_v49 = vrot.slane %v14745_v2, 4  ;;  %v14747_v11 = vld [vmem:[#allocation90_spill] sm:$0xff] }
 0x454   : > { %v3379_v41 = vrot.slane %v14748_v17, 4  ;;  %v2453_v10 = vrot.slane %v11338_v12, 4  ;;  %v11370_v39 = vperm.slane %v2406_v30, %v8374_v14  ;;  %v11373_v28 = vperm.slane %v2594_v40, %v8333_v3  ;;  %v14749_v30 = vld [vmem:[#allocation23_spill] sm:$0xff] }
 0x455   : > { %14744 = vst [vmem:[#allocation64_spill] sm:$0xff] %v11356_v23  ;;  %v3368_v38 = vsel %vm1001_vm0, %v14747_v11, %v14746_v49  ;;  %4812 = vmax.xlane.f32.xlu1 %v4811_v26  ;;  %v11376_v13 = vperm.slane %v3392_v61, %v8333_v3  ;;  %v6583_v0 = vperm.slane %v11356_v23, %v9325_v54  ;;  %v4808_v9 = vsel %vm4585_vm1, %v2110_v6, -inf }
 0x456   : > { %4809 = vmax.xlane.f32.xlu0 %v4808_v9  ;;  %v4724_v46 = vsel %vm4585_vm1, %v1670_v1, -inf  ;;  %v11383_v26 = vperm.slane %v2408_v43, %v8374_v14  ;;  %v11386_v22 = vperm.slane %v2430_v31, %v8374_v14  ;;  %v2618_v35 = vsel %vm1001_vm0, %v2617_v55, %v10358_v42 }
 0x457   : > { %v2470_v40 = vsel %vm1001_vm0, %v2469_v27, %v14749_v30  ;;  %v14750_v61 = vrot.slane %v14749_v30, 4  ;;  %v11398_v1 = vsel %vm5785_vm3, %v6583_v0, %v11043_v33  ;;  %4725 = vmax.xlane.f32.xlu2 %v4724_v46  ;;  %v2642_v31 = vsel %vm1001_vm0, %v2641_v45, %v11373_v28  ;;  %v14753_v27 = vld [vmem:[#allocation170_spill] sm:$0xff] }
 0x458   : > { %14751 = vst [vmem:[#allocation175_spill] sm:$0xff] %v11398_v1  ;;  %v4675_v43 = vpop.xlane.xlu1 %4674  ;;  %v14752_v2 = vrot.slane %v14708_v34, 4  ;;  %v3380_v49 = vsel %vm1001_vm0, %v14753_v27, %v3379_v41  ;;  %v2451_v11 = vrot.slane %v11370_v39, 4  ;;  %v3376_v33 = vperm.slane %v3368_v38, %v8333_v3  ;;  %v4672_v0 = vpop.xlane.xlu0 %4671  ;;  %v14760_v27 = vld [vmem:[#allocation115_spill] sm:$0xff] }
 0x459   : > { %v2472_v6 = vsel %vm1001_vm0, %v14739_v48, %v14750_v61  ;;  %v2454_v48 = vsel %vm1001_vm0, %v2453_v10, %v11383_v26  ;;  %v3437_v17 = vrot.slane %v11376_v13, 4  ;;  %v2107_v45 = vrot.slane %v11250_v24, 4 }
 0x45a   : > { %v2024_v55 = vsel %vm1001_vm0, %v14702_v29, %v14752_v2  ;;  %v2624_v34 = vperm.slane %v2618_v35, %v8374_v14  ;;  %v11416_v9 = vperm.slane %v4474_v47, %v8333_v3  ;;  %v11418_v29 = vmax.f32 %v4672_v0, %v4675_v43  ;;  %v5212_v41 = vpop.xlane.xlu2 %5211  ;;  %v14759_v43 = vld [vmem:[#allocation85_spill] sm:$0xff]  ;;  %v14761_v0 = vld [vmem:[#allocation179_spill] sm:$0xff] }
 0x45b   : > { %v2452_v10 = vsel %vm1001_vm0, %v11386_v22, %v2451_v11  ;;  %v2648_v46 = vperm.slane %v2642_v31, %v8374_v14  ;;  %v11424_v38 = vperm.slane %v2472_v6, %v8333_v3  ;;  %v3388_v30 = vperm.slane %v3380_v49, %v8333_v3 }
 0x45c   : > { %14754 = vst [vmem:[#allocation88_spill] sm:$0xff] %v11416_v9  ;;  %v4892_v24 = vsel %vm4585_vm1, %v2454_v48, -inf  ;;  %v2108_v35 = vsel %vm1001_vm0, %v11224_v44, %v2107_v45  ;;  %v11431_v47 = vperm.slane %v2470_v40, %v8333_v3  ;;  %v11434_v61 = vperm.slane %v2024_v55, %v8333_v3 }
 0x45d   : > { %14755 = vst [vmem:[#allocation66_spill] sm:$0xff] %v11418_v29  ;;  %v3813_v2 = vrot.slane %v14759_v43, 4  ;;  %v6426_v31 = vperm.slane %v11418_v29, %v14760_v27  ;;  %4893 = vmax.xlane.f32.xlu1 %v4892_v24  ;;  %v3413_v6 = vrot.slane %v3376_v33, 4  ;;  %v4889_v49 = vsel %vm4585_vm1, %v2452_v10, -inf }
 0x45e   : > { %14756 = vst [vmem:[#allocation53_spill] sm:$0xff] %v11424_v38  ;;  %v2667_v11 = vrot.slane %v2624_v34, 4  ;;  %v3438_v48 = vsel %vm1001_vm0, %v3437_v17, %v3388_v30  ;;  %v3825_v44 = vrot.slane %v14761_v0, 4  ;;  %4890 = vmax.xlane.f32.xlu0 %v4889_v49  ;;  %v4805_v55 = vsel %vm4585_vm1, %v2108_v35, -inf  ;;  %v14766_v35 = vld [vmem:[#allocation33_spill] sm:$0xff] }
 0x45f   : > { %14757 = vst [vmem:[#allocation69_spill] sm:$0xff] %v11431_v47  ;;  %v11444_v40 = vsel %vm5801_vm7, %v6426_v31, %v10572_v52  ;;  %v2665_v45 = vrot.slane %v2648_v46, 4  ;;  %v14762_v29 = vrot.slane %v10277_v53, 4  ;;  %4806 = vmax.xlane.f32.xlu2 %v4805_v55  ;;  %v2449_v52 = vrot.slane %v11386_v22, 4  ;;  %v14764_v55 = vld [vmem:[#allocation50_spill] sm:$0xff] }
 0x460   : > { %14758 = vst [vmem:[#allocation36_spill] sm:$0xff] %v11434_v61  ;;  %v11455_v17 = vpop.xlane.xlu1 %4755  ;;  %v2668_v49 = vsel %vm1001_vm0, %v2648_v46, %v2667_v11  ;;  %v11462_v23 = vperm.slane %v3438_v48, %v8374_v14  ;;  %v2643_v24 = vrot.slane %v11373_v28, 4  ;;  %v11466_v53 = vmax.f32 %v5212_v41, %v11342_v50  ;;  %v14767_v11 = vld [vmem:[#allocation123_spill] sm:$0xff] }
 0x461   : > { %v11453_v10 = vsel %vm1001_vm0, %v11424_v38, %v14762_v29  ;;  %v4681_v29 = vpop.xlane.xlu0 %4680  ;;  %v14765_v22 = vrot.slane %v10358_v42, 4  ;;  %v3814_v46 = vsel %vm1001_vm0, %v3813_v2, %v14766_v35  ;;  %v3826_v48 = vsel %vm1001_vm0, %v3825_v44, %v14767_v11  ;;  %v14768_v38 = vld [vmem:[#allocation43_spill] sm:$0xff] }
 0x462   : > { %14763 = vst [vmem:[#allocation155_spill] sm:$0xff] %v11453_v10  ;;  %v3414_v10 = vsel %vm1001_vm0, %v3413_v6, %v14764_v55  ;;  %v3837_v28 = vrot.slane %v14768_v38, 4  ;;  %v5221_v9 = vpop.xlane.xlu2 %5220  ;;  %v2666_v50 = vsel %vm1001_vm0, %v2665_v45, %v2624_v34  ;;  %v4925_v6 = vsel %vm4585_vm1, %v2668_v49, -inf  ;;  %v14785_v38 = vld [vmem:[#allocation13_spill] sm:$0xff] }
 0x463   : > { %v2620_v31 = vsel %vm1001_vm0, %v11314_v51, %v14765_v22  ;;  %v11481_v41 = vmax.f32 %v11331_v59, %v5221_v9  ;;  %v2450_v42 = vsel %vm1001_vm0, %v2449_v52, %v11370_v39  ;;  %v2644_v51 = vsel %vm1001_vm0, %v11322_v58, %v2643_v24  ;;  %v14770_v24 = vld [vmem:[#allocation152_spill] sm:$0xff] }
 0x464   : > { %v14769_v2 = vrot.slane %v14764_v55, 4  ;;  %v11492_v22 = vperm.slane %v3414_v10, %v8374_v14  ;;  %v3457_v34 = vrot.slane %v11462_v23, 4  ;;  %v11496_v59 = vperm.slane %v2620_v31, %v8374_v14  ;;  %v14772_v55 = vld [vmem:[#allocation14_spill] sm:$0xff] }
 0x465   : > { %4926 = vmax.xlane.f32.xlu1 %v4925_v6  ;;  %v3439_v9 = vrot.slane %v3388_v30, 4  ;;  %v6595_v39 = vperm.slane %v11466_v53, %v9248_v56  ;;  %v6596_v58 = vperm.slane %v11481_v41, %v9265_v19  ;;  %v4922_v45 = vsel %vm4585_vm1, %v2666_v50, -inf  ;;  %v14771_v30 = vld [vmem:[#allocation83_spill] sm:$0xff] }
 0x466   : > { %v3416_v44 = vsel %vm1001_vm0, %v3376_v33, %v14769_v2  ;;  %v11504_v33 = vperm.slane %v3826_v48, %v8333_v3  ;;  %v3838_v10 = vsel %vm1001_vm0, %v3837_v28, %v14770_v24  ;;  %4923 = vmax.xlane.f32.xlu0 %v4922_v45  ;;  %v4886_v52 = vsel %vm4585_vm1, %v2450_v42, -inf  ;;  %v14788_v24 = vld [vmem:[#allocation180_spill] sm:$0xff] }
 0x467   : > { %v11510_v31 = vperm.slane %v2644_v51, %v8374_v14  ;;  %v2245_v49 = vrot.slane %v14771_v30, 4  ;;  %v14773_v6 = vrot.slane %v14772_v55, 4  ;;  %v11518_v50 = vsel %vm5781_vm2, %v6596_v58, %v6595_v39  ;;  %4887 = vmax.xlane.f32.xlu2 %v4886_v52 }
 0x468   : > { %14774 = vst [vmem:[#allocation12_spill] sm:$0xff] %v11518_v50  ;;  %v11520_v48 = vpop.xlane.xlu1 %4764  ;;  %v3440_v28 = vsel %vm1001_vm0, %v11376_v13, %v3439_v9  ;;  %v3820_v42 = vperm.slane %v3814_v46, %v8333_v3  ;;  %v3458_v51 = vsel %vm1001_vm0, %v3457_v34, %v11492_v22  ;;  %v2671_v45 = vrot.slane %v11496_v59, 4 }
 0x469   : > { %v2248_v2 = vsel %vm1001_vm0, %v14771_v30, %v14773_v6  ;;  %14775 = vst [vmem:[#allocation77_spill] sm:$0xff] %v11520_v48  ;;  %v3424_v1 = vperm.slane %v3416_v44, %v8374_v14  ;;  %v14776_v30 = vrot.slane %v14685_v4, 4  ;;  %v4175_v58 = vrot.slane %v14689_v60, 4  ;;  %v11535_v6 = vpop.xlane.xlu0 %4761 }
 0x46a   : > { %v3844_v52 = vperm.slane %v3838_v10, %v8333_v3  ;;  %14777 = vst [vmem:[#allocation133_spill] sm:$0xff] %v11535_v6  ;;  %v2455_v13 = vrot.slane %v11383_v26, 4  ;;  %v11539_v46 = vperm.slane %v2248_v2, %v8333_v3  ;;  %v3875_v34 = vrot.slane %v11504_v33, 4  ;;  %v4678_v9 = vpop.xlane.xlu2 %4677 }
 0x46b   : > { %v4152_v39 = vsel %vm1001_vm0, %v14678_v57, %v14776_v30  ;;  %v2672_v4 = vsel %vm1001_vm0, %v11510_v31, %v2671_v45  ;;  %v3448_v44 = vperm.slane %v3440_v28, %v8374_v14  ;;  %v14779_v57 = vld [vmem:[#allocation187_spill] sm:$0xff]  ;;  %v11547_v30 = vmax.f32 %v4678_v9, %v4681_v29  ;;  %v14781_v28 = vld [vmem:[#allocation80_spill] sm:$0xff] }
 0x46c   : > { %14778 = vst [vmem:[#allocation94_spill] sm:$0xff] %v11539_v46  ;;  %v4176_v60 = vsel %vm1001_vm0, %v14779_v57, %v4175_v58  ;;  %v5102_v10 = vsel %vm4585_vm1, %v3458_v51, -inf  ;;  %v2456_v26 = vsel %vm1001_vm0, %v11338_v12, %v2455_v13  ;;  %v2246_v2 = vsel %vm1001_vm0, %v2245_v49, %v14772_v55  ;;  %v14782_v12 = vld [vmem:[#allocation192_spill] sm:$0xff] }
 0x46d   : > { %14780 = vst [vmem:[#allocation67_spill] sm:$0xff] %v11547_v30  ;;  %v3849_v6 = vrot.slane %v3820_v42, 4  ;;  %v11555_v48 = vperm.slane %v4152_v39, %v8333_v3  ;;  %5103 = vmax.xlane.f32.xlu1 %v5102_v10  ;;  %v3463_v45 = vrot.slane %v3424_v1, 4  ;;  %v6428_v58 = vperm.slane %v11547_v30, %v14781_v28  ;;  %v14783_v39 = vld [vmem:[#allocation99_spill] sm:$0xff] }
 0x46e   : > { %v4931_v29 = vsel %vm4585_vm1, %v2672_v4, -inf  ;;  %v3876_v51 = vsel %vm1001_vm0, %v3844_v52, %v3875_v34  ;;  %v11562_v9 = vperm.slane %v4176_v60, %v8333_v3  ;;  %v4397_v13 = vrot.slane %v14782_v12, 4  ;;  %v14784_v4 = vld [vmem:[#allocation125_spill] sm:$0xff] }
 0x46f   : > { %4932 = vmax.xlane.f32.xlu0 %v4931_v29  ;;  %v4895_v49 = vsel %vm4585_vm1, %v2456_v26, -inf  ;;  %v3461_v55 = vrot.slane %v3448_v44, 4  ;;  %v4373_v57 = vrot.slane %v14783_v39, 4  ;;  %v3873_v10 = vrot.slane %v3844_v52, 4 }
 0x470   : > { %v6429_v0 = vsel %vm5805_vm8, %v6428_v58, %v11444_v40  ;;  %4896 = vmax.xlane.f32.xlu2 %v4895_v49  ;;  %v11569_v30 = vpop.xlane.xlu1 %4845  ;;  %v2669_v34 = vrot.slane %v11510_v31, 4  ;;  %v4163_v60 = vrot.slane %v14784_v4, 4  ;;  %v3464_v26 = vsel %vm1001_vm0, %v3448_v44, %v3463_v45  ;;  %v14789_v44 = vld [vmem:[#allocation156_spill] sm:$0xff] }
 0x471   : > { %v11575_v61 = vsel %vm6032_vm9, %v6429_v0, %v14785_v38  ;;  %v11579_v29 = vperm.slane %v3876_v51, %v8374_v14  ;;  %v4197_v40 = vrot.slane %v11555_v48, 4  ;;  %v4843_v58 = vpop.xlane.xlu0 %4842  ;;  %v14787_v49 = vrot.slane %v11076_v62, 4 }
 0x472   : > { %14786 = vst [vmem:[#allocation97_spill] sm:$0xff] %v11575_v61  ;;  %v3850_v4 = vsel %vm1001_vm0, %v3849_v6, %v11076_v62  ;;  %v4164_v38 = vsel %vm1001_vm0, %v14788_v24, %v4163_v60  ;;  %v4221_v0 = vrot.slane %v11562_v9, 4  ;;  %v4398_v45 = vsel %vm1001_vm0, %v4397_v13, %v14789_v44  ;;  %v4759_v51 = vpop.xlane.xlu2 %4758  ;;  %v14791_v24 = vld [vmem:[#allocation41_spill] sm:$0xff] }
 0x473   : > { %v3852_v31 = vsel %vm1001_vm0, %v3820_v42, %v14787_v49  ;;  %v3462_v52 = vsel %vm1001_vm0, %v3461_v55, %v3424_v1  ;;  %v11595_v61 = vmax.f32 %v11455_v17, %v4759_v51  ;;  %v5111_v47 = vsel %vm4585_vm1, %v3464_v26, -inf  ;;  %v14792_v60 = vld [vmem:[#allocation177_spill] sm:$0xff] }
 0x474   : > { %v2670_v42 = vsel %vm1001_vm0, %v2669_v34, %v11496_v59  ;;  %v3874_v62 = vsel %vm1001_vm0, %v3873_v10, %v11504_v33  ;;  %v4374_v6 = vsel %vm1001_vm0, %v4373_v57, %v14791_v24  ;;  %v4385_v49 = vrot.slane %v14792_v60, 4  ;;  %v14793_v57 = vld [vmem:[#allocation135_spill] sm:$0xff] }
 0x475   : > { %14790 = vst [vmem:[#allocation78_spill] sm:$0xff] %v11595_v61  ;;  %5112 = vmax.xlane.f32.xlu1 %v5111_v47  ;;  %v3901_v13 = vrot.slane %v11579_v29, 4  ;;  %v11607_v1 = vperm.slane %v3850_v4, %v8374_v14  ;;  %v11610_v17 = vperm.slane %v4164_v38, %v8333_v3  ;;  %v11613_v55 = vperm.slane %v4398_v45, %v8333_v3  ;;  %v14794_v10 = vld [vmem:[#allocation163_spill] sm:$0xff]  ;;  %v14796_v45 = vld [vmem:[#allocation76_spill] sm:$0xff] }
 0x476   : > { %v6452_v59 = vperm.slane %v11595_v61, %v14598_v20  ;;  %v5108_v33 = vsel %vm4585_vm1, %v3462_v52, -inf  ;;  %v11620_v34 = vmax.f32 %v14794_v10, %v14793_v57  ;;  %v4928_v47 = vsel %vm4585_vm1, %v2670_v42, -inf  ;;  %v14798_v42 = vld [vmem:[#allocation84_spill] sm:$0xff] }
 0x477   : > { %5109 = vmax.xlane.f32.xlu0 %v5108_v33  ;;  %v11624_v26 = vperm.slane %v3852_v31, %v8374_v14  ;;  %v11627_v4 = vperm.slane %v3874_v62, %v8374_v14  ;;  %v11630_v38 = vperm.slane %v2246_v2, %v8333_v3  ;;  %v4198_v33 = vsel %vm1001_vm0, %v4197_v40, %v11200_v8  ;;  %v14799_v62 = vld [vmem:[#allocation129_spill] sm:$0xff] }
 0x478   : > { %14795 = vst [vmem:[#allocation159_spill] sm:$0xff] %v11620_v34  ;;  %v11634_v51 = vsel %vm5793_vm5, %v6452_v59, %v14796_v45  ;;  %4929 = vmax.xlane.f32.xlu2 %v4928_v47  ;;  %v11636_v52 = vpop.xlane.xlu1 %4878  ;;  %v4222_v31 = vsel %vm1001_vm0, %v4221_v0, %v11610_v17  ;;  %v2693_v57 = vrot.slane %v14798_v42, 4  ;;  %v4386_v10 = vsel %vm1001_vm0, %v4385_v49, %v14799_v62  ;;  %v14800_v45 = vld [vmem:[#allocation27_spill] sm:$0xff]  ;;  %v14802_v49 = vld [vmem:[#allocation82_spill] sm:$0xff] }
 0x479   : > { %14797 = vst [vmem:[#allocation21_spill] sm:$0xff] %v11634_v51  ;;  %v3902_v2 = vsel %vm1001_vm0, %v3901_v13, %v11624_v26  ;;  %v3899_v59 = vrot.slane %v11607_v1, 4  ;;  %v14801_v47 = vrot.slane %v14800_v45, 4  ;;  %v11653_v40 = vperm.slane %v4374_v6, %v8333_v3  ;;  %v11656_v51 = vpop.xlane.xlu0 %4875 }
 0x47a   : > { %v4433_v0 = vrot.slane %v11613_v55, 4  ;;  %v3459_v11 = vrot.slane %v11492_v22, 4  ;;  %v6570_v50 = vperm.slane %v11620_v34, %v14802_v49  ;;  %v4840_v13 = vpop.xlane.xlu2 %4839  ;;  %v4204_v60 = vperm.slane %v4198_v33, %v8374_v14 }
 0x47b   : > { %v2696_v61 = vsel %vm1001_vm0, %v14798_v42, %v14801_v47  ;;  %v3900_v21 = vsel %vm1001_vm0, %v11627_v4, %v3899_v59  ;;  %v4228_v42 = vperm.slane %v4222_v31, %v8374_v14  ;;  %v11666_v6 = vperm.slane %v4386_v10, %v8333_v3 }
 0x47c   : > { %v11668_v47 = vmax.f32 %v4840_v13, %v4843_v58  ;;  %v5192_v12 = vsel %vm4585_vm1, %v3902_v2, -inf  ;;  %v3460_v22 = vsel %vm1001_vm0, %v11462_v23, %v3459_v11  ;;  %v11674_v34 = vperm.slane %v2696_v61, %v8333_v3  ;;  %v14807_v58 = vld [vmem:[#allocation146_spill] sm:$0xff] }
 0x47d   : > { %v14805_v44 = vrot.slane %v14766_v35, 4  ;;  %v14806_v31 = vrot.slane %v14731_v63, 4  ;;  %5193 = vmax.xlane.f32.xlu1 %v5192_v12  ;;  %v11686_v2 = vsel %vm5789_vm4, %v6570_v50, %v14807_v58  ;;  %v2694_v23 = vsel %vm1001_vm0, %v2693_v57, %v14800_v45  ;;  %v14815_v50 = vld [vmem:[#allocation107_spill] sm:$0xff] }
 0x47e   : > { %14803 = vst [vmem:[#allocation18_spill] sm:$0xff] %v11668_v47  ;;  %v6478_v61 = vperm.slane %v11668_v47, %v9325_v54  ;;  %v5189_v35 = vsel %vm4585_vm1, %v3900_v21, -inf  ;;  %v4409_v63 = vrot.slane %v11653_v40, 4  ;;  %v4243_v11 = vrot.slane %v4204_v60, 4 }
 0x47f   : > { %14804 = vst [vmem:[#allocation68_spill] sm:$0xff] %v11674_v34  ;;  %v3816_v33 = vsel %vm1001_vm0, %v14759_v43, %v14805_v44  ;;  %v2584_v10 = vsel %vm1001_vm0, %v14724_v25, %v14806_v31  ;;  %v4434_v43 = vsel %vm1001_vm0, %v4433_v0, %v11666_v6  ;;  %5190 = vmax.xlane.f32.xlu0 %v5189_v35  ;;  %v5105_v25 = vsel %vm4585_vm1, %v3460_v22, -inf  ;;  %v14808_v44 = vld [vmem:[#allocation148_spill] sm:$0xff]  ;;  %v14811_v22 = vld [vmem:[#allocation106_spill] sm:$0xff]  ;;  %v14830_v34 = vld [vmem:[#allocation91_spill] sm:$0xff] }
 0x480   : > { %v4241_v12 = vrot.slane %v4228_v42, 4  ;;  %v14809_v59 = vrot.slane %v14808_v44, 4  ;;  %v6479_v21 = vsel %vm5785_vm3, %v6478_v61, %v11276_v7  ;;  %5106 = vmax.xlane.f32.xlu2 %v5105_v25  ;;  %v11706_v45 = vpop.xlane.xlu1 %5007  ;;  %v3897_v0 = vrot.slane %v11627_v4, 4 }
 0x481   : > { %v11710_v13 = vperm.slane %v3816_v33, %v8333_v3  ;;  %v1811_v31 = vrot.slane %v14811_v22, 4  ;;  %v4244_v58 = vsel %vm1001_vm0, %v4228_v42, %v4243_v11  ;;  %v11715_v35 = vperm.slane %v4434_v43, %v8374_v14  ;;  %v4885_v25 = vpop.xlane.xlu0 %4884  ;;  %v14814_v42 = vld [vmem:[#allocation162_spill] sm:$0xff] }
 0x482   : > { %v11702_v57 = vsel %vm1001_vm0, %v11539_v46, %v14809_v59  ;;  %v11718_v59 = vperm.slane %v2694_v23, %v8333_v3  ;;  %v11721_v7 = vperm.slane %v2584_v10, %v8333_v3  ;;  %v14813_v61 = vrot.slane %v11200_v8, 4  ;;  %v4849_v11 = vpop.xlane.xlu2 %4848 }
 0x483   : > { %14810 = vst [vmem:[#allocation45_spill] sm:$0xff] %v11702_v57  ;;  %v4223_v33 = vrot.slane %v11610_v17, 4  ;;  %v1812_v43 = vsel %vm1001_vm0, %v14814_v42, %v1811_v31  ;;  %v4242_v23 = vsel %vm1001_vm0, %v4241_v12, %v4204_v60  ;;  %v4410_v10 = vsel %vm1001_vm0, %v4409_v63, %v14815_v50  ;;  %v14817_v31 = vld [vmem:[#allocation137_spill] sm:$0xff] }
 0x484   : > { %14812 = vst [vmem:[#allocation55_spill] sm:$0xff] %v11718_v59  ;;  %v4200_v4 = vsel %vm1001_vm0, %v11555_v48, %v14813_v61  ;;  %v11735_v47 = vmax.f32 %v11569_v30, %v4849_v11  ;;  %v5273_v8 = vsel %vm4585_vm1, %v4244_v58, -inf  ;;  %v3898_v48 = vsel %vm1001_vm0, %v3897_v0, %v11607_v1  ;;  %v14818_v0 = vld [vmem:[#allocation182_spill] sm:$0xff] }
 0x485   : > { %v4224_v17 = vsel %vm1001_vm0, %v11562_v9, %v4223_v33  ;;  %v1823_v42 = vrot.slane %v14817_v31, 4  ;;  %5274 = vmax.xlane.f32.xlu1 %v5273_v8  ;;  %v4457_v60 = vrot.slane %v11715_v35, 4  ;;  %v11746_v63 = vperm.slane %v4200_v4, %v8374_v14  ;;  %v14824_v61 = vld [vmem:[#allocation138_spill] sm:$0xff] }
 0x486   : > { %14816 = vst [vmem:[#allocation119_spill] sm:$0xff] %v11735_v47  ;;  %v11749_v30 = vperm.slane %v1812_v43, %v8333_v3  ;;  %v4435_v12 = vrot.slane %v11666_v6, 4  ;;  %v6480_v1 = vperm.slane %v11735_v47, %v14802_v49  ;;  %v5270_v9 = vsel %vm4585_vm1, %v4242_v23, -inf  ;;  %v14819_v43 = vld [vmem:[#allocation58_spill] sm:$0xff] }
 0x487   : > { %v1824_v58 = vsel %vm1001_vm0, %v14818_v0, %v1823_v42  ;;  %5271 = vmax.xlane.f32.xlu0 %v5270_v9  ;;  %v5186_v33 = vsel %vm4585_vm1, %v3898_v48, -inf  ;;  %v11759_v11 = vperm.slane %v4410_v10, %v8374_v14  ;;  %v11762_v4 = vperm.slane %v4224_v17, %v8374_v14 }
 0x488   : > { %v2269_v8 = vrot.slane %v14819_v43, 4  ;;  %v11766_v6 = vsel %vm5789_vm4, %v6480_v1, %v6479_v21  ;;  %5187 = vmax.xlane.f32.xlu2 %v5186_v33  ;;  %v5017_v31 = vpop.xlane.xlu1 %5016  ;;  %v14821_v23 = vrot.slane %v14815_v50, 4  ;;  %v4436_v48 = vsel %vm1001_vm0, %v11613_v55, %v4435_v12 }
 0x489   : > { %14820 = vst [vmem:[#allocation86_spill] sm:$0xff] %v11766_v6  ;;  %v14822_v10 = vrot.slane %v11079_v5, 4  ;;  %v4458_v21 = vsel %vm1001_vm0, %v4457_v60, %v11759_v11  ;;  %v4247_v1 = vrot.slane %v11746_v63, 4  ;;  %v1871_v50 = vrot.slane %v11749_v30, 4  ;;  %v5014_v12 = vpop.xlane.xlu0 %5013 }
 0x48a   : > { %v4412_v42 = vsel %vm1001_vm0, %v11653_v40, %v14821_v23  ;;  %v1832_v40 = vperm.slane %v1824_v58, %v8333_v3  ;;  %v11788_v55 = vmax.f32 %v11656_v51, %v11636_v52  ;;  %v3903_v0 = vrot.slane %v11624_v26, 4  ;;  %v4882_v23 = vpop.xlane.xlu2 %4881 }
 0x48b   : > { %v11778_v17 = vsel %vm1001_vm0, %v11710_v13, %v14822_v10  ;;  %v11791_v33 = vmax.f32 %v5014_v12, %v5017_v31  ;;  %v4248_v10 = vsel %vm1001_vm0, %v11762_v4, %v4247_v1  ;;  %v4420_v60 = vperm.slane %v4412_v42, %v8374_v14  ;;  %v14826_v31 = vld [vmem:[#allocation109_spill] sm:$0xff]  ;;  %v14828_v42 = vld [vmem:[#allocation39_spill] sm:$0xff] }
 0x48c   : > { %14823 = vst [vmem:[#allocation87_spill] sm:$0xff] %v11788_v55  ;;  %v4444_v22 = vperm.slane %v4436_v48, %v8374_v14  ;;  %v2270_v58 = vsel %vm1001_vm0, %v2269_v8, %v14824_v61  ;;  %v11799_v9 = vmax.f32 %v4882_v23, %v4885_v25  ;;  %v5306_v51 = vsel %vm4585_vm1, %v4458_v21, -inf  ;;  %v14831_v25 = vld [vmem:[#allocation164_spill] sm:$0xff] }
 0x48d   : > { %v3904_v26 = vsel %vm1001_vm0, %v11579_v29, %v3903_v0  ;;  %v14827_v12 = vrot.slane %v14826_v31, 4  ;;  %v14829_v48 = vrot.slane %v14828_v42, 4  ;;  %v2257_v23 = vrot.slane %v14831_v25, 4  ;;  %5307 = vmax.xlane.f32.xlu1 %v5306_v51  ;;  %v14836_v25 = vld [vmem:[#allocation95_spill] sm:$0xff] }
 0x48e   : > { %14825 = vst [vmem:[#allocation71_spill] sm:$0xff] %v11799_v9  ;;  %v1872_v21 = vsel %vm1001_vm0, %v1832_v40, %v1871_v50  ;;  %v6490_v29 = vperm.slane %v11788_v55, %v9248_v56  ;;  %v6491_v0 = vperm.slane %v11799_v9, %v9265_v19  ;;  %v5279_v52 = vsel %vm4585_vm1, %v4248_v10, -inf }
 0x48f   : > { %v11809_v1 = vsel %vm1001_vm0, %v11721_v7, %v14827_v12  ;;  %v4488_v8 = vsel %vm1001_vm0, %v14830_v34, %v14829_v48  ;;  %v11823_v12 = vperm.slane %v2270_v58, %v8333_v3  ;;  %5280 = vmax.xlane.f32.xlu0 %v5279_v52  ;;  %v5195_v47 = vsel %vm4585_vm1, %v3904_v26, -inf }
 0x490   : > { %v4463_v48 = vrot.slane %v4420_v60, 4  ;;  %v4461_v6 = vrot.slane %v4444_v22, 4  ;;  %v4485_v51 = vrot.slane %v14830_v34, 4  ;;  %v1869_v59 = vrot.slane %v1832_v40, 4  ;;  %5196 = vmax.xlane.f32.xlu2 %v5195_v47  ;;  %v11830_v57 = vpop.xlane.xlu1 %5061  ;;  %v14834_v34 = vld [vmem:[#allocation22_spill] sm:$0xff]  ;;  %v14837_v47 = vld [vmem:[#allocation96_spill] sm:$0xff] }
 0x491   : > { %v11828_v50 = vsel %vm5781_vm2, %v6491_v0, %v6490_v29  ;;  %v4245_v43 = vrot.slane %v11762_v4, 4  ;;  %v11834_v10 = vperm.slane %v4488_v8, %v8333_v3  ;;  %v2607_v58 = vrot.slane %v14733_v15, 4  ;;  %v5059_v9 = vpop.xlane.xlu0 %5058  ;;  %v14839_v8 = vld [vmem:[#allocation34_spill] sm:$0xff] }
 0x492   : > { %14832 = vst [vmem:[#allocation15_spill] sm:$0xff] %v11828_v50  ;;  %v4464_v26 = vsel %vm1001_vm0, %v4444_v22, %v4463_v48  ;;  %v11839_v52 = vperm.slane %v1872_v21, %v8374_v14  ;;  %v14835_v40 = vrot.slane %v14834_v34, 4  ;;  %v4037_v0 = vrot.slane %v14837_v47, 4  ;;  %v14838_v50 = vld [vmem:[#allocation102_spill] sm:$0xff]  ;;  %v5011_v48 = vpop.xlane.xlu2 %5010 }
 0x493   : > { %14833 = vst [vmem:[#allocation141_spill] sm:$0xff] %v11834_v10  ;;  %v2258_v4 = vsel %vm1001_vm0, %v2257_v23, %v14838_v50  ;;  %v14840_v55 = vrot.slane %v11187_v32, 4  ;;  %v2305_v22 = vrot.slane %v11823_v12, 4  ;;  %v2608_v21 = vsel %vm1001_vm0, %v14727_v16, %v2607_v58 }
 0x494   : > { %v3592_v29 = vsel %vm1001_vm0, %v14836_v25, %v14835_v40  ;;  %v4462_v34 = vsel %vm1001_vm0, %v4461_v6, %v4420_v60  ;;  %v14841_v25 = vrot.slane %v14839_v8, 4  ;;  %v5424_v23 = vmax.f32 %v11706_v45, %v5011_v48 }
 0x495   : > { %v1846_v15 = vsel %vm1001_vm0, %v14840_v55, %v14839_v8  ;;  %v5315_v46 = vsel %vm4585_vm1, %v4464_v26, -inf  ;;  %v4246_v55 = vsel %vm1001_vm0, %v4245_v43, %v11746_v63  ;;  %v1870_v44 = vsel %vm1001_vm0, %v1869_v59, %v11749_v30 }
 0x496   : > { %v1848_v40 = vsel %vm1001_vm0, %v11187_v32, %v14841_v25  ;;  %v2595_v16 = vrot.slane %v14742_v37, 4  ;;  %v11868_v58 = vperm.slane %v2258_v4, %v8333_v3  ;;  %5316 = vmax.xlane.f32.xlu1 %v5315_v46  ;;  %v1893_v6 = vrot.slane %v11839_v52, 4  ;;  %v14843_v4 = vld [vmem:[#allocation136_spill] sm:$0xff] }
 0x497   : > { %v11872_v32 = vperm.slane %v1846_v15, %v8374_v14  ;;  %v11875_v45 = vperm.slane %v2608_v21, %v8333_v3  ;;  %v11878_v60 = vpack.c.bf16 %v11791_v33, %v5424_v23  ;;  %v6531_v63 = vperm.slane %v5424_v23, %v14760_v27  ;;  %v14844_v21 = vld [vmem:[#allocation51_spill] sm:$0xff]  ;;  %v14846_v23 = vld [vmem:[#allocation38_spill] sm:$0xff] }
 0x498   : > { %v5312_v59 = vsel %vm4585_vm1, %v4462_v34, -inf  ;;  %v6533_v37 = vperm.slane %v11791_v33, %v14781_v28  ;;  %v5276_v46 = vsel %vm4585_vm1, %v4246_v55, -inf  ;;  %v11886_v30 = vperm.slane %v1848_v40, %v8374_v14  ;;  %v5143_v15 = vpop.xlane.xlu1 %5142 }
 0x499   : > { %14842 = vst [vmem:[#allocation167_spill] sm:$0xff] %v11878_v60  ;;  %5313 = vmax.xlane.f32.xlu0 %v5312_v59  ;;  %v11889_v43 = vperm.slane %v1870_v44, %v8374_v14  ;;  %v4486_v26 = vsel %vm1001_vm0, %v4485_v51, %v14828_v42  ;;  %v6532_v8 = vsel %vm5801_vm7, %v6531_v63, %v14843_v4  ;;  %v14845_v33 = vrot.slane %v11630_v38, 4 }
 0x49a   : > { %5277 = vmax.xlane.f32.xlu2 %v5276_v46  ;;  %v2306_v34 = vsel %vm1001_vm0, %v2305_v22, %v11868_v58  ;;  %v2596_v44 = vsel %vm1001_vm0, %v14736_v18, %v2595_v16  ;;  %v11904_v25 = vsel %vm5805_vm8, %v6533_v37, %v6532_v8  ;;  %v1894_v42 = vsel %vm1001_vm0, %v1893_v6, %v11886_v30  ;;  %v5140_v22 = vpop.xlane.xlu0 %5139  ;;  %v5056_v16 = vpop.xlane.xlu2 %5055 }
 0x49b   : > { %v2282_v48 = vsel %vm1001_vm0, %v14845_v33, %v14844_v21  ;;  %v1891_v51 = vrot.slane %v11872_v32, 4  ;;  %v11910_v40 = vperm.slane %v3592_v29, %v8333_v3  ;;  %v4038_v55 = vsel %vm1001_vm0, %v4037_v0, %v14846_v23 }
 0x49c   : > { %v2653_v63 = vrot.slane %v11875_v45, 4  ;;  %v4459_v59 = vrot.slane %v11759_v11, 4  ;;  %v11916_v18 = vmax.f32 %v5140_v22, %v5143_v15  ;;  %v2288_v6 = vperm.slane %v2282_v48, %v8374_v14  ;;  %v14850_v22 = vld [vmem:[#allocation114_spill] sm:$0xff] }
 0x49d   : > { %v1892_v37 = vsel %vm1001_vm0, %v11889_v43, %v1891_v51  ;;  %v2312_v46 = vperm.slane %v2306_v34, %v8374_v14  ;;  %v11923_v29 = vperm.slane %v2596_v44, %v8333_v3  ;;  %v5432_v4 = vmax.f32 %v5056_v16, %v5059_v9 }
 0x49e   : > { %v4772_v0 = vsel %vm4585_vm1, %v1894_v42, -inf  ;;  %v4460_v8 = vsel %vm1001_vm0, %v11715_v35, %v4459_v59  ;;  %v11929_v11 = vperm.slane %v4486_v26, %v8333_v3  ;;  %v14848_v15 = vrot.slane %v14846_v23, 4  ;;  %v14851_v59 = vld [vmem:[#allocation144_spill] sm:$0xff] }
 0x49f   : > { %v11936_v48 = vperm.slane %v4038_v55, %v8333_v3  ;;  %v6572_v34 = vperm.slane %v11916_v18, %v14598_v20  ;;  %4773 = vmax.xlane.f32.xlu1 %v4772_v0  ;;  %v14849_v9 = vrot.slane %v14791_v24, 4  ;;  %v6546_v26 = vperm.slane %v5432_v4, %v14760_v27 }
 0x4a0   : > { %14847 = vst [vmem:[#allocation145_spill] sm:$0xff] %v11929_v11  ;;  %v4040_v33 = vsel %vm1001_vm0, %v14837_v47, %v14848_v15  ;;  %v4769_v44 = vsel %vm4585_vm1, %v1892_v37, -inf  ;;  %v2654_v42 = vsel %vm1001_vm0, %v2653_v63, %v11923_v29  ;;  %v5309_v51 = vsel %vm4585_vm1, %v4460_v8, -inf  ;;  %v11957_v37 = vpop.xlane.xlu1 %5223 }
 0x4a1   : > { %v4376_v35 = vsel %vm1001_vm0, %v14783_v39, %v14849_v9  ;;  %v11950_v47 = vsel %vm5793_vm5, %v6572_v34, %v11686_v2  ;;  %4770 = vmax.xlane.f32.xlu0 %v4769_v44  ;;  %v2331_v23 = vrot.slane %v2288_v6, 4  ;;  %v2329_v55 = vrot.slane %v2312_v46, 4 }
 0x4a2   : > { %v3637_v24 = vrot.slane %v11910_v40, 4  ;;  %v3603_v39 = vrot.slane %v14850_v22, 4  ;;  %v6547_v16 = vsel %vm5801_vm7, %v6546_v26, %v14851_v59  ;;  %5310 = vmax.xlane.f32.xlu2 %v5309_v51  ;;  %v1889_v63 = vrot.slane %v11889_v43, 4  ;;  %v14853_v26 = vld [vmem:[#allocation172_spill] sm:$0xff]  ;;  %v5149_v51 = vpop.xlane.xlu0 %5148  ;;  %v14855_v22 = vld [vmem:[#allocation101_spill] sm:$0xff] }
 0x4a3   : > { %v11961_v2 = vperm.slane %v4040_v33, %v8333_v3  ;;  %v2332_v8 = vsel %vm1001_vm0, %v2312_v46, %v2331_v23  ;;  %v11966_v15 = vperm.slane %v2654_v42, %v8374_v14  ;;  %v11969_v34 = vperm.slane %v4376_v35, %v8333_v3  ;;  %v14856_v46 = vld [vmem:[#allocation149_spill] sm:$0xff]  ;;  %v5065_v42 = vpop.xlane.xlu2 %5064 }
 0x4a4   : > { %v2307_v9 = vrot.slane %v11868_v58, 4  ;;  %v3604_v44 = vsel %vm1001_vm0, %v14853_v26, %v3603_v39  ;;  %v14854_v43 = vrot.slane %v14844_v21, 4  ;;  %v4261_v59 = vrot.slane %v14855_v22, 4 }
 0x4a5   : > { %14852 = vst [vmem:[#allocation73_spill] sm:$0xff] %v11961_v2  ;;  %v3615_v23 = vrot.slane %v14856_v46, 4  ;;  %v2330_v0 = vsel %vm1001_vm0, %v2329_v55, %v2288_v6  ;;  %v14857_v35 = vrot.slane %v11721_v7, 4  ;;  %v5433_v39 = vmax.f32 %v11830_v57, %v5065_v42  ;;  %v14858_v57 = vld [vmem:[#allocation59_spill] sm:$0xff] }
 0x4a6   : > { %v2284_v33 = vsel %vm1001_vm0, %v11630_v38, %v14854_v43  ;;  %v4853_v26 = vsel %vm4585_vm1, %v2332_v8, -inf  ;;  %v1890_v21 = vsel %vm1001_vm0, %v1889_v63, %v11872_v32  ;;  %v2308_v38 = vsel %vm1001_vm0, %v11823_v12, %v2307_v9  ;;  %v14860_v63 = vld [vmem:[#allocation188_spill] sm:$0xff] }
 0x4a7   : > { %v2630_v58 = vsel %vm1001_vm0, %v14857_v35, %v14826_v31  ;;  %v2655_v43 = vrot.slane %v11923_v29, 4  ;;  %v11993_v46 = vperm.slane %v3604_v44, %v8333_v3  ;;  %4854 = vmax.xlane.f32.xlu1 %v4853_v26  ;;  %v2673_v7 = vrot.slane %v11966_v15, 4 }
 0x4a8   : > { %v11997_v31 = vperm.slane %v2284_v33, %v8374_v14  ;;  %v3616_v6 = vsel %vm1001_vm0, %v14858_v57, %v3615_v23  ;;  %v12001_v55 = vpack.c.bf16 %v5433_v39, %v5432_v4  ;;  %v6548_v32 = vperm.slane %v5433_v39, %v14781_v28  ;;  %v14861_v33 = vld [vmem:[#allocation28_spill] sm:$0xff]  ;;  %v14864_v57 = vld [vmem:[#allocation153_spill] sm:$0xff] }
 0x4a9   : > { %v4850_v12 = vsel %vm4585_vm1, %v2330_v0, -inf  ;;  %v4061_v29 = vrot.slane %v14860_v63, 4  ;;  %v4766_v8 = vsel %vm4585_vm1, %v1890_v21, -inf  ;;  %v12008_v9 = vperm.slane %v2630_v58, %v8374_v14  ;;  %v5233_v0 = vpop.xlane.xlu1 %5232 }
 0x4aa   : > { %14859 = vst [vmem:[#allocation40_spill] sm:$0xff] %v12001_v55  ;;  %4851 = vmax.xlane.f32.xlu0 %v4850_v12  ;;  %v12011_v44 = vperm.slane %v2308_v38, %v8374_v14  ;;  %v14862_v42 = vrot.slane %v14861_v33, 4  ;;  %v6549_v23 = vsel %vm5805_vm8, %v6548_v32, %v6547_v16  ;;  %4767 = vmax.xlane.f32.xlu2 %v4766_v8  ;;  %v2335_v21 = vrot.slane %v11997_v31, 4 }
 0x4ab   : > { %v2640_v35 = vperm.slane %v11809_v1, %v8374_v14  ;;  %v2656_v58 = vsel %vm1001_vm0, %v11875_v45, %v2655_v43  ;;  %v3624_v39 = vperm.slane %v3616_v6, %v8333_v3  ;;  %v12027_v26 = vsel %vm6032_vm9, %v6549_v23, %v11904_v25  ;;  %v5230_v45 = vpop.xlane.xlu0 %5229  ;;  %v5146_v32 = vpop.xlane.xlu2 %5145 }
 0x4ac   : > { %v12017_v4 = vsel %vm1001_vm0, %v14855_v22, %v14862_v42  ;;  %14863 = vst [vmem:[#allocation104_spill] sm:$0xff] %v12027_v26  ;;  %v2674_v22 = vsel %vm1001_vm0, %v2673_v7, %v12008_v9  ;;  %v12034_v16 = vsel %vm1001_vm0, %v4261_v59, %v14861_v33  ;;  %v4387_v1 = vrot.slane %v14799_v62, 4  ;;  %v14866_v42 = vld [vmem:[#allocation174_spill] sm:$0xff]  ;;  %v14901_v26 = vld [vmem:[#allocation16_spill] sm:$0xff] }
 0x4ad   : > { %v3663_v38 = vrot.slane %v11993_v46, 4  ;;  %v1895_v43 = vrot.slane %v11886_v30, 4  ;;  %v4062_v25 = vsel %vm1001_vm0, %v4061_v29, %v14864_v57  ;;  %v12041_v6 = vmax.f32 %v5230_v45, %v5233_v0  ;;  %v14867_v29 = vld [vmem:[#allocation143_spill] sm:$0xff] }
 0x4ae   : > { %v2336_v7 = vsel %vm1001_vm0, %v12011_v44, %v2335_v21  ;;  %v2664_v12 = vperm.slane %v2656_v58, %v8374_v14  ;;  %v5447_v59 = vmax.f32 %v5146_v32, %v5149_v51  ;;  %v4934_v8 = vsel %vm4585_vm1, %v2674_v22, -inf }
 0x4af   : > { %14865 = vst [vmem:[#allocation103_spill] sm:$0xff] %v12041_v6  ;;  %v1896_v62 = vsel %vm1001_vm0, %v11839_v52, %v1895_v43  ;;  %v2679_v33 = vrot.slane %v2640_v35, 4  ;;  %v4049_v30 = vrot.slane %v14866_v42, 4  ;;  %v3664_v23 = vsel %vm1001_vm0, %v3624_v39, %v3663_v38  ;;  %4935 = vmax.xlane.f32.xlu1 %v4934_v8  ;;  %v14870_v38 = vld [vmem:[#allocation165_spill] sm:$0xff]  ;;  %v14871_v43 = vld [vmem:[#allocation191_spill] sm:$0xff] }
 0x4b0   : > { %v14868_v0 = vrot.slane %v14867_v29, 4  ;;  %v3638_v51 = vsel %vm1001_vm0, %v3637_v24, %v14867_v29  ;;  %v12060_v58 = vperm.slane %v4062_v25, %v8333_v3  ;;  %v12063_v52 = vpack.c.bf16 %v5447_v59, %v11916_v18  ;;  %v14873_v25 = vld [vmem:[#allocation156_spill] sm:$0xff] }
 0x4b1   : > { %v6574_v22 = vperm.slane %v5447_v59, %v14607_v36  ;;  %v4859_v21 = vsel %vm4585_vm1, %v2336_v7, -inf  ;;  %v12069_v32 = vmax.f32 %v14871_v43, %v14870_v38  ;;  %v5534_v8 = vpack.c.bf16 %v11481_v41, %v11466_v53  ;;  %v12079_v7 = vpop.xlane.xlu1 %5265 }
 0x4b2   : > { %v3640_v45 = vsel %vm1001_vm0, %v11910_v40, %v14868_v0  ;;  %14869 = vst [vmem:[#allocation32_spill] sm:$0xff] %v12063_v52  ;;  %4860 = vmax.xlane.f32.xlu0 %v4859_v21  ;;  %v4775_v40 = vsel %vm4585_vm1, %v1896_v62, -inf  ;;  %v2677_v24 = vrot.slane %v2664_v12, 4  ;;  %v4399_v29 = vrot.slane %v14873_v25, 4  ;;  %v14876_v21 = vld [vmem:[#allocation192_spill] sm:$0xff] }
 0x4b3   : > { %14872 = vst [vmem:[#allocation90_spill] sm:$0xff] %v12069_v32  ;;  %v3661_v0 = vrot.slane %v3624_v39, 4  ;;  %v12077_v18 = vsel %vm5797_vm6, %v6574_v22, %v11950_v47  ;;  %4776 = vmax.xlane.f32.xlu2 %v4775_v40  ;;  %v2333_v59 = vrot.slane %v12011_v44, 4  ;;  %v2680_v38 = vsel %vm1001_vm0, %v2664_v12, %v2679_v33  ;;  %v14875_v39 = vld [vmem:[#allocation126_spill] sm:$0xff]  ;;  %v5263_v44 = vpop.xlane.xlu0 %5262  ;;  %v14877_v40 = vld [vmem:[#allocation56_spill] sm:$0xff]  ;;  %v5227_v25 = vpop.xlane.xlu2 %5226 }
 0x4b4   : > { %14874 = vst [vmem:[#allocation122_spill] sm:$0xff] %v12077_v18  ;;  %v12084_v53 = vperm.slane %v3640_v45, %v8374_v14  ;;  %v12087_v41 = vperm.slane %v3664_v23, %v8374_v14  ;;  %v12090_v62 = vperm.slane %v3638_v51, %v8374_v14  ;;  %v4050_v47 = vsel %vm1001_vm0, %v4049_v30, %v14875_v39  ;;  %v14879_v18 = vld [vmem:[#allocation177_spill] sm:$0xff] }
 0x4b5   : > { %v4097_v22 = vrot.slane %v12060_v58, 4  ;;  %v4400_v43 = vsel %vm1001_vm0, %v14876_v21, %v4399_v29  ;;  %v14878_v12 = vrot.slane %v11936_v48, 4  ;;  %v6465_v23 = vperm.slane %v12069_v32, %v14802_v49 }
 0x4b6   : > { %v5752_v45 = vunpack.c.l.b16 %v5534_v8  ;;  %v5753_v51 = vunpack.c.h.b16 %v5534_v8  ;;  %v2678_v55 = vsel %vm1001_vm0, %v2677_v24, %v2640_v35  ;;  %v5460_v30 = vmax.f32 %v11957_v37, %v5227_v25  ;;  %v14880_v35 = vld [vmem:[#allocation29_spill] sm:$0xff] }
 0x4b7   : > { %v4074_v33 = vsel %vm1001_vm0, %v14878_v12, %v14877_v40  ;;  %v4943_v60 = vsel %vm4585_vm1, %v2680_v38, -inf  ;;  %v2334_v29 = vsel %vm1001_vm0, %v2333_v59, %v11997_v31  ;;  %v3662_v21 = vsel %vm1001_vm0, %v3661_v0, %v11993_v46 }
 0x4b8   : > { %v12111_v12 = vperm.slane %v4050_v47, %v8333_v3  ;;  %v4388_v32 = vsel %vm1001_vm0, %v14879_v18, %v4387_v1  ;;  %4944 = vmax.xlane.f32.xlu1 %v4943_v60  ;;  %v3685_v8 = vrot.slane %v12087_v41, 4  ;;  %v12118_v37 = vsel %vm5789_vm4, %v6465_v23, %v14880_v35 }
 0x4b9   : > { %v12121_v24 = vperm.slane %v4400_v43, %v8333_v3  ;;  %v5535_v31 = vpack.c.bf16 %v12041_v6, %v5460_v30  ;;  %v6598_v46 = vperm.slane %v5460_v30, %v9325_v54  ;;  %v4940_v0 = vsel %vm4585_vm1, %v2678_v55, -inf  ;;  %v14881_v43 = vld [vmem:[#allocation12_spill] sm:$0xff]  ;;  %v4723_v25 = vpop.xlane.xlu1 %4722 }
 0x4ba   : > { %v5987_v59 = vperm.slane %v5752_v45, %v9248_v56  ;;  %v5988_v1 = vperm.slane %v5753_v51, %v9265_v19  ;;  %4941 = vmax.xlane.f32.xlu0 %v4940_v0  ;;  %v4856_v60 = vsel %vm4585_vm1, %v2334_v29, -inf  ;;  %v12130_v18 = vperm.slane %v3662_v21, %v8374_v14 }
 0x4bb   : > { %v5754_v38 = vunpack.c.l.b16 %v5535_v31  ;;  %v5755_v47 = vunpack.c.h.b16 %v5535_v31  ;;  %v12134_v23 = vsel %vm5785_vm3, %v6598_v46, %v14881_v43  ;;  %4857 = vmax.xlane.f32.xlu2 %v4856_v60  ;;  %v4098_v55 = vsel %vm1001_vm0, %v4097_v22, %v12111_v12  ;;  %v4720_v0 = vpop.xlane.xlu0 %4719 }
 0x4bc   : > { %14882 = vst [vmem:[#allocation23_spill] sm:$0xff] %v12134_v23  ;;  %v3686_v45 = vsel %vm1001_vm0, %v3685_v8, %v12084_v53  ;;  %v3683_v51 = vrot.slane %v12090_v62, 4  ;;  %v2675_v30 = vrot.slane %v12008_v9, 4  ;;  %v4080_v29 = vperm.slane %v4074_v33, %v8374_v14  ;;  %v5260_v8 = vpop.xlane.xlu2 %5259  ;;  %v14903_v23 = vld [vmem:[#allocation69_spill] sm:$0xff] }
 0x4bd   : > { %v12144_v21 = vperm.slane %v4388_v32, %v8333_v3  ;;  %v4445_v35 = vrot.slane %v12121_v24, 4  ;;  %v5990_v31 = vperm.slane %v5754_v38, %v9325_v54  ;;  %v5992_v46 = vperm.slane %v5755_v47, %v14802_v49 }
 0x4be   : > { %v5989_v22 = vsel %vm5781_vm2, %v5988_v1, %v5987_v59  ;;  %v12150_v60 = vmax.f32 %v4720_v0, %v4723_v25  ;;  %v3684_v9 = vsel %vm1001_vm0, %v12130_v18, %v3683_v51  ;;  %v4104_v33 = vperm.slane %v4098_v55, %v8374_v14 }
 0x4bf   : > { %v5991_v32 = vsel %vm5785_vm3, %v5990_v31, %v5989_v22  ;;  %v5466_v43 = vmax.f32 %v5260_v8, %v5263_v44  ;;  %v5156_v52 = vsel %vm4585_vm1, %v3686_v45, -inf  ;;  %v2676_v38 = vsel %vm1001_vm0, %v11966_v15, %v2675_v30 }
 0x4c0   : > { %v12162_v59 = vperm.slane %v12017_v4, %v8333_v3  ;;  %v12165_v1 = vsel %vm5789_vm4, %v5992_v46, %v5991_v32  ;;  %v6441_v25 = vperm.slane %v12150_v60, %v14760_v27  ;;  %5157 = vmax.xlane.f32.xlu1 %v5156_v52  ;;  %v4421_v44 = vrot.slane %v11969_v34, 4  ;;  %v14885_v4 = vld [vmem:[#allocation194_spill] sm:$0xff]  ;;  %v14890_v32 = vld [vmem:[#allocation132_spill] sm:$0xff] }
 0x4c1   : > { %14884 = vst [vmem:[#allocation85_spill] sm:$0xff] %v12165_v1  ;;  %v12172_v55 = vperm.slane %v12034_v16, %v8333_v3  ;;  %v5153_v15 = vsel %vm4585_vm1, %v3684_v9, -inf  ;;  %v4446_v45 = vsel %vm1001_vm0, %v4445_v35, %v12144_v21  ;;  %v4937_v30 = vsel %vm4585_vm1, %v2676_v38, -inf  ;;  %v14886_v16 = vld [vmem:[#allocation26_spill] sm:$0xff]  ;;  %v12188_v35 = vpop.xlane.xlu1 %4803 }
 0x4c2   : > { %14883 = vst [vmem:[#allocation170_spill] sm:$0xff] %v12162_v59  ;;  %v12179_v51 = vsel %vm5801_vm7, %v6441_v25, %v14885_v4  ;;  %5154 = vmax.xlane.f32.xlu0 %v5153_v15  ;;  %v4123_v31 = vrot.slane %v4080_v29, 4  ;;  %v4121_v52 = vrot.slane %v4104_v33, 4  ;;  %v14887_v22 = vrot.slane %v14886_v16, 4  ;;  %v14888_v25 = vld [vmem:[#allocation111_spill] sm:$0xff]  ;;  %v14899_v1 = vld [vmem:[#allocation142_spill] sm:$0xff] }
 0x4c3   : > { %4938 = vmax.xlane.f32.xlu2 %v4937_v30  ;;  %v3681_v9 = vrot.slane %v12130_v18, 4  ;;  %v2035_v38 = vrot.slane %v14888_v25, 4  ;;  %v12195_v4 = vperm.slane %v4446_v45, %v8374_v14  ;;  %v4729_v30 = vpop.xlane.xlu0 %4728  ;;  %v2047_v0 = vrot.slane %v14890_v32, 4  ;;  %v14891_v25 = vld [vmem:[#allocation160_spill] sm:$0xff] }
 0x4c4   : > { %v4424_v8 = vsel %vm1001_vm0, %v11969_v34, %v14887_v22  ;;  %v4124_v15 = vsel %vm1001_vm0, %v4104_v33, %v4123_v31  ;;  %v4099_v34 = vrot.slane %v12111_v12, 4  ;;  %v14889_v22 = vrot.slane %v14877_v40, 4  ;;  %v5269_v31 = vpop.xlane.xlu2 %5268  ;;  %v14900_v59 = vld [vmem:[#allocation168_spill] sm:$0xff] }
 0x4c5   : > { %v2036_v33 = vsel %vm1001_vm0, %v14891_v25, %v2035_v38  ;;  %v4122_v45 = vsel %vm1001_vm0, %v4121_v52, %v4080_v29  ;;  %v4422_v47 = vsel %vm1001_vm0, %v4421_v44, %v14886_v16  ;;  %v5467_v46 = vmax.f32 %v12079_v7, %v5269_v31  ;;  %v14895_v31 = vld [vmem:[#allocation116_spill] sm:$0xff] }
 0x4c6   : > { %v4076_v18 = vsel %vm1001_vm0, %v11936_v48, %v14889_v22  ;;  %v5237_v12 = vsel %vm4585_vm1, %v4124_v15, -inf  ;;  %v3682_v40 = vsel %vm1001_vm0, %v3681_v9, %v12090_v62  ;;  %v4100_v48 = vsel %vm1001_vm0, %v12060_v58, %v4099_v34  ;;  %v14892_v22 = vld [vmem:[#allocation186_spill] sm:$0xff]  ;;  %v14893_v15 = vld [vmem:[#allocation112_spill] sm:$0xff] }
 0x4c7   : > { %v4447_v32 = vrot.slane %v12144_v21, 4  ;;  %v2048_v38 = vsel %vm1001_vm0, %v14892_v22, %v2047_v0  ;;  %v4465_v29 = vrot.slane %v12195_v4, 4  ;;  %v12221_v44 = vperm.slane %v4076_v18, %v8374_v14 }
 0x4c8   : > { %5238 = vmax.xlane.f32.xlu1 %v5237_v12  ;;  %v6610_v7 = vperm.slane %v5466_v43, %v9248_v56  ;;  %v12224_v52 = vpack.c.bf16 %v5467_v46, %v5466_v43  ;;  %v6611_v62 = vperm.slane %v5467_v46, %v9265_v19  ;;  %v5234_v16 = vsel %vm4585_vm1, %v4122_v45, -inf  ;;  %v14894_v43 = vld [vmem:[#allocation42_spill] sm:$0xff] }
 0x4c9   : > { %v12229_v58 = vperm.slane %v2036_v33, %v8333_v3  ;;  %v5150_v21 = vsel %vm4585_vm1, %v3682_v40, -inf  ;;  %v12233_v0 = vperm.slane %v4422_v47, %v8374_v14  ;;  %v12236_v9 = vperm.slane %v4100_v48, %v8374_v14  ;;  %v4813_v25 = vpop.xlane.xlu1 %4812  ;;  %v14896_v48 = vld [vmem:[#allocation120_spill] sm:$0xff] }
 0x4ca   : > { %5235 = vmax.xlane.f32.xlu0 %v5234_v16  ;;  %v2493_v18 = vrot.slane %v14894_v43, 4  ;;  %v12241_v46 = vsel %vm5781_vm2, %v6611_v62, %v6610_v7  ;;  %v4448_v33 = vsel %vm1001_vm0, %v12121_v24, %v4447_v32  ;;  %v2056_v47 = vperm.slane %v2048_v38, %v8333_v3  ;;  %v14897_v16 = vld [vmem:[#allocation123_spill] sm:$0xff] }
 0x4cb   : > { %5151 = vmax.xlane.f32.xlu2 %v5150_v21  ;;  %v4466_v12 = vsel %vm1001_vm0, %v4465_v29, %v12233_v0  ;;  %v4127_v40 = vrot.slane %v12221_v44, 4  ;;  %v4810_v7 = vpop.xlane.xlu0 %4809  ;;  %v3687_v62 = vrot.slane %v12084_v53, 4  ;;  %v4432_v21 = vperm.slane %v4424_v8, %v8374_v14 }
 0x4cc   : > { %v2095_v24 = vrot.slane %v12229_v58, 4  ;;  %v12255_v32 = vmax.f32 %v4810_v7, %v4813_v25  ;;  %v4726_v45 = vpop.xlane.xlu2 %4725  ;;  %v4456_v29 = vperm.slane %v4448_v33, %v8374_v14  ;;  %v2494_v22 = vsel %vm1001_vm0, %v2493_v18, %v14899_v1 }
 0x4cd   : > { %v4128_v38 = vsel %vm1001_vm0, %v12236_v9, %v4127_v40  ;;  %v5377_v10 = vmax.f32 %v4726_v45, %v4729_v30  ;;  %v5318_v34 = vsel %vm4585_vm1, %v4466_v12, -inf  ;;  %v3688_v53 = vsel %vm1001_vm0, %v12087_v41, %v3687_v62 }
 0x4ce   : > { %14898 = vst [vmem:[#allocation115_spill] sm:$0xff] %v12255_v32  ;;  %v2481_v25 = vrot.slane %v14900_v59, 4  ;;  %v2096_v7 = vsel %vm1001_vm0, %v2056_v47, %v2095_v24  ;;  %v14902_v40 = vrot.slane %v14901_v26, 4  ;;  %v5243_v41 = vsel %vm4585_vm1, %v4128_v38, -inf  ;;  %v14905_v24 = vld [vmem:[#allocation128_spill] sm:$0xff] }
 0x4cf   : > { %v12273_v30 = vpack.c.bf16 %v5377_v10, %v12150_v60  ;;  %v6443_v18 = vperm.slane %v5377_v10, %v14781_v28  ;;  %v12278_v45 = vperm.slane %v2494_v22, %v8333_v3  ;;  %v5159_v12 = vsel %vm4585_vm1, %v3688_v53, -inf  ;;  %v14906_v38 = vld [vmem:[#allocation152_spill] sm:$0xff]  ;;  %v14907_v22 = vld [vmem:[#allocation97_spill] sm:$0xff] }
 0x4d0   : > { %5319 = vmax.xlane.f32.xlu1 %v5318_v34  ;;  %v2508_v33 = vsel %vm1001_vm0, %v14903_v23, %v14902_v40  ;;  %v4471_v34 = vrot.slane %v4432_v21, 4  ;;  %v4469_v62 = vrot.slane %v4456_v29, 4  ;;  %v2093_v6 = vrot.slane %v2056_v47, 4 }
 0x4d1   : > { %14904 = vst [vmem:[#allocation50_spill] sm:$0xff] %v12273_v30  ;;  %v6444_v40 = vsel %vm5805_vm8, %v6443_v18, %v12179_v51  ;;  %v12284_v60 = vpop.xlane.xlu1 %4893  ;;  %v4125_v10 = vrot.slane %v12236_v9, 4  ;;  %v3839_v30 = vrot.slane %v14906_v38, 4  ;;  %v12294_v11 = vperm.slane %v2096_v7, %v8374_v14  ;;  %v14909_v18 = vld [vmem:[#allocation65_spill] sm:$0xff]  ;;  %v14913_v7 = vld [vmem:[#allocation43_spill] sm:$0xff] }
 0x4d2   : > { %5244 = vmax.xlane.f32.xlu0 %v5243_v41  ;;  %v12290_v41 = vsel %vm6034_vm10, %v6444_v40, %v14907_v22  ;;  %v4472_v53 = vsel %vm1001_vm0, %v4456_v29, %v4471_v34  ;;  %v2482_v47 = vsel %vm1001_vm0, %v2481_v25, %v14893_v15  ;;  %v14912_v38 = vrot.slane %v14903_v23, 4 }
 0x4d3   : > { %5160 = vmax.xlane.f32.xlu2 %v5159_v12  ;;  %14908 = vst [vmem:[#allocation33_spill] sm:$0xff] %v12290_v41  ;;  %v4891_v51 = vpop.xlane.xlu0 %4890  ;;  %v14910_v12 = vld [vmem:[#allocation36_spill] sm:$0xff]  ;;  %v12307_v22 = vperm.slane %v2508_v33, %v8374_v14  ;;  %v2529_v29 = vrot.slane %v12278_v45, 4  ;;  %v3840_v34 = vsel %vm1001_vm0, %v14913_v7, %v3839_v30  ;;  %v4470_v41 = vsel %vm1001_vm0, %v4469_v62, %v4432_v21 }
 0x4d4   : > { %v14911_v8 = vrot.slane %v14910_v12, 4  ;;  %v2506_v40 = vsel %vm1001_vm0, %v14912_v38, %v14901_v26  ;;  %v4807_v25 = vpop.xlane.xlu2 %4806  ;;  %v14914_v43 = vrot.slane %v14909_v18, 4  ;;  %v5327_v26 = vsel %vm4585_vm1, %v4472_v53, -inf }
 0x4d5   : > { %v5390_v23 = vmax.f32 %v12188_v35, %v4807_v25  ;;  %v4126_v33 = vsel %vm1001_vm0, %v4125_v10, %v12221_v44  ;;  %v2094_v38 = vsel %vm1001_vm0, %v2093_v6, %v12229_v58  ;;  %v12324_v30 = vperm.slane %v2482_v47, %v8333_v3  ;;  %v14916_v10 = vld [vmem:[#allocation140_spill] sm:$0xff] }
 0x4d6   : > { %v2070_v9 = vsel %vm1001_vm0, %v14911_v8, %v14909_v18  ;;  %v2072_v8 = vsel %vm1001_vm0, %v14910_v12, %v14914_v43  ;;  %v2117_v21 = vrot.slane %v12294_v11, 4  ;;  %v12331_v43 = vperm.slane %v2506_v40, %v8374_v14 }
 0x4d7   : > { %v12328_v62 = vperm.slane %v2070_v9, %v8374_v14  ;;  %v12334_v35 = vperm.slane %v3840_v34, %v8333_v3  ;;  %v12337_v44 = vpack.c.bf16 %v12255_v32, %v5390_v23  ;;  %v6467_v6 = vperm.slane %v5390_v23, %v14598_v20  ;;  %v14929_v32 = vld [vmem:[#allocation175_spill] sm:$0xff] }
 0x4d8   : > { %5328 = vmax.xlane.f32.xlu1 %v5327_v26  ;;  %v5324_v58 = vsel %vm4585_vm1, %v4470_v41, -inf  ;;  %v5240_v47 = vsel %vm4585_vm1, %v4126_v33, -inf  ;;  %v12344_v18 = vperm.slane %v2072_v8, %v8374_v14  ;;  %v12347_v12 = vperm.slane %v2094_v38, %v8374_v14  ;;  %v14919_v8 = vld [vmem:[#allocation179_spill] sm:$0xff]  ;;  %v14920_v26 = vld [vmem:[#allocation124_spill] sm:$0xff]  ;;  %v14921_v33 = vld [vmem:[#allocation25_spill] sm:$0xff] }
 0x4d9   : > { %14915 = vst [vmem:[#allocation83_spill] sm:$0xff] %v12337_v44  ;;  %v12352_v40 = vsel %vm5793_vm5, %v6467_v6, %v12118_v37  ;;  %v4927_v7 = vpop.xlane.xlu1 %4926  ;;  %v2530_v41 = vsel %vm1001_vm0, %v2529_v29, %v12324_v30  ;;  %v14918_v25 = vrot.slane %v14897_v16, 4  ;;  %v12363_v38 = vmax.f32 %v14921_v33, %v14920_v26  ;;  %v14927_v44 = vld [vmem:[#allocation87_spill] sm:$0xff] }
 0x4da   : > { %5325 = vmax.xlane.f32.xlu0 %v5324_v58  ;;  %14917 = vst [vmem:[#allocation14_spill] sm:$0xff] %v12352_v40  ;;  %v2118_v37 = vsel %vm1001_vm0, %v2117_v21, %v12344_v18  ;;  %v2115_v6 = vrot.slane %v12328_v62, 4  ;;  %v3885_v29 = vrot.slane %v12334_v35, 4  ;;  %v4467_v53 = vrot.slane %v12233_v0, 4 }
 0x4db   : > { %5241 = vmax.xlane.f32.xlu2 %v5240_v47  ;;  %v3828_v23 = vsel %vm1001_vm0, %v14919_v8, %v14918_v25  ;;  %v4924_v47 = vpop.xlane.xlu0 %4923  ;;  %v2555_v16 = vrot.slane %v12331_v43, 4  ;;  %v2536_v21 = vperm.slane %v2530_v41, %v8374_v14  ;;  %v4820_v34 = vsel %vm4585_vm1, %v2118_v37, -inf }
 0x4dc   : > { %v12373_v8 = vmax.f32 %v4924_v47, %v4927_v7  ;;  %v4888_v26 = vpop.xlane.xlu2 %4887  ;;  %v2116_v33 = vsel %vm1001_vm0, %v12347_v12, %v2115_v6  ;;  %v12379_v9 = vperm.slane %v3828_v23, %v8333_v3  ;;  %v4468_v0 = vsel %vm1001_vm0, %v12195_v4, %v4467_v53  ;;  %v14923_v23 = vld [vmem:[#allocation148_spill] sm:$0xff] }
 0x4dd   : > { %v5404_v58 = vmax.f32 %v4888_v26, %v4891_v51  ;;  %v6585_v25 = vperm.slane %v12363_v38, %v14802_v49  ;;  %v14922_v7 = vrot.slane %v11710_v13, 4  ;;  %v12392_v41 = vperm.slane %v11778_v17, %v8374_v14  ;;  %v14924_v51 = vld [vmem:[#allocation94_spill] sm:$0xff] }
 0x4de   : > { %v14925_v47 = vrot.slane %v14924_v51, 4  ;;  %v14926_v26 = vld [vmem:[#allocation178_spill] sm:$0xff]  ;;  %v3886_v13 = vsel %vm1001_vm0, %v3885_v29, %v12379_v9  ;;  %v5321_v17 = vsel %vm4585_vm1, %v4468_v0, -inf  ;;  %v2553_v40 = vrot.slane %v2536_v21, 4 }
 0x4df   : > { %v3862_v6 = vsel %vm1001_vm0, %v14922_v7, %v11079_v5  ;;  %v4273_v4 = vrot.slane %v14926_v26, 4  ;;  %v6493_v53 = vperm.slane %v5404_v58, %v9325_v54  ;;  %v14928_v5 = vld [vmem:[#allocation71_spill] sm:$0xff]  ;;  %v12408_v51 = vsel %vm5789_vm4, %v6585_v25, %v14929_v32 }
 0x4e0   : > { %4821 = vmax.xlane.f32.xlu1 %v4820_v34  ;;  %v2294_v37 = vsel %vm1001_vm0, %v14925_v47, %v14923_v23  ;;  %v4817_v34 = vsel %vm4585_vm1, %v2116_v33, -inf  ;;  %v5506_v7 = vpack.c.bf16 %v14928_v5, %v14927_v44  ;;  %v14930_v23 = vld [vmem:[#allocation15_spill] sm:$0xff]  ;;  %v2113_v33 = vrot.slane %v12347_v12, 4 }
 0x4e1   : > { %v6494_v47 = vsel %vm5785_vm3, %v6493_v53, %v14930_v23  ;;  %v12412_v26 = vpop.xlane.xlu1 %5103  ;;  %v12416_v29 = vperm.slane %v3862_v6, %v8374_v14  ;;  %v2119_v44 = vrot.slane %v12344_v18, 4  ;;  %v2531_v0 = vrot.slane %v12324_v30, 4  ;;  %v14931_v53 = vld [vmem:[#allocation154_spill] sm:$0xff]  ;;  %v14932_v12 = vld [vmem:[#allocation19_spill] sm:$0xff] }
 0x4e2   : > { %4818 = vmax.xlane.f32.xlu0 %v4817_v34  ;;  %v2556_v34 = vsel %vm1001_vm0, %v2536_v21, %v2555_v16  ;;  %v12422_v32 = vperm.slane %v3886_v13, %v8374_v14  ;;  %v4285_v23 = vrot.slane %v14932_v12, 4  ;;  %v12430_v1 = vperm.slane %v2294_v37, %v8374_v14  ;;  %v14933_v13 = vld [vmem:[#allocation157_spill] sm:$0xff] }
 0x4e3   : > { %5322 = vmax.xlane.f32.xlu2 %v5321_v17  ;;  %v4274_v17 = vsel %vm1001_vm0, %v4273_v4, %v14896_v48  ;;  %v4933_v6 = vpop.xlane.xlu0 %4932  ;;  %v5696_v18 = vunpack.c.l.b16 %v5506_v7  ;;  %v5697_v30 = vunpack.c.h.b16 %v5506_v7  ;;  %v2554_v16 = vsel %vm1001_vm0, %v2553_v40, %v12331_v43 }
 0x4e4   : > { %v4897_v2 = vpop.xlane.xlu2 %4896  ;;  %v2532_v21 = vsel %vm1001_vm0, %v12278_v45, %v2531_v0  ;;  %v4901_v4 = vsel %vm4585_vm1, %v2556_v34, -inf  ;;  %v2114_v12 = vsel %vm1001_vm0, %v2113_v33, %v12328_v62  ;;  %v14934_v37 = vrot.slane %v14893_v15, 4 }
 0x4e5   : > { %v5405_v25 = vmax.f32 %v12284_v60, %v4897_v2  ;;  %v3887_v48 = vrot.slane %v12379_v9, 4  ;;  %v12447_v43 = vperm.slane %v4274_v17, %v8333_v3  ;;  %v3905_v45 = vrot.slane %v12422_v32, 4 }
 0x4e6   : > { %v2484_v7 = vsel %vm1001_vm0, %v14900_v59, %v14934_v37  ;;  %v4898_v60 = vsel %vm4585_vm1, %v2554_v16, -inf  ;;  %v12453_v62 = vperm.slane %v2532_v21, %v8374_v14  ;;  %v4286_v15 = vsel %vm1001_vm0, %v4285_v23, %v14931_v53 }
 0x4e7   : > { %v5507_v40 = vpack.c.bf16 %v5405_v25, %v5404_v58  ;;  %v6495_v2 = vperm.slane %v5405_v25, %v14802_v49  ;;  %v5882_v59 = vperm.slane %v5696_v18, %v9248_v56  ;;  %v5883_v9 = vperm.slane %v5697_v30, %v9265_v19  ;;  %v14937_v18 = vld [vmem:[#allocation164_spill] sm:$0xff] }
 0x4e8   : > { %4902 = vmax.xlane.f32.xlu1 %v4901_v4  ;;  %v4814_v33 = vsel %vm4585_vm1, %v2114_v12, -inf  ;;  %v3888_v17 = vsel %vm1001_vm0, %v12334_v35, %v3887_v48  ;;  %v12466_v16 = vperm.slane %v2484_v7, %v8333_v3  ;;  %v14936_v23 = vrot.slane %v14838_v50, 4 }
 0x4e9   : > { %v5698_v0 = vunpack.c.l.b16 %v5507_v40  ;;  %v5699_v34 = vunpack.c.h.b16 %v5507_v40  ;;  %v12461_v58 = vsel %vm5789_vm4, %v6495_v2, %v6494_v47  ;;  %v5113_v25 = vpop.xlane.xlu1 %5112  ;;  %v4323_v12 = vrot.slane %v12447_v43, 4  ;;  %v14940_v40 = vld [vmem:[#allocation58_spill] sm:$0xff] }
 0x4ea   : > { %4899 = vmax.xlane.f32.xlu0 %v4898_v60  ;;  %14935 = vst [vmem:[#allocation187_spill] sm:$0xff] %v12461_v58  ;;  %v2260_v30 = vsel %vm1001_vm0, %v14937_v18, %v14936_v23  ;;  %v3906_v21 = vsel %vm1001_vm0, %v3905_v45, %v12416_v29  ;;  %v4292_v47 = vperm.slane %v4286_v15, %v8333_v3  ;;  %v14938_v35 = vrot.slane %v12307_v22, 4 }
 0x4eb   : > { %4815 = vmax.xlane.f32.xlu2 %v4814_v33  ;;  %v5885_v4 = vperm.slane %v5698_v0, %v9325_v54  ;;  %v5887_v37 = vperm.slane %v5699_v34, %v14802_v49  ;;  %v5110_v48 = vpop.xlane.xlu0 %5109  ;;  %v14939_v7 = vrot.slane %v14824_v61, 4  ;;  %v5884_v60 = vsel %vm5781_vm2, %v5883_v9, %v5882_v59  ;;  %v14942_v9 = vld [vmem:[#allocation45_spill] sm:$0xff] }
 0x4ec   : > { %v2560_v50 = vsel %vm1001_vm0, %v12453_v62, %v14938_v35  ;;  %v12487_v45 = vmax.f32 %v5110_v48, %v5113_v25  ;;  %v4930_v15 = vpop.xlane.xlu2 %4929  ;;  %v3896_v33 = vperm.slane %v3888_v17, %v8374_v14  ;;  %v5198_v23 = vsel %vm4585_vm1, %v3906_v21, -inf  ;;  %v14943_v21 = vld [vmem:[#allocation74_spill] sm:$0xff] }
 0x4ed   : > { %v2272_v2 = vsel %vm1001_vm0, %v14940_v40, %v14939_v7  ;;  %v5886_v0 = vsel %vm5785_vm3, %v5885_v4, %v5884_v60  ;;  %v5411_v34 = vmax.f32 %v4930_v15, %v4933_v6  ;;  %v2120_v18 = vsel %vm1001_vm0, %v12294_v11, %v2119_v44 }
 0x4ee   : > { %v12495_v61 = vperm.slane %v2260_v30, %v8333_v3  ;;  %v12498_v35 = vsel %vm5789_vm4, %v5887_v37, %v5886_v0  ;;  %v4907_v59 = vsel %vm4585_vm1, %v2560_v50, -inf  ;;  %v12503_v25 = vperm.slane %v14942_v9, %v8374_v14 }
 0x4ef   : > { %14941 = vst [vmem:[#allocation80_spill] sm:$0xff] %v12498_v35  ;;  %v6505_v6 = vperm.slane %v12373_v8, %v9248_v56  ;;  %v12508_v17 = vpack.c.bf16 %v5411_v34, %v12373_v8  ;;  %v6506_v11 = vperm.slane %v5411_v34, %v9265_v19  ;;  %v4324_v44 = vsel %vm1001_vm0, %v4292_v47, %v4323_v12 }
 0x4f0   : > { %5199 = vmax.xlane.f32.xlu1 %v5198_v23  ;;  %v12513_v30 = vperm.slane %v2272_v2, %v8333_v3  ;;  %v2717_v4 = vrot.slane %v14943_v21, 4  ;;  %v4823_v37 = vsel %vm4585_vm1, %v2120_v18, -inf  ;;  %v3909_v48 = vrot.slane %v3896_v33, 4  ;;  %v14945_v18 = vld [vmem:[#allocation147_spill] sm:$0xff] }
 0x4f1   : > { %v4321_v50 = vrot.slane %v4292_v47, 4  ;;  %v12518_v7 = vsel %vm5781_vm2, %v6506_v11, %v6505_v6  ;;  %v12520_v8 = vpop.xlane.xlu1 %5193  ;;  %v2557_v40 = vrot.slane %v12453_v62, 4  ;;  %v3907_v12 = vrot.slane %v12416_v29, 4  ;;  %v14948_v6 = vld [vmem:[#allocation166_spill] sm:$0xff]  ;;  %v14960_v47 = vld [vmem:[#allocation64_spill] sm:$0xff] }
 0x4f2   : > { %4908 = vmax.xlane.f32.xlu0 %v4907_v59  ;;  %v14944_v60 = vrot.slane %v12392_v41, 4  ;;  %v12529_v0 = vperm.slane %v4324_v44, %v8374_v14  ;;  %v14946_v59 = vrot.slane %v14945_v18, 4  ;;  %v14947_v29 = vrot.slane %v12172_v55, 4 }
 0x4f3   : > { %4824 = vmax.xlane.f32.xlu2 %v4823_v37  ;;  %v5191_v23 = vpop.xlane.xlu0 %5190  ;;  %v2705_v11 = vrot.slane %v14948_v6, 4  ;;  %v2317_v44 = vrot.slane %v12513_v30, 4  ;;  %v2718_v37 = vsel %vm1001_vm0, %v2717_v4, %v14916_v10  ;;  %v3910_v2 = vsel %vm1001_vm0, %v3909_v48, %v12392_v41 }
 0x4f4   : > { %v3912_v15 = vsel %vm1001_vm0, %v3896_v33, %v14944_v60  ;;  %v4300_v62 = vsel %vm1001_vm0, %v12172_v55, %v14946_v59  ;;  %v4298_v9 = vsel %vm1001_vm0, %v14947_v29, %v14945_v18  ;;  %v5107_v60 = vpop.xlane.xlu2 %5106  ;;  %v2558_v55 = vsel %vm1001_vm0, %v2557_v40, %v12307_v22 }
 0x4f5   : > { %v5440_v59 = vmax.f32 %v12412_v26, %v5107_v60  ;;  %v5207_v5 = vsel %vm4585_vm1, %v3912_v15, -inf  ;;  %v4322_v18 = vsel %vm1001_vm0, %v4321_v50, %v12447_v43  ;;  %v14949_v29 = vrot.slane %v14895_v31, 4  ;;  %v14952_v60 = vld [vmem:[#allocation183_spill] sm:$0xff] }
 0x4f6   : > { %v12559_v4 = vperm.slane %v4300_v62, %v8374_v14  ;;  %v4349_v41 = vrot.slane %v12529_v0, 4  ;;  %v12563_v26 = vperm.slane %v4298_v9, %v8374_v14  ;;  %v12566_v48 = vperm.slane %v2718_v37, %v8333_v3 }
 0x4f7   : > { %v2708_v33 = vsel %vm1001_vm0, %v14948_v6, %v14949_v29  ;;  %v12569_v22 = vpack.c.bf16 %v12487_v45, %v5440_v59  ;;  %v6561_v43 = vperm.slane %v5440_v59, %v14760_v27  ;;  %v5204_v50 = vsel %vm4585_vm1, %v3910_v2, -inf  ;;  %v14951_v6 = vld [vmem:[#allocation70_spill] sm:$0xff]  ;;  %v14953_v59 = vld [vmem:[#allocation55_spill] sm:$0xff] }
 0x4f8   : > { %5208 = vmax.xlane.f32.xlu1 %v5207_v5  ;;  %v6563_v5 = vperm.slane %v12487_v45, %v14781_v28  ;;  %v4904_v40 = vsel %vm4585_vm1, %v2558_v55, -inf  ;;  %v12577_v15 = vperm.slane %v4322_v18, %v8374_v14  ;;  %v2318_v62 = vsel %vm1001_vm0, %v2317_v44, %v12495_v61  ;;  %v14957_v44 = vld [vmem:[#allocation133_spill] sm:$0xff] }
 0x4f9   : > { %14950 = vst [vmem:[#allocation99_spill] sm:$0xff] %v12569_v22  ;;  %v2706_v9 = vsel %vm1001_vm0, %v2705_v11, %v14895_v31  ;;  %v6562_v37 = vsel %vm5801_vm7, %v6561_v43, %v14951_v6  ;;  %v5275_v2 = vpop.xlane.xlu1 %5274  ;;  %v14954_v45 = vrot.slane %v14953_v59, 4  ;;  %v14955_v55 = vrot.slane %v14952_v60, 4 }
 0x4fa   : > { %5205 = vmax.xlane.f32.xlu0 %v5204_v50  ;;  %v14956_v50 = vld [vmem:[#allocation77_spill] sm:$0xff]  ;;  %v12598_v31 = vsel %vm5805_vm8, %v6563_v5, %v6562_v37  ;;  %v4350_v11 = vsel %vm1001_vm0, %v4349_v41, %v12559_v4  ;;  %v4347_v43 = vrot.slane %v12563_v26, 4  ;;  %v2753_v6 = vrot.slane %v12566_v48, 4  ;;  %v14958_v5 = vld [vmem:[#allocation199_spill] sm:$0xff]  ;;  %v14959_v37 = vld [vmem:[#allocation60_spill] sm:$0xff] }
 0x4fb   : > { %4905 = vmax.xlane.f32.xlu2 %v4904_v40  ;;  %v2730_v29 = vsel %vm1001_vm0, %v14954_v45, %v14952_v60  ;;  %v2732_v18 = vsel %vm1001_vm0, %v14953_v59, %v14955_v55  ;;  %v12595_v34 = vmax.f32 %v14957_v44, %v14956_v50  ;;  %v12604_v40 = vperm.slane %v2708_v33, %v8333_v3  ;;  %v5272_v60 = vpop.xlane.xlu0 %5271 }
 0x4fc   : > { %v3908_v59 = vsel %vm1001_vm0, %v12422_v32, %v3907_v12  ;;  %v2324_v45 = vperm.slane %v2318_v62, %v8374_v14  ;;  %v2712_v55 = vperm.slane %v2706_v9, %v8333_v3  ;;  %v5530_v50 = vpack.c.bf16 %v14959_v37, %v14958_v5  ;;  %v5188_v41 = vpop.xlane.xlu2 %5187 }
 0x4fd   : > { %v12613_v44 = vmax.f32 %v5272_v60, %v5275_v2  ;;  %v4348_v33 = vsel %vm1001_vm0, %v12577_v15, %v4347_v43  ;;  %v5531_v22 = vpack.c.bf16 %v12363_v38, %v14960_v47  ;;  %v5454_v35 = vmax.f32 %v5188_v41, %v5191_v23  ;;  %v14962_v60 = vld [vmem:[#allocation21_spill] sm:$0xff] }
 0x4fe   : > { %v5288_v58 = vsel %vm4585_vm1, %v4350_v11, -inf  ;;  %v12621_v32 = vperm.slane %v2732_v18, %v8374_v14  ;;  %v14961_v12 = vrot.slane %v14875_v39, 4  ;;  %v6454_v9 = vperm.slane %v12595_v34, %v14607_v36 }
 0x4ff   : > { %v6613_v2 = vperm.slane %v12613_v44, %v9325_v54  ;;  %v5201_v38 = vsel %vm4585_vm1, %v3908_v59, -inf  ;;  %v6587_v47 = vperm.slane %v5454_v35, %v14598_v20  ;;  %v5285_v23 = vsel %vm4585_vm1, %v4348_v33, -inf }
 0x500   : > { %v4052_v62 = vsel %vm1001_vm0, %v14866_v42, %v14961_v12  ;;  %5289 = vmax.xlane.f32.xlu1 %v5288_v58  ;;  %v2337_v18 = vrot.slane %v2324_v45, 4  ;;  %v2754_v11 = vsel %vm1001_vm0, %v2753_v6, %v2712_v55  ;;  %v5744_v39 = vunpack.c.l.b16 %v5530_v50 }
 0x501   : > { %v5745_v43 = vunpack.c.h.b16 %v5530_v50  ;;  %v12637_v42 = vsel %vm5785_vm3, %v6613_v2, %v12241_v46  ;;  %v12641_v5 = vsel %vm5797_vm6, %v6454_v9, %v14962_v60  ;;  %v5746_v58 = vunpack.c.l.b16 %v5531_v22  ;;  %v12645_v37 = vpop.xlane.xlu1 %5307 }
 0x502   : > { %5286 = vmax.xlane.f32.xlu0 %v5285_v23  ;;  %v6588_v59 = vsel %vm5793_vm5, %v6587_v47, %v12408_v51  ;;  %v4345_v6 = vrot.slane %v12577_v15, 4  ;;  %v12649_v50 = vperm.slane %v2730_v29, %v8374_v14  ;;  %v2755_v41 = vrot.slane %v2712_v55, 4  ;;  %v14964_v51 = vld [vmem:[#allocation184_spill] sm:$0xff] }
 0x503   : > { %5202 = vmax.xlane.f32.xlu2 %v5201_v38  ;;  %v12652_v46 = vperm.slane %v4052_v62, %v8333_v3  ;;  %v14963_v33 = vrot.slane %v12430_v1, 4  ;;  %v12658_v9 = vperm.slane %v2754_v11, %v8374_v14  ;;  %v4497_v2 = vrot.slane %v14964_v51, 4  ;;  %v5281_v29 = vpop.xlane.xlu0 %5280 }
 0x504   : > { %v14965_v38 = vrot.slane %v14905_v24, 4  ;;  %v14966_v55 = vrot.slane %v12495_v61, 4  ;;  %v5973_v23 = vperm.slane %v5745_v43, %v9265_v19  ;;  %v5747_v11 = vunpack.c.h.b16 %v5531_v22  ;;  %v5197_v60 = vpop.xlane.xlu2 %5196  ;;  %v14968_v43 = vld [vmem:[#allocation75_spill] sm:$0xff] }
 0x505   : > { %v2340_v12 = vsel %vm1001_vm0, %v2324_v45, %v14963_v33  ;;  %v5972_v45 = vperm.slane %v5744_v39, %v9248_v56  ;;  %v2338_v33 = vsel %vm1001_vm0, %v2337_v18, %v12430_v1  ;;  %v14967_v39 = vrot.slane %v14864_v57, 4 }
 0x506   : > { %v12665_v15 = vsel %vm1001_vm0, %v14964_v51, %v14965_v38  ;;  %v2320_v62 = vsel %vm1001_vm0, %v12513_v30, %v14966_v55  ;;  %v5975_v51 = vperm.slane %v5746_v58, %v9325_v54  ;;  %v5455_v38 = vmax.f32 %v12520_v8, %v5197_v60 }
 0x507   : > { %v4865_v61 = vsel %vm4585_vm1, %v2340_v12, -inf  ;;  %v4346_v30 = vsel %vm1001_vm0, %v4345_v6, %v12563_v26  ;;  %v4111_v55 = vrot.slane %v12652_v46, 4  ;;  %v4064_v22 = vsel %vm1001_vm0, %v14860_v63, %v14967_v39 }
 0x508   : > { %v4509_v47 = vrot.slane %v14968_v43, 4  ;;  %4866 = vmax.xlane.f32.xlu1 %v4865_v61  ;;  %v2777_v1 = vrot.slane %v12658_v9, 4  ;;  %v5532_v18 = vpack.c.bf16 %v5455_v38, %v5454_v35  ;;  %v6589_v8 = vperm.slane %v5455_v38, %v14607_v36 }
 0x509   : > { %v4862_v58 = vsel %vm4585_vm1, %v2338_v33, -inf  ;;  %v12691_v12 = vperm.slane %v2320_v62, %v8374_v14  ;;  %v5974_v26 = vsel %vm5781_vm2, %v5973_v23, %v5972_v45  ;;  %v5977_v57 = vperm.slane %v5747_v11, %v14802_v49  ;;  %v5317_v62 = vpop.xlane.xlu1 %5316 }
 0x50a   : > { %4863 = vmax.xlane.f32.xlu0 %v4862_v58  ;;  %v5282_v63 = vsel %vm4585_vm1, %v4346_v30, -inf  ;;  %v2756_v6 = vsel %vm1001_vm0, %v12566_v48, %v2755_v41  ;;  %v5976_v60 = vsel %vm5785_vm3, %v5975_v51, %v5974_v26  ;;  %v5748_v35 = vunpack.c.l.b16 %v5532_v18 }
 0x50b   : > { %v5749_v61 = vunpack.c.h.b16 %v5532_v18  ;;  %v12700_v38 = vsel %vm5797_vm6, %v6589_v8, %v6588_v59  ;;  %5283 = vmax.xlane.f32.xlu2 %v5282_v63  ;;  %v4072_v33 = vperm.slane %v4064_v22, %v8333_v3  ;;  %v4510_v45 = vsel %vm1001_vm0, %v4509_v47, %v14933_v13 }
 0x50c   : > { %v2778_v23 = vsel %vm1001_vm0, %v2777_v1, %v12649_v50  ;;  %v4351_v11 = vrot.slane %v12559_v4, 4  ;;  %v5979_v48 = vperm.slane %v5748_v35, %v14598_v20  ;;  %v5314_v51 = vpop.xlane.xlu0 %5313  ;;  %v14969_v59 = vrot.slane %v12503_v25, 4 }
 0x50d   : > { %v5981_v41 = vperm.slane %v5749_v61, %v14607_v36  ;;  %v2764_v39 = vperm.slane %v2756_v6, %v8374_v14  ;;  %v5978_v22 = vsel %vm5789_vm4, %v5977_v57, %v5976_v60  ;;  %v5760_v47 = vunpack.c.l.b16 %v12224_v52  ;;  %v5278_v4 = vpop.xlane.xlu2 %5277 }
 0x50e   : > { %v2344_v30 = vsel %vm1001_vm0, %v12691_v12, %v14969_v59  ;;  %v5761_v1 = vunpack.c.h.b16 %v12224_v52  ;;  %v5475_v18 = vmax.f32 %v5314_v51, %v5317_v62  ;;  %v5980_v8 = vsel %vm5793_vm5, %v5979_v48, %v5978_v22  ;;  %v14971_v59 = vld [vmem:[#allocation158_spill] sm:$0xff]  ;;  %v14973_v22 = vld [vmem:[#allocation73_spill] sm:$0xff] }
 0x50f   : > { %v5469_v58 = vmax.f32 %v5278_v4, %v5281_v29  ;;  %v4946_v26 = vsel %vm4585_vm1, %v2778_v23, -inf  ;;  %v4352_v63 = vsel %vm1001_vm0, %v12529_v0, %v4351_v11  ;;  %v4498_v35 = vsel %vm1001_vm0, %v4497_v2, %v14905_v24  ;;  %v14976_v4 = vld [vmem:[#allocation42_spill] sm:$0xff] }
 0x510   : > { %v4112_v6 = vsel %vm1001_vm0, %v4072_v33, %v4111_v55  ;;  %v12726_v57 = vperm.slane %v4510_v45, %v8333_v3  ;;  %v12729_v52 = vsel %vm5797_vm6, %v5981_v41, %v5980_v8  ;;  %4947 = vmax.xlane.f32.xlu1 %v4946_v26  ;;  %v4871_v61 = vsel %vm4585_vm1, %v2344_v30, -inf }
 0x511   : > { %v5539_v60 = vpack.c.bf16 %v5469_v58, %v12613_v44  ;;  %v6615_v29 = vperm.slane %v5469_v58, %v14802_v49  ;;  %v2341_v0 = vrot.slane %v12691_v12, 4  ;;  %v6002_v62 = vperm.slane %v5760_v47, %v9248_v56 }
 0x512   : > { %v6003_v24 = vperm.slane %v5761_v1, %v9265_v19  ;;  %4872 = vmax.xlane.f32.xlu0 %v4871_v61  ;;  %v5291_v2 = vsel %vm4585_vm1, %v4352_v63, -inf  ;;  %v2781_v55 = vrot.slane %v2764_v39, 4  ;;  %v4109_v45 = vrot.slane %v4072_v33, 4  ;;  %v12742_v48 = vpop.xlane.xlu1 %4773 }
 0x513   : > { %v5762_v23 = vunpack.c.l.b16 %v5539_v60  ;;  %v5763_v11 = vunpack.c.h.b16 %v5539_v60  ;;  %v12740_v44 = vsel %vm5789_vm4, %v6615_v29, %v12637_v42  ;;  %5292 = vmax.xlane.f32.xlu2 %v5291_v2  ;;  %v12745_v12 = vperm.slane %v4498_v35, %v8333_v3  ;;  %v14974_v42 = vld [vmem:[#allocation142_spill] sm:$0xff] }
 0x514   : > { %v14970_v41 = vrot.slane %v12621_v32, 4  ;;  %v14972_v30 = vrot.slane %v14971_v59, 4  ;;  %v12755_v47 = vperm.slane %v4112_v6, %v8374_v14  ;;  %v14975_v1 = vrot.slane %v14974_v42, 4  ;;  %v4771_v63 = vpop.xlane.xlu0 %4770  ;;  %v14979_v42 = vld [vmem:[#allocation145_spill] sm:$0xff] }
 0x515   : > { %v6005_v58 = vperm.slane %v5762_v23, %v9325_v54  ;;  %v6007_v26 = vperm.slane %v5763_v11, %v14802_v49  ;;  %v4545_v60 = vrot.slane %v12726_v57, 4  ;;  %v6004_v6 = vsel %vm5781_vm2, %v6003_v24, %v6002_v62  ;;  %v5311_v29 = vpop.xlane.xlu2 %5310 }
 0x516   : > { %v2784_v51 = vsel %vm1001_vm0, %v2764_v39, %v14970_v41  ;;  %v4088_v33 = vsel %vm1001_vm0, %v14973_v22, %v14972_v30  ;;  %v2496_v8 = vsel %vm1001_vm0, %v14976_v4, %v14975_v1  ;;  %v14977_v39 = vrot.slane %v14973_v22, 4  ;;  %v14978_v22 = vld [vmem:[#allocation88_spill] sm:$0xff] }
 0x517   : > { %v2782_v61 = vsel %vm1001_vm0, %v2781_v55, %v12621_v32  ;;  %v2342_v2 = vsel %vm1001_vm0, %v2341_v0, %v12503_v25  ;;  %v6006_v23 = vsel %vm5785_vm3, %v6005_v58, %v6004_v6  ;;  %v5474_v11 = vmax.f32 %v12645_v37, %v5311_v29  ;;  %v14983_v6 = vld [vmem:[#allocation178_spill] sm:$0xff] }
 0x518   : > { %v4086_v35 = vsel %vm1001_vm0, %v14977_v39, %v14971_v59  ;;  %v4955_v41 = vsel %vm4585_vm1, %v2784_v51, -inf  ;;  %v4110_v59 = vsel %vm1001_vm0, %v4109_v45, %v12652_v46  ;;  %v12779_v30 = vperm.slane %v2496_v8, %v8333_v3  ;;  %v14981_v39 = vld [vmem:[#allocation120_spill] sm:$0xff] }
 0x519   : > { %v12782_v62 = vsel %vm5789_vm4, %v6007_v26, %v6006_v23  ;;  %4956 = vmax.xlane.f32.xlu1 %v4955_v41  ;;  %v4133_v32 = vrot.slane %v12755_v47, 4  ;;  %v12786_v25 = vperm.slane %v4086_v35, %v8374_v14  ;;  %v6626_v0 = vperm.slane %v5475_v18, %v9265_v19 }
 0x51a   : > { %v12789_v37 = vpack.c.bf16 %v5475_v18, %v5474_v11  ;;  %v6625_v24 = vperm.slane %v5474_v11, %v9248_v56  ;;  %v4952_v46 = vsel %vm4585_vm1, %v2782_v61, -inf  ;;  %v4868_v55 = vsel %vm4585_vm1, %v2342_v2, -inf }
 0x51b   : > { %4953 = vmax.xlane.f32.xlu0 %v4952_v46  ;;  %v12795_v45 = vperm.slane %v4088_v33, %v8374_v14  ;;  %v12798_v51 = vperm.slane %v4110_v59, %v8374_v14  ;;  %v14980_v1 = vrot.slane %v14979_v42, 4  ;;  %v12806_v18 = vperm.slane %v12665_v15, %v8333_v3  ;;  %4869 = vmax.xlane.f32.xlu2 %v4868_v55  ;;  %v4855_v33 = vpop.xlane.xlu1 %4854 }
 0x51c   : > { %v4547_v8 = vrot.slane %v12745_v12, 4  ;;  %v12810_v58 = vsel %vm5781_vm2, %v6626_v0, %v6625_v24  ;;  %v4546_v26 = vsel %vm1001_vm0, %v4545_v60, %v12745_v12  ;;  %v14982_v35 = vrot.slane %v14981_v39, 4  ;;  %v14986_v60 = vld [vmem:[#allocation19_spill] sm:$0xff] }
 0x51d   : > { %v4522_v4 = vsel %vm1001_vm0, %v14980_v1, %v14978_v22  ;;  %v4134_v61 = vsel %vm1001_vm0, %v4133_v32, %v12795_v45  ;;  %v4131_v15 = vrot.slane %v12786_v25, 4  ;;  %v2779_v2 = vrot.slane %v12649_v50, 4  ;;  %v4852_v0 = vpop.xlane.xlu0 %4851  ;;  %v14987_v32 = vld [vmem:[#allocation103_spill] sm:$0xff]  ;;  %v4768_v50 = vpop.xlane.xlu2 %4767 }
 0x51e   : > { %v4276_v29 = vsel %vm1001_vm0, %v14983_v6, %v14982_v35  ;;  %v2541_v23 = vrot.slane %v12779_v30, 4  ;;  %v14984_v11 = vrot.slane %v14916_v10, 4  ;;  %v14985_v12 = vrot.slane %v14931_v53, 4 }
 0x51f   : > { %v4528_v24 = vperm.slane %v4522_v4, %v8374_v14  ;;  %v6600_v46 = vperm.slane %v14987_v32, %v14802_v49  ;;  %v12834_v55 = vmax.f32 %v4852_v0, %v4855_v33  ;;  %v4132_v10 = vsel %vm1001_vm0, %v12798_v51, %v4131_v15  ;;  %v14991_v32 = vld [vmem:[#allocation185_spill] sm:$0xff] }
 0x520   : > { %v2720_v41 = vsel %vm1001_vm0, %v14943_v21, %v14984_v11  ;;  %v4288_v59 = vsel %vm1001_vm0, %v14986_v60, %v14985_v12  ;;  %v4552_v1 = vperm.slane %v4546_v26, %v8374_v14  ;;  %v12840_v21 = vperm.slane %v4276_v29, %v8333_v3  ;;  %v14988_v26 = vld [vmem:[#allocation23_spill] sm:$0xff]  ;;  %v14990_v11 = vld [vmem:[#allocation86_spill] sm:$0xff] }
 0x521   : > { %v5384_v53 = vmax.f32 %v4768_v50, %v4771_v63  ;;  %v5252_v39 = vsel %vm4585_vm1, %v4134_v61, -inf  ;;  %v2780_v4 = vsel %vm1001_vm0, %v12658_v9, %v2779_v2  ;;  %v12846_v35 = vperm.slane %v2720_v41, %v8333_v3 }
 0x522   : > { %v12849_v33 = vperm.slane %v4288_v59, %v8333_v3  ;;  %v6482_v6 = vperm.slane %v12834_v55, %v14598_v20  ;;  %5253 = vmax.xlane.f32.xlu1 %v5252_v39  ;;  %v12855_v29 = vsel %vm5789_vm4, %v6600_v46, %v14988_v26  ;;  %v14989_v63 = vrot.slane %v14933_v13, 4  ;;  %v14992_v46 = vld [vmem:[#allocation53_spill] sm:$0xff]  ;;  %v14996_v26 = vld [vmem:[#allocation62_spill] sm:$0xff] }
 0x523   : > { %v6456_v9 = vperm.slane %v5384_v53, %v14760_v27  ;;  %v5249_v15 = vsel %vm4585_vm1, %v4132_v10, -inf  ;;  %v2542_v2 = vsel %vm1001_vm0, %v2541_v23, %v12466_v16  ;;  %v4949_v12 = vsel %vm4585_vm1, %v2780_v4, -inf }
 0x524   : > { %v4512_v61 = vsel %vm1001_vm0, %v14968_v43, %v14989_v63  ;;  %v12867_v41 = vsel %vm5793_vm5, %v6482_v6, %v14990_v11  ;;  %5250 = vmax.xlane.f32.xlu0 %v5249_v15  ;;  %v4571_v60 = vrot.slane %v4528_v24, 4  ;;  %v4569_v59 = vrot.slane %v4552_v1, 4  ;;  %4950 = vmax.xlane.f32.xlu2 %v4949_v12  ;;  %v12872_v43 = vpop.xlane.xlu1 %4935  ;;  %v14995_v6 = vld [vmem:[#allocation48_spill] sm:$0xff] }
 0x525   : > { %v6457_v13 = vsel %vm5801_vm7, %v6456_v9, %v12641_v5  ;;  %v4129_v0 = vrot.slane %v12798_v51, 4  ;;  %v14993_v23 = vrot.slane %v14992_v46, 4  ;;  %v14994_v10 = vrot.slane %v14978_v22, 4  ;;  %v4861_v22 = vpop.xlane.xlu0 %4860  ;;  %v14997_v12 = vld [vmem:[#allocation104_spill] sm:$0xff]  ;;  %v14999_v46 = vld [vmem:[#allocation119_spill] sm:$0xff] }
 0x526   : > { %v4335_v4 = vrot.slane %v12840_v21, 4  ;;  %v5502_v5 = vpack.c.bf16 %v14996_v26, %v14995_v6  ;;  %v4572_v63 = vsel %vm1001_vm0, %v4552_v1, %v4571_v60  ;;  %v12888_v9 = vperm.slane %v2542_v2, %v8374_v14  ;;  %v4777_v1 = vpop.xlane.xlu2 %4776  ;;  %v15007_v15 = vld [vmem:[#allocation92_spill] sm:$0xff] }
 0x527   : > { %v2518_v50 = vsel %vm1001_vm0, %v14993_v23, %v14991_v32  ;;  %v4524_v39 = vsel %vm1001_vm0, %v14979_v42, %v14994_v10  ;;  %v12893_v11 = vperm.slane %v4512_v61, %v8333_v3  ;;  %v12898_v42 = vsel %vm6034_vm10, %v12598_v31, %v14997_v12  ;;  %v14998_v32 = vld [vmem:[#allocation18_spill] sm:$0xff] }
 0x528   : > { %v5503_v23 = vpack.c.bf16 %v14999_v46, %v14998_v32  ;;  %v4570_v2 = vsel %vm1001_vm0, %v4569_v59, %v4528_v24  ;;  %v12904_v60 = vperm.slane %v2518_v50, %v8374_v14  ;;  %v12907_v10 = vperm.slane %v4524_v39, %v8374_v14  ;;  %v15000_v59 = vld [vmem:[#allocation189_spill] sm:$0xff]  ;;  %v15001_v50 = vld [vmem:[#allocation68_spill] sm:$0xff] }
 0x529   : > { %v5385_v3 = vmax.f32 %v12742_v48, %v4777_v1  ;;  %v5333_v61 = vsel %vm4585_vm1, %v4572_v63, -inf  ;;  %v4130_v31 = vsel %vm1001_vm0, %v4129_v0, %v12786_v25  ;;  %v4548_v6 = vsel %vm1001_vm0, %v12726_v57, %v4547_v8 }
 0x52a   : > { %v5688_v26 = vunpack.c.l.b16 %v5502_v5  ;;  %v5689_v12 = vunpack.c.h.b16 %v5502_v5  ;;  %5334 = vmax.xlane.f32.xlu1 %v5333_v61  ;;  %v2561_v24 = vrot.slane %v12888_v9, 4  ;;  %v15002_v32 = vrot.slane %v15001_v50, 4  ;;  %v15003_v5 = vld [vmem:[#allocation155_spill] sm:$0xff] }
 0x52b   : > { %v12920_v48 = vpack.c.bf16 %v5385_v3, %v5384_v53  ;;  %v6458_v63 = vperm.slane %v5385_v3, %v14781_v28  ;;  %v5330_v25 = vsel %vm4585_vm1, %v4570_v2, -inf  ;;  %v5690_v0 = vunpack.c.l.b16 %v5503_v23 }
 0x52c   : > { %v2742_v39 = vsel %vm1001_vm0, %v15002_v32, %v15000_v59  ;;  %5331 = vmax.xlane.f32.xlu0 %v5330_v25  ;;  %v5246_v57 = vsel %vm4585_vm1, %v4130_v31, -inf  ;;  %v12926_v8 = vperm.slane %v4548_v6, %v8374_v14  ;;  %v2528_v46 = vperm.slane %v15003_v5, %v8374_v14  ;;  %v4945_v61 = vpop.xlane.xlu1 %4944  ;;  %v15005_v25 = vld [vmem:[#allocation33_spill] sm:$0xff] }
 0x52d   : > { %v6459_v1 = vsel %vm5805_vm8, %v6458_v63, %v6457_v13  ;;  %5247 = vmax.xlane.f32.xlu2 %v5246_v57  ;;  %v4575_v53 = vrot.slane %v12907_v10, 4  ;;  %v15004_v3 = vrot.slane %v12466_v16, 4  ;;  %v12937_v32 = vperm.slane %v2742_v39, %v8374_v14  ;;  %v4942_v57 = vpop.xlane.xlu0 %4941  ;;  %v15006_v63 = vld [vmem:[#allocation44_spill] sm:$0xff] }
 0x52e   : > { %v5867_v31 = vperm.slane %v5688_v26, %v9248_v56  ;;  %v5868_v6 = vperm.slane %v5689_v12, %v9265_v19  ;;  %v12943_v5 = vsel %vm6036_vm11, %v6459_v1, %v15005_v25  ;;  %v2562_v13 = vsel %vm1001_vm0, %v2561_v24, %v12904_v60  ;;  %v4858_v12 = vpop.xlane.xlu2 %4857 }
 0x52f   : > { %v2544_v2 = vsel %vm1001_vm0, %v12779_v30, %v15004_v3  ;;  %v4336_v16 = vsel %vm1001_vm0, %v12849_v33, %v4335_v4  ;;  %v5691_v30 = vunpack.c.h.b16 %v5503_v23  ;;  %v4135_v39 = vrot.slane %v12795_v45, 4 }
 0x530   : > { %v5870_v26 = vperm.slane %v5690_v0, %v9325_v54  ;;  %v12952_v3 = vmax.f32 %v4942_v57, %v4945_v61  ;;  %v4576_v1 = vsel %vm1001_vm0, %v12926_v8, %v4575_v53  ;;  %v2552_v25 = vperm.slane %v2544_v2, %v8374_v14 }
 0x531   : > { %v5399_v24 = vmax.f32 %v4858_v12, %v4861_v22  ;;  %v4910_v51 = vsel %vm4585_vm1, %v2562_v13, -inf  ;;  %v4136_v4 = vsel %vm1001_vm0, %v12755_v47, %v4135_v39  ;;  %v2567_v23 = vrot.slane %v2528_v46, 4 }
 0x532   : > { %v12962_v45 = vpack.c.bf16 %v15007_v15, %v15006_v63  ;;  %v5869_v0 = vsel %vm5781_vm2, %v5868_v6, %v5867_v31  ;;  %4911 = vmax.xlane.f32.xlu1 %v4910_v51  ;;  %v2563_v61 = vrot.slane %v12904_v60, 4  ;;  %v5872_v2 = vperm.slane %v5691_v30, %v14802_v49 }
 0x533   : > { %v5504_v22 = vpack.c.bf16 %v5399_v24, %v12834_v55  ;;  %v6484_v13 = vperm.slane %v5399_v24, %v14607_v36  ;;  %v5339_v47 = vsel %vm4585_vm1, %v4576_v1, -inf  ;;  %v5871_v57 = vsel %vm5785_vm3, %v5870_v26, %v5869_v0  ;;  %v15008_v1 = vld [vmem:[#allocation79_spill] sm:$0xff] }
 0x534   : > { %5340 = vmax.xlane.f32.xlu0 %v5339_v47  ;;  %v5255_v15 = vsel %vm4585_vm1, %v4136_v4, -inf  ;;  %v2568_v31 = vsel %vm1001_vm0, %v2552_v25, %v2567_v23  ;;  %v2565_v51 = vrot.slane %v2552_v25, 4  ;;  %v12978_v55 = vpop.xlane.xlu1 %5157  ;;  %v4573_v30 = vrot.slane %v12926_v8, 4  ;;  %v15010_v4 = vld [vmem:[#allocation170_spill] sm:$0xff] }
 0x535   : > { %v5692_v6 = vunpack.c.l.b16 %v5504_v22  ;;  %v5693_v63 = vunpack.c.h.b16 %v5504_v22  ;;  %v12976_v39 = vsel %vm5797_vm6, %v6484_v13, %v12867_v41  ;;  %5256 = vmax.xlane.f32.xlu2 %v5255_v15  ;;  %v5736_v12 = vunpack.c.l.b16 %v12962_v45  ;;  %v5155_v13 = vpop.xlane.xlu0 %5154 }
 0x536   : > { %v5737_v26 = vunpack.c.h.b16 %v12962_v45  ;;  %v15009_v24 = vrot.slane %v15008_v1, 4  ;;  %v12988_v23 = vperm.slane %v4336_v16, %v8374_v14  ;;  %v5873_v41 = vsel %vm5789_vm4, %v5872_v2, %v5871_v57 }
 0x537   : > { %v5874_v0 = vperm.slane %v5692_v6, %v14598_v20  ;;  %v5876_v22 = vperm.slane %v5693_v63, %v14607_v36  ;;  %v15011_v8 = vrot.slane %v15010_v4, 4  ;;  %v5704_v47 = vunpack.c.l.b16 %v12508_v17 }
 0x538   : > { %v4312_v25 = vsel %vm1001_vm0, %v15010_v4, %v15009_v24  ;;  %v5705_v15 = vunpack.c.h.b16 %v12508_v17  ;;  %v4939_v24 = vpop.xlane.xlu2 %4938  ;;  %v4919_v16 = vsel %vm4585_vm1, %v2568_v31, -inf  ;;  %v2566_v53 = vsel %vm1001_vm0, %v2565_v51, %v2528_v46  ;;  %v15013_v4 = vld [vmem:[#allocation113_spill] sm:$0xff] }
 0x539   : > { %v4310_v45 = vsel %vm1001_vm0, %v15011_v8, %v15008_v1  ;;  %v5875_v2 = vsel %vm5793_vm5, %v5874_v0, %v5873_v41  ;;  %v5412_v57 = vmax.f32 %v12872_v43, %v4939_v24  ;;  %v4574_v6 = vsel %vm1001_vm0, %v4573_v30, %v12907_v10  ;;  %v15014_v8 = vld [vmem:[#allocation159_spill] sm:$0xff] }
 0x53a   : > { %v15012_v63 = vrot.slane %v12849_v33, 4  ;;  %v13011_v17 = vpack.c.bf16 %v15014_v8, %v15013_v4  ;;  %v13014_v31 = vsel %vm5797_vm6, %v5876_v22, %v5875_v2  ;;  %4920 = vmax.xlane.f32.xlu1 %v4919_v16  ;;  %v4357_v46 = vrot.slane %v12988_v23, 4 }
 0x53b   : > { %v13018_v43 = vperm.slane %v4310_v45, %v8374_v14  ;;  %v5511_v10 = vpack.c.bf16 %v12952_v3, %v5412_v57  ;;  %v6508_v51 = vperm.slane %v5412_v57, %v9325_v54  ;;  %v4916_v33 = vsel %vm4585_vm1, %v2566_v53, -inf }
 0x53c   : > { %v4334_v1 = vsel %vm1001_vm0, %v15012_v63, %v12840_v21  ;;  %v13024_v21 = vperm.slane %v4312_v25, %v8374_v14  ;;  %v5897_v30 = vperm.slane %v5704_v47, %v9248_v56  ;;  %v5898_v41 = vperm.slane %v5705_v15, %v9265_v19  ;;  %4917 = vmax.xlane.f32.xlu0 %v4916_v33  ;;  %v5239_v53 = vpop.xlane.xlu1 %5238 }
 0x53d   : > { %v5336_v0 = vsel %vm4585_vm1, %v4574_v6, -inf  ;;  %v4340_v22 = vperm.slane %v4334_v1, %v8374_v14  ;;  %v5706_v45 = vunpack.c.l.b16 %v5511_v10  ;;  %v5707_v24 = vunpack.c.h.b16 %v5511_v10  ;;  %v5236_v8 = vpop.xlane.xlu0 %5235 }
 0x53e   : > { %v13032_v16 = vsel %vm5785_vm3, %v6508_v51, %v12518_v7  ;;  %5337 = vmax.xlane.f32.xlu2 %v5336_v0  ;;  %v15015_v25 = vrot.slane %v12846_v35, 4  ;;  %v5957_v15 = vperm.slane %v5736_v12, %v9248_v56  ;;  %v5738_v2 = vunpack.c.l.b16 %v13011_v17 }
 0x53f   : > { %v4358_v57 = vsel %vm1001_vm0, %v4357_v46, %v13024_v21  ;;  %v4355_v6 = vrot.slane %v13018_v43, 4  ;;  %v5958_v63 = vperm.slane %v5737_v26, %v9265_v19  ;;  %v5739_v7 = vunpack.c.h.b16 %v13011_v17 }
 0x540   : > { %v2766_v47 = vsel %vm1001_vm0, %v15015_v25, %v12604_v40  ;;  %v5900_v1 = vperm.slane %v5706_v45, %v9325_v54  ;;  %v5902_v4 = vperm.slane %v5707_v24, %v14802_v49  ;;  %v5899_v10 = vsel %vm5781_vm2, %v5898_v41, %v5897_v30  ;;  %v5152_v12 = vpop.xlane.xlu2 %5151  ;;  %v15016_v30 = vld [vmem:[#allocation115_spill] sm:$0xff] }
 0x541   : > { %v13048_v51 = vmax.f32 %v5236_v8, %v5239_v53  ;;  %v4356_v33 = vsel %vm1001_vm0, %v4340_v22, %v4355_v6  ;;  %v2772_v46 = vperm.slane %v2766_v47, %v8374_v14  ;;  %v5448_v25 = vmax.f32 %v5152_v12, %v5155_v13  ;;  %v15017_v13 = vld [vmem:[#allocation32_spill] sm:$0xff] }
 0x542   : > { %v5901_v0 = vsel %vm5785_vm3, %v5900_v1, %v5899_v10  ;;  %v5300_v26 = vsel %vm4585_vm1, %v4358_v57, -inf  ;;  %v2564_v17 = vsel %vm1001_vm0, %v12888_v9, %v2563_v61  ;;  %v5960_v45 = vperm.slane %v5738_v2, %v9325_v54  ;;  %v15020_v10 = vld [vmem:[#allocation122_spill] sm:$0xff] }
 0x543   : > { %v6469_v41 = vperm.slane %v15016_v30, %v14607_v36  ;;  %v13062_v24 = vsel %vm5789_vm4, %v5902_v4, %v5901_v0  ;;  %v6602_v53 = vperm.slane %v13048_v51, %v14598_v20  ;;  %5301 = vmax.xlane.f32.xlu1 %v5300_v26  ;;  %v5740_v47 = vunpack.c.l.b16 %v15017_v13  ;;  %v15019_v4 = vld [vmem:[#allocation14_spill] sm:$0xff]  ;;  %v15022_v30 = vld [vmem:[#allocation117_spill] sm:$0xff] }
 0x544   : > { %v6576_v57 = vperm.slane %v5448_v25, %v14760_v27  ;;  %v5297_v60 = vsel %vm4585_vm1, %v4356_v33, -inf  ;;  %v15018_v9 = vrot.slane %v12893_v11, 4  ;;  %v4913_v6 = vsel %vm4585_vm1, %v2564_v17, -inf  ;;  %v13084_v33 = vpop.xlane.xlu1 %5319  ;;  %v15024_v17 = vld [vmem:[#allocation141_spill] sm:$0xff] }
 0x545   : > { %v13075_v2 = vsel %vm5793_vm5, %v6602_v53, %v12855_v29  ;;  %5298 = vmax.xlane.f32.xlu0 %v5297_v60  ;;  %v2785_v1 = vrot.slane %v2772_v46, 4  ;;  %v13080_v8 = vsel %vm5797_vm6, %v6469_v41, %v15019_v4  ;;  %v4353_v0 = vrot.slane %v4340_v22, 4  ;;  %v5245_v4 = vpop.xlane.xlu0 %5244 }
 0x546   : > { %v4558_v61 = vsel %vm1001_vm0, %v15018_v9, %v12806_v18  ;;  %v6577_v12 = vsel %vm5801_vm7, %v6576_v57, %v15020_v10  ;;  %4914 = vmax.xlane.f32.xlu2 %v4913_v6  ;;  %v15021_v26 = vrot.slane %v15000_v59, 4  ;;  %v15023_v53 = vrot.slane %v15022_v30, 4 }
 0x547   : > { %v15025_v41 = vrot.slane %v12937_v32, 4  ;;  %v13098_v57 = vperm.slane %v4558_v61, %v8374_v14  ;;  %v2767_v6 = vrot.slane %v12604_v40, 4  ;;  %v5959_v22 = vsel %vm5781_vm2, %v5958_v63, %v5957_v15 }
 0x548   : > { %v2744_v29 = vsel %vm1001_vm0, %v15001_v50, %v15021_v26  ;;  %v4536_v60 = vsel %vm1001_vm0, %v15024_v17, %v15023_v53  ;;  %v5962_v59 = vperm.slane %v5739_v7, %v14802_v49  ;;  %v15026_v50 = vrot.slane %v15024_v17, 4  ;;  %v5161_v61 = vpop.xlane.xlu2 %5160 }
 0x549   : > { %v2788_v9 = vsel %vm1001_vm0, %v2772_v46, %v15025_v41  ;;  %v5961_v26 = vsel %vm5785_vm3, %v5960_v45, %v5959_v22  ;;  %v5741_v53 = vunpack.c.h.b16 %v15017_v13  ;;  %v5964_v46 = vperm.slane %v5740_v47, %v14598_v20 }
 0x54a   : > { %v4534_v10 = vsel %vm1001_vm0, %v15026_v50, %v15022_v30  ;;  %v2786_v40 = vsel %vm1001_vm0, %v2785_v1, %v12937_v32  ;;  %v5449_v15 = vmax.f32 %v12978_v55, %v5161_v61  ;;  %v4961_v63 = vsel %vm4585_vm1, %v2788_v9, -inf }
 0x54b   : > { %v4354_v7 = vsel %vm1001_vm0, %v4353_v0, %v13018_v43  ;;  %v2768_v30 = vsel %vm1001_vm0, %v12846_v35, %v2767_v6  ;;  %v4559_v45 = vrot.slane %v12806_v18, 4  ;;  %4962 = vmax.xlane.f32.xlu1 %v4961_v63  ;;  %v13120_v13 = vperm.slane %v4534_v10, %v8374_v14 }
 0x54c   : > { %v4577_v47 = vrot.slane %v13098_v57, 4  ;;  %v2752_v32 = vperm.slane %v2744_v29, %v8374_v14  ;;  %v5963_v55 = vsel %vm5789_vm4, %v5962_v59, %v5961_v26  ;;  %v5529_v1 = vpack.c.bf16 %v5449_v15, %v5448_v25  ;;  %v5329_v22 = vpop.xlane.xlu1 %5328 }
 0x54d   : > { %v6578_v17 = vperm.slane %v5449_v15, %v14781_v28  ;;  %v4958_v43 = vsel %vm4585_vm1, %v2786_v40, -inf  ;;  %v5965_v0 = vsel %vm5793_vm5, %v5964_v46, %v5963_v55  ;;  %v5966_v35 = vperm.slane %v5741_v53, %v14607_v36  ;;  %v5326_v46 = vpop.xlane.xlu0 %5325 }
 0x54e   : > { %4959 = vmax.xlane.f32.xlu0 %v4958_v43  ;;  %v5294_v18 = vsel %vm4585_vm1, %v4354_v7, -inf  ;;  %v2776_v41 = vperm.slane %v2768_v30, %v8374_v14  ;;  %v5742_v9 = vunpack.c.l.b16 %v5529_v1  ;;  %v5743_v6 = vunpack.c.h.b16 %v5529_v1 }
 0x54f   : > { %v6579_v29 = vsel %vm5805_vm8, %v6578_v17, %v6577_v12  ;;  %5295 = vmax.xlane.f32.xlu2 %v5294_v18  ;;  %v4560_v25 = vsel %vm1001_vm0, %v12893_v11, %v4559_v45  ;;  %v4578_v50 = vsel %vm1001_vm0, %v4577_v47, %v13120_v13  ;;  %v2791_v10 = vrot.slane %v2752_v32, 4 }
 0x550   : > { %v13136_v59 = vsel %vm6036_vm11, %v6579_v29, %v12898_v42  ;;  %v5968_v26 = vperm.slane %v5742_v9, %v14760_v27  ;;  %v5970_v53 = vperm.slane %v5743_v6, %v14781_v28  ;;  %v4359_v12 = vrot.slane %v13024_v21, 4  ;;  %v5242_v15 = vpop.xlane.xlu2 %5241 }
 0x551   : > { %15027 = vst [vmem:[#allocation125_spill] sm:$0xff] %v13136_v59  ;;  %v4544_v61 = vperm.slane %v4536_v60, %v8374_v14  ;;  %v5967_v40 = vsel %vm5797_vm6, %v5966_v35, %v5965_v0  ;;  %v13145_v11 = vmax.f32 %v5326_v46, %v5329_v22  ;;  %v2792_v42 = vsel %vm1001_vm0, %v2776_v41, %v2791_v10 }
 0x552   : > { %v4568_v63 = vperm.slane %v4560_v25, %v8374_v14  ;;  %v5969_v7 = vsel %vm5801_vm7, %v5968_v26, %v5967_v40  ;;  %v5463_v30 = vmax.f32 %v5242_v15, %v5245_v4  ;;  %v5342_v45 = vsel %vm4585_vm1, %v4578_v50, -inf  ;;  %v15030_v40 = vld [vmem:[#allocation81_spill] sm:$0xff]  ;;  %v15031_v15 = vld [vmem:[#allocation31_spill] sm:$0xff] }
 0x553   : > { %v4360_v47 = vsel %vm1001_vm0, %v12988_v23, %v4359_v12  ;;  %v13154_v21 = vsel %vm5805_vm8, %v5970_v53, %v5969_v7  ;;  %5343 = vmax.xlane.f32.xlu1 %v5342_v45  ;;  %v4967_v1 = vsel %vm4585_vm1, %v2792_v42, -inf  ;;  %v4583_v17 = vrot.slane %v4544_v61, 4  ;;  %v15033_v45 = vld [vmem:[#allocation90_spill] sm:$0xff] }
 0x554   : > { %15028 = vst [vmem:[#allocation13_spill] sm:$0xff] %v13154_v21  ;;  %v5536_v60 = vpack.c.bf16 %v5463_v30, %v13048_v51  ;;  %v6604_v55 = vperm.slane %v5463_v30, %v14607_v36  ;;  %v5303_v14 = vsel %vm4585_vm1, %v4360_v47, -inf  ;;  %v4581_v4 = vrot.slane %v4568_v63, 4  ;;  %v13164_v35 = vpop.xlane.xlu1 %4821  ;;  %v15032_v30 = vld [vmem:[#allocation61_spill] sm:$0xff] }
 0x555   : > { %v2789_v18 = vrot.slane %v2776_v41, 4  ;;  %v4584_v51 = vsel %vm1001_vm0, %v4568_v63, %v4583_v17  ;;  %v4819_v29 = vpop.xlane.xlu0 %4818  ;;  %v5768_v22 = vunpack.c.l.b16 %v12789_v37  ;;  %v5769_v25 = vunpack.c.h.b16 %v12789_v37  ;;  %v15074_v21 = vld [vmem:[#allocation105_spill] sm:$0xff] }
 0x556   : > { %4968 = vmax.xlane.f32.xlu0 %v4967_v1  ;;  %v5756_v43 = vunpack.c.l.b16 %v5536_v60  ;;  %v5757_v0 = vunpack.c.h.b16 %v5536_v60  ;;  %v13162_v23 = vsel %vm5797_vm6, %v6604_v55, %v13075_v2  ;;  %v4582_v10 = vsel %vm1001_vm0, %v4581_v4, %v4544_v61  ;;  %v15029_v2 = vld [vmem:[#allocation85_spill] sm:$0xff] }
 0x557   : > { %5304 = vmax.xlane.f32.xlu2 %v5303_v14  ;;  %v5351_v41 = vsel %vm4585_vm1, %v4584_v51, -inf  ;;  %v2790_v46 = vsel %vm1001_vm0, %v2789_v18, %v2752_v32  ;;  %v5498_v42 = vpack.c.bf16 %v15031_v15, %v15030_v40  ;;  %v5348_v63 = vsel %vm4585_vm1, %v4582_v10, -inf  ;;  %v15035_v40 = vld [vmem:[#allocation187_spill] sm:$0xff] }
 0x558   : > { %v5994_v9 = vperm.slane %v5756_v43, %v14598_v20  ;;  %v5996_v6 = vperm.slane %v5757_v0, %v14607_v36  ;;  %v5323_v50 = vpop.xlane.xlu2 %5322  ;;  %v6017_v7 = vperm.slane %v5768_v22, %v9248_v56  ;;  %v4964_v32 = vsel %vm4585_vm1, %v2790_v46, -inf }
 0x559   : > { %v5476_v53 = vmax.f32 %v13084_v33, %v5323_v50  ;;  %v6018_v33 = vperm.slane %v5769_v25, %v9265_v19  ;;  %v5499_v47 = vpack.c.bf16 %v15033_v45, %v15032_v30  ;;  %v5680_v17 = vunpack.c.l.b16 %v5498_v42 }
 0x55a   : > { %v5995_v26 = vsel %vm5793_vm5, %v5994_v9, %v15029_v2  ;;  %v4579_v18 = vrot.slane %v13120_v13, 4  ;;  %v5681_v51 = vunpack.c.h.b16 %v5498_v42 }
 0x55b   : > { %v13178_v12 = vsel %vm5797_vm6, %v5996_v6, %v5995_v26  ;;  %5352 = vmax.xlane.f32.xlu1 %v5351_v41  ;;  %v5543_v37 = vpack.c.bf16 %v13145_v11, %v5476_v53  ;;  %v6628_v61 = vperm.slane %v5476_v53, %v9325_v54  ;;  %v6019_v9 = vsel %vm5781_vm2, %v6018_v33, %v6017_v7 }
 0x55c   : > { %v4903_v14 = vpop.xlane.xlu1 %4902  ;;  %v5682_v25 = vunpack.c.l.b16 %v5499_v47  ;;  %v4580_v10 = vsel %vm1001_vm0, %v13098_v57, %v4579_v18  ;;  %v5852_v53 = vperm.slane %v5680_v17, %v9248_v56  ;;  %v5853_v41 = vperm.slane %v5681_v51, %v9265_v19  ;;  %v15036_v57 = vld [vmem:[#allocation83_spill] sm:$0xff] }
 0x55d   : > { %v5770_v60 = vunpack.c.l.b16 %v5543_v37  ;;  %v5771_v55 = vunpack.c.h.b16 %v5543_v37  ;;  %v13192_v1 = vsel %vm5785_vm3, %v6628_v61, %v12810_v58  ;;  %v4900_v0 = vpop.xlane.xlu0 %4899  ;;  %v5683_v46 = vunpack.c.h.b16 %v5499_v47 }
 0x55e   : > { %5349 = vmax.xlane.f32.xlu0 %v5348_v63  ;;  %v5406_v6 = vmax.f32 %v4900_v0, %v4903_v14  ;;  %v5855_v42 = vperm.slane %v5682_v25, %v9325_v54  ;;  %v5684_v37 = vunpack.c.l.b16 %v15036_v57  ;;  %v5854_v33 = vsel %vm5781_vm2, %v5853_v41, %v5852_v53 }
 0x55f   : > { %4965 = vmax.xlane.f32.xlu2 %v4964_v32  ;;  %v6020_v4 = vperm.slane %v5770_v60, %v9325_v54  ;;  %v6022_v43 = vperm.slane %v5771_v55, %v14802_v49  ;;  %v5857_v32 = vperm.slane %v5683_v46, %v14802_v49  ;;  %v5685_v30 = vunpack.c.h.b16 %v15036_v57 }
 0x560   : > { %v4816_v22 = vpop.xlane.xlu2 %4815  ;;  %v6497_v26 = vperm.slane %v5406_v6, %v14598_v20  ;;  %v5856_v47 = vsel %vm5785_vm3, %v5855_v42, %v5854_v33  ;;  %v5859_v60 = vperm.slane %v5684_v37, %v14598_v20  ;;  %v6510_v41 = vperm.slane %v12952_v3, %v14802_v49  ;;  %v15039_v37 = vld [vmem:[#allocation130_spill] sm:$0xff]  ;;  %v15040_v33 = vld [vmem:[#allocation80_spill] sm:$0xff] }
 0x561   : > { %v6021_v50 = vsel %vm5785_vm3, %v6020_v4, %v6019_v9  ;;  %v5392_v58 = vmax.f32 %v4816_v22, %v4819_v29  ;;  %v5345_v29 = vsel %vm4585_vm1, %v4580_v10, -inf  ;;  %v5858_v17 = vsel %vm5789_vm4, %v5857_v32, %v5856_v47 }
 0x562   : > { %v13202_v2 = vsel %vm5789_vm4, %v6022_v43, %v6021_v50  ;;  %v6498_v15 = vsel %vm5793_vm5, %v6497_v26, %v15035_v40  ;;  %v5861_v4 = vperm.slane %v5685_v30, %v14607_v36  ;;  %v5860_v43 = vsel %vm5793_vm5, %v5859_v60, %v5858_v17  ;;  %v15041_v30 = vld [vmem:[#allocation63_spill] sm:$0xff] }
 0x563   : > { %15034 = vst [vmem:[#allocation180_spill] sm:$0xff] %v13202_v2  ;;  %v6471_v13 = vperm.slane %v5392_v58, %v14760_v27  ;;  %v13250_v57 = vsel %vm5789_vm4, %v6510_v41, %v13032_v16  ;;  %vm6055_vm0 = vcmask 130048   ;;  %vm6112_vm1 = vcmask 1043456  }
 0x564   : > { %v5200_v63 = vpop.xlane.xlu1 %5199  ;;  %v5862_v25 = vsel %vm5797_vm6, %v5861_v4, %v5860_v43 }
 0x565   : > { %v6472_v61 = vsel %vm5801_vm7, %v6471_v13, %v13080_v8  ;;  %v4909_v7 = vpop.xlane.xlu0 %4908 }
 0x567   : > { %5346 = vmax.xlane.f32.xlu2 %v5345_v29 }
 0x568   : > { %v4825_v45 = vpop.xlane.xlu2 %4824 }
 0x569   : > { %v5393_v55 = vmax.f32 %v13164_v35, %v4825_v45 }
 0x56b   : > { %v13221_v14 = vpack.c.bf16 %v5393_v55, %v5392_v58  ;;  %v6473_v8 = vperm.slane %v5393_v55, %v14781_v28 }
 0x56c   : > { %v5209_v51 = vpop.xlane.xlu1 %5208 }
 0x56d   : > { %v5686_v0 = vunpack.c.l.b16 %v13221_v14  ;;  %v6474_v18 = vsel %vm5805_vm8, %v6473_v8, %v6472_v61  ;;  %v5206_v22 = vpop.xlane.xlu0 %5205 }
 0x56e   : > { %v13231_v9 = vsel %vm6038_vm12, %v6474_v18, %v12943_v5  ;;  %v5457_v50 = vmax.f32 %v5206_v22, %v5209_v51  ;;  %v15043_v18 = vld [vmem:[#allocation150_spill] sm:$0xff] }
 0x56f   : > { %15037 = vst [vmem:[#allocation41_spill] sm:$0xff] %v13231_v9  ;;  %v5863_v35 = vperm.slane %v5686_v0, %v14760_v27  ;;  %v15065_v9 = vld [vmem:[#allocation190_spill] sm:$0xff] }
 0x570   : > { %v4906_v58 = vpop.xlane.xlu2 %4905  ;;  %v6593_v16 = vperm.slane %v5457_v50, %v14781_v28 }
 0x571   : > { %v13236_v10 = vsel %vm5801_vm7, %v5863_v35, %v5862_v25  ;;  %v5407_v26 = vmax.f32 %v4906_v58, %v4909_v7  ;;  %v6630_v35 = vperm.slane %v13145_v11, %v14802_v49 }
 0x573   : > { %v13238_v53 = vpack.c.bf16 %v5407_v26, %v5406_v6  ;;  %v6499_v13 = vperm.slane %v5407_v26, %v14607_v36  ;;  %v15038_v6 = vld [vmem:[#allocation108_spill] sm:$0xff] }
 0x574   : > { %v5290_v40 = vpop.xlane.xlu1 %5289  ;;  %v5482_v61 = vpack.c.bf16 %v15039_v37, %v15038_v6 }
 0x575   : > { %v5700_v5 = vunpack.c.l.b16 %v13238_v53  ;;  %v13245_v46 = vsel %vm5797_vm6, %v6499_v13, %v6498_v15  ;;  %v5287_v42 = vpop.xlane.xlu0 %5286  ;;  %v15042_v15 = vld [vmem:[#allocation176_spill] sm:$0xff] }
 0x576   : > { %v5483_v45 = vpack.c.bf16 %v15042_v15, %v15041_v30  ;;  %v5648_v55 = vunpack.c.l.b16 %v5482_v61  ;;  %v5649_v8 = vunpack.c.h.b16 %v5482_v61  ;;  %v15046_v61 = vld [vmem:[#allocation131_spill] sm:$0xff]  ;;  %v15048_v30 = vld [vmem:[#allocation49_spill] sm:$0xff] }
 0x577   : > { %v5889_v29 = vperm.slane %v5700_v5, %v14598_v20 }
 0x578   : > { %v5203_v7 = vpop.xlane.xlu2 %5202  ;;  %v5650_v0 = vunpack.c.l.b16 %v5483_v45  ;;  %v5778_v58 = vperm.slane %v5648_v55, %v9248_v56  ;;  %v5780_v41 = vperm.slane %v5649_v8, %v9265_v19  ;;  %v5651_v5 = vunpack.c.h.b16 %v5483_v45 }
 0x579   : > { %v13256_v3 = vsel %vm5793_vm5, %v5889_v29, %v15040_v33  ;;  %v5456_v32 = vmax.f32 %v5200_v63, %v5203_v7  ;;  %v15044_v63 = vld [vmem:[#allocation121_spill] sm:$0xff]  ;;  %v15047_v7 = vld [vmem:[#allocation30_spill] sm:$0xff] }
 0x57a   : > { %v5484_v51 = vpack.c.bf16 %v15044_v63, %v15043_v18  ;;  %v5784_v6 = vperm.slane %v5650_v0, %v9325_v54  ;;  %v5485_v33 = vpack.c.bf16 %v15047_v7, %v15046_v61  ;;  %v15055_v61 = vld [vmem:[#allocation198_spill] sm:$0xff] }
 0x57b   : > { %v13260_v47 = vpack.c.bf16 %v5457_v50, %v5456_v32  ;;  %v6591_v60 = vperm.slane %v5456_v32, %v14760_v27 }
 0x57c   : > { %v4867_v43 = vpop.xlane.xlu1 %4866  ;;  %v5652_v37 = vunpack.c.l.b16 %v5484_v51  ;;  %v5653_v55 = vunpack.c.h.b16 %v5484_v51 }
 0x57d   : > { %v5750_v17 = vunpack.c.l.b16 %v13260_v47  ;;  %v6592_v4 = vsel %vm5801_vm7, %v6591_v60, %v12700_v38  ;;  %v4864_v50 = vpop.xlane.xlu0 %4863  ;;  %v13280_v38 = vsel %vm5789_vm4, %v6630_v35, %v13192_v1  ;;  %v15049_v1 = vld [vmem:[#allocation193_spill] sm:$0xff]  ;;  %v15051_v35 = vld [vmem:[#allocation196_spill] sm:$0xff] }
 0x57e   : > { %v13272_v22 = vsel %vm5805_vm8, %v6593_v16, %v6592_v4  ;;  %v13276_v26 = vmax.f32 %v4864_v50, %v4867_v43  ;;  %v5486_v15 = vpack.c.bf16 %v15049_v1, %v15048_v30  ;;  %v5792_v4 = vperm.slane %v5652_v37, %v14598_v20  ;;  %v15052_v50 = vld [vmem:[#allocation17_spill] sm:$0xff]  ;;  %v15056_v1 = vld [vmem:[#allocation54_spill] sm:$0xff] }
 0x57f   : > { %15045 = vst [vmem:[#allocation135_spill] sm:$0xff] %v13272_v22  ;;  %v5983_v25 = vperm.slane %v5750_v17, %v14760_v27  ;;  %v5654_v43 = vunpack.c.l.b16 %v5485_v33 }
 0x580   : > { %v5284_v13 = vpop.xlane.xlu2 %5283  ;;  %v6486_v32 = vperm.slane %v13276_v26, %v14760_v27  ;;  %v5656_v0 = vunpack.c.l.b16 %v5486_v15  ;;  %v5657_v18 = vunpack.c.h.b16 %v5486_v15  ;;  %v15057_v15 = vld [vmem:[#allocation93_spill] sm:$0xff] }
 0x581   : > { %v13285_v11 = vsel %vm5801_vm7, %v5983_v25, %v12729_v52  ;;  %v5470_v29 = vmax.f32 %v5284_v13, %v5287_v42  ;;  %v5782_v52 = vsel %vm5781_vm2, %v5780_v41, %v5778_v58  ;;  %v5788_v42 = vperm.slane %v5651_v5, %v14802_v49  ;;  %v15053_v58 = vld [vmem:[#allocation171_spill] sm:$0xff]  ;;  %v15054_v5 = vld [vmem:[#allocation197_spill] sm:$0xff] }
 0x582   : > { %v13297_v45 = vsel %vm5801_vm7, %v6486_v32, %v12976_v39  ;;  %v5786_v17 = vsel %vm5785_vm3, %v5784_v6, %v5782_v52  ;;  %v15050_v39 = vld [vmem:[#allocation195_spill] sm:$0xff]  ;;  %v5487_v13 = vpack.c.bf16 %v15053_v58, %v15052_v50  ;;  %v5518_v6 = vpack.c.bf16 %v15055_v61, %v15054_v5 }
 0x583   : > { %v6617_v60 = vperm.slane %v5470_v29, %v14598_v20  ;;  %v5514_v25 = vpack.c.bf16 %v15051_v35, %v15050_v39  ;;  %v5790_v41 = vsel %vm5789_vm4, %v5788_v42, %v5786_v17  ;;  %v5655_v32 = vunpack.c.h.b16 %v5485_v33 }
 0x584   : > { %v13303_v8 = vpop.xlane.xlu1 %4947  ;;  %v5794_v37 = vsel %vm5793_vm5, %v5792_v4, %v5790_v41  ;;  %v5800_v30 = vperm.slane %v5654_v43, %v14760_v27  ;;  %v5807_v52 = vperm.slane %v5656_v0, %v9248_v56  ;;  %v5808_v39 = vperm.slane %v5657_v18, %v9265_v19 }
 0x585   : > { %v6618_v16 = vsel %vm5793_vm5, %v6617_v60, %v12740_v44  ;;  %v4873_v63 = vpop.xlane.xlu0 %4872  ;;  %v5796_v44 = vperm.slane %v5653_v55, %v14607_v36  ;;  %v5490_v60 = vpack.c.bf16 %v15057_v15, %v15056_v1  ;;  %v5712_v55 = vunpack.c.l.b16 %v5514_v25  ;;  %v15058_v15 = vld [vmem:[#allocation35_spill] sm:$0xff] }
 0x586   : > { %v5713_v17 = vunpack.c.h.b16 %v5514_v25  ;;  %v5658_v50 = vunpack.c.l.b16 %v5487_v13  ;;  %v5721_v58 = vunpack.c.h.b16 %v5518_v6  ;;  %v5804_v0 = vperm.slane %v5655_v32, %v14781_v28 }
 0x587   : > { %v5659_v18 = vunpack.c.h.b16 %v5487_v13  ;;  %v5809_v5 = vsel %vm5781_vm2, %v5808_v39, %v5807_v52  ;;  %v5665_v25 = vunpack.c.h.b16 %v5490_v60 }
 0x588   : > { %v5293_v51 = vpop.xlane.xlu2 %5292  ;;  %v5810_v1 = vperm.slane %v5658_v50, %v9325_v54 }
 0x589   : > { %v5471_v7 = vmax.f32 %v5290_v40, %v5293_v51  ;;  %v5720_v40 = vunpack.c.l.b16 %v5518_v6  ;;  %v5798_v51 = vsel %vm5797_vm6, %v5796_v44, %v5794_v37  ;;  %v15059_v44 = vld [vmem:[#allocation151_spill] sm:$0xff]  ;;  %v5812_v39 = vperm.slane %v5659_v18, %v14802_v49 }
 0x58a   : > { %v5802_v41 = vsel %vm5801_vm7, %v5800_v30, %v5798_v51  ;;  %v5515_v37 = vpack.c.bf16 %v15059_v44, %v15058_v15  ;;  %v5928_v30 = vperm.slane %v5721_v58, %v9265_v19  ;;  %v15063_v51 = vld [vmem:[#allocation52_spill] sm:$0xff]  ;;  %v5823_v44 = vperm.slane %v5665_v25, %v9265_v19 }
 0x58b   : > { %v13321_v35 = vpack.c.bf16 %v5471_v7, %v5470_v29  ;;  %v6619_v42 = vperm.slane %v5471_v7, %v14607_v36  ;;  %v5664_v29 = vunpack.c.l.b16 %v5490_v60  ;;  %v5912_v7 = vperm.slane %v5712_v55, %v9248_v56  ;;  %v15060_v55 = vld [vmem:[#allocation134_spill] sm:$0xff] }
 0x58c   : > { %v4957_v43 = vpop.xlane.xlu1 %4956  ;;  %v5927_v13 = vperm.slane %v5720_v40, %v9248_v56  ;;  %v15064_v40 = vld [vmem:[#allocation37_spill] sm:$0xff]  ;;  %v5714_v18 = vunpack.c.l.b16 %v5515_v37 }
 0x58d   : > { %v5764_v33 = vunpack.c.l.b16 %v13321_v35  ;;  %v13326_v4 = vsel %vm5797_vm6, %v6619_v42, %v6618_v16  ;;  %v5913_v16 = vperm.slane %v5713_v17, %v9265_v19  ;;  %v5822_v42 = vperm.slane %v5664_v29, %v9248_v56  ;;  %v15061_v17 = vld [vmem:[#allocation100_spill] sm:$0xff]  ;;  %v15066_v29 = vld [vmem:[#allocation139_spill] sm:$0xff] }
 0x58e   : > { %v4954_v6 = vpop.xlane.xlu0 %4953  ;;  %v5519_v50 = vpack.c.bf16 %v15061_v17, %v15060_v55  ;;  %v5491_v58 = vpack.c.bf16 %v15065_v9, %v15064_v40  ;;  %v13361_v55 = vsel %vm5805_vm8, %v5804_v0, %v5802_v41  ;;  %v15069_v0 = vld [vmem:[#allocation20_spill] sm:$0xff]  ;;  %v15070_v41 = vld [vmem:[#allocation110_spill] sm:$0xff] }
 0x58f   : > { %v6009_v61 = vperm.slane %v5764_v33, %v14598_v20  ;;  %v15062_v33 = vld [vmem:[#allocation161_spill] sm:$0xff]  ;;  %v5914_v17 = vsel %vm5781_vm2, %v5913_v16, %v5912_v7  ;;  %v5715_v16 = vunpack.c.h.b16 %v5515_v37 }
 0x590   : > { %v4870_v32 = vpop.xlane.xlu2 %4869  ;;  %v5522_v15 = vpack.c.bf16 %v15063_v51, %v15062_v33  ;;  %v5824_v51 = vsel %vm5781_vm2, %v5823_v44, %v5822_v42  ;;  %v5666_v40 = vunpack.c.l.b16 %v5491_v58  ;;  %v5723_v59 = vunpack.c.h.b16 %v5519_v50 }
 0x591   : > { %v13342_v60 = vsel %vm5793_vm5, %v6009_v61, %v12782_v62  ;;  %v5401_v52 = vmax.f32 %v4870_v32, %v4873_v63  ;;  %v5811_v63 = vsel %vm5785_vm3, %v5810_v1, %v5809_v5  ;;  %v15067_v61 = vld [vmem:[#allocation46_spill] sm:$0xff] }
 0x592   : > { %v5494_v32 = vpack.c.bf16 %v15067_v61, %v15066_v29  ;;  %v5728_v33 = vunpack.c.l.b16 %v5522_v15  ;;  %v5729_v5 = vunpack.c.h.b16 %v5522_v15  ;;  %v5813_v1 = vsel %vm5789_vm4, %v5812_v39, %v5811_v63  ;;  %v15073_v15 = vld [vmem:[#allocation72_spill] sm:$0xff] }
 0x593   : > { %v13354_v22 = vpack.c.bf16 %v5401_v52, %v13276_v26  ;;  %v6488_v62 = vperm.slane %v5401_v52, %v14781_v28  ;;  %v5929_v26 = vsel %vm5781_vm2, %v5928_v30, %v5927_v13  ;;  %v5722_v52 = vunpack.c.l.b16 %v5519_v50  ;;  %v15071_v13 = vld [vmem:[#allocation127_spill] sm:$0xff]  ;;  %v15072_v30 = vld [vmem:[#allocation181_spill] sm:$0xff] }
 0x594   : > { %v5523_v29 = vpack.c.bf16 %v15070_v41, %v15069_v0  ;;  %v5673_v61 = vunpack.c.h.b16 %v5494_v32  ;;  %v5488_v2 = vpack.c.bf16 %v15072_v30, %v15071_v13  ;;  %v5495_v39 = vpack.c.bf16 %v15074_v21, %v15073_v15  ;;  %v15075_v30 = vld [vmem:[#allocation47_spill] sm:$0xff] }
 0x595   : > { %v13366_v25 = vsel %vm5805_vm8, %v6488_v62, %v13297_v45  ;;  %v13368_v9 = vpop.xlane.xlu1 %5253  ;;  %v5915_v45 = vperm.slane %v5714_v18, %v9325_v54  ;;  %v5672_v62 = vunpack.c.l.b16 %v5494_v32  ;;  %v5930_v44 = vperm.slane %v5722_v52, %v9325_v54 }
 0x596   : > { %15068 = vst [vmem:[#allocation163_spill] sm:$0xff] %v13366_v25  ;;  %v5942_v63 = vperm.slane %v5728_v33, %v9248_v56  ;;  %v5943_v37 = vperm.slane %v5729_v5, %v9265_v19  ;;  %v13386_v18 = vmax.f32 %v4954_v6, %v4957_v43  ;;  %v5667_v32 = vunpack.c.h.b16 %v5491_v58 }
 0x597   : > { %v5251_v7 = vpop.xlane.xlu0 %5250  ;;  %v5825_v50 = vperm.slane %v5666_v40, %v9325_v54  ;;  %v5730_v0 = vunpack.c.l.b16 %v5523_v29  ;;  %v5916_v21 = vsel %vm5785_vm3, %v5915_v45, %v5914_v17  ;;  %v5838_v52 = vperm.slane %v5673_v61, %v9265_v19  ;;  %v15076_v17 = vld [vmem:[#allocation57_spill] sm:$0xff] }
 0x598   : > { %v4951_v25 = vpop.xlane.xlu2 %4950  ;;  %v5932_v33 = vperm.slane %v5723_v59, %v14802_v49  ;;  %v5660_v5 = vunpack.c.l.b16 %v5488_v2  ;;  %v5674_v43 = vunpack.c.l.b16 %v5495_v39  ;;  %v5931_v40 = vsel %vm5785_vm3, %v5930_v44, %v5929_v26 }
 0x599   : > { %v13381_v42 = vmax.f32 %v13303_v8, %v4951_v25  ;;  %v5917_v8 = vperm.slane %v5715_v16, %v14802_v49  ;;  %v5837_v25 = vperm.slane %v5672_v62, %v9248_v56  ;;  %v5944_v13 = vsel %vm5781_vm2, %v5943_v37, %v5942_v63 }
 0x59a   : > { %v5516_v45 = vpack.c.bf16 %v15076_v17, %v15075_v30  ;;  %v6514_v56 = vperm.slane %v13386_v18, %v14607_v36  ;;  %v5826_v19 = vsel %vm5785_vm3, %v5825_v50, %v5824_v51  ;;  %v5827_v59 = vperm.slane %v5667_v32, %v14802_v49  ;;  %v15077_v32 = vld [vmem:[#allocation24_spill] sm:$0xff]  ;;  %v15079_v17 = vld [vmem:[#allocation169_spill] sm:$0xff] }
 0x59b   : > { %v6512_v41 = vperm.slane %v13381_v42, %v14598_v20  ;;  %v5731_v16 = vunpack.c.h.b16 %v5523_v29  ;;  %v5945_v62 = vperm.slane %v5730_v0, %v9325_v54  ;;  %v5661_v15 = vunpack.c.h.b16 %v5488_v2  ;;  %v15078_v0 = vld [vmem:[#allocation89_spill] sm:$0xff] }
 0x59c   : > { %v5814_v37 = vperm.slane %v5660_v5, %v14598_v20  ;;  %v5840_v51 = vperm.slane %v5674_v43, %v9325_v54  ;;  %v5716_v29 = vunpack.c.l.b16 %v5516_v45  ;;  %v5520_v30 = vpack.c.bf16 %v15078_v0, %v15077_v32  ;;  %v15081_v5 = vld [vmem:[#allocation173_spill] sm:$0xff]  ;;  %v15083_v43 = vld [vmem:[#allocation66_spill] sm:$0xff] }
 0x59d   : > { %v6513_v6 = vsel %vm5793_vm5, %v6512_v41, %v13250_v57  ;;  %v5335_v58 = vpop.xlane.xlu1 %5334  ;;  %v5839_v57 = vsel %vm5781_vm2, %v5838_v52, %v5837_v25  ;;  %v5675_v41 = vunpack.c.h.b16 %v5495_v39  ;;  %v15080_v25 = vld [vmem:[#allocation118_spill] sm:$0xff]  ;;  %vm6099_vm2 = vcmask 64512  }
 0x59e   : > { %v13411_v63 = vsel %vm5797_vm6, %v6514_v56, %v6513_v6  ;;  %v5492_v2 = vpack.c.bf16 %v15080_v25, %v15079_v17  ;;  %v5946_v6 = vsel %vm5785_vm3, %v5945_v62, %v5944_v13  ;;  %v15082_v39 = vld [vmem:[#allocation98_spill] sm:$0xff]  ;;  %v5815_v13 = vsel %vm5793_vm5, %v5814_v37, %v5813_v1 }
 0x59f   : > { %v5332_v61 = vpop.xlane.xlu0 %5331  ;;  %v5524_v56 = vpack.c.bf16 %v15082_v39, %v15081_v5  ;;  %v15085_v32 = vld [vmem:[#allocation78_spill] sm:$0xff]  ;;  %v5717_v62 = vunpack.c.h.b16 %v5516_v45  ;;  %v5919_v39 = vperm.slane %v5716_v29, %v14598_v20  ;;  %v5828_v1 = vsel %vm5789_vm4, %v5827_v59, %v5826_v19 }
 0x5a0   : > { %v13408_v26 = vmax.f32 %v5332_v61, %v5335_v58  ;;  %v5248_v44 = vpop.xlane.xlu2 %5247  ;;  %v5947_v58 = vperm.slane %v5731_v16, %v14802_v49  ;;  %v15084_v61 = vld [vmem:[#allocation67_spill] sm:$0xff]  ;;  %v5496_v0 = vpack.c.bf16 %v12595_v34, %v15085_v32  ;;  %v5842_v16 = vperm.slane %v5675_v41, %v14802_v49 }
 0x5a1   : > { %v13415_v50 = vmax.f32 %v5248_v44, %v5251_v7  ;;  %v5816_v7 = vperm.slane %v5661_v15, %v14607_v36  ;;  %v5489_v44 = vpack.c.bf16 %v15084_v61, %v15083_v43  ;;  %v5841_v15 = vsel %vm5785_vm3, %v5840_v51, %v5839_v57 }
 0x5a2   : > { %v6632_v52 = vperm.slane %v13408_v26, %v14598_v20  ;;  %v5724_v43 = vunpack.c.l.b16 %v5520_v30  ;;  %v5668_v34 = vunpack.c.l.b16 %v5492_v2  ;;  %v5918_v61 = vsel %vm5789_vm4, %v5917_v8, %v5916_v21 }
 0x5a3   : > { %v6606_v54 = vperm.slane %v13415_v50, %v14760_v27  ;;  %v5732_v37 = vunpack.c.l.b16 %v5524_v56  ;;  %v5948_v45 = vsel %vm5789_vm4, %v5947_v58, %v5946_v6  ;;  %v5662_v41 = vunpack.c.l.b16 %v5489_v44 }
 0x5a4   : > { %v13436_v17 = vsel %vm5793_vm5, %v6632_v52, %v13280_v38  ;;  %v5933_v38 = vsel %vm5789_vm4, %v5932_v33, %v5931_v40  ;;  %v5676_v52 = vunpack.c.l.b16 %v5496_v0  ;;  %v5843_v57 = vsel %vm5789_vm4, %v5842_v16, %v5841_v15  ;;  %v15086_v16 = vld [vmem:[#allocation50_spill] sm:$0xff] }
 0x5a5   : > { %v6607_v25 = vsel %vm5801_vm7, %v6606_v54, %v13162_v23  ;;  %v13442_v5 = vpop.xlane.xlu1 %4911  ;;  %v5817_v23 = vsel %vm5797_vm6, %v5816_v7, %v5815_v13  ;;  %v5921_v51 = vperm.slane %v5717_v62, %v14607_v36  ;;  %v5725_v29 = vunpack.c.h.b16 %v5520_v30 }
 0x5a6   : > { %v5920_v8 = vsel %vm5793_vm5, %v5919_v39, %v5918_v61  ;;  %v5934_v33 = vperm.slane %v5724_v43, %v14598_v20  ;;  %v5669_v40 = vunpack.c.h.b16 %v5492_v2  ;;  %v5829_v19 = vperm.slane %v5668_v34, %v14598_v20  ;;  %v15087_v2 = vld [vmem:[#allocation167_spill] sm:$0xff]  ;;  %v15088_v61 = vld [vmem:[#allocation40_spill] sm:$0xff] }
 0x5a7   : > { %v5341_v49 = vpop.xlane.xlu0 %5340  ;;  %v5733_v59 = vunpack.c.h.b16 %v5524_v56  ;;  %v5949_v6 = vperm.slane %v5732_v37, %v14598_v20  ;;  %v5663_v58 = vunpack.c.h.b16 %v5489_v44  ;;  %v5818_v32 = vperm.slane %v5662_v41, %v14760_v27 }
 0x5a8   : > { %v5257_v54 = vpop.xlane.xlu2 %5256  ;;  %v5677_v13 = vunpack.c.h.b16 %v5496_v0  ;;  %v5844_v30 = vperm.slane %v5676_v52, %v14598_v20  ;;  %v5922_v62 = vsel %vm5797_vm6, %v5921_v51, %v5920_v8  ;;  %v5936_v15 = vperm.slane %v5725_v29, %v14607_v36 }
 0x5a9   : > { %v5465_v21 = vmax.f32 %v13368_v9, %v5257_v54  ;;  %v5670_v9 = vunpack.c.l.b16 %v15086_v16  ;;  %v5718_v39 = vunpack.c.l.b16 %v15087_v2  ;;  %v5935_v44 = vsel %vm5793_vm5, %v5934_v33, %v5933_v38 }
 0x5aa   : > { %v5830_v34 = vsel %vm5793_vm5, %v5829_v19, %v5828_v1  ;;  %v5831_v0 = vperm.slane %v5669_v40, %v14607_v36  ;;  %v5726_v37 = vunpack.c.l.b16 %v15088_v61  ;;  %v5950_v41 = vsel %vm5793_vm5, %v5949_v6, %v5948_v45  ;;  %v15089_v19 = vld [vmem:[#allocation99_spill] sm:$0xff] }
 0x5ab   : > { %v6608_v7 = vperm.slane %v5465_v21, %v14781_v28  ;;  %v5951_v52 = vperm.slane %v5733_v59, %v14607_v36  ;;  %v5820_v54 = vperm.slane %v5663_v58, %v14781_v28  ;;  %v5671_v51 = vunpack.c.h.b16 %v15086_v16 }
 0x5ac   : > { %v5845_v8 = vsel %vm5793_vm5, %v5844_v30, %v5843_v57  ;;  %v5846_v38 = vperm.slane %v5677_v13, %v14607_v36  ;;  %v5833_v1 = vperm.slane %v5670_v9, %v14760_v27  ;;  %v5719_v40 = vunpack.c.h.b16 %v15087_v2 }
 0x5ad   : > { %v13466_v56 = vsel %vm5805_vm8, %v6608_v7, %v6607_v25  ;;  %v4921_v43 = vpop.xlane.xlu1 %4920  ;;  %v5819_v25 = vsel %vm5801_vm7, %v5818_v32, %v5817_v23  ;;  %v5923_v45 = vperm.slane %v5718_v39, %v14760_v27  ;;  %v5734_v59 = vunpack.c.l.b16 %v15089_v19 }
 0x5ae   : > { %v5937_v58 = vsel %vm5797_vm6, %v5936_v15, %v5935_v44  ;;  %v5832_v7 = vsel %vm5797_vm6, %v5831_v0, %v5830_v34  ;;  %v5727_v23 = vunpack.c.h.b16 %v15088_v61  ;;  %v5938_v57 = vperm.slane %v5726_v37, %v14760_v27 }
 0x5af   : > { %v4918_v29 = vpop.xlane.xlu0 %4917  ;;  %v5952_v32 = vsel %vm5797_vm6, %v5951_v52, %v5950_v41  ;;  %v5835_v13 = vperm.slane %v5671_v51, %v14781_v28  ;;  %v5735_v30 = vunpack.c.h.b16 %v15089_v19  ;;  %v5847_v9 = vsel %vm5797_vm6, %v5846_v38, %v5845_v8 }
 0x5b0   : > { %v5834_v15 = vsel %vm5801_vm7, %v5833_v1, %v5832_v7  ;;  %v5512_v2 = vpack.c.bf16 %v13386_v18, %v13381_v42  ;;  %v13502_v39 = vsel %vm5801_vm7, %v5923_v45, %v5922_v62  ;;  %v13505_v44 = vperm.slane %v5719_v40, %v14781_v28 }
 0x5b1   : > { %v5338_v33 = vpop.xlane.xlu2 %5337  ;;  %v5953_v34 = vperm.slane %v5734_v59, %v14760_v27  ;;  %v5939_v37 = vsel %vm5801_vm7, %v5938_v57, %v5937_v58  ;;  %v5940_v41 = vperm.slane %v5727_v23, %v14781_v28  ;;  %v5678_v42 = vunpack.c.l.b16 %v12920_v48 }
 0x5b2   : > { %v13483_v6 = vmax.f32 %v5338_v33, %v5341_v49  ;;  %v13495_v49 = vsel %vm5805_vm8, %v5820_v54, %v5819_v25  ;;  %v5687_v18 = vunpack.c.h.b16 %v13221_v14  ;;  %v5836_v62 = vsel %vm5805_vm8, %v5835_v13, %v5834_v15 }
 0x5b3   : > { %v5955_v52 = vperm.slane %v5735_v30, %v14781_v28  ;;  %v5694_v54 = vunpack.c.l.b16 %v13354_v22  ;;  %v5537_v51 = vpack.c.bf16 %v5465_v21, %v13415_v50  ;;  %v5701_v25 = vunpack.c.h.b16 %v13238_v53 }
 0x5b4   : > { %v6634_v16 = vperm.slane %v13483_v6, %v14607_v36  ;;  %v5751_v8 = vunpack.c.h.b16 %v13260_v47  ;;  %v5695_v38 = vunpack.c.h.b16 %v13354_v22  ;;  %v5708_v1 = vunpack.c.l.b16 %v5512_v2 }
 0x5b5   : > { %v5954_v40 = vsel %vm5801_vm7, %v5953_v34, %v5952_v32  ;;  %v5709_v14 = vunpack.c.h.b16 %v5512_v2  ;;  %v13526_v45 = vmax.f32 %v4918_v29, %v4921_v43  ;;  %v5679_v59 = vunpack.c.h.b16 %v12920_v48 }
 0x5b6   : > { %v13510_v0 = vsel %vm5797_vm6, %v6634_v16, %v13436_v17  ;;  %v13512_v61 = vpop.xlane.xlu1 %5301  ;;  %v5848_v50 = vperm.slane %v5678_v42, %v14760_v27  ;;  %v5865_v21 = vperm.slane %v5687_v18, %v14781_v28  ;;  %v5765_v53 = vunpack.c.h.b16 %v13321_v35 }
 0x5b7   : > { %v5878_v47 = vperm.slane %v5694_v54, %v14760_v27  ;;  %v5758_v22 = vunpack.c.l.b16 %v5537_v51  ;;  %v5891_v43 = vperm.slane %v5701_v25, %v14607_v36  ;;  %v5985_v29 = vperm.slane %v5751_v8, %v14781_v28 }
 0x5b8   : > { %v5299_v17 = vpop.xlane.xlu0 %5298  ;;  %v5904_v48 = vperm.slane %v5708_v1, %v14598_v20  ;;  %v5906_v23 = vperm.slane %v5709_v14, %v14607_v36  ;;  %v5849_v30 = vsel %vm5801_vm7, %v5848_v50, %v5847_v9  ;;  %v5850_v16 = vperm.slane %v5679_v59, %v14781_v28 }
 0x5b9   : > { %v4915_v33 = vpop.xlane.xlu2 %4914  ;;  %v6011_v15 = vperm.slane %v5765_v53, %v14607_v36  ;;  %v5759_v2 = vunpack.c.h.b16 %v5537_v51  ;;  %v5998_v34 = vperm.slane %v5758_v22, %v14760_v27  ;;  %v5866_v54 = vsel %vm5805_vm8, %v5865_v21, %v13236_v10 }
 0x5ba   : > { %v5408_v19 = vmax.f32 %v13442_v5, %v4915_v33  ;;  %v5880_v5 = vperm.slane %v5695_v38, %v14781_v28  ;;  %v5892_v38 = vsel %vm5797_vm6, %v5891_v43, %v13256_v3  ;;  %v5905_v51 = vsel %vm5793_vm5, %v5904_v48, %v13062_v24  ;;  %v5551_v43 = vld [vmem:[%s13779_s2 + $0x8] sm:$0xff] }
 0x5bb   : > { %v13561_v14 = vsel %vm5797_vm6, %v5906_v23, %v5905_v51  ;;  %v5986_v10 = vsel %vm5805_vm8, %v5985_v29, %v13285_v11  ;;  %v6012_v3 = vsel %vm5797_vm6, %v6011_v15, %v13342_v60  ;;  %v5941_v24 = vsel %vm5805_vm8, %v5940_v41, %v5939_v37  ;;  %v5550_v29 = vld [vmem:[%s13779_s2] sm:$0xff] }
 0x5bc   : > { %v5509_v58 = vpack.c.bf16 %v13526_v45, %v5408_v19  ;;  %v6501_v7 = vperm.slane %v5408_v19, %v14760_v27  ;;  %v6000_v50 = vperm.slane %v5759_v2, %v14781_v28  ;;  %v6033_v21 = vsel %vm6032_vm9, %v13495_v49, %v13361_v55 }
 0x5bd   : > { %v5956_v11 = vsel %vm5805_vm8, %v5955_v52, %v5954_v40  ;;  %v6035_v60 = vsel %vm6034_vm10, %v5836_v62, %v6033_v21  ;;  %v5926_v37 = vsel %vm5805_vm8, %v13505_v44, %v13502_v39  ;;  %v7260_v48 = vmov 0  }
 0x5be   : > { %v5702_v57 = vunpack.c.l.b16 %v5509_v58  ;;  %v5703_v32 = vunpack.c.h.b16 %v5509_v58  ;;  %v13543_v35 = vsel %vm5801_vm7, %v6501_v7, %v13245_v46  ;;  %v4963_v13 = vpop.xlane.xlu1 %4962  ;;  %v5879_v46 = vsel %vm5801_vm7, %v5878_v47, %v13014_v31  ;;  %7023 = vset.pattern.permute.xlu0 %v7260_v48  ;;  %7022 = vset.pattern.permute.xlu2 %v7260_v48 }
 0x5bf   : > { %v5881_v9 = vsel %vm5805_vm8, %v5880_v5, %v5879_v46  ;;  %v5851_v31 = vsel %vm5805_vm8, %v5850_v16, %v5849_v30  ;;  %v5999_v47 = vsel %vm5801_vm7, %v5998_v34, %v13178_v12  ;;  %5561 = vperm.xlu0 %7023, %v5551_v43   ;;  %5556 = vperm.xlu2 %7022, %v5550_v29   ;;  %vm6145_vm3 = vcmask 523264  }
 0x5c0   : > { %v5893_v42 = vperm.slane %v5702_v57, %v14760_v27  ;;  %v5895_v1 = vperm.slane %v5703_v32, %v14781_v28  ;;  %v6037_v49 = vsel %vm6036_vm11, %v5851_v31, %v6035_v60  ;;  %v6001_v12 = vsel %vm5805_vm8, %v6000_v50, %v5999_v47 }
 0x5c1   : > { %v4960_v18 = vpop.xlane.xlu0 %4959  ;;  %v6039_v52 = vsel %vm6038_vm12, %v5866_v54, %v6037_v49 }
 0x5c2   : > { %v5416_v25 = vmax.f32 %v4960_v18, %v4963_v13  ;;  %v5296_v8 = vpop.xlane.xlu2 %5295  ;;  %v5894_v59 = vsel %vm5801_vm7, %v5893_v42, %v5892_v38  ;;  %v6041_v62 = vsel %vm6040_vm13, %v5881_v9, %v6039_v52  ;;  %v5544_v42 = vpack.c.bf16 %v13483_v6, %v13408_v26 }
 0x5c3   : > { %v5472_v33 = vmax.f32 %v5296_v8, %v5299_v17  ;;  %v5896_v55 = vsel %vm5805_vm8, %v5895_v1, %v5894_v59 }
 0x5c4   : > { %v6516_v19 = vperm.slane %v5416_v25, %v14760_v27  ;;  %v6043_v44 = vsel %vm6042_vm14, %v5896_v55, %v6041_v62  ;;  %v5772_v38 = vunpack.c.l.b16 %v5544_v42  ;;  %v5773_v26 = vunpack.c.h.b16 %v5544_v42 }
 0x5c5   : > { %v6621_v17 = vperm.slane %v5472_v33, %v14760_v27 }
 0x5c6   : > { %v13579_v53 = vsel %vm5801_vm7, %v6516_v19, %v13411_v63  ;;  %v6046_v63 = vsel %vm6032_vm9, %v5941_v24, %v5926_v37  ;;  %v6024_v59 = vperm.slane %v5772_v38, %v14598_v20  ;;  %v6026_v47 = vperm.slane %v5773_v26, %v14607_v36  ;;  %v15094_v26 = vld [vmem:[#allocation41_spill] sm:$0xff] }
 0x5c7   : > { %v6622_v41 = vsel %vm5801_vm7, %v6621_v17, %v13326_v4  ;;  %v6047_v40 = vsel %vm6034_vm10, %v5956_v11, %v6046_v63  ;;  %v15090_v4 = vld [vmem:[#allocation13_spill] sm:$0xff] }
 0x5c8   : > { %v6048_v22 = vsel %vm6036_vm11, %v15090_v4, %v6047_v40 }
 0x5c9   : > { %v6049_v7 = vsel %vm6038_vm12, %v5986_v10, %v6048_v22  ;;  %v4969_v32 = vpop.xlane.xlu0 %4968 }
 0x5ca   : > { %v5305_v39 = vpop.xlane.xlu2 %5304  ;;  %v6050_v5 = vsel %vm6040_vm13, %v6001_v12, %v6049_v7 }
 0x5cb   : > { %v5473_v58 = vmax.f32 %v13512_v61, %v5305_v39  ;;  %v5344_v61 = vpop.xlane.xlu1 %5343 }
 0x5cd   : > { %v5541_v23 = vpack.c.bf16 %v5473_v58, %v5472_v33  ;;  %v6623_v57 = vperm.slane %v5473_v58, %v14781_v28 }
 0x5cf   : > { %v5766_v13 = vunpack.c.l.b16 %v5541_v23  ;;  %v5767_v30 = vunpack.c.h.b16 %v5541_v23  ;;  %v13610_v16 = vsel %vm5805_vm8, %v6623_v57, %v6622_v41  ;;  %v15091_v41 = vld [vmem:[#allocation180_spill] sm:$0xff] }
 0x5d1   : > { %v6013_v15 = vperm.slane %v5766_v13, %v14760_v27  ;;  %v6015_v2 = vperm.slane %v5767_v30, %v14781_v28  ;;  %v5350_v10 = vpop.xlane.xlu0 %5349 }
 0x5d2   : > { %v4966_v34 = vpop.xlane.xlu2 %4965 }
 0x5d3   : > { %v13616_v18 = vmax.f32 %v4966_v34, %v4969_v32  ;;  %v6014_v54 = vsel %vm5801_vm7, %v6013_v15, %v6012_v3  ;;  %v5353_v33 = vpop.xlane.xlu1 %5352 }
 0x5d4   : > { %v6016_v46 = vsel %vm5805_vm8, %v6015_v2, %v6014_v54  ;;  %v13625_v3 = vmax.f32 %v5350_v10, %v5353_v33  ;;  %v15092_v54 = vld [vmem:[#allocation125_spill] sm:$0xff] }
 0x5d5   : > { %v5513_v8 = vpack.c.bf16 %v13616_v18, %v5416_v25  ;;  %v6051_v9 = vsel %vm6042_vm14, %v6016_v46, %v6050_v5  ;;  %v15093_v46 = vld [vmem:[#allocation135_spill] sm:$0xff] }
 0x5d7   : > { %v5710_v51 = vunpack.c.l.b16 %v5513_v8  ;;  %v5711_v1 = vunpack.c.h.b16 %v5513_v8  ;;  %v6650_v8 = vsel %vm6038_vm12, %v15093_v46, %v15092_v54 }
 0x5d9   : > { %v5908_v31 = vperm.slane %v5710_v51, %v14760_v27  ;;  %v5910_v19 = vperm.slane %v5711_v1, %v14781_v28 }
 0x5da   : > { %v5347_v6 = vpop.xlane.xlu2 %5346 }
 0x5db   : > { %v5480_v24 = vmax.f32 %v5344_v61, %v5347_v6  ;;  %v5909_v25 = vsel %vm5801_vm7, %v5908_v31, %v13561_v14  ;;  %v6025_v14 = vsel %vm5793_vm5, %v6024_v59, %v15091_v41  ;;  %v15095_v6 = vld [vmem:[#allocation163_spill] sm:$0xff] }
 0x5dc   : > { %v5911_v50 = vsel %vm5805_vm8, %v5910_v19, %v5909_v25  ;;  %v6027_v52 = vsel %vm5797_vm6, %v6026_v47, %v6025_v14  ;;  %v6644_v59 = vsel %vm6040_vm13, %v15095_v6, %v15094_v26 }
 0x5dd   : > { %v5545_v17 = vpack.c.bf16 %v13625_v3, %v5480_v24  ;;  %v6636_v21 = vperm.slane %v5480_v24, %v14760_v27  ;;  %v6045_v11 = vsel %vm6044_vm15, %v5911_v50, %v6043_v44  ;;  %v6651_v50 = vsel %vm6040_vm13, %v13466_v56, %v6650_v8 }
 0x5de   : > { %v6652_v47 = vsel %vm6042_vm14, %v13610_v16, %v6651_v50  ;;  %v6638_v56 = vperm.slane %v13625_v3, %v14781_v28 }
 0x5df   : > { %v5774_v60 = vunpack.c.l.b16 %v5545_v17  ;;  %v5775_v37 = vunpack.c.h.b16 %v5545_v17  ;;  %v13636_v20 = vsel %vm5801_vm7, %v6636_v21, %v13510_v0  ;;  %v6945_v0 = vld [vmem:[%s13778_s1] sm:$0xff]  ;;  %v6503_v17 = vperm.slane %v13526_v45, %v14781_v28 }
 0x5e0   : > { %v6639_v45 = vsel %vm5805_vm8, %v6638_v56, %v13636_v20 }
 0x5e1   : > { %v6028_v55 = vperm.slane %v5774_v60, %v14760_v27  ;;  %v6030_v49 = vperm.slane %v5775_v37, %v14781_v28  ;;  %v6946_v27 = vld [vmem:[%s13778_s1 + $0x8] sm:$0xff]  ;;  %v6504_v21 = vsel %vm5805_vm8, %v6503_v17, %v13543_v35  ;;  %v6518_v60 = vperm.slane %v13616_v18, %v14781_v28 }
 0x5e2   : > { %v13694_v35 = vsel %vm6044_vm15, %v6639_v45, %v6652_v47 }
 0x5e3   : > { %v6029_v63 = vsel %vm5801_vm7, %v6028_v55, %v6027_v52  ;;  %v6519_v37 = vsel %vm5805_vm8, %v6518_v60, %v13579_v53  ;;  %v6668_v60 = vld [vmem:[#allocation6 + $0x50] sm:$0xff] }
 0x5e4   : > { %v6031_v12 = vsel %vm5805_vm8, %v6030_v49, %v6029_v63 }
 0x5e5   : > { %v6052_v36 = vsel %vm6044_vm15, %v6031_v12, %v6051_v9 }
 0x5e6   : > { %v6053_v62 = vpack.c.b16 %v6052_v36, %v6045_v11  ;;  %v6645_v11 = vsel %vm6042_vm14, %v6504_v21, %v6644_v59  ;;  %v6672_v21 = vld [vmem:[#allocation6 + $0x70] sm:$0xff] }
 0x5e7   : > { %v13687_v41 = vsel %vm6044_vm15, %v6519_v37, %v6645_v11  ;;  %v6670_v11 = vld [vmem:[#allocation6 + $0x60] sm:$0xff]  ;;  %6688 = vmatpush.msra.mxu3 %v6672_v21 }
 0x5e8   : > { %6069 = vmatpush.bf16.msra.mxu0 %v6053_v62 }
 0x5e9   : > { %6689 = vmatpush.msra.mxu3 %v6670_v11 }
 0x5eb   : > { %6924 = vmatmul.msk.bf16.vlgmr.msra.gmra.mxu0 %vm6055_vm0, %v6945_v0  ;;  %6690 = vmatpush.msra.mxu3 %v6668_v60 }
 0x5fb   : > { %6925 = vmatmul.msk.bf16.gmra.mxu0 %vm6055_vm0, %v6946_v27 }
 0x619   : > { %v5557_v40 = vpop.permute.xlu2 %5556 }
 0x631   : > { %v5562_v22 = vpop.permute.xlu0 %5561 }
 0x668   : > { %v6071_v39 = vpop.f32.mrf.mxu0 }
 0x669   : > { %v6072_v44 = vadd.f32 %v6071_v39, %v5557_v40 }
 0x66b   : > { %v6081_v4 = vpack.c.bf16 %v6072_v44, %v6072_v44 }
 0x66d   : > { %6083 = vxpose.xlu1.c.b16.start.end [1/1] (short) (narrow) %v6081_v4, 64 }
 0x670   : > { %v6073_v58 = vpop.f32.mrf.mxu0 }
 0x671   : > { %v6074_v7 = vadd.f32 %v6073_v58, %v5562_v22 }
 0x673   : > { %v6082_v43 = vpack.c.bf16 %v6074_v7, %v6074_v7 }
 0x675   : > { %v6114_v29 = vsel %vm6112_vm1, %v6082_v43, 0 }
 0x676   : > { %6123 = vmatpush.bf16.msrb.mxu0 %v6114_v29  ;;  %6948 = vmatpush.bf16.msra.mxu1 %v6114_v29 }
 0x678   : > { %v13655_v2 = vpop.f32.mrf.mxu0 }
 0x680   : > { %v13661_v9 = vpop.f32.mrf.mxu0 }
 0x719   : > { %v6091_v5 = vpop.trf.xlu1 }
 0x71a   : > { %6926 = vmatmul.msk.bf16.vlgmr.msrb.gmra.mxu0 %vm6099_vm2, %v6091_v5 }
 0x729   : > { %v6092_v48 = vpop.trf.xlu1 }
 0x72a   : > { %6927 = vmatmul.msk.bf16.vlgmr.msra.gmra.mxu1 %vm6099_vm2, %v6092_v48 }
 0x739   : > { %v6093_v23 = vpop.trf.xlu1 }
 0x73a   : > { %6928 = vmatmul.msk.bf16.gmra.mxu1 %vm6099_vm2, %v6093_v23 }
 0x749   : > { %v6094_v57 = vpop.trf.xlu1 }
 0x74a   : > { %6929 = vmatmul.msk.bf16.gmra.mxu1 %vm6099_vm2, %v6094_v57 }
 0x797   : > { %v6125_v33 = vpop.f32.mrf.mxu0 }
 0x798   : > { %v6146_v31 = vsel %vm6145_vm3, %v6125_v33, -inf }
 0x79f   : > { %v6127_v24 = vpop.f32.mrf.mxu0 }
 0x7a0   : > { %v6149_v25 = vsel %vm6145_vm3, %v6127_v24, -inf }
 0x7a7   : > { %v6130_v61 = vpop.f32.mrf.mxu1 }
 0x7a8   : > { %v6152_v10 = vsel %vm6145_vm3, %v6130_v61, -inf }
 0x7af   : > { %v13652_v32 = vpop.f32.mrf.mxu1 }
 0x7b0   : > { %v6155_v19 = vsel %vm6145_vm3, %v13652_v32, -inf }
 0x7b7   : > { %v6135_v13 = vpop.f32.mrf.mxu1 }
 0x7b8   : > { %v6158_v30 = vsel %vm6145_vm3, %v6135_v13, -inf }
 0x7b9   : > { %6159 = vmax.xlane.f32.xlu1 %v6158_v30 }
 0x7bf   : > { %v6137_v15 = vpop.f32.mrf.mxu1 }
 0x7c0   : > { %v6161_v1 = vsel %vm6145_vm3, %v6137_v15, -inf }
 0x7c7   : > { %v6140_v34 = vpop.f32.mrf.mxu1 }
 0x7c8   : > { %v6164_v42 = vsel %vm6145_vm3, %v6140_v34, -inf }
 0x7c9   : > { %6165 = vmax.xlane.f32.xlu2 %v6164_v42 }
 0x7cf   : > { %v6142_v38 = vpop.f32.mrf.mxu1 }
 0x7d0   : > { %v6167_v51 = vsel %vm6145_vm3, %v6142_v38, -inf }
 0x7d1   : > { %6162 = vmax.xlane.f32.xlu2 %v6161_v1  ;;  %6168 = vmax.xlane.f32.xlu0 %v6167_v51  ;;  %v5552_v51 = vld [vmem:[%s13779_s2 + $0x10] sm:$0xff]  ;;  %v5553_v1 = vld [vmem:[%s13779_s2 + $0x18] sm:$0xff] }
 0x7d9   : > { %6153 = vmax.xlane.f32.xlu2 %v6152_v10  ;;  %6147 = vmax.xlane.f32.xlu0 %v6146_v31 }
 0x7e1   : > { %6156 = vmax.xlane.f32.xlu2 %v6155_v19 }
 0x7e9   : > { %6150 = vmax.xlane.f32.xlu2 %v6149_v25 }
 0x82c   : > { %v6160_v14 = vpop.xlane.xlu1 %6159 }
 0x82d   : > { %v6174_v49 = vsub.f32 %v6135_v13, %v6160_v14 }
 0x82f   : > { %v6186_v52 = vmul.f32 1.442695, %v6174_v49  ;;  %v6664_v49 = vld [vmem:[#allocation6 + $0x30] sm:$0xff] }
 0x83c   : > { %v6166_v16 = vpop.xlane.xlu2 %6165 }
 0x83d   : > { %v6176_v55 = vsub.f32 %v6140_v34, %v6166_v16  ;;  %v6666_v16 = vld [vmem:[#allocation6 + $0x40] sm:$0xff] }
 0x83e   : > { %6691 = vmatpush.msra.mxu3 %v6666_v16 }
 0x83f   : > { %v6190_v18 = vmul.f32 1.442695, %v6176_v55 }
 0x840   : > { %6692 = vmatpush.msra.mxu3 %v6664_v49 }
 0x841   : > { %7024 = vpow2.f32 %v6190_v18 }
 0x842   : > { %7026 = vpow2.f32 %v6186_v52 }
 0x844   : > { %v6163_v53 = vpop.xlane.xlu2 %6162  ;;  %v6169_v63 = vpop.xlane.xlu0 %6168 }
 0x845   : > { %v6177_v12 = vsub.f32 %v6142_v38, %v6169_v63  ;;  %v6175_v28 = vsub.f32 %v6137_v15, %v6163_v53 }
 0x847   : > { %v7025_v36 = vpop.eup %7024  ;;  %v6192_v62 = vmul.f32 1.442695, %v6177_v12  ;;  %v6188_v20 = vmul.f32 1.442695, %v6175_v28 }
 0x848   : > { %v6212_v3 = vsel %vm6145_vm3, %v7025_v36, 0.0  ;;  %v13697_v40 = vpop.eup %7026 }
 0x849   : > { %6213 = vadd.xlane.f32.xlu0 %v6212_v3  ;;  %7028 = vpow2.f32 %v6192_v62  ;;  %v6206_v58 = vsel %vm6145_vm3, %v13697_v40, 0.0 }
 0x84a   : > { %7030 = vpow2.f32 %v6188_v20 }
 0x84c   : > { %v6154_v0 = vpop.xlane.xlu2 %6153  ;;  %v6148_v27 = vpop.xlane.xlu0 %6147 }
 0x84d   : > { %v6172_v39 = vsub.f32 %v6130_v61, %v6154_v0  ;;  %v6170_v4 = vsub.f32 %v6125_v33, %v6148_v27 }
 0x84f   : > { %v6182_v44 = vmul.f32 1.442695, %v6172_v39  ;;  %v7029_v22 = vpop.eup %7028  ;;  %v6178_v43 = vmul.f32 1.442695, %v6170_v4 }
 0x850   : > { %v6215_v7 = vsel %vm6145_vm3, %v7029_v22, 0.0  ;;  %v7031_v48 = vpop.eup %7030 }
 0x851   : > { %7032 = vpow2.f32 %v6182_v44  ;;  %6207 = vadd.xlane.f32.xlu0 %v6206_v58  ;;  %6216 = vadd.xlane.f32.xlu2 %v6215_v7  ;;  %v6209_v13 = vsel %vm6145_vm3, %v7031_v48, 0.0 }
 0x852   : > { %7034 = vpow2.f32 %v6178_v43 }
 0x854   : > { %v6157_v29 = vpop.xlane.xlu2 %6156 }
 0x855   : > { %v6173_v5 = vsub.f32 %v13652_v32, %v6157_v29  ;;  %v6662_v29 = vld [vmem:[#allocation6 + $0x20] sm:$0xff] }
 0x856   : > { %6693 = vmatpush.msra.mxu3 %v6662_v29 }
 0x857   : > { %v13703_v23 = vpop.eup %7032  ;;  %v6184_v57 = vmul.f32 1.442695, %v6173_v5  ;;  %v6660_v5 = vld [vmem:[#allocation6 + $0x10] sm:$0xff] }
 0x858   : > { %v6200_v61 = vsel %vm6145_vm3, %v13703_v23, 0.0  ;;  %v13708_v15 = vpop.eup %7034  ;;  %6694 = vmatpush.msra.mxu3 %v6660_v5 }
 0x859   : > { %7036 = vpow2.f32 %v6184_v57  ;;  %6201 = vadd.xlane.f32.xlu0 %v6200_v61  ;;  %6210 = vadd.xlane.f32.xlu2 %v6209_v13  ;;  %v6194_v46 = vsel %vm6145_vm3, %v13708_v15, 0.0  ;;  %v6671_v57 = vld [vmem:[#allocation6 + $0x68] sm:$0xff]  ;;  %v6669_v61 = vld [vmem:[#allocation6 + $0x58] sm:$0xff] }
 0x85a   : > { %v6667_v13 = vld [vmem:[#allocation6 + $0x48] sm:$0xff] }
 0x85c   : > { %v6151_v30 = vpop.xlane.xlu2 %6150 }
 0x85d   : > { %v6171_v34 = vsub.f32 %v6127_v24, %v6151_v30  ;;  %v6665_v30 = vld [vmem:[#allocation6 + $0x38] sm:$0xff] }
 0x85f   : > { %v7037_v42 = vpop.eup %7036  ;;  %v6180_v54 = vmul.f32 1.442695, %v6171_v34  ;;  %v6269_v34 = vstv %s6268_s29 }
 0x860   : > { %v6203_v32 = vsel %vm6145_vm3, %v7037_v42, 0.0 }
 0x861   : > { %7038 = vpow2.f32 %v6180_v54  ;;  %6195 = vadd.xlane.f32.xlu0 %v6194_v46  ;;  %6204 = vadd.xlane.f32.xlu2 %v6203_v32 }
 0x867   : > { %v7039_v8 = vpop.eup %7038 }
 0x868   : > { %v6197_v38 = vsel %vm6145_vm3, %v7039_v8, 0.0 }
 0x869   : > { %6198 = vadd.xlane.f32.xlu2 %v6197_v38 }
 0x875   : > { %5566 = vperm.xlu0 %7023, %v5552_v51  }
 0x881   : > { %5571 = vperm.xlu2 %7022, %v5553_v1  }
 0x8bc   : > { %v6214_v33 = vpop.xlane.xlu0 %6213 }
 0x8bd   : > { %7040 = vrcp.f32 %v6214_v33 }
 0x8c3   : > { %v7041_v19 = vpop.eup %7040 }
 0x8c4   : > { %v6217_v10 = vpop.xlane.xlu2 %6216  ;;  %v6208_v31 = vpop.xlane.xlu0 %6207  ;;  %v6232_v59 = vmul.f32 %v7041_v19, %v7025_v36 }
 0x8c5   : > { %7042 = vrcp.f32 %v6217_v10 }
 0x8c6   : > { %7044 = vrcp.f32 %v6208_v31 }
 0x8cb   : > { %v7043_v26 = vpop.eup %7042 }
 0x8cc   : > { %v6211_v6 = vpop.xlane.xlu2 %6210  ;;  %v6233_v24 = vmul.f32 %v7043_v26, %v7029_v22  ;;  %v6202_v25 = vpop.xlane.xlu0 %6201 }
 0x8cd   : > { %7046 = vrcp.f32 %v6211_v6  ;;  %v7045_v47 = vpop.eup %7044 }
 0x8ce   : > { %v6238_v50 = vpack.c.bf16 %v6233_v24, %v6232_v59  ;;  %7048 = vrcp.f32 %v6202_v25  ;;  %v6230_v45 = vmul.f32 %v7045_v47, %v13697_v40 }
 0x8d0   : > { %v6252_v17 = vsel %vm6145_vm3, %v6238_v50, 0 }
 0x8d1   : > { %6258 = vmatpush.bf16.xpose.msra.mxu2 %v6252_v17 }
 0x8d3   : > { %v7047_v37 = vpop.eup %7046 }
 0x8d4   : > { %v6205_v56 = vpop.xlane.xlu2 %6204  ;;  %v6231_v14 = vmul.f32 %v7047_v37, %v7031_v48  ;;  %v6196_v18 = vpop.xlane.xlu0 %6195  ;;  %v6658_v48 = vld [vmem:[#allocation6] sm:$0xff] }
 0x8d5   : > { %7050 = vrcp.f32 %v6205_v56  ;;  %v7049_v53 = vpop.eup %7048  ;;  %6695 = vmatpush.msra.mxu3 %v6658_v48 }
 0x8d6   : > { %v6237_v55 = vpack.c.bf16 %v6231_v14, %v6230_v45  ;;  %7052 = vrcp.f32 %v6196_v18  ;;  %v6228_v36 = vmul.f32 %v7049_v53, %v13703_v23  ;;  %v6673_v23 = vld [vmem:[#allocation6 + $0x78] sm:$0xff] }
 0x8d7   : > { %6711 = vmatpush.msrb.mxu3 %v6673_v23 }
 0x8d8   : > { %v6249_v52 = vsel %vm6145_vm3, %v6237_v55, 0 }
 0x8d9   : > { %6259 = vmatpush.bf16.xpose.msra.mxu2 %v6249_v52  ;;  %6712 = vmatpush.msrb.mxu3 %v6671_v57 }
 0x8db   : > { %v7051_v63 = vpop.eup %7050  ;;  %6713 = vmatpush.msrb.mxu3 %v6669_v61 }
 0x8dc   : > { %v6199_v12 = vpop.xlane.xlu2 %6198  ;;  %v6229_v62 = vmul.f32 %v7051_v63, %v7037_v42  ;;  %v7053_v20 = vpop.eup %7052 }
 0x8dd   : > { %7054 = vrcp.f32 %v6199_v12  ;;  %v6226_v27 = vmul.f32 %v7053_v20, %v13708_v15  ;;  %6714 = vmatpush.msrb.mxu3 %v6667_v13  ;;  %v6659_v15 = vld [vmem:[#allocation6 + $0x8] sm:$0xff] }
 0x8de   : > { %v6236_v28 = vpack.c.bf16 %v6229_v62, %v6228_v36 }
 0x8df   : > { %6715 = vmatpush.msrb.mxu3 %v6665_v30 }
 0x8e0   : > { %v6246_v3 = vsel %vm6145_vm3, %v6236_v28, 0 }
 0x8e1   : > { %6260 = vmatpush.bf16.xpose.msra.mxu2 %v6246_v3 }
 0x8e3   : > { %v7055_v0 = vpop.eup %7054 }
 0x8e4   : > { %v6227_v40 = vmul.f32 %v7055_v0, %v7039_v8  ;;  %v5572_v22 = vpop.permute.xlu2 %5571 }
 0x8e5   : > { %v6079_v7 = vadd.f32 %v13661_v9, %v5572_v22  ;;  %v6661_v9 = vld [vmem:[#allocation6 + $0x18] sm:$0xff] }
 0x8e6   : > { %v6235_v39 = vpack.c.bf16 %v6227_v40, %v6226_v27 }
 0x8e7   : > { %v5567_v44 = vpop.permute.xlu0 %5566 }
 0x8e8   : > { %v6243_v4 = vsel %vm6145_vm3, %v6235_v39, 0  ;;  %v6077_v58 = vadd.f32 %v13655_v2, %v5567_v44  ;;  %v6663_v2 = vld [vmem:[#allocation6 + $0x28] sm:$0xff] }
 0x8e9   : > { %6261 = vmatpush.bf16.xpose.msra.mxu2 %v6243_v4  ;;  %6716 = vmatpush.msrb.mxu3 %v6663_v2 }
 0x8ea   : > { %v6234_v43 = vpack.c.bf16 %v6079_v7, %v6077_v58 }
 0x8eb   : > { %6717 = vmatpush.msrb.mxu3 %v6661_v9 }
 0x8ed   : > { %6718 = vmatpush.msrb.mxu3 %v6659_v15 }
 0x8f0   : > { %6930 = vmatmul.msk.bf16.vlgmr.msra.gmra.mxu2 %vm6145_vm3, %v6234_v43 }
 0x973   : > { %v6263_v42 = vpop.f32.mrf.mxu2 }
 0x974   : > { %v6270_v54 = vmul.f32 %v6269_v34, %v6263_v42 }
 0x976   : > { %v6656_v32 = vadd.f32 %v13687_v41, %v6270_v54 }
 0x978   : > { %6931 = vmatmul.msk.f32.vlgmr.msra.gmra.mxu3 %vm6145_vm3, %v6656_v32 }
 0x97b   : > { %v6265_v46 = vpop.f32.mrf.mxu2 }
 0x97c   : > { %v6271_v8 = vmul.f32 %v6269_v34, %v6265_v46 }
 0x97e   : > { %v6657_v38 = vadd.f32 %v13694_v35, %v6271_v8 }
 0x980   : > { %6932 = vmatmul.msk.f32.gmra.mxu3 %vm6145_vm3, %v6657_v38 }
 0x988   : > { %6933 = vmatmul.msk.f32.vlgmr.msrb.gmra.mxu3 %vm6145_vm3, %v6656_v32 }
 0x990   : > { %6934 = vmatmul.msk.f32.gmra.mxu3 %vm6145_vm3, %v6657_v38 }
 0x9fb   : > { %v6697_v51 = vpop.f32.mrf.mxu3 }
 0x9fc   : > { %v6935_v1 = vmul.f32 -1.442695, %v6697_v51 }
 0x9fe   : > { %7056 = vpow2.f32 %v6935_v1 }
 0xa03   : > { %v6700_v33 = vpop.f32.mrf.mxu3 }
 0xa04   : > { %v7057_v10 = vpop.eup %7056  ;;  %v6937_v31 = vmul.f32 -1.442695, %v6700_v33 }
 0xa05   : > { %v6738_v41 = vadd.f32 1.0, %v7057_v10 }
 0xa06   : > { %7058 = vpow2.f32 %v6937_v31 }
 0xa07   : > { %7060 = vrcp.f32 %v6738_v41  ;;  %v6753_v50 = vand.u32 2147483648, %v6738_v41  ;;  %v6751_v21 = vand.u32 2147483647, %v6738_v41  ;;  %vm6747_vm5 = vweird.f32 %v6738_v41 }
 0xa09   : > { %v6754_v45 = vor.u32 1.1754944e-38, %v6753_v50  ;;  %vm6752_vm7 = vcmp.eq.f32.partialorder %v6751_v21, 8.507059e+37 }
 0xa0b   : > { %v6720_v19 = vpop.f32.mrf.mxu3 }
 0xa0c   : > { %v7059_v26 = vpop.eup %7058  ;;  %v6936_v6 = vmul.f32 -1.442695, %v6720_v19 }
 0xa0d   : > { %v7061_v35 = vpop.eup %7060  ;;  %v6740_v59 = vadd.f32 1.0, %v7059_v26 }
 0xa0e   : > { %v6743_v24 = vmul.f32 %v7061_v35, %v6738_v41  ;;  %7062 = vpow2.f32 %v6936_v6  ;;  %vm6748_vm4 = vweird.f32 %v7061_v35 }
 0xa0f   : > { %7064 = vrcp.f32 %v6740_v59  ;;  %vm6749_vm6 = vmor %vm6747_vm5, %vm6748_vm4  ;;  %v6783_v52 = vand.u32 2147483648, %v6740_v59  ;;  %v6781_v63 = vand.u32 2147483647, %v6740_v59  ;;  %vm6777_vm9 = vweird.f32 %v6740_v59 }
 0xa10   : > { %v6744_v25 = vsub.f32 1.0, %v6743_v24 }
 0xa11   : > { %v6784_v28 = vor.u32 1.1754944e-38, %v6783_v52  ;;  %vm6782_vm11 = vcmp.eq.f32.partialorder %v6781_v63, 8.507059e+37 }
 0xa12   : > { %v6745_v17 = vmul.f32 %v7061_v35, %v6744_v25 }
 0xa13   : > { %v6723_v11 = vpop.f32.mrf.mxu3 }
 0xa14   : > { %v7063_v47 = vpop.eup %7062  ;;  %v6746_v60 = vadd.f32 %v7061_v35, %v6745_v17  ;;  %v6938_v37 = vmul.f32 -1.442695, %v6723_v11 }
 0xa15   : > { %v7065_v56 = vpop.eup %7064  ;;  %v6739_v14 = vadd.f32 1.0, %v7063_v47 }
 0xa16   : > { %v6750_v16 = vsel %vm6749_vm6, %v7061_v35, %v6746_v60  ;;  %v6773_v55 = vmul.f32 %v7065_v56, %v6740_v59  ;;  %7066 = vpow2.f32 %v6938_v37  ;;  %vm6778_vm8 = vweird.f32 %v7065_v56 }
 0xa17   : > { %v6755_v49 = vsel %vm6752_vm7, %v6754_v45, %v6750_v16  ;;  %7068 = vrcp.f32 %v6739_v14  ;;  %vm6779_vm10 = vmor %vm6777_vm9, %vm6778_vm8  ;;  %v6768_v39 = vand.u32 2147483648, %v6739_v14  ;;  %v6766_v4 = vand.u32 2147483647, %v6739_v14 }
 0xa18   : > { %6802 = vst [vmem:[%s13737_s7] sm:$0xff] %v6755_v49  ;;  %v6774_v18 = vsub.f32 1.0, %v6773_v55  ;;  %vm6762_vm13 = vweird.f32 %v6739_v14 }
 0xa19   : > { %v6769_v7 = vor.u32 1.1754944e-38, %v6768_v39  ;;  %vm6767_vm15 = vcmp.eq.f32.partialorder %v6766_v4, 8.507059e+37 }
 0xa1a   : > { %v6775_v53 = vmul.f32 %v7065_v56, %v6774_v18 }
 0xa1c   : > { %v7067_v12 = vpop.eup %7066  ;;  %v6776_v36 = vadd.f32 %v7065_v56, %v6775_v53 }
 0xa1d   : > { %v7069_v62 = vpop.eup %7068  ;;  %v6741_v3 = vadd.f32 1.0, %v7067_v12 }
 0xa1e   : > { %v6780_v20 = vsel %vm6779_vm10, %v7065_v56, %v6776_v36  ;;  %v6758_v0 = vmul.f32 %v7069_v62, %v6739_v14  ;;  %vm6763_vm12 = vweird.f32 %v7069_v62 }
 0xa1f   : > { %v6785_v27 = vsel %vm6782_vm11, %v6784_v28, %v6780_v20  ;;  %7070 = vrcp.f32 %v6741_v3  ;;  %vm6764_vm14 = vmor %vm6762_vm13, %vm6763_vm12  ;;  %v6798_v23 = vand.u32 2147483648, %v6741_v3  ;;  %v6796_v61 = vand.u32 2147483647, %v6741_v3 }
 0xa20   : > { %6804 = vst [vmem:[%s13737_s7 + $0x10] sm:$0xff] %v6785_v27  ;;  %v6759_v40 = vsub.f32 1.0, %v6758_v0  ;;  %vm6792_vm1 = vweird.f32 %v6741_v3 }
 0xa21   : > { %v6799_v30 = vor.u32 1.1754944e-38, %v6798_v23  ;;  %vm6797_vm3 = vcmp.eq.f32.partialorder %v6796_v61, 8.507059e+37 }
 0xa22   : > { %v6760_v44 = vmul.f32 %v7069_v62, %v6759_v40 }
 0xa24   : > { %v6761_v22 = vadd.f32 %v7069_v62, %v6760_v44 }
 0xa25   : > { %v7071_v58 = vpop.eup %7070 }
 0xa26   : > { %v6765_v43 = vsel %vm6764_vm14, %v7069_v62, %v6761_v22  ;;  %v6788_v29 = vmul.f32 %v7071_v58, %v6741_v3  ;;  %vm6793_vm0 = vweird.f32 %v7071_v58 }
 0xa27   : > { %v6770_v5 = vsel %vm6767_vm15, %v6769_v7, %v6765_v43  ;;  %vm6794_vm2 = vmor %vm6792_vm1, %vm6793_vm0 }
 0xa28   : > { %6803 = vst [vmem:[%s13737_s7 + $0x8] sm:$0xff] %v6770_v5  ;;  %v6789_v48 = vsub.f32 1.0, %v6788_v29 }
 0xa2a   : > { %v6790_v57 = vmul.f32 %v7071_v58, %v6789_v48 }
 0xa2c   : > { %v6791_v13 = vadd.f32 %v7071_v58, %v6790_v57 }
 0xa2e   : > { %v6795_v2 = vsel %vm6794_vm2, %v7071_v58, %v6791_v13 }
 0xa2f   : > { %v6800_v9 = vsel %vm6797_vm3, %v6799_v30, %v6795_v2 }
 0xa30   : > { %6805 = vst [vmem:[%s13737_s7 + $0x18] sm:$0xff] %v6800_v9 }
 0xa31   : > { %7201 = shalt.err (!%p7198_p10)
}
 0xa32   : > { %s7261_s24 = smov 256   ;;  %s7262_s29 = smov 16  }
 0xa33   : > { %6955 = dma.vmem_to_hbm [thread:$0]  (%p7363_p7), %s6820_s3, 512, %s6822_s18, %s6807_s15, %s7261_s24, %s7261_s24, %s7262_s29  }
 0xa34 PF: > { %s6836_s6 = sand.u32 1, %s7232_s20   ;;  %p15096_p12 = scmp.ge.s32.totalorder %s7244_s23, 2 }
 0xa35   : > { %s6837_s7 = scalar_lea.sflag [#allocation5], %s6836_s6 }
 0xa36   : > { %p6966_p13 = pnand %p15096_p12, %p7331_p6 }
 0xa38   : > { %p6967_p0 = pneg %p6966_p13 }
 0xa3a   : > { %7227 = dma.done.wait (%p6967_p0), %s6837_s7, 512  }
 0xa3b   : > { %7229 = vsyncadd (%p6967_p0), %s6837_s7, 4294966784  ;;  %p20_p3 = scmp.ge.s32.totalorder %s7349_s8, 4   ;;  %s15097_s20 = smov %s7236_s21 }
 0xa3c   : > { %s15098_s21 = smov %s7240_s22  ;;  %s15099_s22 = smov %s7359_s13 }
 0xa3d   : > { %s15100_s23 = smov %s7349_s8  ;;  %22 = sbr.rel (!%p20_p3) target bundleno = 8 (0x8), region = 89 }
 0xa42   :  { %6843 = vsyncpa [#allocation4], 1 }
 0xa43   :  { %6845 = vsyncpa [#allocation4 + $0x1], 1 }
 0xa44   :  { %6846 = vsyncpa [#allocation7], 1 }
 0xa45   :  { %6847 = vsyncpa [#allocation5], 1 }
 0xa46   :  { %6849 = vsyncpa [#allocation5 + $0x1], 1 }

</bundles_post_ra>
